<compile_context>
chip_gen: v5e
topology: v5e:2x2
jax: 0.10.0
libtpu: 0.0.40
codegen_flags: <defaults>
</compile_context>

<pallas_src>
import functools
import math

import numpy as np
import jax
import jax.numpy as jnp
from jax.experimental import pallas as pl
from jax.experimental.pallas import tpu as pltpu

VMEM_SPEC = pl.BlockSpec(memory_space=pltpu.MemorySpace.VMEM)


# ---------------------------------------------------------------------------
# Fused forward kernel
# ---------------------------------------------------------------------------
def gvae_fused_kernel(*refs, heads, conv_couts):
    """refs = (inputs..., outputs...)

    Inputs (in order):
      x [N,F], adj_mask [N,N], eps [N,latent], gather_src [E,N], gather_tgt [E,N],
      5 x TransformerConv params (wq, bq, wk, bk, wv, bv, ws, bs, wba, wbs),
      3 x BatchNorm params (gamma, beta),
      decoder params (w3_src, w3_tgt, b3, gamma3, beta3, w4_row, b4).
    Outputs:
      mu [N,latent], logvar [N,latent], logit [E,1]
    """
    n_conv = len(conv_couts)
    pos = [0]

    def take(k):
        out = refs[pos[0]:pos[0] + k]
        pos[0] += k
        return out

    x_ref, mask_ref, eps_ref, gsrc_ref, gtgt_ref = take(5)
    conv_params = [take(10) for _ in range(n_conv)]
    bn_params = [take(2) for _ in range(3)]
    w3a_ref, w3b_ref, b3_ref, g3_ref, be3_ref, w4r_ref, b4_ref = take(7)
    mu_ref, lv_ref, logit_ref = take(3)

    mask = mask_ref[...]                               # mask[i, j] = 1 iff edge j -> i
    neg_bias = jnp.where(mask > 0.0, 0.0, -1e30)       # computed once, reused by all 5 layers

    def transformer_conv(x, params, cout):
        # PyG TransformerConv(heads=4, concat=False, beta=True, root_weight=True)
        wq, bq, wk, bk, wv, bv, ws, bs, wba, wbs = params
        # 1/sqrt(cout) attention scale is already folded into wq/bq on the host.
        q = jnp.dot(x, wq[...], preferred_element_type=jnp.float32) + bq[...]
        k = jnp.dot(x, wk[...], preferred_element_type=jnp.float32) + bk[...]
        v = jnp.dot(x, wv[...], preferred_element_type=jnp.float32) + bv[...]
        n_nodes = x.shape[0]
        agg = jnp.zeros((n_nodes, cout), jnp.float32)
        for h in range(heads):                         # static unroll (heads=4)
            sl = slice(h * cout, (h + 1) * cout)
            s = jnp.dot(q[:, sl], k[:, sl].T,
                        preferred_element_type=jnp.float32) + neg_bias
            m = jnp.max(s, axis=1, keepdims=True)
            p = jnp.exp(s - m) * mask
            denom = jnp.sum(p, axis=1, keepdims=True)
            alpha = p / jnp.maximum(denom, 1e-16)      # nodes w/o in-edges -> zero rows
            agg = agg + jnp.dot(alpha, v[:, sl], preferred_element_type=jnp.float32)
        agg = agg * (1.0 / heads)                      # concat=False -> mean over heads
        skip = jnp.dot(x, ws[...], preferred_element_type=jnp.float32) + bs[...]
        # beta = sigmoid(lin_beta([agg, skip, agg - skip])) with weights prefolded:
        # logit = agg.(wb0+wb2) + skip.(wb1-wb2) -> a single lane reduction (no MXU push).
        beta_logit = jnp.sum(agg * wba[...] + skip * wbs[...], axis=-1, keepdims=True)
        beta = jax.nn.sigmoid(beta_logit)
        return beta * skip + (1.0 - beta) * agg

    def relu_bn(y, gamma_ref, beta_ref):
        y = jnp.maximum(y, 0.0)
        mean = jnp.mean(y, axis=0, keepdims=True)
        var = jnp.mean(jnp.square(y - mean), axis=0, keepdims=True)  # biased var, like BN
        return (y - mean) * jax.lax.rsqrt(var + 1e-5) * gamma_ref[...] + beta_ref[...]

    # ----------------------------- encoder -----------------------------
    h = x_ref[...]
    for li in range(3):
        h = transformer_conv(h, conv_params[li], conv_couts[li])
        h = relu_bn(h, *bn_params[li])
    mu = transformer_conv(h, conv_params[3], conv_couts[3])
    logvar = transformer_conv(h, conv_params[4], conv_couts[4])
    mu_ref[...] = mu
    lv_ref[...] = logvar

    # ------------------- reparam (training mode) -----------------------
    # original module: std = exp(logvar) (NOT exp(0.5*logvar)); z = eps*std + mu
    z = eps_ref[...] * jnp.exp(logvar) + mu

    # ----------------------------- decoder -----------------------------
    # pair gather via constant one-hot matmuls; z stays in VMEM.
    zsrc = jnp.dot(gsrc_ref[...], z, preferred_element_type=jnp.float32)   # [E, latent]
    ztgt = jnp.dot(gtgt_ref[...], z, preferred_element_type=jnp.float32)   # [E, latent]
    hd = (jnp.dot(zsrc, w3a_ref[...], preferred_element_type=jnp.float32)
          + jnp.dot(ztgt, w3b_ref[...], preferred_element_type=jnp.float32)
          + b3_ref[...])
    hd = jnp.maximum(hd, 0.0)
    mean = jnp.mean(hd, axis=0, keepdims=True)
    var = jnp.mean(jnp.square(hd - mean), axis=0, keepdims=True)
    hd = (hd - mean) * jax.lax.rsqrt(var + 1e-5) * g3_ref[...] + be3_ref[...]
    # final Linear(decoder_size -> 1) as a lane reduction (avoids width-1 MXU matmul).
    logit_ref[...] = jnp.sum(hd * w4r_ref[...], axis=-1, keepdims=True) + b4_ref[...]


# ---------------------------------------------------------------------------
# Wrapper
# ---------------------------------------------------------------------------
def gvae_forward(x, adj_mask, eps, gather_src, gather_tgt,
                 conv_params, bn_params, dec_params, *, heads, conv_couts):
    n = x.shape[0]
    e = gather_src.shape[0]
    latent = conv_couts[-1]

    flat = [x, adj_mask, eps, gather_src, gather_tgt]
    for p in conv_params:
        flat.extend(p)
    for p in bn_params:
        flat.extend(p)
    flat.extend(dec_params)

    kernel = functools.partial(gvae_fused_kernel, heads=heads,
                               conv_couts=tuple(conv_couts))
    mu, logvar, logit = pl.pallas_call(
        kernel,
        out_shape=(jax.ShapeDtypeStruct((n, latent), jnp.float32),
                   jax.ShapeDtypeStruct((n, latent), jnp.float32),
                   jax.ShapeDtypeStruct((e, 1), jnp.float32)),
        in_specs=[VMEM_SPEC] * len(flat),
        out_specs=(VMEM_SPEC, VMEM_SPEC, VMEM_SPEC),
    )(*flat)
    return logit, mu, logvar


# ---------------------------------------------------------------------------
# Deterministic parameter construction + host-side folding
# ---------------------------------------------------------------------------
def init_linear(key, fan_in, fan_out, scale=0.1):
    kw, kb = jax.random.split(key)
    w = scale * jax.random.normal(kw, (fan_in, fan_out), jnp.float32)
    b = scale * jax.random.normal(kb, (1, fan_out), jnp.float32)
    return w, b


def init_transformer_conv(key, fin, cout, heads):
    ks = jax.random.split(key, 5)
    wq, bq = init_linear(ks[0], fin, heads * cout)
    wk, bk = init_linear(ks[1], fin, heads * cout)
    wv, bv = init_linear(ks[2], fin, heads * cout)
    ws, bs = init_linear(ks[3], fin, cout)
    wb = 0.1 * jax.random.normal(ks[4], (3 * cout, 1), jnp.float32)  # lin_beta, bias=False
    return (wq, bq, wk, bk, wv, bv, ws, bs, wb)


def prep_transformer_conv(raw, cout):
    """Host-side folding: attention scale into wq/bq; beta-gate weights into two
    row vectors for an in-kernel lane reduction."""
    wq, bq, wk, bk, wv, bv, ws, bs, wb = raw
    scale = 1.0 / math.sqrt(cout)
    wba = (wb[0:cout, 0] + wb[2 * cout:3 * cout, 0]).reshape(1, cout)   # wb0 + wb2
    wbs_ = (wb[cout:2 * cout, 0] - wb[2 * cout:3 * cout, 0]).reshape(1, cout)  # wb1 - wb2
    return (wq * scale, bq * scale, wk, bk, wv, bv, ws, bs, wba, wbs_)


if __name__ == "__main__":
    feature_size = 8
    embedding_size = 8
    latent = embedding_size // 2          # latent_embedding_size
    decoder_size = embedding_size * 4
    heads = 4
    nodes_per_graph = 8
    num_graphs = 2
    N = nodes_per_graph * num_graphs

    # graph: bidirectional ring within each graph (every node has incoming edges)
    src, tgt = [], []
    for g in range(num_graphs):
        base = g * nodes_per_graph
        for i in range(nodes_per_graph):
            j = (i + 1) % nodes_per_graph
            src += [base + i, base + j]
            tgt += [base + j, base + i]
    edge_index = np.array([src, tgt], dtype=np.int32)                 # [2, E_edges]
    batch_index = np.repeat(np.arange(num_graphs), nodes_per_graph).astype(np.int32)

    adj_mask = np.zeros((N, N), dtype=np.float32)
    adj_mask[edge_index[1], edge_index[0]] = 1.0                      # mask[tgt, src]
    adj_mask = jnp.asarray(adj_mask)

    # per-graph upper-triangular node pairs -> constant one-hot gather matrices
    src_idx, tgt_idx = [], []
    for g in range(num_graphs):
        nodes = np.where(batch_index == g)[0]
        iu = np.triu_indices(len(nodes), k=1)
        src_idx.append(nodes[iu[0]])
        tgt_idx.append(nodes[iu[1]])
    src_idx = np.concatenate(src_idx)
    tgt_idx = np.concatenate(tgt_idx)
    E = src_idx.shape[0]
    gather_src = np.zeros((E, N), dtype=np.float32)
    gather_tgt = np.zeros((E, N), dtype=np.float32)
    gather_src[np.arange(E), src_idx] = 1.0
    gather_tgt[np.arange(E), tgt_idx] = 1.0
    gather_src = jnp.asarray(gather_src)
    gather_tgt = jnp.asarray(gather_tgt)

    key = jax.random.PRNGKey(0)
    keys = jax.random.split(key, 16)
    x = jax.random.normal(keys[0], (N, feature_size), jnp.float32)

    conv_couts = (embedding_size * 4, embedding_size * 2, embedding_size, latent, latent)
    conv_fins = (feature_size, embedding_size * 4, embedding_size * 2,
                 embedding_size, embedding_size)
    conv_params = [
        prep_transformer_conv(
            init_transformer_conv(keys[1 + i], conv_fins[i], conv_couts[i], heads),
            conv_couts[i])
        for i in range(5)
    ]

    bn_params = [
        (jnp.ones((1, conv_couts[i]), jnp.float32),
         jnp.zeros((1, conv_couts[i]), jnp.float32))
        for i in range(3)
    ]

    w3, b3 = init_linear(keys[6], 2 * latent, decoder_size)
    w3a, w3b = w3[:latent, :], w3[latent:, :]          # split concat([z_src, z_tgt]) matmul
    g3 = jnp.ones((1, decoder_size), jnp.float32)
    be3 = jnp.zeros((1, decoder_size), jnp.float32)
    w4, b4 = init_linear(keys[7], decoder_size, 1)
    dec_params = (w3a, w3b, b3, g3, be3, w4.T, b4)     # w4 passed as a [1, D] row vector

    eps = jax.random.normal(keys[8], (N, latent), jnp.float32)

    logit, mu, logvar = gvae_forward(
        x, adj_mask, eps, gather_src, gather_tgt,
        conv_params, bn_params, dec_params,
        heads=heads, conv_couts=conv_couts)

    jax.block_until_ready((logit, mu, logvar))
    assert logit.shape == (E, 1)
    assert mu.shape == (N, latent) and logvar.shape == (N, latent)
    print("KERNEL_OK")
</pallas_src>

<mosaic_0001>
module attributes {stable_mosaic.version = 11 : i64} {
  func.func @gvae_fused_kernel(%arg0: memref<16x8xf32, #tpu.memory_space<vmem>>, %arg1: memref<16x16xf32, #tpu.memory_space<vmem>>, %arg2: memref<16x4xf32, #tpu.memory_space<vmem>>, %arg3: memref<56x16xf32, #tpu.memory_space<vmem>>, %arg4: memref<56x16xf32, #tpu.memory_space<vmem>>, %arg5: memref<8x128xf32, #tpu.memory_space<vmem>>, %arg6: memref<1x128xf32, #tpu.memory_space<vmem>>, %arg7: memref<8x128xf32, #tpu.memory_space<vmem>>, %arg8: memref<1x128xf32, #tpu.memory_space<vmem>>, %arg9: memref<8x128xf32, #tpu.memory_space<vmem>>, %arg10: memref<1x128xf32, #tpu.memory_space<vmem>>, %arg11: memref<8x32xf32, #tpu.memory_space<vmem>>, %arg12: memref<1x32xf32, #tpu.memory_space<vmem>>, %arg13: memref<1x32xf32, #tpu.memory_space<vmem>>, %arg14: memref<1x32xf32, #tpu.memory_space<vmem>>, %arg15: memref<32x64xf32, #tpu.memory_space<vmem>>, %arg16: memref<1x64xf32, #tpu.memory_space<vmem>>, %arg17: memref<32x64xf32, #tpu.memory_space<vmem>>, %arg18: memref<1x64xf32, #tpu.memory_space<vmem>>, %arg19: memref<32x64xf32, #tpu.memory_space<vmem>>, %arg20: memref<1x64xf32, #tpu.memory_space<vmem>>, %arg21: memref<32x16xf32, #tpu.memory_space<vmem>>, %arg22: memref<1x16xf32, #tpu.memory_space<vmem>>, %arg23: memref<1x16xf32, #tpu.memory_space<vmem>>, %arg24: memref<1x16xf32, #tpu.memory_space<vmem>>, %arg25: memref<16x32xf32, #tpu.memory_space<vmem>>, %arg26: memref<1x32xf32, #tpu.memory_space<vmem>>, %arg27: memref<16x32xf32, #tpu.memory_space<vmem>>, %arg28: memref<1x32xf32, #tpu.memory_space<vmem>>, %arg29: memref<16x32xf32, #tpu.memory_space<vmem>>, %arg30: memref<1x32xf32, #tpu.memory_space<vmem>>, %arg31: memref<16x8xf32, #tpu.memory_space<vmem>>, %arg32: memref<1x8xf32, #tpu.memory_space<vmem>>, %arg33: memref<1x8xf32, #tpu.memory_space<vmem>>, %arg34: memref<1x8xf32, #tpu.memory_space<vmem>>, %arg35: memref<8x16xf32, #tpu.memory_space<vmem>>, %arg36: memref<1x16xf32, #tpu.memory_space<vmem>>, %arg37: memref<8x16xf32, #tpu.memory_space<vmem>>, %arg38: memref<1x16xf32, #tpu.memory_space<vmem>>, %arg39: memref<8x16xf32, #tpu.memory_space<vmem>>, %arg40: memref<1x16xf32, #tpu.memory_space<vmem>>, %arg41: memref<8x4xf32, #tpu.memory_space<vmem>>, %arg42: memref<1x4xf32, #tpu.memory_space<vmem>>, %arg43: memref<1x4xf32, #tpu.memory_space<vmem>>, %arg44: memref<1x4xf32, #tpu.memory_space<vmem>>, %arg45: memref<8x16xf32, #tpu.memory_space<vmem>>, %arg46: memref<1x16xf32, #tpu.memory_space<vmem>>, %arg47: memref<8x16xf32, #tpu.memory_space<vmem>>, %arg48: memref<1x16xf32, #tpu.memory_space<vmem>>, %arg49: memref<8x16xf32, #tpu.memory_space<vmem>>, %arg50: memref<1x16xf32, #tpu.memory_space<vmem>>, %arg51: memref<8x4xf32, #tpu.memory_space<vmem>>, %arg52: memref<1x4xf32, #tpu.memory_space<vmem>>, %arg53: memref<1x4xf32, #tpu.memory_space<vmem>>, %arg54: memref<1x4xf32, #tpu.memory_space<vmem>>, %arg55: memref<1x32xf32, #tpu.memory_space<vmem>>, %arg56: memref<1x32xf32, #tpu.memory_space<vmem>>, %arg57: memref<1x16xf32, #tpu.memory_space<vmem>>, %arg58: memref<1x16xf32, #tpu.memory_space<vmem>>, %arg59: memref<1x8xf32, #tpu.memory_space<vmem>>, %arg60: memref<1x8xf32, #tpu.memory_space<vmem>>, %arg61: memref<4x32xf32, #tpu.memory_space<vmem>>, %arg62: memref<4x32xf32, #tpu.memory_space<vmem>>, %arg63: memref<1x32xf32, #tpu.memory_space<vmem>>, %arg64: memref<1x32xf32, #tpu.memory_space<vmem>>, %arg65: memref<1x32xf32, #tpu.memory_space<vmem>>, %arg66: memref<1x32xf32, #tpu.memory_space<vmem>>, %arg67: memref<1x1xf32, #tpu.memory_space<vmem>>, %arg68: memref<16x4xf32, #tpu.memory_space<vmem>>, %arg69: memref<16x4xf32, #tpu.memory_space<vmem>>, %arg70: memref<56x1xf32, #tpu.memory_space<vmem>>) attributes {dimension_semantics = [], scalar_prefetch = 0 : i64, scratch_operands = 0 : i64, tpu.core_type = #tpu.core_type<tc>} {
    %c0 = arith.constant 0 : index
    %c0_0 = arith.constant 0 : index
    %0 = vector.load %arg1[%c0, %c0_0] : memref<16x16xf32, #tpu.memory_space<vmem>>, vector<16x16xf32>
    %cst = arith.constant 0.000000e+00 : f32
    %1 = vector.broadcast %cst : f32 to vector<16x16xf32>
    %2 = arith.cmpf ogt, %0, %1 : vector<16x16xf32>
    %cst_1 = arith.constant 0.000000e+00 : f32
    %cst_2 = arith.constant -1.000000e+30 : f32
    %3 = vector.broadcast %cst_1 : f32 to vector<16x16xf32>
    %4 = vector.broadcast %cst_2 : f32 to vector<16x16xf32>
    %5 = arith.select %2, %3, %4 : vector<16x16xi1>, vector<16x16xf32>
    %c0_3 = arith.constant 0 : index
    %c0_4 = arith.constant 0 : index
    %6 = vector.load %arg0[%c0_3, %c0_4] : memref<16x8xf32, #tpu.memory_space<vmem>>, vector<16x8xf32>
    %c0_5 = arith.constant 0 : index
    %c0_6 = arith.constant 0 : index
    %7 = vector.load %arg5[%c0_5, %c0_6] : memref<8x128xf32, #tpu.memory_space<vmem>>, vector<8x128xf32>
    %cst_7 = arith.constant dense<0.000000e+00> : vector<16x128xf32>
    %8 = tpu.matmul %6, %7, %cst_7 {dimension_numbers = #tpu.dot_dimension_numbers<[1], [0], [0], [1], [0, 0, 1, 1], [], []>} : vector<16x8xf32>, vector<8x128xf32>, vector<16x128xf32> -> vector<16x128xf32>
    %c0_8 = arith.constant 0 : index
    %c0_9 = arith.constant 0 : index
    %9 = vector.load %arg6[%c0_8, %c0_9] : memref<1x128xf32, #tpu.memory_space<vmem>>, vector<1x128xf32>
    %10 = vector.broadcast %9 : vector<1x128xf32> to vector<16x128xf32>
    %11 = arith.addf %8, %10 : vector<16x128xf32>
    %c0_10 = arith.constant 0 : index
    %c0_11 = arith.constant 0 : index
    %12 = vector.load %arg7[%c0_10, %c0_11] : memref<8x128xf32, #tpu.memory_space<vmem>>, vector<8x128xf32>
    %cst_12 = arith.constant dense<0.000000e+00> : vector<16x128xf32>
    %13 = tpu.matmul %6, %12, %cst_12 {dimension_numbers = #tpu.dot_dimension_numbers<[1], [0], [0], [1], [0, 0, 1, 1], [], []>} : vector<16x8xf32>, vector<8x128xf32>, vector<16x128xf32> -> vector<16x128xf32>
    %c0_13 = arith.constant 0 : index
    %c0_14 = arith.constant 0 : index
    %14 = vector.load %arg8[%c0_13, %c0_14] : memref<1x128xf32, #tpu.memory_space<vmem>>, vector<1x128xf32>
    %15 = vector.broadcast %14 : vector<1x128xf32> to vector<16x128xf32>
    %16 = arith.addf %13, %15 : vector<16x128xf32>
    %c0_15 = arith.constant 0 : index
    %c0_16 = arith.constant 0 : index
    %17 = vector.load %arg9[%c0_15, %c0_16] : memref<8x128xf32, #tpu.memory_space<vmem>>, vector<8x128xf32>
    %cst_17 = arith.constant dense<0.000000e+00> : vector<16x128xf32>
    %18 = tpu.matmul %6, %17, %cst_17 {dimension_numbers = #tpu.dot_dimension_numbers<[1], [0], [0], [1], [0, 0, 1, 1], [], []>} : vector<16x8xf32>, vector<8x128xf32>, vector<16x128xf32> -> vector<16x128xf32>
    %c0_18 = arith.constant 0 : index
    %c0_19 = arith.constant 0 : index
    %19 = vector.load %arg10[%c0_18, %c0_19] : memref<1x128xf32, #tpu.memory_space<vmem>>, vector<1x128xf32>
    %20 = vector.broadcast %19 : vector<1x128xf32> to vector<16x128xf32>
    %21 = arith.addf %18, %20 : vector<16x128xf32>
    %cst_20 = arith.constant 0.000000e+00 : f32
    %22 = vector.broadcast %cst_20 : f32 to vector<16x32xf32>
    %23 = vector.extract_strided_slice %11 {offsets = [0, 0], sizes = [16, 32], strides = [1, 1]} : vector<16x128xf32> to vector<16x32xf32>
    %24 = vector.extract_strided_slice %16 {offsets = [0, 0], sizes = [16, 32], strides = [1, 1]} : vector<16x128xf32> to vector<16x32xf32>
    %25 = tpu.transpose %24, [1, 0] : vector<16x32xf32> -> vector<32x16xf32>
    %cst_21 = arith.constant dense<0.000000e+00> : vector<16x16xf32>
    %26 = tpu.matmul %23, %25, %cst_21 {dimension_numbers = #tpu.dot_dimension_numbers<[1], [0], [0], [1], [0, 0, 1, 1], [], []>} : vector<16x32xf32>, vector<32x16xf32>, vector<16x16xf32> -> vector<16x16xf32>
    %27 = arith.addf %26, %5 : vector<16x16xf32>
    %cst_22 = arith.constant dense<0xFF800000> : vector<16xf32>
    %28 = vector.multi_reduction <maximumf>, %27, %cst_22 [1] : vector<16x16xf32> to vector<16xf32>
    %29 = vector.shape_cast %28 : vector<16xf32> to vector<16x1xf32>
    %30 = vector.broadcast %29 : vector<16x1xf32> to vector<16x16xf32>
    %31 = arith.subf %27, %30 : vector<16x16xf32>
    %32 = math.exp %31 : vector<16x16xf32>
    %33 = arith.mulf %32, %0 : vector<16x16xf32>
    %cst_23 = arith.constant dense<0.000000e+00> : vector<16xf32>
    %34 = vector.multi_reduction <add>, %33, %cst_23 [1] : vector<16x16xf32> to vector<16xf32>
    %35 = vector.shape_cast %34 : vector<16xf32> to vector<16x1xf32>
    %cst_24 = arith.constant 1.000000e-16 : f32
    %36 = vector.broadcast %cst_24 : f32 to vector<16x1xf32>
    %37 = arith.maximumf %35, %36 : vector<16x1xf32>
    %38 = vector.broadcast %37 : vector<16x1xf32> to vector<16x16xf32>
    %39 = arith.divf %33, %38 : vector<16x16xf32>
    %40 = vector.extract_strided_slice %21 {offsets = [0, 0], sizes = [16, 32], strides = [1, 1]} : vector<16x128xf32> to vector<16x32xf32>
    %cst_25 = arith.constant dense<0.000000e+00> : vector<16x32xf32>
    %41 = tpu.matmul %39, %40, %cst_25 {dimension_numbers = #tpu.dot_dimension_numbers<[1], [0], [0], [1], [0, 0, 1, 1], [], []>} : vector<16x16xf32>, vector<16x32xf32>, vector<16x32xf32> -> vector<16x32xf32>
    %42 = arith.addf %22, %41 : vector<16x32xf32>
    %43 = vector.extract_strided_slice %11 {offsets = [0, 32], sizes = [16, 32], strides = [1, 1]} : vector<16x128xf32> to vector<16x32xf32>
    %44 = vector.extract_strided_slice %16 {offsets = [0, 32], sizes = [16, 32], strides = [1, 1]} : vector<16x128xf32> to vector<16x32xf32>
    %45 = tpu.transpose %44, [1, 0] : vector<16x32xf32> -> vector<32x16xf32>
    %cst_26 = arith.constant dense<0.000000e+00> : vector<16x16xf32>
    %46 = tpu.matmul %43, %45, %cst_26 {dimension_numbers = #tpu.dot_dimension_numbers<[1], [0], [0], [1], [0, 0, 1, 1], [], []>} : vector<16x32xf32>, vector<32x16xf32>, vector<16x16xf32> -> vector<16x16xf32>
    %47 = arith.addf %46, %5 : vector<16x16xf32>
    %cst_27 = arith.constant dense<0xFF800000> : vector<16xf32>
    %48 = vector.multi_reduction <maximumf>, %47, %cst_27 [1] : vector<16x16xf32> to vector<16xf32>
    %49 = vector.shape_cast %48 : vector<16xf32> to vector<16x1xf32>
    %50 = vector.broadcast %49 : vector<16x1xf32> to vector<16x16xf32>
    %51 = arith.subf %47, %50 : vector<16x16xf32>
    %52 = math.exp %51 : vector<16x16xf32>
    %53 = arith.mulf %52, %0 : vector<16x16xf32>
    %cst_28 = arith.constant dense<0.000000e+00> : vector<16xf32>
    %54 = vector.multi_reduction <add>, %53, %cst_28 [1] : vector<16x16xf32> to vector<16xf32>
    %55 = vector.shape_cast %54 : vector<16xf32> to vector<16x1xf32>
    %cst_29 = arith.constant 1.000000e-16 : f32
    %56 = vector.broadcast %cst_29 : f32 to vector<16x1xf32>
    %57 = arith.maximumf %55, %56 : vector<16x1xf32>
    %58 = vector.broadcast %57 : vector<16x1xf32> to vector<16x16xf32>
    %59 = arith.divf %53, %58 : vector<16x16xf32>
    %60 = vector.extract_strided_slice %21 {offsets = [0, 32], sizes = [16, 32], strides = [1, 1]} : vector<16x128xf32> to vector<16x32xf32>
    %cst_30 = arith.constant dense<0.000000e+00> : vector<16x32xf32>
    %61 = tpu.matmul %59, %60, %cst_30 {dimension_numbers = #tpu.dot_dimension_numbers<[1], [0], [0], [1], [0, 0, 1, 1], [], []>} : vector<16x16xf32>, vector<16x32xf32>, vector<16x32xf32> -> vector<16x32xf32>
    %62 = arith.addf %42, %61 : vector<16x32xf32>
    %63 = vector.extract_strided_slice %11 {offsets = [0, 64], sizes = [16, 32], strides = [1, 1]} : vector<16x128xf32> to vector<16x32xf32>
    %64 = vector.extract_strided_slice %16 {offsets = [0, 64], sizes = [16, 32], strides = [1, 1]} : vector<16x128xf32> to vector<16x32xf32>
    %65 = tpu.transpose %64, [1, 0] : vector<16x32xf32> -> vector<32x16xf32>
    %cst_31 = arith.constant dense<0.000000e+00> : vector<16x16xf32>
    %66 = tpu.matmul %63, %65, %cst_31 {dimension_numbers = #tpu.dot_dimension_numbers<[1], [0], [0], [1], [0, 0, 1, 1], [], []>} : vector<16x32xf32>, vector<32x16xf32>, vector<16x16xf32> -> vector<16x16xf32>
    %67 = arith.addf %66, %5 : vector<16x16xf32>
    %cst_32 = arith.constant dense<0xFF800000> : vector<16xf32>
    %68 = vector.multi_reduction <maximumf>, %67, %cst_32 [1] : vector<16x16xf32> to vector<16xf32>
    %69 = vector.shape_cast %68 : vector<16xf32> to vector<16x1xf32>
    %70 = vector.broadcast %69 : vector<16x1xf32> to vector<16x16xf32>
    %71 = arith.subf %67, %70 : vector<16x16xf32>
    %72 = math.exp %71 : vector<16x16xf32>
    %73 = arith.mulf %72, %0 : vector<16x16xf32>
    %cst_33 = arith.constant dense<0.000000e+00> : vector<16xf32>
    %74 = vector.multi_reduction <add>, %73, %cst_33 [1] : vector<16x16xf32> to vector<16xf32>
    %75 = vector.shape_cast %74 : vector<16xf32> to vector<16x1xf32>
    %cst_34 = arith.constant 1.000000e-16 : f32
    %76 = vector.broadcast %cst_34 : f32 to vector<16x1xf32>
    %77 = arith.maximumf %75, %76 : vector<16x1xf32>
    %78 = vector.broadcast %77 : vector<16x1xf32> to vector<16x16xf32>
    %79 = arith.divf %73, %78 : vector<16x16xf32>
    %80 = vector.extract_strided_slice %21 {offsets = [0, 64], sizes = [16, 32], strides = [1, 1]} : vector<16x128xf32> to vector<16x32xf32>
    %cst_35 = arith.constant dense<0.000000e+00> : vector<16x32xf32>
    %81 = tpu.matmul %79, %80, %cst_35 {dimension_numbers = #tpu.dot_dimension_numbers<[1], [0], [0], [1], [0, 0, 1, 1], [], []>} : vector<16x16xf32>, vector<16x32xf32>, vector<16x32xf32> -> vector<16x32xf32>
    %82 = arith.addf %62, %81 : vector<16x32xf32>
    %83 = vector.extract_strided_slice %11 {offsets = [0, 96], sizes = [16, 32], strides = [1, 1]} : vector<16x128xf32> to vector<16x32xf32>
    %84 = vector.extract_strided_slice %16 {offsets = [0, 96], sizes = [16, 32], strides = [1, 1]} : vector<16x128xf32> to vector<16x32xf32>
    %85 = tpu.transpose %84, [1, 0] : vector<16x32xf32> -> vector<32x16xf32>
    %cst_36 = arith.constant dense<0.000000e+00> : vector<16x16xf32>
    %86 = tpu.matmul %83, %85, %cst_36 {dimension_numbers = #tpu.dot_dimension_numbers<[1], [0], [0], [1], [0, 0, 1, 1], [], []>} : vector<16x32xf32>, vector<32x16xf32>, vector<16x16xf32> -> vector<16x16xf32>
    %87 = arith.addf %86, %5 : vector<16x16xf32>
    %cst_37 = arith.constant dense<0xFF800000> : vector<16xf32>
    %88 = vector.multi_reduction <maximumf>, %87, %cst_37 [1] : vector<16x16xf32> to vector<16xf32>
    %89 = vector.shape_cast %88 : vector<16xf32> to vector<16x1xf32>
    %90 = vector.broadcast %89 : vector<16x1xf32> to vector<16x16xf32>
    %91 = arith.subf %87, %90 : vector<16x16xf32>
    %92 = math.exp %91 : vector<16x16xf32>
    %93 = arith.mulf %92, %0 : vector<16x16xf32>
    %cst_38 = arith.constant dense<0.000000e+00> : vector<16xf32>
    %94 = vector.multi_reduction <add>, %93, %cst_38 [1] : vector<16x16xf32> to vector<16xf32>
    %95 = vector.shape_cast %94 : vector<16xf32> to vector<16x1xf32>
    %cst_39 = arith.constant 1.000000e-16 : f32
    %96 = vector.broadcast %cst_39 : f32 to vector<16x1xf32>
    %97 = arith.maximumf %95, %96 : vector<16x1xf32>
    %98 = vector.broadcast %97 : vector<16x1xf32> to vector<16x16xf32>
    %99 = arith.divf %93, %98 : vector<16x16xf32>
    %100 = vector.extract_strided_slice %21 {offsets = [0, 96], sizes = [16, 32], strides = [1, 1]} : vector<16x128xf32> to vector<16x32xf32>
    %cst_40 = arith.constant dense<0.000000e+00> : vector<16x32xf32>
    %101 = tpu.matmul %99, %100, %cst_40 {dimension_numbers = #tpu.dot_dimension_numbers<[1], [0], [0], [1], [0, 0, 1, 1], [], []>} : vector<16x16xf32>, vector<16x32xf32>, vector<16x32xf32> -> vector<16x32xf32>
    %102 = arith.addf %82, %101 : vector<16x32xf32>
    %cst_41 = arith.constant 2.500000e-01 : f32
    %103 = vector.broadcast %cst_41 : f32 to vector<16x32xf32>
    %104 = arith.mulf %102, %103 : vector<16x32xf32>
    %c0_42 = arith.constant 0 : index
    %c0_43 = arith.constant 0 : index
    %105 = vector.load %arg11[%c0_42, %c0_43] : memref<8x32xf32, #tpu.memory_space<vmem>>, vector<8x32xf32>
    %cst_44 = arith.constant dense<0.000000e+00> : vector<16x32xf32>
    %106 = tpu.matmul %6, %105, %cst_44 {dimension_numbers = #tpu.dot_dimension_numbers<[1], [0], [0], [1], [0, 0, 1, 1], [], []>} : vector<16x8xf32>, vector<8x32xf32>, vector<16x32xf32> -> vector<16x32xf32>
    %c0_45 = arith.constant 0 : index
    %c0_46 = arith.constant 0 : index
    %107 = vector.load %arg12[%c0_45, %c0_46] : memref<1x32xf32, #tpu.memory_space<vmem>>, vector<1x32xf32>
    %108 = vector.broadcast %107 : vector<1x32xf32> to vector<16x32xf32>
    %109 = arith.addf %106, %108 : vector<16x32xf32>
    %c0_47 = arith.constant 0 : index
    %c0_48 = arith.constant 0 : index
    %110 = vector.load %arg13[%c0_47, %c0_48] : memref<1x32xf32, #tpu.memory_space<vmem>>, vector<1x32xf32>
    %111 = vector.broadcast %110 : vector<1x32xf32> to vector<16x32xf32>
    %112 = arith.mulf %104, %111 : vector<16x32xf32>
    %c0_49 = arith.constant 0 : index
    %c0_50 = arith.constant 0 : index
    %113 = vector.load %arg14[%c0_49, %c0_50] : memref<1x32xf32, #tpu.memory_space<vmem>>, vector<1x32xf32>
    %114 = vector.broadcast %113 : vector<1x32xf32> to vector<16x32xf32>
    %115 = arith.mulf %109, %114 : vector<16x32xf32>
    %116 = arith.addf %112, %115 : vector<16x32xf32>
    %cst_51 = arith.constant dense<0.000000e+00> : vector<16xf32>
    %117 = vector.multi_reduction <add>, %116, %cst_51 [1] : vector<16x32xf32> to vector<16xf32>
    %118 = vector.shape_cast %117 : vector<16xf32> to vector<16x1xf32>
    %119 = arith.negf %118 : vector<16x1xf32>
    %120 = math.exp %119 : vector<16x1xf32>
    %cst_52 = arith.constant 1.000000e+00 : f32
    %121 = vector.broadcast %cst_52 : f32 to vector<16x1xf32>
    %122 = arith.addf %121, %120 : vector<16x1xf32>
    %123 = arith.divf %121, %122 : vector<16x1xf32>
    %124 = vector.broadcast %123 : vector<16x1xf32> to vector<16x32xf32>
    %125 = arith.mulf %124, %109 : vector<16x32xf32>
    %cst_53 = arith.constant 1.000000e+00 : f32
    %126 = vector.broadcast %cst_53 : f32 to vector<16x1xf32>
    %127 = arith.subf %126, %123 : vector<16x1xf32>
    %128 = vector.broadcast %127 : vector<16x1xf32> to vector<16x32xf32>
    %129 = arith.mulf %128, %104 : vector<16x32xf32>
    %130 = arith.addf %125, %129 : vector<16x32xf32>
    %cst_54 = arith.constant 0.000000e+00 : f32
    %131 = vector.broadcast %cst_54 : f32 to vector<16x32xf32>
    %132 = arith.maximumf %130, %131 : vector<16x32xf32>
    %cst_55 = arith.constant dense<0.000000e+00> : vector<32xf32>
    %133 = vector.multi_reduction <add>, %132, %cst_55 [0] : vector<16x32xf32> to vector<32xf32>
    %134 = vector.shape_cast %133 : vector<32xf32> to vector<1x32xf32>
    %cst_56 = arith.constant 1.600000e+01 : f32
    %135 = vector.broadcast %cst_56 : f32 to vector<1x32xf32>
    %136 = arith.divf %134, %135 : vector<1x32xf32>
    %137 = vector.broadcast %136 : vector<1x32xf32> to vector<16x32xf32>
    %138 = arith.subf %132, %137 : vector<16x32xf32>
    %139 = arith.mulf %138, %138 : vector<16x32xf32>
    %cst_57 = arith.constant dense<0.000000e+00> : vector<32xf32>
    %140 = vector.multi_reduction <add>, %139, %cst_57 [0] : vector<16x32xf32> to vector<32xf32>
    %141 = vector.shape_cast %140 : vector<32xf32> to vector<1x32xf32>
    %cst_58 = arith.constant 1.600000e+01 : f32
    %142 = vector.broadcast %cst_58 : f32 to vector<1x32xf32>
    %143 = arith.divf %141, %142 : vector<1x32xf32>
    %144 = vector.broadcast %136 : vector<1x32xf32> to vector<16x32xf32>
    %145 = arith.subf %132, %144 : vector<16x32xf32>
    %cst_59 = arith.constant 9.99999974E-6 : f32
    %146 = vector.broadcast %cst_59 : f32 to vector<1x32xf32>
    %147 = arith.addf %143, %146 : vector<1x32xf32>
    %148 = math.rsqrt %147 : vector<1x32xf32>
    %149 = vector.broadcast %148 : vector<1x32xf32> to vector<16x32xf32>
    %150 = arith.mulf %145, %149 : vector<16x32xf32>
    %c0_60 = arith.constant 0 : index
    %c0_61 = arith.constant 0 : index
    %151 = vector.load %arg55[%c0_60, %c0_61] : memref<1x32xf32, #tpu.memory_space<vmem>>, vector<1x32xf32>
    %152 = vector.broadcast %151 : vector<1x32xf32> to vector<16x32xf32>
    %153 = arith.mulf %150, %152 : vector<16x32xf32>
    %c0_62 = arith.constant 0 : index
    %c0_63 = arith.constant 0 : index
    %154 = vector.load %arg56[%c0_62, %c0_63] : memref<1x32xf32, #tpu.memory_space<vmem>>, vector<1x32xf32>
    %155 = vector.broadcast %154 : vector<1x32xf32> to vector<16x32xf32>
    %156 = arith.addf %153, %155 : vector<16x32xf32>
    %c0_64 = arith.constant 0 : index
    %c0_65 = arith.constant 0 : index
    %157 = vector.load %arg15[%c0_64, %c0_65] : memref<32x64xf32, #tpu.memory_space<vmem>>, vector<32x64xf32>
    %cst_66 = arith.constant dense<0.000000e+00> : vector<16x64xf32>
    %158 = tpu.matmul %156, %157, %cst_66 {dimension_numbers = #tpu.dot_dimension_numbers<[1], [0], [0], [1], [0, 0, 1, 1], [], []>} : vector<16x32xf32>, vector<32x64xf32>, vector<16x64xf32> -> vector<16x64xf32>
    %c0_67 = arith.constant 0 : index
    %c0_68 = arith.constant 0 : index
    %159 = vector.load %arg16[%c0_67, %c0_68] : memref<1x64xf32, #tpu.memory_space<vmem>>, vector<1x64xf32>
    %160 = vector.broadcast %159 : vector<1x64xf32> to vector<16x64xf32>
    %161 = arith.addf %158, %160 : vector<16x64xf32>
    %c0_69 = arith.constant 0 : index
    %c0_70 = arith.constant 0 : index
    %162 = vector.load %arg17[%c0_69, %c0_70] : memref<32x64xf32, #tpu.memory_space<vmem>>, vector<32x64xf32>
    %cst_71 = arith.constant dense<0.000000e+00> : vector<16x64xf32>
    %163 = tpu.matmul %156, %162, %cst_71 {dimension_numbers = #tpu.dot_dimension_numbers<[1], [0], [0], [1], [0, 0, 1, 1], [], []>} : vector<16x32xf32>, vector<32x64xf32>, vector<16x64xf32> -> vector<16x64xf32>
    %c0_72 = arith.constant 0 : index
    %c0_73 = arith.constant 0 : index
    %164 = vector.load %arg18[%c0_72, %c0_73] : memref<1x64xf32, #tpu.memory_space<vmem>>, vector<1x64xf32>
    %165 = vector.broadcast %164 : vector<1x64xf32> to vector<16x64xf32>
    %166 = arith.addf %163, %165 : vector<16x64xf32>
    %c0_74 = arith.constant 0 : index
    %c0_75 = arith.constant 0 : index
    %167 = vector.load %arg19[%c0_74, %c0_75] : memref<32x64xf32, #tpu.memory_space<vmem>>, vector<32x64xf32>
    %cst_76 = arith.constant dense<0.000000e+00> : vector<16x64xf32>
    %168 = tpu.matmul %156, %167, %cst_76 {dimension_numbers = #tpu.dot_dimension_numbers<[1], [0], [0], [1], [0, 0, 1, 1], [], []>} : vector<16x32xf32>, vector<32x64xf32>, vector<16x64xf32> -> vector<16x64xf32>
    %c0_77 = arith.constant 0 : index
    %c0_78 = arith.constant 0 : index
    %169 = vector.load %arg20[%c0_77, %c0_78] : memref<1x64xf32, #tpu.memory_space<vmem>>, vector<1x64xf32>
    %170 = vector.broadcast %169 : vector<1x64xf32> to vector<16x64xf32>
    %171 = arith.addf %168, %170 : vector<16x64xf32>
    %cst_79 = arith.constant 0.000000e+00 : f32
    %172 = vector.broadcast %cst_79 : f32 to vector<16x16xf32>
    %173 = vector.extract_strided_slice %161 {offsets = [0, 0], sizes = [16, 16], strides = [1, 1]} : vector<16x64xf32> to vector<16x16xf32>
    %174 = vector.extract_strided_slice %166 {offsets = [0, 0], sizes = [16, 16], strides = [1, 1]} : vector<16x64xf32> to vector<16x16xf32>
    %175 = tpu.transpose %174, [1, 0] : vector<16x16xf32> -> vector<16x16xf32>
    %cst_80 = arith.constant dense<0.000000e+00> : vector<16x16xf32>
    %176 = tpu.matmul %173, %175, %cst_80 {dimension_numbers = #tpu.dot_dimension_numbers<[1], [0], [0], [1], [0, 0, 1, 1], [], []>} : vector<16x16xf32>, vector<16x16xf32>, vector<16x16xf32> -> vector<16x16xf32>
    %177 = arith.addf %176, %5 : vector<16x16xf32>
    %cst_81 = arith.constant dense<0xFF800000> : vector<16xf32>
    %178 = vector.multi_reduction <maximumf>, %177, %cst_81 [1] : vector<16x16xf32> to vector<16xf32>
    %179 = vector.shape_cast %178 : vector<16xf32> to vector<16x1xf32>
    %180 = vector.broadcast %179 : vector<16x1xf32> to vector<16x16xf32>
    %181 = arith.subf %177, %180 : vector<16x16xf32>
    %182 = math.exp %181 : vector<16x16xf32>
    %183 = arith.mulf %182, %0 : vector<16x16xf32>
    %cst_82 = arith.constant dense<0.000000e+00> : vector<16xf32>
    %184 = vector.multi_reduction <add>, %183, %cst_82 [1] : vector<16x16xf32> to vector<16xf32>
    %185 = vector.shape_cast %184 : vector<16xf32> to vector<16x1xf32>
    %cst_83 = arith.constant 1.000000e-16 : f32
    %186 = vector.broadcast %cst_83 : f32 to vector<16x1xf32>
    %187 = arith.maximumf %185, %186 : vector<16x1xf32>
    %188 = vector.broadcast %187 : vector<16x1xf32> to vector<16x16xf32>
    %189 = arith.divf %183, %188 : vector<16x16xf32>
    %190 = vector.extract_strided_slice %171 {offsets = [0, 0], sizes = [16, 16], strides = [1, 1]} : vector<16x64xf32> to vector<16x16xf32>
    %cst_84 = arith.constant dense<0.000000e+00> : vector<16x16xf32>
    %191 = tpu.matmul %189, %190, %cst_84 {dimension_numbers = #tpu.dot_dimension_numbers<[1], [0], [0], [1], [0, 0, 1, 1], [], []>} : vector<16x16xf32>, vector<16x16xf32>, vector<16x16xf32> -> vector<16x16xf32>
    %192 = arith.addf %172, %191 : vector<16x16xf32>
    %193 = vector.extract_strided_slice %161 {offsets = [0, 16], sizes = [16, 16], strides = [1, 1]} : vector<16x64xf32> to vector<16x16xf32>
    %194 = vector.extract_strided_slice %166 {offsets = [0, 16], sizes = [16, 16], strides = [1, 1]} : vector<16x64xf32> to vector<16x16xf32>
    %195 = tpu.transpose %194, [1, 0] : vector<16x16xf32> -> vector<16x16xf32>
    %cst_85 = arith.constant dense<0.000000e+00> : vector<16x16xf32>
    %196 = tpu.matmul %193, %195, %cst_85 {dimension_numbers = #tpu.dot_dimension_numbers<[1], [0], [0], [1], [0, 0, 1, 1], [], []>} : vector<16x16xf32>, vector<16x16xf32>, vector<16x16xf32> -> vector<16x16xf32>
    %197 = arith.addf %196, %5 : vector<16x16xf32>
    %cst_86 = arith.constant dense<0xFF800000> : vector<16xf32>
    %198 = vector.multi_reduction <maximumf>, %197, %cst_86 [1] : vector<16x16xf32> to vector<16xf32>
    %199 = vector.shape_cast %198 : vector<16xf32> to vector<16x1xf32>
    %200 = vector.broadcast %199 : vector<16x1xf32> to vector<16x16xf32>
    %201 = arith.subf %197, %200 : vector<16x16xf32>
    %202 = math.exp %201 : vector<16x16xf32>
    %203 = arith.mulf %202, %0 : vector<16x16xf32>
    %cst_87 = arith.constant dense<0.000000e+00> : vector<16xf32>
    %204 = vector.multi_reduction <add>, %203, %cst_87 [1] : vector<16x16xf32> to vector<16xf32>
    %205 = vector.shape_cast %204 : vector<16xf32> to vector<16x1xf32>
    %cst_88 = arith.constant 1.000000e-16 : f32
    %206 = vector.broadcast %cst_88 : f32 to vector<16x1xf32>
    %207 = arith.maximumf %205, %206 : vector<16x1xf32>
    %208 = vector.broadcast %207 : vector<16x1xf32> to vector<16x16xf32>
    %209 = arith.divf %203, %208 : vector<16x16xf32>
    %210 = vector.extract_strided_slice %171 {offsets = [0, 16], sizes = [16, 16], strides = [1, 1]} : vector<16x64xf32> to vector<16x16xf32>
    %cst_89 = arith.constant dense<0.000000e+00> : vector<16x16xf32>
    %211 = tpu.matmul %209, %210, %cst_89 {dimension_numbers = #tpu.dot_dimension_numbers<[1], [0], [0], [1], [0, 0, 1, 1], [], []>} : vector<16x16xf32>, vector<16x16xf32>, vector<16x16xf32> -> vector<16x16xf32>
    %212 = arith.addf %192, %211 : vector<16x16xf32>
    %213 = vector.extract_strided_slice %161 {offsets = [0, 32], sizes = [16, 16], strides = [1, 1]} : vector<16x64xf32> to vector<16x16xf32>
    %214 = vector.extract_strided_slice %166 {offsets = [0, 32], sizes = [16, 16], strides = [1, 1]} : vector<16x64xf32> to vector<16x16xf32>
    %215 = tpu.transpose %214, [1, 0] : vector<16x16xf32> -> vector<16x16xf32>
    %cst_90 = arith.constant dense<0.000000e+00> : vector<16x16xf32>
    %216 = tpu.matmul %213, %215, %cst_90 {dimension_numbers = #tpu.dot_dimension_numbers<[1], [0], [0], [1], [0, 0, 1, 1], [], []>} : vector<16x16xf32>, vector<16x16xf32>, vector<16x16xf32> -> vector<16x16xf32>
    %217 = arith.addf %216, %5 : vector<16x16xf32>
    %cst_91 = arith.constant dense<0xFF800000> : vector<16xf32>
    %218 = vector.multi_reduction <maximumf>, %217, %cst_91 [1] : vector<16x16xf32> to vector<16xf32>
    %219 = vector.shape_cast %218 : vector<16xf32> to vector<16x1xf32>
    %220 = vector.broadcast %219 : vector<16x1xf32> to vector<16x16xf32>
    %221 = arith.subf %217, %220 : vector<16x16xf32>
    %222 = math.exp %221 : vector<16x16xf32>
    %223 = arith.mulf %222, %0 : vector<16x16xf32>
    %cst_92 = arith.constant dense<0.000000e+00> : vector<16xf32>
    %224 = vector.multi_reduction <add>, %223, %cst_92 [1] : vector<16x16xf32> to vector<16xf32>
    %225 = vector.shape_cast %224 : vector<16xf32> to vector<16x1xf32>
    %cst_93 = arith.constant 1.000000e-16 : f32
    %226 = vector.broadcast %cst_93 : f32 to vector<16x1xf32>
    %227 = arith.maximumf %225, %226 : vector<16x1xf32>
    %228 = vector.broadcast %227 : vector<16x1xf32> to vector<16x16xf32>
    %229 = arith.divf %223, %228 : vector<16x16xf32>
    %230 = vector.extract_strided_slice %171 {offsets = [0, 32], sizes = [16, 16], strides = [1, 1]} : vector<16x64xf32> to vector<16x16xf32>
    %cst_94 = arith.constant dense<0.000000e+00> : vector<16x16xf32>
    %231 = tpu.matmul %229, %230, %cst_94 {dimension_numbers = #tpu.dot_dimension_numbers<[1], [0], [0], [1], [0, 0, 1, 1], [], []>} : vector<16x16xf32>, vector<16x16xf32>, vector<16x16xf32> -> vector<16x16xf32>
    %232 = arith.addf %212, %231 : vector<16x16xf32>
    %233 = vector.extract_strided_slice %161 {offsets = [0, 48], sizes = [16, 16], strides = [1, 1]} : vector<16x64xf32> to vector<16x16xf32>
    %234 = vector.extract_strided_slice %166 {offsets = [0, 48], sizes = [16, 16], strides = [1, 1]} : vector<16x64xf32> to vector<16x16xf32>
    %235 = tpu.transpose %234, [1, 0] : vector<16x16xf32> -> vector<16x16xf32>
    %cst_95 = arith.constant dense<0.000000e+00> : vector<16x16xf32>
    %236 = tpu.matmul %233, %235, %cst_95 {dimension_numbers = #tpu.dot_dimension_numbers<[1], [0], [0], [1], [0, 0, 1, 1], [], []>} : vector<16x16xf32>, vector<16x16xf32>, vector<16x16xf32> -> vector<16x16xf32>
    %237 = arith.addf %236, %5 : vector<16x16xf32>
    %cst_96 = arith.constant dense<0xFF800000> : vector<16xf32>
    %238 = vector.multi_reduction <maximumf>, %237, %cst_96 [1] : vector<16x16xf32> to vector<16xf32>
    %239 = vector.shape_cast %238 : vector<16xf32> to vector<16x1xf32>
    %240 = vector.broadcast %239 : vector<16x1xf32> to vector<16x16xf32>
    %241 = arith.subf %237, %240 : vector<16x16xf32>
    %242 = math.exp %241 : vector<16x16xf32>
    %243 = arith.mulf %242, %0 : vector<16x16xf32>
    %cst_97 = arith.constant dense<0.000000e+00> : vector<16xf32>
    %244 = vector.multi_reduction <add>, %243, %cst_97 [1] : vector<16x16xf32> to vector<16xf32>
    %245 = vector.shape_cast %244 : vector<16xf32> to vector<16x1xf32>
    %cst_98 = arith.constant 1.000000e-16 : f32
    %246 = vector.broadcast %cst_98 : f32 to vector<16x1xf32>
    %247 = arith.maximumf %245, %246 : vector<16x1xf32>
    %248 = vector.broadcast %247 : vector<16x1xf32> to vector<16x16xf32>
    %249 = arith.divf %243, %248 : vector<16x16xf32>
    %250 = vector.extract_strided_slice %171 {offsets = [0, 48], sizes = [16, 16], strides = [1, 1]} : vector<16x64xf32> to vector<16x16xf32>
    %cst_99 = arith.constant dense<0.000000e+00> : vector<16x16xf32>
    %251 = tpu.matmul %249, %250, %cst_99 {dimension_numbers = #tpu.dot_dimension_numbers<[1], [0], [0], [1], [0, 0, 1, 1], [], []>} : vector<16x16xf32>, vector<16x16xf32>, vector<16x16xf32> -> vector<16x16xf32>
    %252 = arith.addf %232, %251 : vector<16x16xf32>
    %cst_100 = arith.constant 2.500000e-01 : f32
    %253 = vector.broadcast %cst_100 : f32 to vector<16x16xf32>
    %254 = arith.mulf %252, %253 : vector<16x16xf32>
    %c0_101 = arith.constant 0 : index
    %c0_102 = arith.constant 0 : index
    %255 = vector.load %arg21[%c0_101, %c0_102] : memref<32x16xf32, #tpu.memory_space<vmem>>, vector<32x16xf32>
    %cst_103 = arith.constant dense<0.000000e+00> : vector<16x16xf32>
    %256 = tpu.matmul %156, %255, %cst_103 {dimension_numbers = #tpu.dot_dimension_numbers<[1], [0], [0], [1], [0, 0, 1, 1], [], []>} : vector<16x32xf32>, vector<32x16xf32>, vector<16x16xf32> -> vector<16x16xf32>
    %c0_104 = arith.constant 0 : index
    %c0_105 = arith.constant 0 : index
    %257 = vector.load %arg22[%c0_104, %c0_105] : memref<1x16xf32, #tpu.memory_space<vmem>>, vector<1x16xf32>
    %258 = vector.broadcast %257 : vector<1x16xf32> to vector<16x16xf32>
    %259 = arith.addf %256, %258 : vector<16x16xf32>
    %c0_106 = arith.constant 0 : index
    %c0_107 = arith.constant 0 : index
    %260 = vector.load %arg23[%c0_106, %c0_107] : memref<1x16xf32, #tpu.memory_space<vmem>>, vector<1x16xf32>
    %261 = vector.broadcast %260 : vector<1x16xf32> to vector<16x16xf32>
    %262 = arith.mulf %254, %261 : vector<16x16xf32>
    %c0_108 = arith.constant 0 : index
    %c0_109 = arith.constant 0 : index
    %263 = vector.load %arg24[%c0_108, %c0_109] : memref<1x16xf32, #tpu.memory_space<vmem>>, vector<1x16xf32>
    %264 = vector.broadcast %263 : vector<1x16xf32> to vector<16x16xf32>
    %265 = arith.mulf %259, %264 : vector<16x16xf32>
    %266 = arith.addf %262, %265 : vector<16x16xf32>
    %cst_110 = arith.constant dense<0.000000e+00> : vector<16xf32>
    %267 = vector.multi_reduction <add>, %266, %cst_110 [1] : vector<16x16xf32> to vector<16xf32>
    %268 = vector.shape_cast %267 : vector<16xf32> to vector<16x1xf32>
    %269 = arith.negf %268 : vector<16x1xf32>
    %270 = math.exp %269 : vector<16x1xf32>
    %cst_111 = arith.constant 1.000000e+00 : f32
    %271 = vector.broadcast %cst_111 : f32 to vector<16x1xf32>
    %272 = arith.addf %271, %270 : vector<16x1xf32>
    %273 = arith.divf %271, %272 : vector<16x1xf32>
    %274 = vector.broadcast %273 : vector<16x1xf32> to vector<16x16xf32>
    %275 = arith.mulf %274, %259 : vector<16x16xf32>
    %cst_112 = arith.constant 1.000000e+00 : f32
    %276 = vector.broadcast %cst_112 : f32 to vector<16x1xf32>
    %277 = arith.subf %276, %273 : vector<16x1xf32>
    %278 = vector.broadcast %277 : vector<16x1xf32> to vector<16x16xf32>
    %279 = arith.mulf %278, %254 : vector<16x16xf32>
    %280 = arith.addf %275, %279 : vector<16x16xf32>
    %cst_113 = arith.constant 0.000000e+00 : f32
    %281 = vector.broadcast %cst_113 : f32 to vector<16x16xf32>
    %282 = arith.maximumf %280, %281 : vector<16x16xf32>
    %cst_114 = arith.constant dense<0.000000e+00> : vector<16xf32>
    %283 = vector.multi_reduction <add>, %282, %cst_114 [0] : vector<16x16xf32> to vector<16xf32>
    %284 = vector.shape_cast %283 : vector<16xf32> to vector<1x16xf32>
    %cst_115 = arith.constant 1.600000e+01 : f32
    %285 = vector.broadcast %cst_115 : f32 to vector<1x16xf32>
    %286 = arith.divf %284, %285 : vector<1x16xf32>
    %287 = vector.broadcast %286 : vector<1x16xf32> to vector<16x16xf32>
    %288 = arith.subf %282, %287 : vector<16x16xf32>
    %289 = arith.mulf %288, %288 : vector<16x16xf32>
    %cst_116 = arith.constant dense<0.000000e+00> : vector<16xf32>
    %290 = vector.multi_reduction <add>, %289, %cst_116 [0] : vector<16x16xf32> to vector<16xf32>
    %291 = vector.shape_cast %290 : vector<16xf32> to vector<1x16xf32>
    %cst_117 = arith.constant 1.600000e+01 : f32
    %292 = vector.broadcast %cst_117 : f32 to vector<1x16xf32>
    %293 = arith.divf %291, %292 : vector<1x16xf32>
    %294 = vector.broadcast %286 : vector<1x16xf32> to vector<16x16xf32>
    %295 = arith.subf %282, %294 : vector<16x16xf32>
    %cst_118 = arith.constant 9.99999974E-6 : f32
    %296 = vector.broadcast %cst_118 : f32 to vector<1x16xf32>
    %297 = arith.addf %293, %296 : vector<1x16xf32>
    %298 = math.rsqrt %297 : vector<1x16xf32>
    %299 = vector.broadcast %298 : vector<1x16xf32> to vector<16x16xf32>
    %300 = arith.mulf %295, %299 : vector<16x16xf32>
    %c0_119 = arith.constant 0 : index
    %c0_120 = arith.constant 0 : index
    %301 = vector.load %arg57[%c0_119, %c0_120] : memref<1x16xf32, #tpu.memory_space<vmem>>, vector<1x16xf32>
    %302 = vector.broadcast %301 : vector<1x16xf32> to vector<16x16xf32>
    %303 = arith.mulf %300, %302 : vector<16x16xf32>
    %c0_121 = arith.constant 0 : index
    %c0_122 = arith.constant 0 : index
    %304 = vector.load %arg58[%c0_121, %c0_122] : memref<1x16xf32, #tpu.memory_space<vmem>>, vector<1x16xf32>
    %305 = vector.broadcast %304 : vector<1x16xf32> to vector<16x16xf32>
    %306 = arith.addf %303, %305 : vector<16x16xf32>
    %c0_123 = arith.constant 0 : index
    %c0_124 = arith.constant 0 : index
    %307 = vector.load %arg25[%c0_123, %c0_124] : memref<16x32xf32, #tpu.memory_space<vmem>>, vector<16x32xf32>
    %cst_125 = arith.constant dense<0.000000e+00> : vector<16x32xf32>
    %308 = tpu.matmul %306, %307, %cst_125 {dimension_numbers = #tpu.dot_dimension_numbers<[1], [0], [0], [1], [0, 0, 1, 1], [], []>} : vector<16x16xf32>, vector<16x32xf32>, vector<16x32xf32> -> vector<16x32xf32>
    %c0_126 = arith.constant 0 : index
    %c0_127 = arith.constant 0 : index
    %309 = vector.load %arg26[%c0_126, %c0_127] : memref<1x32xf32, #tpu.memory_space<vmem>>, vector<1x32xf32>
    %310 = vector.broadcast %309 : vector<1x32xf32> to vector<16x32xf32>
    %311 = arith.addf %308, %310 : vector<16x32xf32>
    %c0_128 = arith.constant 0 : index
    %c0_129 = arith.constant 0 : index
    %312 = vector.load %arg27[%c0_128, %c0_129] : memref<16x32xf32, #tpu.memory_space<vmem>>, vector<16x32xf32>
    %cst_130 = arith.constant dense<0.000000e+00> : vector<16x32xf32>
    %313 = tpu.matmul %306, %312, %cst_130 {dimension_numbers = #tpu.dot_dimension_numbers<[1], [0], [0], [1], [0, 0, 1, 1], [], []>} : vector<16x16xf32>, vector<16x32xf32>, vector<16x32xf32> -> vector<16x32xf32>
    %c0_131 = arith.constant 0 : index
    %c0_132 = arith.constant 0 : index
    %314 = vector.load %arg28[%c0_131, %c0_132] : memref<1x32xf32, #tpu.memory_space<vmem>>, vector<1x32xf32>
    %315 = vector.broadcast %314 : vector<1x32xf32> to vector<16x32xf32>
    %316 = arith.addf %313, %315 : vector<16x32xf32>
    %c0_133 = arith.constant 0 : index
    %c0_134 = arith.constant 0 : index
    %317 = vector.load %arg29[%c0_133, %c0_134] : memref<16x32xf32, #tpu.memory_space<vmem>>, vector<16x32xf32>
    %cst_135 = arith.constant dense<0.000000e+00> : vector<16x32xf32>
    %318 = tpu.matmul %306, %317, %cst_135 {dimension_numbers = #tpu.dot_dimension_numbers<[1], [0], [0], [1], [0, 0, 1, 1], [], []>} : vector<16x16xf32>, vector<16x32xf32>, vector<16x32xf32> -> vector<16x32xf32>
    %c0_136 = arith.constant 0 : index
    %c0_137 = arith.constant 0 : index
    %319 = vector.load %arg30[%c0_136, %c0_137] : memref<1x32xf32, #tpu.memory_space<vmem>>, vector<1x32xf32>
    %320 = vector.broadcast %319 : vector<1x32xf32> to vector<16x32xf32>
    %321 = arith.addf %318, %320 : vector<16x32xf32>
    %cst_138 = arith.constant 0.000000e+00 : f32
    %322 = vector.broadcast %cst_138 : f32 to vector<16x8xf32>
    %323 = vector.extract_strided_slice %311 {offsets = [0, 0], sizes = [16, 8], strides = [1, 1]} : vector<16x32xf32> to vector<16x8xf32>
    %324 = vector.extract_strided_slice %316 {offsets = [0, 0], sizes = [16, 8], strides = [1, 1]} : vector<16x32xf32> to vector<16x8xf32>
    %325 = tpu.transpose %324, [1, 0] : vector<16x8xf32> -> vector<8x16xf32>
    %cst_139 = arith.constant dense<0.000000e+00> : vector<16x16xf32>
    %326 = tpu.matmul %323, %325, %cst_139 {dimension_numbers = #tpu.dot_dimension_numbers<[1], [0], [0], [1], [0, 0, 1, 1], [], []>} : vector<16x8xf32>, vector<8x16xf32>, vector<16x16xf32> -> vector<16x16xf32>
    %327 = arith.addf %326, %5 : vector<16x16xf32>
    %cst_140 = arith.constant dense<0xFF800000> : vector<16xf32>
    %328 = vector.multi_reduction <maximumf>, %327, %cst_140 [1] : vector<16x16xf32> to vector<16xf32>
    %329 = vector.shape_cast %328 : vector<16xf32> to vector<16x1xf32>
    %330 = vector.broadcast %329 : vector<16x1xf32> to vector<16x16xf32>
    %331 = arith.subf %327, %330 : vector<16x16xf32>
    %332 = math.exp %331 : vector<16x16xf32>
    %333 = arith.mulf %332, %0 : vector<16x16xf32>
    %cst_141 = arith.constant dense<0.000000e+00> : vector<16xf32>
    %334 = vector.multi_reduction <add>, %333, %cst_141 [1] : vector<16x16xf32> to vector<16xf32>
    %335 = vector.shape_cast %334 : vector<16xf32> to vector<16x1xf32>
    %cst_142 = arith.constant 1.000000e-16 : f32
    %336 = vector.broadcast %cst_142 : f32 to vector<16x1xf32>
    %337 = arith.maximumf %335, %336 : vector<16x1xf32>
    %338 = vector.broadcast %337 : vector<16x1xf32> to vector<16x16xf32>
    %339 = arith.divf %333, %338 : vector<16x16xf32>
    %340 = vector.extract_strided_slice %321 {offsets = [0, 0], sizes = [16, 8], strides = [1, 1]} : vector<16x32xf32> to vector<16x8xf32>
    %cst_143 = arith.constant dense<0.000000e+00> : vector<16x8xf32>
    %341 = tpu.matmul %339, %340, %cst_143 {dimension_numbers = #tpu.dot_dimension_numbers<[1], [0], [0], [1], [0, 0, 1, 1], [], []>} : vector<16x16xf32>, vector<16x8xf32>, vector<16x8xf32> -> vector<16x8xf32>
    %342 = arith.addf %322, %341 : vector<16x8xf32>
    %343 = vector.extract_strided_slice %311 {offsets = [0, 8], sizes = [16, 8], strides = [1, 1]} : vector<16x32xf32> to vector<16x8xf32>
    %344 = vector.extract_strided_slice %316 {offsets = [0, 8], sizes = [16, 8], strides = [1, 1]} : vector<16x32xf32> to vector<16x8xf32>
    %345 = tpu.transpose %344, [1, 0] : vector<16x8xf32> -> vector<8x16xf32>
    %cst_144 = arith.constant dense<0.000000e+00> : vector<16x16xf32>
    %346 = tpu.matmul %343, %345, %cst_144 {dimension_numbers = #tpu.dot_dimension_numbers<[1], [0], [0], [1], [0, 0, 1, 1], [], []>} : vector<16x8xf32>, vector<8x16xf32>, vector<16x16xf32> -> vector<16x16xf32>
    %347 = arith.addf %346, %5 : vector<16x16xf32>
    %cst_145 = arith.constant dense<0xFF800000> : vector<16xf32>
    %348 = vector.multi_reduction <maximumf>, %347, %cst_145 [1] : vector<16x16xf32> to vector<16xf32>
    %349 = vector.shape_cast %348 : vector<16xf32> to vector<16x1xf32>
    %350 = vector.broadcast %349 : vector<16x1xf32> to vector<16x16xf32>
    %351 = arith.subf %347, %350 : vector<16x16xf32>
    %352 = math.exp %351 : vector<16x16xf32>
    %353 = arith.mulf %352, %0 : vector<16x16xf32>
    %cst_146 = arith.constant dense<0.000000e+00> : vector<16xf32>
    %354 = vector.multi_reduction <add>, %353, %cst_146 [1] : vector<16x16xf32> to vector<16xf32>
    %355 = vector.shape_cast %354 : vector<16xf32> to vector<16x1xf32>
    %cst_147 = arith.constant 1.000000e-16 : f32
    %356 = vector.broadcast %cst_147 : f32 to vector<16x1xf32>
    %357 = arith.maximumf %355, %356 : vector<16x1xf32>
    %358 = vector.broadcast %357 : vector<16x1xf32> to vector<16x16xf32>
    %359 = arith.divf %353, %358 : vector<16x16xf32>
    %360 = vector.extract_strided_slice %321 {offsets = [0, 8], sizes = [16, 8], strides = [1, 1]} : vector<16x32xf32> to vector<16x8xf32>
    %cst_148 = arith.constant dense<0.000000e+00> : vector<16x8xf32>
    %361 = tpu.matmul %359, %360, %cst_148 {dimension_numbers = #tpu.dot_dimension_numbers<[1], [0], [0], [1], [0, 0, 1, 1], [], []>} : vector<16x16xf32>, vector<16x8xf32>, vector<16x8xf32> -> vector<16x8xf32>
    %362 = arith.addf %342, %361 : vector<16x8xf32>
    %363 = vector.extract_strided_slice %311 {offsets = [0, 16], sizes = [16, 8], strides = [1, 1]} : vector<16x32xf32> to vector<16x8xf32>
    %364 = vector.extract_strided_slice %316 {offsets = [0, 16], sizes = [16, 8], strides = [1, 1]} : vector<16x32xf32> to vector<16x8xf32>
    %365 = tpu.transpose %364, [1, 0] : vector<16x8xf32> -> vector<8x16xf32>
    %cst_149 = arith.constant dense<0.000000e+00> : vector<16x16xf32>
    %366 = tpu.matmul %363, %365, %cst_149 {dimension_numbers = #tpu.dot_dimension_numbers<[1], [0], [0], [1], [0, 0, 1, 1], [], []>} : vector<16x8xf32>, vector<8x16xf32>, vector<16x16xf32> -> vector<16x16xf32>
    %367 = arith.addf %366, %5 : vector<16x16xf32>
    %cst_150 = arith.constant dense<0xFF800000> : vector<16xf32>
    %368 = vector.multi_reduction <maximumf>, %367, %cst_150 [1] : vector<16x16xf32> to vector<16xf32>
    %369 = vector.shape_cast %368 : vector<16xf32> to vector<16x1xf32>
    %370 = vector.broadcast %369 : vector<16x1xf32> to vector<16x16xf32>
    %371 = arith.subf %367, %370 : vector<16x16xf32>
    %372 = math.exp %371 : vector<16x16xf32>
    %373 = arith.mulf %372, %0 : vector<16x16xf32>
    %cst_151 = arith.constant dense<0.000000e+00> : vector<16xf32>
    %374 = vector.multi_reduction <add>, %373, %cst_151 [1] : vector<16x16xf32> to vector<16xf32>
    %375 = vector.shape_cast %374 : vector<16xf32> to vector<16x1xf32>
    %cst_152 = arith.constant 1.000000e-16 : f32
    %376 = vector.broadcast %cst_152 : f32 to vector<16x1xf32>
    %377 = arith.maximumf %375, %376 : vector<16x1xf32>
    %378 = vector.broadcast %377 : vector<16x1xf32> to vector<16x16xf32>
    %379 = arith.divf %373, %378 : vector<16x16xf32>
    %380 = vector.extract_strided_slice %321 {offsets = [0, 16], sizes = [16, 8], strides = [1, 1]} : vector<16x32xf32> to vector<16x8xf32>
    %cst_153 = arith.constant dense<0.000000e+00> : vector<16x8xf32>
    %381 = tpu.matmul %379, %380, %cst_153 {dimension_numbers = #tpu.dot_dimension_numbers<[1], [0], [0], [1], [0, 0, 1, 1], [], []>} : vector<16x16xf32>, vector<16x8xf32>, vector<16x8xf32> -> vector<16x8xf32>
    %382 = arith.addf %362, %381 : vector<16x8xf32>
    %383 = vector.extract_strided_slice %311 {offsets = [0, 24], sizes = [16, 8], strides = [1, 1]} : vector<16x32xf32> to vector<16x8xf32>
    %384 = vector.extract_strided_slice %316 {offsets = [0, 24], sizes = [16, 8], strides = [1, 1]} : vector<16x32xf32> to vector<16x8xf32>
    %385 = tpu.transpose %384, [1, 0] : vector<16x8xf32> -> vector<8x16xf32>
    %cst_154 = arith.constant dense<0.000000e+00> : vector<16x16xf32>
    %386 = tpu.matmul %383, %385, %cst_154 {dimension_numbers = #tpu.dot_dimension_numbers<[1], [0], [0], [1], [0, 0, 1, 1], [], []>} : vector<16x8xf32>, vector<8x16xf32>, vector<16x16xf32> -> vector<16x16xf32>
    %387 = arith.addf %386, %5 : vector<16x16xf32>
    %cst_155 = arith.constant dense<0xFF800000> : vector<16xf32>
    %388 = vector.multi_reduction <maximumf>, %387, %cst_155 [1] : vector<16x16xf32> to vector<16xf32>
    %389 = vector.shape_cast %388 : vector<16xf32> to vector<16x1xf32>
    %390 = vector.broadcast %389 : vector<16x1xf32> to vector<16x16xf32>
    %391 = arith.subf %387, %390 : vector<16x16xf32>
    %392 = math.exp %391 : vector<16x16xf32>
    %393 = arith.mulf %392, %0 : vector<16x16xf32>
    %cst_156 = arith.constant dense<0.000000e+00> : vector<16xf32>
    %394 = vector.multi_reduction <add>, %393, %cst_156 [1] : vector<16x16xf32> to vector<16xf32>
    %395 = vector.shape_cast %394 : vector<16xf32> to vector<16x1xf32>
    %cst_157 = arith.constant 1.000000e-16 : f32
    %396 = vector.broadcast %cst_157 : f32 to vector<16x1xf32>
    %397 = arith.maximumf %395, %396 : vector<16x1xf32>
    %398 = vector.broadcast %397 : vector<16x1xf32> to vector<16x16xf32>
    %399 = arith.divf %393, %398 : vector<16x16xf32>
    %400 = vector.extract_strided_slice %321 {offsets = [0, 24], sizes = [16, 8], strides = [1, 1]} : vector<16x32xf32> to vector<16x8xf32>
    %cst_158 = arith.constant dense<0.000000e+00> : vector<16x8xf32>
    %401 = tpu.matmul %399, %400, %cst_158 {dimension_numbers = #tpu.dot_dimension_numbers<[1], [0], [0], [1], [0, 0, 1, 1], [], []>} : vector<16x16xf32>, vector<16x8xf32>, vector<16x8xf32> -> vector<16x8xf32>
    %402 = arith.addf %382, %401 : vector<16x8xf32>
    %cst_159 = arith.constant 2.500000e-01 : f32
    %403 = vector.broadcast %cst_159 : f32 to vector<16x8xf32>
    %404 = arith.mulf %402, %403 : vector<16x8xf32>
    %c0_160 = arith.constant 0 : index
    %c0_161 = arith.constant 0 : index
    %405 = vector.load %arg31[%c0_160, %c0_161] : memref<16x8xf32, #tpu.memory_space<vmem>>, vector<16x8xf32>
    %cst_162 = arith.constant dense<0.000000e+00> : vector<16x8xf32>
    %406 = tpu.matmul %306, %405, %cst_162 {dimension_numbers = #tpu.dot_dimension_numbers<[1], [0], [0], [1], [0, 0, 1, 1], [], []>} : vector<16x16xf32>, vector<16x8xf32>, vector<16x8xf32> -> vector<16x8xf32>
    %c0_163 = arith.constant 0 : index
    %c0_164 = arith.constant 0 : index
    %407 = vector.load %arg32[%c0_163, %c0_164] : memref<1x8xf32, #tpu.memory_space<vmem>>, vector<1x8xf32>
    %408 = vector.broadcast %407 : vector<1x8xf32> to vector<16x8xf32>
    %409 = arith.addf %406, %408 : vector<16x8xf32>
    %c0_165 = arith.constant 0 : index
    %c0_166 = arith.constant 0 : index
    %410 = vector.load %arg33[%c0_165, %c0_166] : memref<1x8xf32, #tpu.memory_space<vmem>>, vector<1x8xf32>
    %411 = vector.broadcast %410 : vector<1x8xf32> to vector<16x8xf32>
    %412 = arith.mulf %404, %411 : vector<16x8xf32>
    %c0_167 = arith.constant 0 : index
    %c0_168 = arith.constant 0 : index
    %413 = vector.load %arg34[%c0_167, %c0_168] : memref<1x8xf32, #tpu.memory_space<vmem>>, vector<1x8xf32>
    %414 = vector.broadcast %413 : vector<1x8xf32> to vector<16x8xf32>
    %415 = arith.mulf %409, %414 : vector<16x8xf32>
    %416 = arith.addf %412, %415 : vector<16x8xf32>
    %cst_169 = arith.constant dense<0.000000e+00> : vector<16xf32>
    %417 = vector.multi_reduction <add>, %416, %cst_169 [1] : vector<16x8xf32> to vector<16xf32>
    %418 = vector.shape_cast %417 : vector<16xf32> to vector<16x1xf32>
    %419 = arith.negf %418 : vector<16x1xf32>
    %420 = math.exp %419 : vector<16x1xf32>
    %cst_170 = arith.constant 1.000000e+00 : f32
    %421 = vector.broadcast %cst_170 : f32 to vector<16x1xf32>
    %422 = arith.addf %421, %420 : vector<16x1xf32>
    %423 = arith.divf %421, %422 : vector<16x1xf32>
    %424 = vector.broadcast %423 : vector<16x1xf32> to vector<16x8xf32>
    %425 = arith.mulf %424, %409 : vector<16x8xf32>
    %cst_171 = arith.constant 1.000000e+00 : f32
    %426 = vector.broadcast %cst_171 : f32 to vector<16x1xf32>
    %427 = arith.subf %426, %423 : vector<16x1xf32>
    %428 = vector.broadcast %427 : vector<16x1xf32> to vector<16x8xf32>
    %429 = arith.mulf %428, %404 : vector<16x8xf32>
    %430 = arith.addf %425, %429 : vector<16x8xf32>
    %cst_172 = arith.constant 0.000000e+00 : f32
    %431 = vector.broadcast %cst_172 : f32 to vector<16x8xf32>
    %432 = arith.maximumf %430, %431 : vector<16x8xf32>
    %cst_173 = arith.constant dense<0.000000e+00> : vector<8xf32>
    %433 = vector.multi_reduction <add>, %432, %cst_173 [0] : vector<16x8xf32> to vector<8xf32>
    %434 = vector.shape_cast %433 : vector<8xf32> to vector<1x8xf32>
    %cst_174 = arith.constant 1.600000e+01 : f32
    %435 = vector.broadcast %cst_174 : f32 to vector<1x8xf32>
    %436 = arith.divf %434, %435 : vector<1x8xf32>
    %437 = vector.broadcast %436 : vector<1x8xf32> to vector<16x8xf32>
    %438 = arith.subf %432, %437 : vector<16x8xf32>
    %439 = arith.mulf %438, %438 : vector<16x8xf32>
    %cst_175 = arith.constant dense<0.000000e+00> : vector<8xf32>
    %440 = vector.multi_reduction <add>, %439, %cst_175 [0] : vector<16x8xf32> to vector<8xf32>
    %441 = vector.shape_cast %440 : vector<8xf32> to vector<1x8xf32>
    %cst_176 = arith.constant 1.600000e+01 : f32
    %442 = vector.broadcast %cst_176 : f32 to vector<1x8xf32>
    %443 = arith.divf %441, %442 : vector<1x8xf32>
    %444 = vector.broadcast %436 : vector<1x8xf32> to vector<16x8xf32>
    %445 = arith.subf %432, %444 : vector<16x8xf32>
    %cst_177 = arith.constant 9.99999974E-6 : f32
    %446 = vector.broadcast %cst_177 : f32 to vector<1x8xf32>
    %447 = arith.addf %443, %446 : vector<1x8xf32>
    %448 = math.rsqrt %447 : vector<1x8xf32>
    %449 = vector.broadcast %448 : vector<1x8xf32> to vector<16x8xf32>
    %450 = arith.mulf %445, %449 : vector<16x8xf32>
    %c0_178 = arith.constant 0 : index
    %c0_179 = arith.constant 0 : index
    %451 = vector.load %arg59[%c0_178, %c0_179] : memref<1x8xf32, #tpu.memory_space<vmem>>, vector<1x8xf32>
    %452 = vector.broadcast %451 : vector<1x8xf32> to vector<16x8xf32>
    %453 = arith.mulf %450, %452 : vector<16x8xf32>
    %c0_180 = arith.constant 0 : index
    %c0_181 = arith.constant 0 : index
    %454 = vector.load %arg60[%c0_180, %c0_181] : memref<1x8xf32, #tpu.memory_space<vmem>>, vector<1x8xf32>
    %455 = vector.broadcast %454 : vector<1x8xf32> to vector<16x8xf32>
    %456 = arith.addf %453, %455 : vector<16x8xf32>
    %c0_182 = arith.constant 0 : index
    %c0_183 = arith.constant 0 : index
    %457 = vector.load %arg35[%c0_182, %c0_183] : memref<8x16xf32, #tpu.memory_space<vmem>>, vector<8x16xf32>
    %cst_184 = arith.constant dense<0.000000e+00> : vector<16x16xf32>
    %458 = tpu.matmul %456, %457, %cst_184 {dimension_numbers = #tpu.dot_dimension_numbers<[1], [0], [0], [1], [0, 0, 1, 1], [], []>} : vector<16x8xf32>, vector<8x16xf32>, vector<16x16xf32> -> vector<16x16xf32>
    %c0_185 = arith.constant 0 : index
    %c0_186 = arith.constant 0 : index
    %459 = vector.load %arg36[%c0_185, %c0_186] : memref<1x16xf32, #tpu.memory_space<vmem>>, vector<1x16xf32>
    %460 = vector.broadcast %459 : vector<1x16xf32> to vector<16x16xf32>
    %461 = arith.addf %458, %460 : vector<16x16xf32>
    %c0_187 = arith.constant 0 : index
    %c0_188 = arith.constant 0 : index
    %462 = vector.load %arg37[%c0_187, %c0_188] : memref<8x16xf32, #tpu.memory_space<vmem>>, vector<8x16xf32>
    %cst_189 = arith.constant dense<0.000000e+00> : vector<16x16xf32>
    %463 = tpu.matmul %456, %462, %cst_189 {dimension_numbers = #tpu.dot_dimension_numbers<[1], [0], [0], [1], [0, 0, 1, 1], [], []>} : vector<16x8xf32>, vector<8x16xf32>, vector<16x16xf32> -> vector<16x16xf32>
    %c0_190 = arith.constant 0 : index
    %c0_191 = arith.constant 0 : index
    %464 = vector.load %arg38[%c0_190, %c0_191] : memref<1x16xf32, #tpu.memory_space<vmem>>, vector<1x16xf32>
    %465 = vector.broadcast %464 : vector<1x16xf32> to vector<16x16xf32>
    %466 = arith.addf %463, %465 : vector<16x16xf32>
    %c0_192 = arith.constant 0 : index
    %c0_193 = arith.constant 0 : index
    %467 = vector.load %arg39[%c0_192, %c0_193] : memref<8x16xf32, #tpu.memory_space<vmem>>, vector<8x16xf32>
    %cst_194 = arith.constant dense<0.000000e+00> : vector<16x16xf32>
    %468 = tpu.matmul %456, %467, %cst_194 {dimension_numbers = #tpu.dot_dimension_numbers<[1], [0], [0], [1], [0, 0, 1, 1], [], []>} : vector<16x8xf32>, vector<8x16xf32>, vector<16x16xf32> -> vector<16x16xf32>
    %c0_195 = arith.constant 0 : index
    %c0_196 = arith.constant 0 : index
    %469 = vector.load %arg40[%c0_195, %c0_196] : memref<1x16xf32, #tpu.memory_space<vmem>>, vector<1x16xf32>
    %470 = vector.broadcast %469 : vector<1x16xf32> to vector<16x16xf32>
    %471 = arith.addf %468, %470 : vector<16x16xf32>
    %cst_197 = arith.constant 0.000000e+00 : f32
    %472 = vector.broadcast %cst_197 : f32 to vector<16x4xf32>
    %473 = vector.extract_strided_slice %461 {offsets = [0, 0], sizes = [16, 4], strides = [1, 1]} : vector<16x16xf32> to vector<16x4xf32>
    %474 = vector.extract_strided_slice %466 {offsets = [0, 0], sizes = [16, 4], strides = [1, 1]} : vector<16x16xf32> to vector<16x4xf32>
    %475 = tpu.transpose %474, [1, 0] : vector<16x4xf32> -> vector<4x16xf32>
    %cst_198 = arith.constant dense<0.000000e+00> : vector<16x16xf32>
    %476 = tpu.matmul %473, %475, %cst_198 {dimension_numbers = #tpu.dot_dimension_numbers<[1], [0], [0], [1], [0, 0, 1, 1], [], []>} : vector<16x4xf32>, vector<4x16xf32>, vector<16x16xf32> -> vector<16x16xf32>
    %477 = arith.addf %476, %5 : vector<16x16xf32>
    %cst_199 = arith.constant dense<0xFF800000> : vector<16xf32>
    %478 = vector.multi_reduction <maximumf>, %477, %cst_199 [1] : vector<16x16xf32> to vector<16xf32>
    %479 = vector.shape_cast %478 : vector<16xf32> to vector<16x1xf32>
    %480 = vector.broadcast %479 : vector<16x1xf32> to vector<16x16xf32>
    %481 = arith.subf %477, %480 : vector<16x16xf32>
    %482 = math.exp %481 : vector<16x16xf32>
    %483 = arith.mulf %482, %0 : vector<16x16xf32>
    %cst_200 = arith.constant dense<0.000000e+00> : vector<16xf32>
    %484 = vector.multi_reduction <add>, %483, %cst_200 [1] : vector<16x16xf32> to vector<16xf32>
    %485 = vector.shape_cast %484 : vector<16xf32> to vector<16x1xf32>
    %cst_201 = arith.constant 1.000000e-16 : f32
    %486 = vector.broadcast %cst_201 : f32 to vector<16x1xf32>
    %487 = arith.maximumf %485, %486 : vector<16x1xf32>
    %488 = vector.broadcast %487 : vector<16x1xf32> to vector<16x16xf32>
    %489 = arith.divf %483, %488 : vector<16x16xf32>
    %490 = vector.extract_strided_slice %471 {offsets = [0, 0], sizes = [16, 4], strides = [1, 1]} : vector<16x16xf32> to vector<16x4xf32>
    %cst_202 = arith.constant dense<0.000000e+00> : vector<16x4xf32>
    %491 = tpu.matmul %489, %490, %cst_202 {dimension_numbers = #tpu.dot_dimension_numbers<[1], [0], [0], [1], [0, 0, 1, 1], [], []>} : vector<16x16xf32>, vector<16x4xf32>, vector<16x4xf32> -> vector<16x4xf32>
    %492 = arith.addf %472, %491 : vector<16x4xf32>
    %493 = vector.extract_strided_slice %461 {offsets = [0, 4], sizes = [16, 4], strides = [1, 1]} : vector<16x16xf32> to vector<16x4xf32>
    %494 = vector.extract_strided_slice %466 {offsets = [0, 4], sizes = [16, 4], strides = [1, 1]} : vector<16x16xf32> to vector<16x4xf32>
    %495 = tpu.transpose %494, [1, 0] : vector<16x4xf32> -> vector<4x16xf32>
    %cst_203 = arith.constant dense<0.000000e+00> : vector<16x16xf32>
    %496 = tpu.matmul %493, %495, %cst_203 {dimension_numbers = #tpu.dot_dimension_numbers<[1], [0], [0], [1], [0, 0, 1, 1], [], []>} : vector<16x4xf32>, vector<4x16xf32>, vector<16x16xf32> -> vector<16x16xf32>
    %497 = arith.addf %496, %5 : vector<16x16xf32>
    %cst_204 = arith.constant dense<0xFF800000> : vector<16xf32>
    %498 = vector.multi_reduction <maximumf>, %497, %cst_204 [1] : vector<16x16xf32> to vector<16xf32>
    %499 = vector.shape_cast %498 : vector<16xf32> to vector<16x1xf32>
    %500 = vector.broadcast %499 : vector<16x1xf32> to vector<16x16xf32>
    %501 = arith.subf %497, %500 : vector<16x16xf32>
    %502 = math.exp %501 : vector<16x16xf32>
    %503 = arith.mulf %502, %0 : vector<16x16xf32>
    %cst_205 = arith.constant dense<0.000000e+00> : vector<16xf32>
    %504 = vector.multi_reduction <add>, %503, %cst_205 [1] : vector<16x16xf32> to vector<16xf32>
    %505 = vector.shape_cast %504 : vector<16xf32> to vector<16x1xf32>
    %cst_206 = arith.constant 1.000000e-16 : f32
    %506 = vector.broadcast %cst_206 : f32 to vector<16x1xf32>
    %507 = arith.maximumf %505, %506 : vector<16x1xf32>
    %508 = vector.broadcast %507 : vector<16x1xf32> to vector<16x16xf32>
    %509 = arith.divf %503, %508 : vector<16x16xf32>
    %510 = vector.extract_strided_slice %471 {offsets = [0, 4], sizes = [16, 4], strides = [1, 1]} : vector<16x16xf32> to vector<16x4xf32>
    %cst_207 = arith.constant dense<0.000000e+00> : vector<16x4xf32>
    %511 = tpu.matmul %509, %510, %cst_207 {dimension_numbers = #tpu.dot_dimension_numbers<[1], [0], [0], [1], [0, 0, 1, 1], [], []>} : vector<16x16xf32>, vector<16x4xf32>, vector<16x4xf32> -> vector<16x4xf32>
    %512 = arith.addf %492, %511 : vector<16x4xf32>
    %513 = vector.extract_strided_slice %461 {offsets = [0, 8], sizes = [16, 4], strides = [1, 1]} : vector<16x16xf32> to vector<16x4xf32>
    %514 = vector.extract_strided_slice %466 {offsets = [0, 8], sizes = [16, 4], strides = [1, 1]} : vector<16x16xf32> to vector<16x4xf32>
    %515 = tpu.transpose %514, [1, 0] : vector<16x4xf32> -> vector<4x16xf32>
    %cst_208 = arith.constant dense<0.000000e+00> : vector<16x16xf32>
    %516 = tpu.matmul %513, %515, %cst_208 {dimension_numbers = #tpu.dot_dimension_numbers<[1], [0], [0], [1], [0, 0, 1, 1], [], []>} : vector<16x4xf32>, vector<4x16xf32>, vector<16x16xf32> -> vector<16x16xf32>
    %517 = arith.addf %516, %5 : vector<16x16xf32>
    %cst_209 = arith.constant dense<0xFF800000> : vector<16xf32>
    %518 = vector.multi_reduction <maximumf>, %517, %cst_209 [1] : vector<16x16xf32> to vector<16xf32>
    %519 = vector.shape_cast %518 : vector<16xf32> to vector<16x1xf32>
    %520 = vector.broadcast %519 : vector<16x1xf32> to vector<16x16xf32>
    %521 = arith.subf %517, %520 : vector<16x16xf32>
    %522 = math.exp %521 : vector<16x16xf32>
    %523 = arith.mulf %522, %0 : vector<16x16xf32>
    %cst_210 = arith.constant dense<0.000000e+00> : vector<16xf32>
    %524 = vector.multi_reduction <add>, %523, %cst_210 [1] : vector<16x16xf32> to vector<16xf32>
    %525 = vector.shape_cast %524 : vector<16xf32> to vector<16x1xf32>
    %cst_211 = arith.constant 1.000000e-16 : f32
    %526 = vector.broadcast %cst_211 : f32 to vector<16x1xf32>
    %527 = arith.maximumf %525, %526 : vector<16x1xf32>
    %528 = vector.broadcast %527 : vector<16x1xf32> to vector<16x16xf32>
    %529 = arith.divf %523, %528 : vector<16x16xf32>
    %530 = vector.extract_strided_slice %471 {offsets = [0, 8], sizes = [16, 4], strides = [1, 1]} : vector<16x16xf32> to vector<16x4xf32>
    %cst_212 = arith.constant dense<0.000000e+00> : vector<16x4xf32>
    %531 = tpu.matmul %529, %530, %cst_212 {dimension_numbers = #tpu.dot_dimension_numbers<[1], [0], [0], [1], [0, 0, 1, 1], [], []>} : vector<16x16xf32>, vector<16x4xf32>, vector<16x4xf32> -> vector<16x4xf32>
    %532 = arith.addf %512, %531 : vector<16x4xf32>
    %533 = vector.extract_strided_slice %461 {offsets = [0, 12], sizes = [16, 4], strides = [1, 1]} : vector<16x16xf32> to vector<16x4xf32>
    %534 = vector.extract_strided_slice %466 {offsets = [0, 12], sizes = [16, 4], strides = [1, 1]} : vector<16x16xf32> to vector<16x4xf32>
    %535 = tpu.transpose %534, [1, 0] : vector<16x4xf32> -> vector<4x16xf32>
    %cst_213 = arith.constant dense<0.000000e+00> : vector<16x16xf32>
    %536 = tpu.matmul %533, %535, %cst_213 {dimension_numbers = #tpu.dot_dimension_numbers<[1], [0], [0], [1], [0, 0, 1, 1], [], []>} : vector<16x4xf32>, vector<4x16xf32>, vector<16x16xf32> -> vector<16x16xf32>
    %537 = arith.addf %536, %5 : vector<16x16xf32>
    %cst_214 = arith.constant dense<0xFF800000> : vector<16xf32>
    %538 = vector.multi_reduction <maximumf>, %537, %cst_214 [1] : vector<16x16xf32> to vector<16xf32>
    %539 = vector.shape_cast %538 : vector<16xf32> to vector<16x1xf32>
    %540 = vector.broadcast %539 : vector<16x1xf32> to vector<16x16xf32>
    %541 = arith.subf %537, %540 : vector<16x16xf32>
    %542 = math.exp %541 : vector<16x16xf32>
    %543 = arith.mulf %542, %0 : vector<16x16xf32>
    %cst_215 = arith.constant dense<0.000000e+00> : vector<16xf32>
    %544 = vector.multi_reduction <add>, %543, %cst_215 [1] : vector<16x16xf32> to vector<16xf32>
    %545 = vector.shape_cast %544 : vector<16xf32> to vector<16x1xf32>
    %cst_216 = arith.constant 1.000000e-16 : f32
    %546 = vector.broadcast %cst_216 : f32 to vector<16x1xf32>
    %547 = arith.maximumf %545, %546 : vector<16x1xf32>
    %548 = vector.broadcast %547 : vector<16x1xf32> to vector<16x16xf32>
    %549 = arith.divf %543, %548 : vector<16x16xf32>
    %550 = vector.extract_strided_slice %471 {offsets = [0, 12], sizes = [16, 4], strides = [1, 1]} : vector<16x16xf32> to vector<16x4xf32>
    %cst_217 = arith.constant dense<0.000000e+00> : vector<16x4xf32>
    %551 = tpu.matmul %549, %550, %cst_217 {dimension_numbers = #tpu.dot_dimension_numbers<[1], [0], [0], [1], [0, 0, 1, 1], [], []>} : vector<16x16xf32>, vector<16x4xf32>, vector<16x4xf32> -> vector<16x4xf32>
    %552 = arith.addf %532, %551 : vector<16x4xf32>
    %cst_218 = arith.constant 2.500000e-01 : f32
    %553 = vector.broadcast %cst_218 : f32 to vector<16x4xf32>
    %554 = arith.mulf %552, %553 : vector<16x4xf32>
    %c0_219 = arith.constant 0 : index
    %c0_220 = arith.constant 0 : index
    %555 = vector.load %arg41[%c0_219, %c0_220] : memref<8x4xf32, #tpu.memory_space<vmem>>, vector<8x4xf32>
    %cst_221 = arith.constant dense<0.000000e+00> : vector<16x4xf32>
    %556 = tpu.matmul %456, %555, %cst_221 {dimension_numbers = #tpu.dot_dimension_numbers<[1], [0], [0], [1], [0, 0, 1, 1], [], []>} : vector<16x8xf32>, vector<8x4xf32>, vector<16x4xf32> -> vector<16x4xf32>
    %c0_222 = arith.constant 0 : index
    %c0_223 = arith.constant 0 : index
    %557 = vector.load %arg42[%c0_222, %c0_223] : memref<1x4xf32, #tpu.memory_space<vmem>>, vector<1x4xf32>
    %558 = vector.broadcast %557 : vector<1x4xf32> to vector<16x4xf32>
    %559 = arith.addf %556, %558 : vector<16x4xf32>
    %c0_224 = arith.constant 0 : index
    %c0_225 = arith.constant 0 : index
    %560 = vector.load %arg43[%c0_224, %c0_225] : memref<1x4xf32, #tpu.memory_space<vmem>>, vector<1x4xf32>
    %561 = vector.broadcast %560 : vector<1x4xf32> to vector<16x4xf32>
    %562 = arith.mulf %554, %561 : vector<16x4xf32>
    %c0_226 = arith.constant 0 : index
    %c0_227 = arith.constant 0 : index
    %563 = vector.load %arg44[%c0_226, %c0_227] : memref<1x4xf32, #tpu.memory_space<vmem>>, vector<1x4xf32>
    %564 = vector.broadcast %563 : vector<1x4xf32> to vector<16x4xf32>
    %565 = arith.mulf %559, %564 : vector<16x4xf32>
    %566 = arith.addf %562, %565 : vector<16x4xf32>
    %cst_228 = arith.constant dense<0.000000e+00> : vector<16xf32>
    %567 = vector.multi_reduction <add>, %566, %cst_228 [1] : vector<16x4xf32> to vector<16xf32>
    %568 = vector.shape_cast %567 : vector<16xf32> to vector<16x1xf32>
    %569 = arith.negf %568 : vector<16x1xf32>
    %570 = math.exp %569 : vector<16x1xf32>
    %cst_229 = arith.constant 1.000000e+00 : f32
    %571 = vector.broadcast %cst_229 : f32 to vector<16x1xf32>
    %572 = arith.addf %571, %570 : vector<16x1xf32>
    %573 = arith.divf %571, %572 : vector<16x1xf32>
    %574 = vector.broadcast %573 : vector<16x1xf32> to vector<16x4xf32>
    %575 = arith.mulf %574, %559 : vector<16x4xf32>
    %cst_230 = arith.constant 1.000000e+00 : f32
    %576 = vector.broadcast %cst_230 : f32 to vector<16x1xf32>
    %577 = arith.subf %576, %573 : vector<16x1xf32>
    %578 = vector.broadcast %577 : vector<16x1xf32> to vector<16x4xf32>
    %579 = arith.mulf %578, %554 : vector<16x4xf32>
    %580 = arith.addf %575, %579 : vector<16x4xf32>
    %c0_231 = arith.constant 0 : index
    %c0_232 = arith.constant 0 : index
    %581 = vector.load %arg45[%c0_231, %c0_232] : memref<8x16xf32, #tpu.memory_space<vmem>>, vector<8x16xf32>
    %cst_233 = arith.constant dense<0.000000e+00> : vector<16x16xf32>
    %582 = tpu.matmul %456, %581, %cst_233 {dimension_numbers = #tpu.dot_dimension_numbers<[1], [0], [0], [1], [0, 0, 1, 1], [], []>} : vector<16x8xf32>, vector<8x16xf32>, vector<16x16xf32> -> vector<16x16xf32>
    %c0_234 = arith.constant 0 : index
    %c0_235 = arith.constant 0 : index
    %583 = vector.load %arg46[%c0_234, %c0_235] : memref<1x16xf32, #tpu.memory_space<vmem>>, vector<1x16xf32>
    %584 = vector.broadcast %583 : vector<1x16xf32> to vector<16x16xf32>
    %585 = arith.addf %582, %584 : vector<16x16xf32>
    %c0_236 = arith.constant 0 : index
    %c0_237 = arith.constant 0 : index
    %586 = vector.load %arg47[%c0_236, %c0_237] : memref<8x16xf32, #tpu.memory_space<vmem>>, vector<8x16xf32>
    %cst_238 = arith.constant dense<0.000000e+00> : vector<16x16xf32>
    %587 = tpu.matmul %456, %586, %cst_238 {dimension_numbers = #tpu.dot_dimension_numbers<[1], [0], [0], [1], [0, 0, 1, 1], [], []>} : vector<16x8xf32>, vector<8x16xf32>, vector<16x16xf32> -> vector<16x16xf32>
    %c0_239 = arith.constant 0 : index
    %c0_240 = arith.constant 0 : index
    %588 = vector.load %arg48[%c0_239, %c0_240] : memref<1x16xf32, #tpu.memory_space<vmem>>, vector<1x16xf32>
    %589 = vector.broadcast %588 : vector<1x16xf32> to vector<16x16xf32>
    %590 = arith.addf %587, %589 : vector<16x16xf32>
    %c0_241 = arith.constant 0 : index
    %c0_242 = arith.constant 0 : index
    %591 = vector.load %arg49[%c0_241, %c0_242] : memref<8x16xf32, #tpu.memory_space<vmem>>, vector<8x16xf32>
    %cst_243 = arith.constant dense<0.000000e+00> : vector<16x16xf32>
    %592 = tpu.matmul %456, %591, %cst_243 {dimension_numbers = #tpu.dot_dimension_numbers<[1], [0], [0], [1], [0, 0, 1, 1], [], []>} : vector<16x8xf32>, vector<8x16xf32>, vector<16x16xf32> -> vector<16x16xf32>
    %c0_244 = arith.constant 0 : index
    %c0_245 = arith.constant 0 : index
    %593 = vector.load %arg50[%c0_244, %c0_245] : memref<1x16xf32, #tpu.memory_space<vmem>>, vector<1x16xf32>
    %594 = vector.broadcast %593 : vector<1x16xf32> to vector<16x16xf32>
    %595 = arith.addf %592, %594 : vector<16x16xf32>
    %cst_246 = arith.constant 0.000000e+00 : f32
    %596 = vector.broadcast %cst_246 : f32 to vector<16x4xf32>
    %597 = vector.extract_strided_slice %585 {offsets = [0, 0], sizes = [16, 4], strides = [1, 1]} : vector<16x16xf32> to vector<16x4xf32>
    %598 = vector.extract_strided_slice %590 {offsets = [0, 0], sizes = [16, 4], strides = [1, 1]} : vector<16x16xf32> to vector<16x4xf32>
    %599 = tpu.transpose %598, [1, 0] : vector<16x4xf32> -> vector<4x16xf32>
    %cst_247 = arith.constant dense<0.000000e+00> : vector<16x16xf32>
    %600 = tpu.matmul %597, %599, %cst_247 {dimension_numbers = #tpu.dot_dimension_numbers<[1], [0], [0], [1], [0, 0, 1, 1], [], []>} : vector<16x4xf32>, vector<4x16xf32>, vector<16x16xf32> -> vector<16x16xf32>
    %601 = arith.addf %600, %5 : vector<16x16xf32>
    %cst_248 = arith.constant dense<0xFF800000> : vector<16xf32>
    %602 = vector.multi_reduction <maximumf>, %601, %cst_248 [1] : vector<16x16xf32> to vector<16xf32>
    %603 = vector.shape_cast %602 : vector<16xf32> to vector<16x1xf32>
    %604 = vector.broadcast %603 : vector<16x1xf32> to vector<16x16xf32>
    %605 = arith.subf %601, %604 : vector<16x16xf32>
    %606 = math.exp %605 : vector<16x16xf32>
    %607 = arith.mulf %606, %0 : vector<16x16xf32>
    %cst_249 = arith.constant dense<0.000000e+00> : vector<16xf32>
    %608 = vector.multi_reduction <add>, %607, %cst_249 [1] : vector<16x16xf32> to vector<16xf32>
    %609 = vector.shape_cast %608 : vector<16xf32> to vector<16x1xf32>
    %cst_250 = arith.constant 1.000000e-16 : f32
    %610 = vector.broadcast %cst_250 : f32 to vector<16x1xf32>
    %611 = arith.maximumf %609, %610 : vector<16x1xf32>
    %612 = vector.broadcast %611 : vector<16x1xf32> to vector<16x16xf32>
    %613 = arith.divf %607, %612 : vector<16x16xf32>
    %614 = vector.extract_strided_slice %595 {offsets = [0, 0], sizes = [16, 4], strides = [1, 1]} : vector<16x16xf32> to vector<16x4xf32>
    %cst_251 = arith.constant dense<0.000000e+00> : vector<16x4xf32>
    %615 = tpu.matmul %613, %614, %cst_251 {dimension_numbers = #tpu.dot_dimension_numbers<[1], [0], [0], [1], [0, 0, 1, 1], [], []>} : vector<16x16xf32>, vector<16x4xf32>, vector<16x4xf32> -> vector<16x4xf32>
    %616 = arith.addf %596, %615 : vector<16x4xf32>
    %617 = vector.extract_strided_slice %585 {offsets = [0, 4], sizes = [16, 4], strides = [1, 1]} : vector<16x16xf32> to vector<16x4xf32>
    %618 = vector.extract_strided_slice %590 {offsets = [0, 4], sizes = [16, 4], strides = [1, 1]} : vector<16x16xf32> to vector<16x4xf32>
    %619 = tpu.transpose %618, [1, 0] : vector<16x4xf32> -> vector<4x16xf32>
    %cst_252 = arith.constant dense<0.000000e+00> : vector<16x16xf32>
    %620 = tpu.matmul %617, %619, %cst_252 {dimension_numbers = #tpu.dot_dimension_numbers<[1], [0], [0], [1], [0, 0, 1, 1], [], []>} : vector<16x4xf32>, vector<4x16xf32>, vector<16x16xf32> -> vector<16x16xf32>
    %621 = arith.addf %620, %5 : vector<16x16xf32>
    %cst_253 = arith.constant dense<0xFF800000> : vector<16xf32>
    %622 = vector.multi_reduction <maximumf>, %621, %cst_253 [1] : vector<16x16xf32> to vector<16xf32>
    %623 = vector.shape_cast %622 : vector<16xf32> to vector<16x1xf32>
    %624 = vector.broadcast %623 : vector<16x1xf32> to vector<16x16xf32>
    %625 = arith.subf %621, %624 : vector<16x16xf32>
    %626 = math.exp %625 : vector<16x16xf32>
    %627 = arith.mulf %626, %0 : vector<16x16xf32>
    %cst_254 = arith.constant dense<0.000000e+00> : vector<16xf32>
    %628 = vector.multi_reduction <add>, %627, %cst_254 [1] : vector<16x16xf32> to vector<16xf32>
    %629 = vector.shape_cast %628 : vector<16xf32> to vector<16x1xf32>
    %cst_255 = arith.constant 1.000000e-16 : f32
    %630 = vector.broadcast %cst_255 : f32 to vector<16x1xf32>
    %631 = arith.maximumf %629, %630 : vector<16x1xf32>
    %632 = vector.broadcast %631 : vector<16x1xf32> to vector<16x16xf32>
    %633 = arith.divf %627, %632 : vector<16x16xf32>
    %634 = vector.extract_strided_slice %595 {offsets = [0, 4], sizes = [16, 4], strides = [1, 1]} : vector<16x16xf32> to vector<16x4xf32>
    %cst_256 = arith.constant dense<0.000000e+00> : vector<16x4xf32>
    %635 = tpu.matmul %633, %634, %cst_256 {dimension_numbers = #tpu.dot_dimension_numbers<[1], [0], [0], [1], [0, 0, 1, 1], [], []>} : vector<16x16xf32>, vector<16x4xf32>, vector<16x4xf32> -> vector<16x4xf32>
    %636 = arith.addf %616, %635 : vector<16x4xf32>
    %637 = vector.extract_strided_slice %585 {offsets = [0, 8], sizes = [16, 4], strides = [1, 1]} : vector<16x16xf32> to vector<16x4xf32>
    %638 = vector.extract_strided_slice %590 {offsets = [0, 8], sizes = [16, 4], strides = [1, 1]} : vector<16x16xf32> to vector<16x4xf32>
    %639 = tpu.transpose %638, [1, 0] : vector<16x4xf32> -> vector<4x16xf32>
    %cst_257 = arith.constant dense<0.000000e+00> : vector<16x16xf32>
    %640 = tpu.matmul %637, %639, %cst_257 {dimension_numbers = #tpu.dot_dimension_numbers<[1], [0], [0], [1], [0, 0, 1, 1], [], []>} : vector<16x4xf32>, vector<4x16xf32>, vector<16x16xf32> -> vector<16x16xf32>
    %641 = arith.addf %640, %5 : vector<16x16xf32>
    %cst_258 = arith.constant dense<0xFF800000> : vector<16xf32>
    %642 = vector.multi_reduction <maximumf>, %641, %cst_258 [1] : vector<16x16xf32> to vector<16xf32>
    %643 = vector.shape_cast %642 : vector<16xf32> to vector<16x1xf32>
    %644 = vector.broadcast %643 : vector<16x1xf32> to vector<16x16xf32>
    %645 = arith.subf %641, %644 : vector<16x16xf32>
    %646 = math.exp %645 : vector<16x16xf32>
    %647 = arith.mulf %646, %0 : vector<16x16xf32>
    %cst_259 = arith.constant dense<0.000000e+00> : vector<16xf32>
    %648 = vector.multi_reduction <add>, %647, %cst_259 [1] : vector<16x16xf32> to vector<16xf32>
    %649 = vector.shape_cast %648 : vector<16xf32> to vector<16x1xf32>
    %cst_260 = arith.constant 1.000000e-16 : f32
    %650 = vector.broadcast %cst_260 : f32 to vector<16x1xf32>
    %651 = arith.maximumf %649, %650 : vector<16x1xf32>
    %652 = vector.broadcast %651 : vector<16x1xf32> to vector<16x16xf32>
    %653 = arith.divf %647, %652 : vector<16x16xf32>
    %654 = vector.extract_strided_slice %595 {offsets = [0, 8], sizes = [16, 4], strides = [1, 1]} : vector<16x16xf32> to vector<16x4xf32>
    %cst_261 = arith.constant dense<0.000000e+00> : vector<16x4xf32>
    %655 = tpu.matmul %653, %654, %cst_261 {dimension_numbers = #tpu.dot_dimension_numbers<[1], [0], [0], [1], [0, 0, 1, 1], [], []>} : vector<16x16xf32>, vector<16x4xf32>, vector<16x4xf32> -> vector<16x4xf32>
    %656 = arith.addf %636, %655 : vector<16x4xf32>
    %657 = vector.extract_strided_slice %585 {offsets = [0, 12], sizes = [16, 4], strides = [1, 1]} : vector<16x16xf32> to vector<16x4xf32>
    %658 = vector.extract_strided_slice %590 {offsets = [0, 12], sizes = [16, 4], strides = [1, 1]} : vector<16x16xf32> to vector<16x4xf32>
    %659 = tpu.transpose %658, [1, 0] : vector<16x4xf32> -> vector<4x16xf32>
    %cst_262 = arith.constant dense<0.000000e+00> : vector<16x16xf32>
    %660 = tpu.matmul %657, %659, %cst_262 {dimension_numbers = #tpu.dot_dimension_numbers<[1], [0], [0], [1], [0, 0, 1, 1], [], []>} : vector<16x4xf32>, vector<4x16xf32>, vector<16x16xf32> -> vector<16x16xf32>
    %661 = arith.addf %660, %5 : vector<16x16xf32>
    %cst_263 = arith.constant dense<0xFF800000> : vector<16xf32>
    %662 = vector.multi_reduction <maximumf>, %661, %cst_263 [1] : vector<16x16xf32> to vector<16xf32>
    %663 = vector.shape_cast %662 : vector<16xf32> to vector<16x1xf32>
    %664 = vector.broadcast %663 : vector<16x1xf32> to vector<16x16xf32>
    %665 = arith.subf %661, %664 : vector<16x16xf32>
    %666 = math.exp %665 : vector<16x16xf32>
    %667 = arith.mulf %666, %0 : vector<16x16xf32>
    %cst_264 = arith.constant dense<0.000000e+00> : vector<16xf32>
    %668 = vector.multi_reduction <add>, %667, %cst_264 [1] : vector<16x16xf32> to vector<16xf32>
    %669 = vector.shape_cast %668 : vector<16xf32> to vector<16x1xf32>
    %cst_265 = arith.constant 1.000000e-16 : f32
    %670 = vector.broadcast %cst_265 : f32 to vector<16x1xf32>
    %671 = arith.maximumf %669, %670 : vector<16x1xf32>
    %672 = vector.broadcast %671 : vector<16x1xf32> to vector<16x16xf32>
    %673 = arith.divf %667, %672 : vector<16x16xf32>
    %674 = vector.extract_strided_slice %595 {offsets = [0, 12], sizes = [16, 4], strides = [1, 1]} : vector<16x16xf32> to vector<16x4xf32>
    %cst_266 = arith.constant dense<0.000000e+00> : vector<16x4xf32>
    %675 = tpu.matmul %673, %674, %cst_266 {dimension_numbers = #tpu.dot_dimension_numbers<[1], [0], [0], [1], [0, 0, 1, 1], [], []>} : vector<16x16xf32>, vector<16x4xf32>, vector<16x4xf32> -> vector<16x4xf32>
    %676 = arith.addf %656, %675 : vector<16x4xf32>
    %cst_267 = arith.constant 2.500000e-01 : f32
    %677 = vector.broadcast %cst_267 : f32 to vector<16x4xf32>
    %678 = arith.mulf %676, %677 : vector<16x4xf32>
    %c0_268 = arith.constant 0 : index
    %c0_269 = arith.constant 0 : index
    %679 = vector.load %arg51[%c0_268, %c0_269] : memref<8x4xf32, #tpu.memory_space<vmem>>, vector<8x4xf32>
    %cst_270 = arith.constant dense<0.000000e+00> : vector<16x4xf32>
    %680 = tpu.matmul %456, %679, %cst_270 {dimension_numbers = #tpu.dot_dimension_numbers<[1], [0], [0], [1], [0, 0, 1, 1], [], []>} : vector<16x8xf32>, vector<8x4xf32>, vector<16x4xf32> -> vector<16x4xf32>
    %c0_271 = arith.constant 0 : index
    %c0_272 = arith.constant 0 : index
    %681 = vector.load %arg52[%c0_271, %c0_272] : memref<1x4xf32, #tpu.memory_space<vmem>>, vector<1x4xf32>
    %682 = vector.broadcast %681 : vector<1x4xf32> to vector<16x4xf32>
    %683 = arith.addf %680, %682 : vector<16x4xf32>
    %c0_273 = arith.constant 0 : index
    %c0_274 = arith.constant 0 : index
    %684 = vector.load %arg53[%c0_273, %c0_274] : memref<1x4xf32, #tpu.memory_space<vmem>>, vector<1x4xf32>
    %685 = vector.broadcast %684 : vector<1x4xf32> to vector<16x4xf32>
    %686 = arith.mulf %678, %685 : vector<16x4xf32>
    %c0_275 = arith.constant 0 : index
    %c0_276 = arith.constant 0 : index
    %687 = vector.load %arg54[%c0_275, %c0_276] : memref<1x4xf32, #tpu.memory_space<vmem>>, vector<1x4xf32>
    %688 = vector.broadcast %687 : vector<1x4xf32> to vector<16x4xf32>
    %689 = arith.mulf %683, %688 : vector<16x4xf32>
    %690 = arith.addf %686, %689 : vector<16x4xf32>
    %cst_277 = arith.constant dense<0.000000e+00> : vector<16xf32>
    %691 = vector.multi_reduction <add>, %690, %cst_277 [1] : vector<16x4xf32> to vector<16xf32>
    %692 = vector.shape_cast %691 : vector<16xf32> to vector<16x1xf32>
    %693 = arith.negf %692 : vector<16x1xf32>
    %694 = math.exp %693 : vector<16x1xf32>
    %cst_278 = arith.constant 1.000000e+00 : f32
    %695 = vector.broadcast %cst_278 : f32 to vector<16x1xf32>
    %696 = arith.addf %695, %694 : vector<16x1xf32>
    %697 = arith.divf %695, %696 : vector<16x1xf32>
    %698 = vector.broadcast %697 : vector<16x1xf32> to vector<16x4xf32>
    %699 = arith.mulf %698, %683 : vector<16x4xf32>
    %cst_279 = arith.constant 1.000000e+00 : f32
    %700 = vector.broadcast %cst_279 : f32 to vector<16x1xf32>
    %701 = arith.subf %700, %697 : vector<16x1xf32>
    %702 = vector.broadcast %701 : vector<16x1xf32> to vector<16x4xf32>
    %703 = arith.mulf %702, %678 : vector<16x4xf32>
    %704 = arith.addf %699, %703 : vector<16x4xf32>
    %c0_280 = arith.constant 0 : index
    %c0_281 = arith.constant 0 : index
    %705 = vector.load %arg68[%c0_280, %c0_281] : memref<16x4xf32, #tpu.memory_space<vmem>>, vector<16x4xf32>
    tpu.vector_store %arg68[%c0_280, %c0_281], %580 {strides = array<i32>} : memref<16x4xf32, #tpu.memory_space<vmem>>, vector<16x4xf32>,
    %c0_282 = arith.constant 0 : index
    %c0_283 = arith.constant 0 : index
    %706 = vector.load %arg69[%c0_282, %c0_283] : memref<16x4xf32, #tpu.memory_space<vmem>>, vector<16x4xf32>
    tpu.vector_store %arg69[%c0_282, %c0_283], %704 {strides = array<i32>} : memref<16x4xf32, #tpu.memory_space<vmem>>, vector<16x4xf32>,
    %c0_284 = arith.constant 0 : index
    %c0_285 = arith.constant 0 : index
    %707 = vector.load %arg2[%c0_284, %c0_285] : memref<16x4xf32, #tpu.memory_space<vmem>>, vector<16x4xf32>
    %708 = math.exp %704 : vector<16x4xf32>
    %709 = arith.mulf %707, %708 : vector<16x4xf32>
    %710 = arith.addf %709, %580 : vector<16x4xf32>
    %c0_286 = arith.constant 0 : index
    %c0_287 = arith.constant 0 : index
    %711 = vector.load %arg3[%c0_286, %c0_287] : memref<56x16xf32, #tpu.memory_space<vmem>>, vector<56x16xf32>
    %cst_288 = arith.constant dense<0.000000e+00> : vector<56x4xf32>
    %712 = tpu.matmul %711, %710, %cst_288 {dimension_numbers = #tpu.dot_dimension_numbers<[1], [0], [0], [1], [0, 0, 1, 1], [], []>} : vector<56x16xf32>, vector<16x4xf32>, vector<56x4xf32> -> vector<56x4xf32>
    %c0_289 = arith.constant 0 : index
    %c0_290 = arith.constant 0 : index
    %713 = vector.load %arg4[%c0_289, %c0_290] : memref<56x16xf32, #tpu.memory_space<vmem>>, vector<56x16xf32>
    %cst_291 = arith.constant dense<0.000000e+00> : vector<56x4xf32>
    %714 = tpu.matmul %713, %710, %cst_291 {dimension_numbers = #tpu.dot_dimension_numbers<[1], [0], [0], [1], [0, 0, 1, 1], [], []>} : vector<56x16xf32>, vector<16x4xf32>, vector<56x4xf32> -> vector<56x4xf32>
    %c0_292 = arith.constant 0 : index
    %c0_293 = arith.constant 0 : index
    %715 = vector.load %arg61[%c0_292, %c0_293] : memref<4x32xf32, #tpu.memory_space<vmem>>, vector<4x32xf32>
    %cst_294 = arith.constant dense<0.000000e+00> : vector<56x32xf32>
    %716 = tpu.matmul %712, %715, %cst_294 {dimension_numbers = #tpu.dot_dimension_numbers<[1], [0], [0], [1], [0, 0, 1, 1], [], []>} : vector<56x4xf32>, vector<4x32xf32>, vector<56x32xf32> -> vector<56x32xf32>
    %c0_295 = arith.constant 0 : index
    %c0_296 = arith.constant 0 : index
    %717 = vector.load %arg62[%c0_295, %c0_296] : memref<4x32xf32, #tpu.memory_space<vmem>>, vector<4x32xf32>
    %cst_297 = arith.constant dense<0.000000e+00> : vector<56x32xf32>
    %718 = tpu.matmul %714, %717, %cst_297 {dimension_numbers = #tpu.dot_dimension_numbers<[1], [0], [0], [1], [0, 0, 1, 1], [], []>} : vector<56x4xf32>, vector<4x32xf32>, vector<56x32xf32> -> vector<56x32xf32>
    %719 = arith.addf %716, %718 : vector<56x32xf32>
    %c0_298 = arith.constant 0 : index
    %c0_299 = arith.constant 0 : index
    %720 = vector.load %arg63[%c0_298, %c0_299] : memref<1x32xf32, #tpu.memory_space<vmem>>, vector<1x32xf32>
    %721 = vector.broadcast %720 : vector<1x32xf32> to vector<56x32xf32>
    %722 = arith.addf %719, %721 : vector<56x32xf32>
    %cst_300 = arith.constant 0.000000e+00 : f32
    %723 = vector.broadcast %cst_300 : f32 to vector<56x32xf32>
    %724 = arith.maximumf %722, %723 : vector<56x32xf32>
    %cst_301 = arith.constant dense<0.000000e+00> : vector<32xf32>
    %725 = vector.multi_reduction <add>, %724, %cst_301 [0] : vector<56x32xf32> to vector<32xf32>
    %726 = vector.shape_cast %725 : vector<32xf32> to vector<1x32xf32>
    %cst_302 = arith.constant 5.600000e+01 : f32
    %727 = vector.broadcast %cst_302 : f32 to vector<1x32xf32>
    %728 = arith.divf %726, %727 : vector<1x32xf32>
    %729 = vector.broadcast %728 : vector<1x32xf32> to vector<56x32xf32>
    %730 = arith.subf %724, %729 : vector<56x32xf32>
    %731 = arith.mulf %730, %730 : vector<56x32xf32>
    %cst_303 = arith.constant dense<0.000000e+00> : vector<32xf32>
    %732 = vector.multi_reduction <add>, %731, %cst_303 [0] : vector<56x32xf32> to vector<32xf32>
    %733 = vector.shape_cast %732 : vector<32xf32> to vector<1x32xf32>
    %cst_304 = arith.constant 5.600000e+01 : f32
    %734 = vector.broadcast %cst_304 : f32 to vector<1x32xf32>
    %735 = arith.divf %733, %734 : vector<1x32xf32>
    %736 = vector.broadcast %728 : vector<1x32xf32> to vector<56x32xf32>
    %737 = arith.subf %724, %736 : vector<56x32xf32>
    %cst_305 = arith.constant 9.99999974E-6 : f32
    %738 = vector.broadcast %cst_305 : f32 to vector<1x32xf32>
    %739 = arith.addf %735, %738 : vector<1x32xf32>
    %740 = math.rsqrt %739 : vector<1x32xf32>
    %741 = vector.broadcast %740 : vector<1x32xf32> to vector<56x32xf32>
    %742 = arith.mulf %737, %741 : vector<56x32xf32>
    %c0_306 = arith.constant 0 : index
    %c0_307 = arith.constant 0 : index
    %743 = vector.load %arg64[%c0_306, %c0_307] : memref<1x32xf32, #tpu.memory_space<vmem>>, vector<1x32xf32>
    %744 = vector.broadcast %743 : vector<1x32xf32> to vector<56x32xf32>
    %745 = arith.mulf %742, %744 : vector<56x32xf32>
    %c0_308 = arith.constant 0 : index
    %c0_309 = arith.constant 0 : index
    %746 = vector.load %arg65[%c0_308, %c0_309] : memref<1x32xf32, #tpu.memory_space<vmem>>, vector<1x32xf32>
    %747 = vector.broadcast %746 : vector<1x32xf32> to vector<56x32xf32>
    %748 = arith.addf %745, %747 : vector<56x32xf32>
    %c0_310 = arith.constant 0 : index
    %c0_311 = arith.constant 0 : index
    %749 = vector.load %arg66[%c0_310, %c0_311] : memref<1x32xf32, #tpu.memory_space<vmem>>, vector<1x32xf32>
    %750 = vector.broadcast %749 : vector<1x32xf32> to vector<56x32xf32>
    %751 = arith.mulf %748, %750 : vector<56x32xf32>
    %cst_312 = arith.constant dense<0.000000e+00> : vector<56xf32>
    %752 = vector.multi_reduction <add>, %751, %cst_312 [1] : vector<56x32xf32> to vector<56xf32>
    %753 = vector.shape_cast %752 : vector<56xf32> to vector<56x1xf32>
    %c0_313 = arith.constant 0 : index
    %c0_314 = arith.constant 0 : index
    %754 = vector.load %arg67[%c0_313, %c0_314] : memref<1x1xf32, #tpu.memory_space<vmem>>, vector<1x1xf32>
    %755 = vector.broadcast %754 : vector<1x1xf32> to vector<56x1xf32>
    %756 = arith.addf %753, %755 : vector<56x1xf32>
    %c0_315 = arith.constant 0 : index
    %c0_316 = arith.constant 0 : index
    %757 = vector.load %arg70[%c0_315, %c0_316] : memref<56x1xf32, #tpu.memory_space<vmem>>, vector<56x1xf32>
    tpu.vector_store %arg70[%c0_315, %c0_316], %756 {strides = array<i32>} : memref<56x1xf32, #tpu.memory_space<vmem>>, vector<56x1xf32>,
    return
  }
}

</mosaic_0001>

<bundles_post_ra>
// kernel: tpu_custom_call.1
= control target key start
LH: loop header
LB: loop body
LE: loop exit
PB: predicated region body
PF: predicated region fallthrough
CT: control target
= control target key end

     0   :  { %s6124_s6 = smov 1   ;;  %s6125_s10 = smov 2   ;;  %s7766_s0 = inlined_call_operand.smem [shape: u32[71], index: -1, kind: input, shape index: {}] }
   0x1   :  { %s6241_s5 = sld [smem:[%s7766_s0]]   ;;  %s6126_s14 = smov 3  }
   0x2   :  { %s6246_s9 = sld [smem:[%s7766_s0 + %s6124_s6]]   ;;  %s6127_s18 = smov 4  }
   0x3   :  { %s6251_s13 = sld [smem:[%s7766_s0 + %s6125_s10]]   ;;  %s6128_s22 = smov 5  }
   0x4   :  { %s6256_s17 = sld [smem:[%s7766_s0 + %s6126_s14]]   ;;  %s6129_s26 = smov 6  }
   0x5   :  { %s6261_s21 = sld [smem:[%s7766_s0 + %s6127_s18]]   ;;  %s6130_s30 = smov 7  }
   0x6   :  { %s6266_s25 = sld [smem:[%s7766_s0 + %s6128_s22]]   ;;  %s6131_s4 = smov 8  }
   0x7   :  { %7793 = sst [smem:[#allocation58_spill]] %s6241_s5  ;;  %s6132_s10 = smov 9  }
   0x8   :  { %7794 = sst [smem:[#allocation59_spill]] %s6246_s9  ;;  %s6133_s15 = smov 10  }
   0x9   :  { %7795 = sst [smem:[#allocation60_spill]] %s6251_s13  ;;  %s6134_s20 = smov 11  }
   0xa   :  { %7796 = sst [smem:[#allocation61_spill]] %s6256_s17  ;;  %s6136_s1 = smov 13  }
   0xb   :  { %7797 = sst [smem:[#allocation62_spill]] %s6261_s21  ;;  %s6137_s7 = smov 14  }
   0xc   :  { %7798 = sst [smem:[#allocation63_spill]] %s6266_s25  ;;  %s6139_s22 = smov 16  }
   0xd   :  { %s6271_s29 = sld [smem:[%s7766_s0 + %s6129_s26]]   ;;  %s6135_s26 = smov 12  }
   0xe   :  { %s6276_s3 = sld [smem:[%s7766_s0 + %s6130_s30]]   ;;  %s6140_s28 = smov 17  }
   0xf   :  { %s6281_s8 = sld [smem:[%s7766_s0 + %s6131_s4]]   ;;  %s6191_s23 = smov 68  }
  0x10   :  { %s6286_s14 = sld [smem:[%s7766_s0 + %s6132_s10]]   ;;  %s6193_s10 = smov 70  }
  0x11   :  { %s6291_s19 = sld [smem:[%s7766_s0 + %s6133_s15]]   ;;  %s6138_s15 = smov 15  }
  0x12   :  { %s6296_s24 = sld [smem:[%s7766_s0 + %s6134_s20]]  }
  0x13   :  { %7799 = sst [smem:[#allocation64_spill]] %s6271_s29 }
  0x14   :  { %7800 = sst [smem:[#allocation65_spill]] %s6276_s3 }
  0x15   :  { %7801 = sst [smem:[#allocation66_spill]] %s6281_s8 }
  0x16   :  { %7802 = sst [smem:[#allocation67_spill]] %s6286_s14 }
  0x17   :  { %s6301_s30 = sld [smem:[%s7766_s0 + %s6135_s26]]  }
  0x18   :  { %7803 = sst [smem:[#allocation68_spill]] %s6296_s24 }
  0x19   :  { %s6306_s6 = sld [smem:[%s7766_s0 + %s6136_s1]]   ;;  %s6192_s1 = smov 69  }
  0x1a   :  { %s6311_s12 = sld [smem:[%s7766_s0 + %s6137_s7]]   ;;  %s6141_s7 = smov 18  }
  0x1b   :  { %s6316_s20 = sld [smem:[%s7766_s0 + %s6138_s15]]   ;;  %s6142_s15 = smov 19  }
  0x1c   :  { %s6321_s27 = sld [smem:[%s7766_s0 + %s6139_s22]]   ;;  %s6143_s22 = smov 20  }
  0x1d   :  { %s6326_s4 = sld [smem:[%s7766_s0 + %s6140_s28]]   ;;  %s6144_s28 = smov 21  }
  0x1e   :  { %s6331_s21 = sld [smem:[%s7766_s0 + %s6141_s7]]   ;;  %s6145_s7 = smov 22  }
  0x1f   :  { %7804 = sst [smem:[#allocation69_spill]] %s6306_s6 }
  0x20   :  { %s6336_s17 = sld [smem:[%s7766_s0 + %s6142_s15]]   ;;  %s6146_s15 = smov 23  }
  0x21   :  { %7805 = sst [smem:[#allocation70_spill]] %s6316_s20 }
  0x22   :  { %7806 = sst [smem:[#allocation71_spill]] %s6321_s27 }
  0x23   :  { %7807 = sst [smem:[#allocation72_spill]] %s6326_s4 }
  0x24   :  { %s6341_s13 = sld [smem:[%s7766_s0 + %s6143_s22]]   ;;  %s6147_s22 = smov 24  }
  0x25   :  { %s6346_s4 = sld [smem:[%s7766_s0 + %s6144_s28]]   ;;  %s6148_s28 = smov 25  }
  0x26   :  { %7808 = sst [smem:[#allocation73_spill]] %s6336_s17 }
  0x27   :  { %s6351_s20 = sld [smem:[%s7766_s0 + %s6145_s7]]   ;;  %s6149_s7 = smov 26  }
  0x28   :  { %s6356_s17 = sld [smem:[%s7766_s0 + %s6146_s15]]   ;;  %s6150_s15 = smov 27  }
  0x29   :  { %s6361_s24 = sld [smem:[%s7766_s0 + %s6147_s22]]   ;;  %s6151_s22 = smov 28  }
  0x2a   :  { %7809 = sst [smem:[#allocation74_spill]] %s6341_s13 }
  0x2b   :  { %7810 = sst [smem:[#allocation75_spill]] %s6346_s4 }
  0x2c   :  { %s6366_s4 = sld [smem:[%s7766_s0 + %s6148_s28]]   ;;  %s6152_s28 = smov 29  }
  0x2d   :  { %s6371_s9 = sld [smem:[%s7766_s0 + %s6149_s7]]   ;;  %s6153_s7 = smov 30  }
  0x2e   :  { %7811 = sst [smem:[#allocation76_spill]] %s6356_s17 }
  0x2f   :  { %s6376_s14 = sld [smem:[%s7766_s0 + %s6150_s15]]   ;;  %s6154_s15 = smov 31  }
  0x30   :  { %s6381_s8 = sld [smem:[%s7766_s0 + %s6151_s22]]   ;;  %s6155_s22 = smov 32  }
  0x31   :  { %s6391_s29 = sld [smem:[%s7766_s0 + %s6153_s7]]   ;;  %s6157_s7 = smov 34  }
  0x32   :  { %7812 = sst [smem:[#allocation77_spill]] %s6366_s4 }
  0x33   :  { %7813 = sst [smem:[#allocation78_spill]] %s6371_s9 }
  0x34   :  { %s6386_s4 = sld [smem:[%s7766_s0 + %s6152_s28]]   ;;  %s6156_s28 = smov 33  }
  0x35   :  { %7814 = sst [smem:[#allocation79_spill]] %s6376_s14 }
  0x36   :  { %s6396_s14 = sld [smem:[%s7766_s0 + %s6154_s15]]   ;;  %s6158_s15 = smov 35  }
  0x37   :  { %7816 = sst [smem:[#allocation81_spill]] %s6391_s29 }
  0x38   :  { %s6401_s25 = sld [smem:[%s7766_s0 + %s6155_s22]]   ;;  %s6159_s22 = smov 36  }
  0x39   :  { %s6411_s5 = sld [smem:[%s7766_s0 + %s6157_s7]]   ;;  %s6161_s7 = smov 38  }
  0x3a   :  { %7815 = sst [smem:[#allocation80_spill]] %s6386_s4 }
  0x3b   :  { %s6406_s4 = sld [smem:[%s7766_s0 + %s6156_s28]]   ;;  %s6160_s28 = smov 37  }
  0x3c   :  { %7817 = sst [smem:[#allocation82_spill]] %s6396_s14 }
  0x3d   :  { %s6416_s14 = sld [smem:[%s7766_s0 + %s6158_s15]]   ;;  %s6162_s15 = smov 39  }
  0x3e   :  { %s6421_s3 = sld [smem:[%s7766_s0 + %s6159_s22]]   ;;  %s6163_s22 = smov 40  }
  0x3f   :  { %s6431_s29 = sld [smem:[%s7766_s0 + %s6161_s7]]   ;;  %s6165_s7 = smov 42  }
  0x40   :  { %s6451_s9 = sld [smem:[%s7766_s0 + %s6165_s7]]   ;;  %s6169_s7 = smov 46  }
  0x41   :  { %7818 = sst [smem:[#allocation83_spill]] %s6406_s4 }
  0x42   :  { %s6426_s4 = sld [smem:[%s7766_s0 + %s6160_s28]]   ;;  %s6164_s28 = smov 41  }
  0x43   :  { %7819 = sst [smem:[#allocation84_spill]] %s6416_s14 }
  0x44   :  { %7820 = sst [smem:[#allocation85_spill]] %s6421_s3 }
  0x45   :  { %s6436_s14 = sld [smem:[%s7766_s0 + %s6162_s15]]   ;;  %s6166_s15 = smov 43  }
  0x46   :  { %s6441_s3 = sld [smem:[%s7766_s0 + %s6163_s22]]   ;;  %s6167_s22 = smov 44  }
  0x47   :  { %s6471_s17 = sld [smem:[%s7766_s0 + %s6169_s7]]   ;;  %s6173_s7 = smov 50  }
  0x48   :  { %7821 = sst [smem:[#allocation86_spill]] %s6426_s4 }
  0x49   :  { %s6446_s4 = sld [smem:[%s7766_s0 + %s6164_s28]]   ;;  %s6168_s28 = smov 45  }
  0x4a   :  { %s6584_s6 = sld [smem:[%s7766_s0 + %s6192_s1]]  }
  0x4b   :  { %7822 = sst [smem:[#allocation87_spill]] %s6436_s14 }
  0x4c   :  { %7823 = sst [smem:[#allocation88_spill]] %s6441_s3 }
  0x4d   :  { %s6456_s14 = sld [smem:[%s7766_s0 + %s6166_s15]]   ;;  %s6170_s15 = smov 47  }
  0x4e   :  { %s6461_s3 = sld [smem:[%s7766_s0 + %s6167_s22]]   ;;  %s6171_s22 = smov 48  }
  0x4f   :  { %7824 = sst [smem:[#allocation89_spill]] %s6446_s4 }
  0x50   :  { %s6466_s4 = sld [smem:[%s7766_s0 + %s6168_s28]]   ;;  %s6172_s28 = smov 49  }
  0x51   :  { %7827 = sst [smem:[#allocation92_spill]] %s6471_s17 }
  0x52   :  { %s6481_s13 = sld [smem:[%s7766_s0 + %s6171_s22]]   ;;  %s6175_s22 = smov 52  }
  0x53   :  { %7825 = sst [smem:[#allocation90_spill]] %s6456_s14 }
  0x54   :  { %s6476_s14 = sld [smem:[%s7766_s0 + %s6170_s15]]   ;;  %s6174_s15 = smov 51  }
  0x55   :  { %s6491_s17 = sld [smem:[%s7766_s0 + %s6173_s7]]   ;;  %s6177_s7 = smov 54  }
  0x56   :  { %7826 = sst [smem:[#allocation91_spill]] %s6466_s4 }
  0x57   :  { %s6486_s4 = sld [smem:[%s7766_s0 + %s6172_s28]]   ;;  %s6176_s28 = smov 53  }
  0x58   :  { %7829 = sst [smem:[#allocation94_spill]] %s6481_s13 }
  0x59   :  { %s6501_s13 = sld [smem:[%s7766_s0 + %s6175_s22]]   ;;  %s6179_s22 = smov 56  }
  0x5a   :  { %7828 = sst [smem:[#allocation93_spill]] %s6476_s14 }
  0x5b   :  { %7831 = sst [smem:[#allocation96_spill]] %s6491_s17 }
  0x5c   :  { %s6496_s14 = sld [smem:[%s7766_s0 + %s6174_s15]]   ;;  %s6178_s15 = smov 55  }
  0x5d   :  { %7830 = sst [smem:[#allocation95_spill]] %s6486_s4 }
  0x5e   :  { %s6506_s4 = sld [smem:[%s7766_s0 + %s6176_s28]]   ;;  %s6180_s28 = smov 57  }
  0x5f   :  { %7833 = sst [smem:[#allocation98_spill]] %s6501_s13 }
  0x60   :  { %s6511_s17 = sld [smem:[%s7766_s0 + %s6177_s7]]   ;;  %s6181_s7 = smov 58  }
  0x61   :  { %s6521_s13 = sld [smem:[%s7766_s0 + %s6179_s22]]   ;;  %s6183_s22 = smov 60  }
  0x62   :  { %7832 = sst [smem:[#allocation97_spill]] %s6496_s14 }
  0x63   :  { %s6516_s14 = sld [smem:[%s7766_s0 + %s6178_s15]]   ;;  %s6182_s15 = smov 59  }
  0x64   :  { %7834 = sst [smem:[#allocation99_spill]] %s6506_s4 }
  0x65   :  { %s6526_s4 = sld [smem:[%s7766_s0 + %s6180_s28]]   ;;  %s6184_s28 = smov 61  }
  0x66   :  { %7835 = sst [smem:[#allocation100_spill]] %s6511_s17 }
  0x67   :  { %7837 = sst [smem:[#allocation102_spill]] %s6521_s13 }
  0x68   :  { %s6531_s17 = sld [smem:[%s7766_s0 + %s6181_s7]]   ;;  %s6185_s7 = smov 62  }
  0x69   :  { %7836 = sst [smem:[#allocation101_spill]] %s6516_s14 }
  0x6a   :  { %s6536_s14 = sld [smem:[%s7766_s0 + %s6182_s15]]   ;;  %s6186_s15 = smov 63  }
  0x6b   :  { %7838 = sst [smem:[#allocation103_spill]] %s6526_s4 }
  0x6c   :  { %s6541_s13 = sld [smem:[%s7766_s0 + %s6183_s22]]   ;;  %s6187_s22 = smov 64  }
  0x6d   :  { %s6546_s4 = sld [smem:[%s7766_s0 + %s6184_s28]]   ;;  %s6188_s28 = smov 65  }
  0x6e   :  { %7839 = sst [smem:[#allocation104_spill]] %s6531_s17 }
  0x6f   :  { %s6551_s17 = sld [smem:[%s7766_s0 + %s6185_s7]]   ;;  %s6189_s7 = smov 66  }
  0x70   :  { %7840 = sst [smem:[#allocation105_spill]] %s6536_s14 }
  0x71   :  { %s6556_s14 = sld [smem:[%s7766_s0 + %s6186_s15]]   ;;  %s6190_s15 = smov 67  }
  0x72   :  { %7841 = sst [smem:[#allocation106_spill]] %s6541_s13 }
  0x73   :  { %7842 = sst [smem:[#allocation107_spill]] %s6546_s4 }
  0x74   :  { %s6561_s13 = sld [smem:[%s7766_s0 + %s6187_s22]]  }
  0x75   :  { %7843 = sst [smem:[#allocation108_spill]] %s6551_s17 }
  0x76   :  { %s6566_s4 = sld [smem:[%s7766_s0 + %s6188_s28]]  }
  0x77   :  { %s6571_s17 = sld [smem:[%s7766_s0 + %s6189_s7]]  }
  0x78   :  { %s4797_s27 = sld [smem:[%s7766_s0 + %s6190_s15]]  }
  0x7a   :  { %7844 = sst [smem:[#allocation109_spill]] %s6561_s13 }
  0x7b   :  { %s6579_s13 = sld [smem:[%s7766_s0 + %s6191_s23]]  }
  0x7d   :  { %7845 = sst [smem:[#allocation110_spill]] %s6571_s17 }
  0x7e   :  { %s6589_s17 = sld [smem:[%s7766_s0 + %s6193_s10]]   ;;  %v147_v0 = vstv %s4797_s27 }
  0x7f   :  { %148 = vst [vmem:[#allocation2] sm:$0x1] %v147_v0 }
  0x80   :  { %149 = vsyncpa [#allocation4], 0 }
  0x81   :  { %150 = vsyncpa [#allocation6], 0 }
  0x82   :  { %151 = vsyncpa [#allocation9], 0 }
  0x83   :  { %152 = vsyncpa [#allocation12], 0 }
  0x84   :  { %153 = vsyncpa [#allocation15], 0 }
  0x85   :  { %154 = vsyncpa [#allocation18], 0 }
  0x86   :  { %155 = vsyncpa [#allocation21], 0 }
  0x87   :  { %156 = vsyncpa [#allocation24], 0 }
  0x88   :  { %157 = vsyncpa [#allocation27], 0 }
  0x89   :  { %158 = vsyncpa [#allocation30], 0 }
  0x8a   :  { %159 = vsyncpa [#allocation33], 0 }
  0x8b   :  { %160 = vsyncpa [#allocation36], 0 }
  0x8c   :  { %161 = vsyncpa [#allocation39], 0  ;;  %s201_s15 = sshll.u32 %s6301_s30, 4  ;;  %s202_s15 = int_to_ptr.hbm [resolvable:$true] %s201_s15 }
  0x8d   :  { %162 = vsyncpa [#allocation42], 0  ;;  %s6194_s0 = smov [#allocation5]   ;;  %s223_s16 = sshll.u32 %s6311_s12, 4  ;;  %s224_s16 = int_to_ptr.hbm [resolvable:$true] %s223_s16 }
  0x8e   :  { %s203_s27 = sshll.u32 %s6194_s0, 4  ;;  %s5448_s18 = sshra.s32 %s202_s15, 4  ;;  %s204_s27 = int_to_ptr.vmem [resolvable:$true] %s203_s27  ;;  %s5449_s18 = int_to_ptr.hbm [resolvable:$true] %s5448_s18 }
  0x8f   :  { %s5450_s23 = scalar_lea.hbm %s5449_s18, 1  ;;  %s5452_s22 = scalar_lea.hbm %s6301_s30, 1 }
  0x90   :  { %p5451_p0 = scmp.ne.s32.totalorder %s5449_s18, %s5450_s23  ;;  %p5453_p1 = scmp.lt.s32.totalorder %s5449_s18, %s6301_s30 }
  0x91   :  { %p5454_p2 = scmp.lt.s32.totalorder %s5452_s22, %s5450_s23 }
  0x93   :  { %p5455_p3 = por %p5454_p2, %p5453_p1 }
  0x95   :  { %p5456_p4 = pnand %p5455_p3, %p5451_p0 }
  0x97   :  { %5459 = shalt.err (!%p5456_p4)
}
  0x98   :  { %206 = dma.hbm_to_vmem [thread:$0]  %s202_s15, 16, %s204_s27, [#allocation6]  }
  0x99   :  { %s6195_s26 = smov [#allocation8]   ;;  %s249_s28 = sshll.u32 %s6331_s21, 4  ;;  %s250_s28 = int_to_ptr.hbm [resolvable:$true] %s249_s28 }
  0x9a   :  { %s225_s1 = sshll.u32 %s6195_s26, 4  ;;  %s5472_s2 = sshra.s32 %s224_s16, 4  ;;  %s226_s1 = int_to_ptr.vmem [resolvable:$true] %s225_s1  ;;  %s5473_s2 = int_to_ptr.hbm [resolvable:$true] %s5472_s2 }
  0x9b   :  { %s5474_s10 = scalar_lea.hbm %s5473_s2, 1  ;;  %s5476_s7 = scalar_lea.hbm %s6311_s12, 1 }
  0x9c   :  { %p5475_p5 = scmp.ne.s32.totalorder %s5473_s2, %s5474_s10  ;;  %p5477_p6 = scmp.lt.s32.totalorder %s5473_s2, %s6311_s12 }
  0x9d   :  { %p5478_p7 = scmp.lt.s32.totalorder %s5476_s7, %s5474_s10 }
  0x9f   :  { %p5479_p8 = por %p5478_p7, %p5477_p6 }
  0xa1   :  { %p5480_p9 = pnand %p5479_p8, %p5475_p5 }
  0xa3   :  { %5483 = shalt.err (!%p5480_p9)
}
  0xa4   :  { %228 = dma.hbm_to_vmem [thread:$0]  %s224_s16, 16, %s226_s1, [#allocation9]  }
  0xa5   :  { %s275_s30 = sshll.u32 %s6351_s20, 4  ;;  %s6196_s11 = smov [#allocation11]   ;;  %s276_s30 = int_to_ptr.hbm [resolvable:$true] %s275_s30 }
  0xa6   :  { %s251_s15 = sshll.u32 %s6196_s11, 4  ;;  %s5496_s0 = sshra.s32 %s250_s28, 4  ;;  %s252_s15 = int_to_ptr.vmem [resolvable:$true] %s251_s15  ;;  %s5497_s0 = int_to_ptr.hbm [resolvable:$true] %s5496_s0 }
  0xa7   :  { %s5498_s27 = scalar_lea.hbm %s5497_s0, 1  ;;  %s5500_s18 = scalar_lea.hbm %s6331_s21, 1 }
  0xa8   :  { %p5499_p10 = scmp.ne.s32.totalorder %s5497_s0, %s5498_s27  ;;  %p5501_p11 = scmp.lt.s32.totalorder %s5497_s0, %s6331_s21 }
  0xa9   :  { %p5502_p12 = scmp.lt.s32.totalorder %s5500_s18, %s5498_s27 }
  0xab   :  { %p5503_p13 = por %p5502_p12, %p5501_p11 }
  0xad   :  { %p5504_p0 = pnand %p5503_p13, %p5499_p10 }
  0xaf   :  { %5507 = shalt.err (!%p5504_p0)
}
  0xb0   :  { %254 = dma.hbm_to_vmem [thread:$0]  %s250_s28, 16, %s252_s15, [#allocation12]  }
  0xb1   :  { %s6197_s12 = smov [#allocation14]   ;;  %s297_s23 = sshll.u32 %s6361_s24, 4  ;;  %s298_s23 = int_to_ptr.hbm [resolvable:$true] %s297_s23 }
  0xb2   :  { %s277_s16 = sshll.u32 %s6197_s12, 4  ;;  %s5520_s22 = sshra.s32 %s276_s30, 4  ;;  %s278_s16 = int_to_ptr.vmem [resolvable:$true] %s277_s16  ;;  %s5521_s22 = int_to_ptr.hbm [resolvable:$true] %s5520_s22 }
  0xb3   :  { %s5522_s26 = scalar_lea.hbm %s5521_s22, 1  ;;  %s5524_s1 = scalar_lea.hbm %s6351_s20, 1 }
  0xb4   :  { %p5523_p1 = scmp.ne.s32.totalorder %s5521_s22, %s5522_s26  ;;  %p5525_p2 = scmp.lt.s32.totalorder %s5521_s22, %s6351_s20 }
  0xb5   :  { %p5526_p3 = scmp.lt.s32.totalorder %s5524_s1, %s5522_s26 }
  0xb7   :  { %p5527_p4 = por %p5526_p3, %p5525_p2 }
  0xb9   :  { %p5528_p5 = pnand %p5527_p4, %p5523_p1 }
  0xbb   :  { %5531 = shalt.err (!%p5528_p5)
}
  0xbc   :  { %280 = dma.hbm_to_vmem [thread:$0]  %s276_s30, 16, %s278_s16, [#allocation15]  }
  0xbd   :  { %s323_s21 = sshll.u32 %s6381_s8, 4  ;;  %s6198_s28 = smov [#allocation17]   ;;  %s324_s21 = int_to_ptr.hbm [resolvable:$true] %s323_s21 }
  0xbe   :  { %s299_s2 = sshll.u32 %s6198_s28, 4  ;;  %s5544_s10 = sshra.s32 %s298_s23, 4  ;;  %s300_s2 = int_to_ptr.vmem [resolvable:$true] %s299_s2  ;;  %s5545_s10 = int_to_ptr.hbm [resolvable:$true] %s5544_s10 }
  0xbf   :  { %s5546_s7 = scalar_lea.hbm %s5545_s10, 1  ;;  %s5548_s11 = scalar_lea.hbm %s6361_s24, 1 }
  0xc0   :  { %p5547_p6 = scmp.ne.s32.totalorder %s5545_s10, %s5546_s7  ;;  %p5549_p7 = scmp.lt.s32.totalorder %s5545_s10, %s6361_s24 }
  0xc1   :  { %p5550_p8 = scmp.lt.s32.totalorder %s5548_s11, %s5546_s7 }
  0xc3   :  { %p5551_p9 = por %p5550_p8, %p5549_p7 }
  0xc5   :  { %p5552_p10 = pnand %p5551_p9, %p5547_p6 }
  0xc7   :  { %5555 = shalt.err (!%p5552_p10)
}
  0xc8   :  { %302 = dma.hbm_to_vmem [thread:$0]  %s298_s23, 16, %s300_s2, [#allocation18]  }
  0xc9   :  { %s6199_s20 = smov [#allocation20]   ;;  %s349_s15 = sshll.u32 %s6401_s25, 4  ;;  %s350_s15 = int_to_ptr.hbm [resolvable:$true] %s349_s15 }
  0xca   :  { %s325_s30 = sshll.u32 %s6199_s20, 4  ;;  %s5568_s0 = sshra.s32 %s324_s21, 4  ;;  %s326_s30 = int_to_ptr.vmem [resolvable:$true] %s325_s30  ;;  %s5569_s0 = int_to_ptr.hbm [resolvable:$true] %s5568_s0 }
  0xcb   :  { %s5570_s27 = scalar_lea.hbm %s5569_s0, 1  ;;  %s5572_s18 = scalar_lea.hbm %s6381_s8, 1 }
  0xcc   :  { %p5571_p11 = scmp.ne.s32.totalorder %s5569_s0, %s5570_s27  ;;  %p5573_p12 = scmp.lt.s32.totalorder %s5569_s0, %s6381_s8 }
  0xcd   :  { %p5574_p13 = scmp.lt.s32.totalorder %s5572_s18, %s5570_s27 }
  0xcf   :  { %p5575_p0 = por %p5574_p13, %p5573_p12 }
  0xd1   :  { %p5576_p1 = pnand %p5575_p0, %p5571_p11 }
  0xd3   :  { %5579 = shalt.err (!%p5576_p1)
}
  0xd4   :  { %328 = dma.hbm_to_vmem [thread:$0]  %s324_s21, 16, %s326_s30, [#allocation21]  }
  0xd5   :  { %s371_s24 = sshll.u32 %s6411_s5, 4  ;;  %s6200_s12 = smov [#allocation23]   ;;  %s372_s24 = int_to_ptr.hbm [resolvable:$true] %s371_s24 }
  0xd6   :  { %s351_s16 = sshll.u32 %s6200_s12, 4  ;;  %s5592_s23 = sshra.s32 %s350_s15, 4  ;;  %s352_s16 = int_to_ptr.vmem [resolvable:$true] %s351_s16  ;;  %s5593_s23 = int_to_ptr.hbm [resolvable:$true] %s5592_s23 }
  0xd7   :  { %s5594_s22 = scalar_lea.hbm %s5593_s23, 1  ;;  %s5596_s26 = scalar_lea.hbm %s6401_s25, 1 }
  0xd8   :  { %p5595_p2 = scmp.ne.s32.totalorder %s5593_s23, %s5594_s22  ;;  %p5597_p3 = scmp.lt.s32.totalorder %s5593_s23, %s6401_s25 }
  0xd9   :  { %p5598_p4 = scmp.lt.s32.totalorder %s5596_s26, %s5594_s22 }
  0xdb   :  { %p5599_p5 = por %p5598_p4, %p5597_p3 }
  0xdd   :  { %p5600_p6 = pnand %p5599_p5, %p5595_p2 }
  0xdf   :  { %5603 = shalt.err (!%p5600_p6)
}
  0xe0   :  { %354 = dma.hbm_to_vmem [thread:$0]  %s350_s15, 16, %s352_s16, [#allocation24]  }
  0xe1   :  { %s6201_s8 = smov [#allocation26]   ;;  %s397_s21 = sshll.u32 %s6431_s29, 4  ;;  %s398_s21 = int_to_ptr.hbm [resolvable:$true] %s397_s21 }
  0xe2   :  { %s373_s1 = sshll.u32 %s6201_s8, 4  ;;  %s5616_s28 = sshra.s32 %s372_s24, 4  ;;  %s374_s1 = int_to_ptr.vmem [resolvable:$true] %s373_s1  ;;  %s5617_s28 = int_to_ptr.hbm [resolvable:$true] %s5616_s28 }
  0xe3   :  { %s5618_s2 = scalar_lea.hbm %s5617_s28, 1  ;;  %s5620_s10 = scalar_lea.hbm %s6411_s5, 1 }
  0xe4   :  { %p5619_p7 = scmp.ne.s32.totalorder %s5617_s28, %s5618_s2  ;;  %p5621_p8 = scmp.lt.s32.totalorder %s5617_s28, %s6411_s5 }
  0xe5   :  { %p5622_p9 = scmp.lt.s32.totalorder %s5620_s10, %s5618_s2 }
  0xe7   :  { %p5623_p10 = por %p5622_p9, %p5621_p8 }
  0xe9   :  { %p5624_p11 = pnand %p5623_p10, %p5619_p7 }
  0xeb   :  { %5627 = shalt.err (!%p5624_p11)
}
  0xec   :  { %376 = dma.hbm_to_vmem [thread:$0]  %s372_s24, 16, %s374_s1, [#allocation27]  }
  0xed   :  { %s423_s25 = sshll.u32 %s6451_s9, 4  ;;  %s6202_s7 = smov [#allocation29]   ;;  %s424_s25 = int_to_ptr.hbm [resolvable:$true] %s423_s25 }
  0xee   :  { %s399_s11 = sshll.u32 %s6202_s7, 4  ;;  %s5640_s20 = sshra.s32 %s398_s21, 4  ;;  %s400_s11 = int_to_ptr.vmem [resolvable:$true] %s399_s11  ;;  %s5641_s20 = int_to_ptr.hbm [resolvable:$true] %s5640_s20 }
  0xef   :  { %s5642_s30 = scalar_lea.hbm %s5641_s20, 1  ;;  %s5644_s15 = scalar_lea.hbm %s6431_s29, 1 }
  0xf0   :  { %p5643_p12 = scmp.ne.s32.totalorder %s5641_s20, %s5642_s30  ;;  %p5645_p13 = scmp.lt.s32.totalorder %s5641_s20, %s6431_s29 }
  0xf1   :  { %p5646_p0 = scmp.lt.s32.totalorder %s5644_s15, %s5642_s30 }
  0xf3   :  { %p5647_p1 = por %p5646_p0, %p5645_p13 }
  0xf5   :  { %p5648_p2 = pnand %p5647_p1, %p5643_p12 }
  0xf7   :  { %5651 = shalt.err (!%p5648_p2)
}
  0xf8   :  { %402 = dma.hbm_to_vmem [thread:$0]  %s398_s21, 16, %s400_s11, [#allocation30]  }
  0xf9   :  { %s6203_s5 = smov [#allocation32]   ;;  %s445_s27 = sshll.u32 %s6461_s3, 4  ;;  %s446_s27 = int_to_ptr.hbm [resolvable:$true] %s445_s27 }
  0xfa   :  { %s425_s0 = sshll.u32 %s6203_s5, 4  ;;  %s5664_s18 = sshra.s32 %s424_s25, 4  ;;  %s426_s0 = int_to_ptr.vmem [resolvable:$true] %s425_s0  ;;  %s5665_s18 = int_to_ptr.hbm [resolvable:$true] %s5664_s18 }
  0xfb   :  { %s5666_s24 = scalar_lea.hbm %s5665_s18, 1  ;;  %s5668_s12 = scalar_lea.hbm %s6451_s9, 1 }
  0xfc   :  { %p5667_p3 = scmp.ne.s32.totalorder %s5665_s18, %s5666_s24  ;;  %p5669_p4 = scmp.lt.s32.totalorder %s5665_s18, %s6451_s9 }
  0xfd   :  { %p5670_p5 = scmp.lt.s32.totalorder %s5668_s12, %s5666_s24 }
  0xff   :  { %p5671_p6 = por %p5670_p5, %p5669_p4 }
 0x101   :  { %p5672_p7 = pnand %p5671_p6, %p5667_p3 }
 0x103   :  { %5675 = shalt.err (!%p5672_p7)
}
 0x104   :  { %428 = dma.hbm_to_vmem [thread:$0]  %s424_s25, 16, %s426_s0, [#allocation33]  }
 0x105   :  { %s501_s29 = sshll.u32 %s6556_s14, 4  ;;  %s6204_s16 = smov [#allocation35]   ;;  %s502_s29 = int_to_ptr.hbm [resolvable:$true] %s501_s29 }
 0x106   :  { %s447_s23 = sshll.u32 %s6204_s16, 4  ;;  %s5688_s22 = sshra.s32 %s446_s27, 4  ;;  %s448_s23 = int_to_ptr.vmem [resolvable:$true] %s447_s23  ;;  %s5689_s22 = int_to_ptr.hbm [resolvable:$true] %s5688_s22 }
 0x107   :  { %s5690_s26 = scalar_lea.hbm %s5689_s22, 1  ;;  %s5692_s8 = scalar_lea.hbm %s6461_s3, 1 }
 0x108   :  { %p5691_p8 = scmp.ne.s32.totalorder %s5689_s22, %s5690_s26  ;;  %p5693_p9 = scmp.lt.s32.totalorder %s5689_s22, %s6461_s3 }
 0x109   :  { %p5694_p10 = scmp.lt.s32.totalorder %s5692_s8, %s5690_s26 }
 0x10b   :  { %p5695_p11 = por %p5694_p10, %p5693_p9 }
 0x10d   :  { %p5696_p12 = pnand %p5695_p11, %p5691_p8 }
 0x10f   :  { %5699 = shalt.err (!%p5696_p12)
}
 0x110   :  { %450 = dma.hbm_to_vmem [thread:$0]  %s446_s27, 16, %s448_s23, [#allocation36]  }
 0x111   :  { %s6205_s9 = smov [#allocation38]   ;;  %s523_s21 = sshll.u32 %s6566_s4, 4  ;;  %s524_s21 = int_to_ptr.hbm [resolvable:$true] %s523_s21 }
 0x112   :  { %s503_s1 = sshll.u32 %s6205_s9, 4  ;;  %s5712_s28 = sshra.s32 %s502_s29, 4  ;;  %s504_s1 = int_to_ptr.vmem [resolvable:$true] %s503_s1  ;;  %s5713_s28 = int_to_ptr.hbm [resolvable:$true] %s5712_s28 }
 0x113   :  { %s5714_s2 = scalar_lea.hbm %s5713_s28, 1  ;;  %s5716_s10 = scalar_lea.hbm %s6556_s14, 1 }
 0x114   :  { %p5715_p13 = scmp.ne.s32.totalorder %s5713_s28, %s5714_s2  ;;  %p5717_p0 = scmp.lt.s32.totalorder %s5713_s28, %s6556_s14 }
 0x115   :  { %p5718_p1 = scmp.lt.s32.totalorder %s5716_s10, %s5714_s2 }
 0x117   :  { %p5719_p2 = por %p5718_p1, %p5717_p0 }
 0x119   :  { %p5720_p3 = pnand %p5719_p2, %p5715_p13 }
 0x11b   :  { %5723 = shalt.err (!%p5720_p3)
}
 0x11c   :  { %506 = dma.hbm_to_vmem [thread:$0]  %s502_s29, 16, %s504_s1, [#allocation39]  }
 0x11d   :  { %s188_s3 = sshll.u32 %s6291_s19, 4  ;;  %s6206_s25 = smov [#allocation41]   ;;  %s189_s3 = int_to_ptr.hbm [resolvable:$true] %s188_s3 }
 0x11e   :  { %s525_s7 = sshll.u32 %s6206_s25, 4  ;;  %s5736_s11 = sshra.s32 %s524_s21, 4  ;;  %s526_s7 = int_to_ptr.vmem [resolvable:$true] %s525_s7  ;;  %s5737_s11 = int_to_ptr.hbm [resolvable:$true] %s5736_s11 }
 0x11f   :  { %s5738_s20 = scalar_lea.hbm %s5737_s11, 1  ;;  %s5740_s30 = scalar_lea.hbm %s6566_s4, 1 }
 0x120   :  { %p5739_p4 = scmp.ne.s32.totalorder %s5737_s11, %s5738_s20  ;;  %p5741_p5 = scmp.lt.s32.totalorder %s5737_s11, %s6566_s4 }
 0x121   :  { %p5742_p6 = scmp.lt.s32.totalorder %s5740_s30, %s5738_s20 }
 0x123   :  { %p5743_p7 = por %p5742_p6, %p5741_p5 }
 0x125   :  { %p5744_p8 = pnand %p5743_p7, %p5739_p4 }
 0x127   :  { %5747 = shalt.err (!%p5744_p8)
}
 0x128   :  { %528 = dma.hbm_to_vmem [thread:$0]  %s524_s21, 16, %s526_s7, [#allocation42]  }
 0x129   :  { %s7846_s14 = sld [smem:[#allocation69_spill]]  ;;  %s6207_s15 = smov [#allocation3]  }
 0x12a   :  { %s190_s5 = sshll.u32 %s6207_s15, 4  ;;  %s5760_s27 = sshra.s32 %s189_s3, 4  ;;  %s191_s5 = int_to_ptr.vmem [resolvable:$true] %s190_s5  ;;  %s5761_s27 = int_to_ptr.hbm [resolvable:$true] %s5760_s27 }
 0x12b   :  { %s5762_s18 = scalar_lea.hbm %s5761_s27, 1  ;;  %s5764_s24 = scalar_lea.hbm %s6291_s19, 1 }
 0x12c   :  { %p5763_p9 = scmp.ne.s32.totalorder %s5761_s27, %s5762_s18  ;;  %p5765_p10 = scmp.lt.s32.totalorder %s5761_s27, %s6291_s19 }
 0x12d   :  { %p5766_p11 = scmp.lt.s32.totalorder %s5764_s24, %s5762_s18 }
 0x12f   :  { %s212_s0 = sshll.u32 %s7846_s14, 4  ;;  %p5767_p12 = por %p5766_p11, %p5765_p10  ;;  %s213_s0 = int_to_ptr.hbm [resolvable:$true] %s212_s0 }
 0x131   :  { %p5768_p13 = pnand %p5767_p12, %p5763_p9 }
 0x133   :  { %5771 = shalt.err (!%p5768_p13)
}
 0x134   :  { %193 = dma.hbm_to_vmem [thread:$0]  %s189_s3, 16, %s191_s5, [#allocation4]  }
 0x135   :  { %s7847_s4 = sld [smem:[#allocation71_spill]]  ;;  %s6208_s29 = smov [#allocation7]  }
 0x136   :  { %s214_s16 = sshll.u32 %s6208_s29, 4  ;;  %s5784_s23 = sshra.s32 %s213_s0, 4  ;;  %s215_s16 = int_to_ptr.vmem [resolvable:$true] %s214_s16  ;;  %s5785_s23 = int_to_ptr.hbm [resolvable:$true] %s5784_s23 }
 0x137   :  { %s5786_s22 = scalar_lea.hbm %s5785_s23, 1  ;;  %s5788_s26 = scalar_lea.hbm %s7846_s14, 1 }
 0x138   :  { %p5787_p0 = scmp.ne.s32.totalorder %s5785_s23, %s5786_s22  ;;  %p5789_p1 = scmp.lt.s32.totalorder %s5785_s23, %s7846_s14 }
 0x139   :  { %p5790_p2 = scmp.lt.s32.totalorder %s5788_s26, %s5786_s22 }
 0x13b   :  { %s236_s12 = sshll.u32 %s7847_s4, 4  ;;  %p5791_p3 = por %p5790_p2, %p5789_p1  ;;  %s237_s12 = int_to_ptr.hbm [resolvable:$true] %s236_s12 }
 0x13d   :  { %p5792_p4 = pnand %p5791_p3, %p5787_p0 }
 0x13f   :  { %5795 = shalt.err (!%p5792_p4)
}
 0x140   :  { %217 = dma.hbm_to_vmem [thread:$0]  %s213_s0, 16, %s215_s16, [#allocation6]  }
 0x141   :  { %s7848_s19 = sld [smem:[#allocation74_spill]]  ;;  %s6209_s8 = smov [#allocation10]  }
 0x142   :  { %s238_s9 = sshll.u32 %s6209_s8, 4  ;;  %s5808_s21 = sshra.s32 %s237_s12, 4  ;;  %s239_s9 = int_to_ptr.vmem [resolvable:$true] %s238_s9  ;;  %s5809_s21 = int_to_ptr.hbm [resolvable:$true] %s5808_s21 }
 0x143   :  { %s5810_s28 = scalar_lea.hbm %s5809_s21, 1  ;;  %s5812_s2 = scalar_lea.hbm %s7847_s4, 1 }
 0x144   :  { %p5811_p5 = scmp.ne.s32.totalorder %s5809_s21, %s5810_s28  ;;  %p5813_p6 = scmp.lt.s32.totalorder %s5809_s21, %s7847_s4 }
 0x145   :  { %p5814_p7 = scmp.lt.s32.totalorder %s5812_s2, %s5810_s28 }
 0x147   :  { %s262_s1 = sshll.u32 %s7848_s19, 4  ;;  %p5815_p8 = por %p5814_p7, %p5813_p6  ;;  %s263_s1 = int_to_ptr.hbm [resolvable:$true] %s262_s1 }
 0x149   :  { %p5816_p9 = pnand %p5815_p8, %p5811_p5 }
 0x14b   :  { %5819 = shalt.err (!%p5816_p9)
}
 0x14c   :  { %241 = dma.hbm_to_vmem [thread:$0]  %s237_s12, 16, %s239_s9, [#allocation9]  }
 0x14d   :  { %s7849_s10 = sld [smem:[#allocation76_spill]]  ;;  %s6210_s25 = smov [#allocation13]  }
 0x14e   :  { %s264_s7 = sshll.u32 %s6210_s25, 4  ;;  %s5832_s11 = sshra.s32 %s263_s1, 4  ;;  %s265_s7 = int_to_ptr.vmem [resolvable:$true] %s264_s7  ;;  %s5833_s11 = int_to_ptr.hbm [resolvable:$true] %s5832_s11 }
 0x14f   :  { %s5834_s20 = scalar_lea.hbm %s5833_s11, 1  ;;  %s5836_s30 = scalar_lea.hbm %s7848_s19, 1 }
 0x150   :  { %p5835_p10 = scmp.ne.s32.totalorder %s5833_s11, %s5834_s20  ;;  %p5837_p11 = scmp.lt.s32.totalorder %s5833_s11, %s7848_s19 }
 0x151   :  { %p5838_p12 = scmp.lt.s32.totalorder %s5836_s30, %s5834_s20 }
 0x153   :  { %s286_s3 = sshll.u32 %s7849_s10, 4  ;;  %p5839_p13 = por %p5838_p12, %p5837_p11  ;;  %s287_s3 = int_to_ptr.hbm [resolvable:$true] %s286_s3 }
 0x155   :  { %p5840_p0 = pnand %p5839_p13, %p5835_p10 }
 0x157   :  { %5843 = shalt.err (!%p5840_p0)
}
 0x158   :  { %267 = dma.hbm_to_vmem [thread:$0]  %s263_s1, 16, %s265_s7, [#allocation12]  }
 0x159   :  { %s7850_s14 = sld [smem:[#allocation78_spill]]  ;;  %s6211_s15 = smov [#allocation16]  }
 0x15a   :  { %s288_s5 = sshll.u32 %s6211_s15, 4  ;;  %s5856_s27 = sshra.s32 %s287_s3, 4  ;;  %s289_s5 = int_to_ptr.vmem [resolvable:$true] %s288_s5  ;;  %s5857_s27 = int_to_ptr.hbm [resolvable:$true] %s5856_s27 }
 0x15b   :  { %s5858_s18 = scalar_lea.hbm %s5857_s27, 1  ;;  %s5860_s24 = scalar_lea.hbm %s7849_s10, 1 }
 0x15c   :  { %p5859_p1 = scmp.ne.s32.totalorder %s5857_s27, %s5858_s18  ;;  %p5861_p2 = scmp.lt.s32.totalorder %s5857_s27, %s7849_s10 }
 0x15d   :  { %p5862_p3 = scmp.lt.s32.totalorder %s5860_s24, %s5858_s18 }
 0x15f   :  { %s310_s0 = sshll.u32 %s7850_s14, 4  ;;  %p5863_p4 = por %p5862_p3, %p5861_p2  ;;  %s311_s0 = int_to_ptr.hbm [resolvable:$true] %s310_s0 }
 0x161   :  { %p5864_p5 = pnand %p5863_p4, %p5859_p1 }
 0x163   :  { %5867 = shalt.err (!%p5864_p5)
}
 0x164   :  { %291 = dma.hbm_to_vmem [thread:$0]  %s287_s3, 16, %s289_s5, [#allocation15]  }
 0x165   :  { %s7851_s4 = sld [smem:[#allocation81_spill]]  ;;  %s6212_s29 = smov [#allocation19]  }
 0x166   :  { %s312_s16 = sshll.u32 %s6212_s29, 4  ;;  %s5880_s23 = sshra.s32 %s311_s0, 4  ;;  %s313_s16 = int_to_ptr.vmem [resolvable:$true] %s312_s16  ;;  %s5881_s23 = int_to_ptr.hbm [resolvable:$true] %s5880_s23 }
 0x167   :  { %s5882_s22 = scalar_lea.hbm %s5881_s23, 1  ;;  %s5884_s26 = scalar_lea.hbm %s7850_s14, 1 }
 0x168   :  { %p5883_p6 = scmp.ne.s32.totalorder %s5881_s23, %s5882_s22  ;;  %p5885_p7 = scmp.lt.s32.totalorder %s5881_s23, %s7850_s14 }
 0x169   :  { %p5886_p8 = scmp.lt.s32.totalorder %s5884_s26, %s5882_s22 }
 0x16b   :  { %s336_s12 = sshll.u32 %s7851_s4, 4  ;;  %p5887_p9 = por %p5886_p8, %p5885_p7  ;;  %s337_s12 = int_to_ptr.hbm [resolvable:$true] %s336_s12 }
 0x16d   :  { %p5888_p10 = pnand %p5887_p9, %p5883_p6 }
 0x16f   :  { %5891 = shalt.err (!%p5888_p10)
}
 0x170   :  { %315 = dma.hbm_to_vmem [thread:$0]  %s311_s0, 16, %s313_s16, [#allocation18]  }
 0x171   :  { %s7852_s19 = sld [smem:[#allocation83_spill]]  ;;  %s6213_s8 = smov [#allocation22]  }
 0x172   :  { %s338_s9 = sshll.u32 %s6213_s8, 4  ;;  %s5904_s21 = sshra.s32 %s337_s12, 4  ;;  %s339_s9 = int_to_ptr.vmem [resolvable:$true] %s338_s9  ;;  %s5905_s21 = int_to_ptr.hbm [resolvable:$true] %s5904_s21 }
 0x173   :  { %s5906_s28 = scalar_lea.hbm %s5905_s21, 1  ;;  %s5908_s2 = scalar_lea.hbm %s7851_s4, 1 }
 0x174   :  { %p5907_p11 = scmp.ne.s32.totalorder %s5905_s21, %s5906_s28  ;;  %p5909_p12 = scmp.lt.s32.totalorder %s5905_s21, %s7851_s4 }
 0x175   :  { %p5910_p13 = scmp.lt.s32.totalorder %s5908_s2, %s5906_s28 }
 0x177   :  { %s360_s1 = sshll.u32 %s7852_s19, 4  ;;  %p5911_p0 = por %p5910_p13, %p5909_p12  ;;  %s361_s1 = int_to_ptr.hbm [resolvable:$true] %s360_s1 }
 0x179   :  { %p5912_p1 = pnand %p5911_p0, %p5907_p11 }
 0x17b   :  { %5915 = shalt.err (!%p5912_p1)
}
 0x17c   :  { %341 = dma.hbm_to_vmem [thread:$0]  %s337_s12, 16, %s339_s9, [#allocation21]  }
 0x17d   :  { %s7853_s10 = sld [smem:[#allocation85_spill]]  ;;  %s6214_s25 = smov [#allocation25]  }
 0x17e   :  { %s362_s7 = sshll.u32 %s6214_s25, 4  ;;  %s5928_s11 = sshra.s32 %s361_s1, 4  ;;  %s363_s7 = int_to_ptr.vmem [resolvable:$true] %s362_s7  ;;  %s5929_s11 = int_to_ptr.hbm [resolvable:$true] %s5928_s11 }
 0x17f   :  { %s5930_s20 = scalar_lea.hbm %s5929_s11, 1  ;;  %s5932_s30 = scalar_lea.hbm %s7852_s19, 1 }
 0x180   :  { %p5931_p2 = scmp.ne.s32.totalorder %s5929_s11, %s5930_s20  ;;  %p5933_p3 = scmp.lt.s32.totalorder %s5929_s11, %s7852_s19 }
 0x181   :  { %p5934_p4 = scmp.lt.s32.totalorder %s5932_s30, %s5930_s20 }
 0x183   :  { %s384_s3 = sshll.u32 %s7853_s10, 4  ;;  %p5935_p5 = por %p5934_p4, %p5933_p3  ;;  %s385_s3 = int_to_ptr.hbm [resolvable:$true] %s384_s3 }
 0x185   :  { %p5936_p6 = pnand %p5935_p5, %p5931_p2 }
 0x187   :  { %5939 = shalt.err (!%p5936_p6)
}
 0x188   :  { %365 = dma.hbm_to_vmem [thread:$0]  %s361_s1, 16, %s363_s7, [#allocation24]  }
 0x189   :  { %s7854_s14 = sld [smem:[#allocation88_spill]]  ;;  %s6215_s15 = smov [#allocation28]  }
 0x18a   :  { %s386_s5 = sshll.u32 %s6215_s15, 4  ;;  %s5952_s27 = sshra.s32 %s385_s3, 4  ;;  %s387_s5 = int_to_ptr.vmem [resolvable:$true] %s386_s5  ;;  %s5953_s27 = int_to_ptr.hbm [resolvable:$true] %s5952_s27 }
 0x18b   :  { %s5954_s18 = scalar_lea.hbm %s5953_s27, 1  ;;  %s5956_s24 = scalar_lea.hbm %s7853_s10, 1 }
 0x18c   :  { %p5955_p7 = scmp.ne.s32.totalorder %s5953_s27, %s5954_s18  ;;  %p5957_p8 = scmp.lt.s32.totalorder %s5953_s27, %s7853_s10 }
 0x18d   :  { %p5958_p9 = scmp.lt.s32.totalorder %s5956_s24, %s5954_s18 }
 0x18f   :  { %s410_s0 = sshll.u32 %s7854_s14, 4  ;;  %p5959_p10 = por %p5958_p9, %p5957_p8  ;;  %s411_s0 = int_to_ptr.hbm [resolvable:$true] %s410_s0 }
 0x191   :  { %p5960_p11 = pnand %p5959_p10, %p5955_p7 }
 0x193   :  { %5963 = shalt.err (!%p5960_p11)
}
 0x194   :  { %389 = dma.hbm_to_vmem [thread:$0]  %s385_s3, 16, %s387_s5, [#allocation27]  }
 0x195   :  { %s7855_s4 = sld [smem:[#allocation90_spill]]  ;;  %s6216_s29 = smov [#allocation31]  }
 0x196   :  { %s412_s16 = sshll.u32 %s6216_s29, 4  ;;  %s5976_s23 = sshra.s32 %s411_s0, 4  ;;  %s413_s16 = int_to_ptr.vmem [resolvable:$true] %s412_s16  ;;  %s5977_s23 = int_to_ptr.hbm [resolvable:$true] %s5976_s23 }
 0x197   :  { %s5978_s22 = scalar_lea.hbm %s5977_s23, 1  ;;  %s5980_s26 = scalar_lea.hbm %s7854_s14, 1 }
 0x198   :  { %p5979_p12 = scmp.ne.s32.totalorder %s5977_s23, %s5978_s22  ;;  %p5981_p13 = scmp.lt.s32.totalorder %s5977_s23, %s7854_s14 }
 0x199   :  { %p5982_p0 = scmp.lt.s32.totalorder %s5980_s26, %s5978_s22 }
 0x19b   :  { %s434_s12 = sshll.u32 %s7855_s4, 4  ;;  %p5983_p1 = por %p5982_p0, %p5981_p13  ;;  %s435_s12 = int_to_ptr.hbm [resolvable:$true] %s434_s12 }
 0x19d   :  { %p5984_p2 = pnand %p5983_p1, %p5979_p12 }
 0x19f   :  { %5987 = shalt.err (!%p5984_p2)
}
 0x1a0   :  { %415 = dma.hbm_to_vmem [thread:$0]  %s411_s0, 16, %s413_s16, [#allocation30]  }
 0x1a1   :  { %s7856_s19 = sld [smem:[#allocation106_spill]]  ;;  %s6217_s8 = smov [#allocation34]  }
 0x1a2   :  { %s436_s9 = sshll.u32 %s6217_s8, 4  ;;  %s6000_s21 = sshra.s32 %s435_s12, 4  ;;  %s437_s9 = int_to_ptr.vmem [resolvable:$true] %s436_s9  ;;  %s6001_s21 = int_to_ptr.hbm [resolvable:$true] %s6000_s21 }
 0x1a3   :  { %s6002_s28 = scalar_lea.hbm %s6001_s21, 1  ;;  %s6004_s2 = scalar_lea.hbm %s7855_s4, 1 }
 0x1a4   :  { %p6003_p3 = scmp.ne.s32.totalorder %s6001_s21, %s6002_s28  ;;  %p6005_p4 = scmp.lt.s32.totalorder %s6001_s21, %s7855_s4 }
 0x1a5   :  { %p6006_p5 = scmp.lt.s32.totalorder %s6004_s2, %s6002_s28 }
 0x1a7   :  { %s486_s1 = sshll.u32 %s7856_s19, 4  ;;  %p6007_p6 = por %p6006_p5, %p6005_p4  ;;  %s487_s1 = int_to_ptr.hbm [resolvable:$true] %s486_s1 }
 0x1a9   :  { %p6008_p7 = pnand %p6007_p6, %p6003_p3 }
 0x1ab   :  { %6011 = shalt.err (!%p6008_p7)
}
 0x1ac   :  { %439 = dma.hbm_to_vmem [thread:$0]  %s435_s12, 16, %s437_s9, [#allocation33]  }
 0x1ad   :  { %s7857_s10 = sld [smem:[#allocation109_spill]]  ;;  %s6218_s25 = smov [#allocation37]  }
 0x1ae   :  { %s488_s7 = sshll.u32 %s6218_s25, 4  ;;  %s6024_s11 = sshra.s32 %s487_s1, 4  ;;  %s489_s7 = int_to_ptr.vmem [resolvable:$true] %s488_s7  ;;  %s6025_s11 = int_to_ptr.hbm [resolvable:$true] %s6024_s11 }
 0x1af   :  { %s6026_s20 = scalar_lea.hbm %s6025_s11, 1  ;;  %s6028_s30 = scalar_lea.hbm %s7856_s19, 1 }
 0x1b0   :  { %p6027_p8 = scmp.ne.s32.totalorder %s6025_s11, %s6026_s20  ;;  %p6029_p9 = scmp.lt.s32.totalorder %s6025_s11, %s7856_s19 }
 0x1b1   :  { %p6030_p10 = scmp.lt.s32.totalorder %s6028_s30, %s6026_s20 }
 0x1b3   :  { %s512_s3 = sshll.u32 %s7857_s10, 4  ;;  %p6031_p11 = por %p6030_p10, %p6029_p9  ;;  %s513_s3 = int_to_ptr.hbm [resolvable:$true] %s512_s3 }
 0x1b5   :  { %p6032_p12 = pnand %p6031_p11, %p6027_p8 }
 0x1b7   :  { %6035 = shalt.err (!%p6032_p12)
}
 0x1b8   :  { %491 = dma.hbm_to_vmem [thread:$0]  %s487_s1, 16, %s489_s7, [#allocation36]  }
 0x1b9   :  { %s7858_s14 = sld [smem:[#allocation110_spill]]  ;;  %s6219_s15 = smov [#allocation40]  }
 0x1ba   :  { %s514_s5 = sshll.u32 %s6219_s15, 4  ;;  %s6048_s27 = sshra.s32 %s513_s3, 4  ;;  %s515_s5 = int_to_ptr.vmem [resolvable:$true] %s514_s5  ;;  %s6049_s27 = int_to_ptr.hbm [resolvable:$true] %s6048_s27 }
 0x1bb   :  { %s6050_s18 = scalar_lea.hbm %s6049_s27, 1  ;;  %s6052_s24 = scalar_lea.hbm %s7857_s10, 1 }
 0x1bc   :  { %p6051_p13 = scmp.ne.s32.totalorder %s6049_s27, %s6050_s18  ;;  %p6053_p0 = scmp.lt.s32.totalorder %s6049_s27, %s7857_s10 }
 0x1bd   :  { %p6054_p1 = scmp.lt.s32.totalorder %s6052_s24, %s6050_s18 }
 0x1bf   :  { %s534_s0 = sshll.u32 %s7858_s14, 4  ;;  %p6055_p2 = por %p6054_p1, %p6053_p0  ;;  %s535_s0 = int_to_ptr.hbm [resolvable:$true] %s534_s0 }
 0x1c1   :  { %p6056_p3 = pnand %p6055_p2, %p6051_p13 }
 0x1c3   :  { %6059 = shalt.err (!%p6056_p3)
}
 0x1c4   :  { %517 = dma.hbm_to_vmem [thread:$0]  %s513_s3, 16, %s515_s5, [#allocation39]  }
 0x1c5   :  { %s6220_s4 = smov [#allocation43]   ;;  %s6072_s29 = sshra.s32 %s535_s0, 4  ;;  %s6073_s29 = int_to_ptr.hbm [resolvable:$true] %s6072_s29 }
 0x1c6   :  { %s536_s12 = sshll.u32 %s6220_s4, 4  ;;  %s6074_s16 = scalar_lea.hbm %s6073_s29, 1  ;;  %s537_s12 = int_to_ptr.vmem [resolvable:$true] %s536_s12 }
 0x1c7   :  { %p6075_p4 = scmp.ne.s32.totalorder %s6073_s29, %s6074_s16  ;;  %s6076_s23 = scalar_lea.hbm %s7858_s14, 1 }
 0x1c8   :  { %p6077_p5 = scmp.lt.s32.totalorder %s6073_s29, %s7858_s14  ;;  %p6078_p6 = scmp.lt.s32.totalorder %s6076_s23, %s6074_s16 }
 0x1ca   :  { %p6079_p7 = por %p6078_p6, %p6077_p5 }
 0x1cc   :  { %p6080_p8 = pnand %p6079_p7, %p6075_p4 }
 0x1ce   :  { %6083 = shalt.err (!%p6080_p8)
}
 0x1cf   :  { %539 = dma.hbm_to_vmem [thread:$0]  %s535_s0, 16, %s537_s12, [#allocation42]  }
 0x1d0   :  { %6096 = dma.done.wait [#allocation4], 16  }
 0x1d1   :  { %6097 = vsyncadd [#allocation4], 4294967280 }
 0x1d2   :  { %6098 = dma.done.wait [#allocation6], 32  }
 0x1d3   :  { %6099 = vsyncadd [#allocation6], 4294967264 }
 0x1d4   :  { %6100 = dma.done.wait [#allocation9], 32  }
 0x1d5   :  { %6101 = vsyncadd [#allocation9], 4294967264 }
 0x1d6   :  { %6102 = dma.done.wait [#allocation12], 32  }
 0x1d7   :  { %6103 = vsyncadd [#allocation12], 4294967264 }
 0x1d8   :  { %6104 = dma.done.wait [#allocation15], 32  }
 0x1d9   :  { %6105 = vsyncadd [#allocation15], 4294967264 }
 0x1da   :  { %6106 = dma.done.wait [#allocation18], 32  }
 0x1db   :  { %6107 = vsyncadd [#allocation18], 4294967264 }
 0x1dc   :  { %6108 = dma.done.wait [#allocation21], 32  }
 0x1dd   :  { %6109 = vsyncadd [#allocation21], 4294967264 }
 0x1de   :  { %6110 = dma.done.wait [#allocation24], 32  }
 0x1df   :  { %6111 = vsyncadd [#allocation24], 4294967264 }
 0x1e0   :  { %6112 = dma.done.wait [#allocation27], 32  }
 0x1e1   :  { %6113 = vsyncadd [#allocation27], 4294967264 }
 0x1e2   :  { %6114 = dma.done.wait [#allocation30], 32  }
 0x1e3   :  { %6115 = vsyncadd [#allocation30], 4294967264 }
 0x1e4   :  { %6116 = dma.done.wait [#allocation33], 32  }
 0x1e5   :  { %6117 = vsyncadd [#allocation33], 4294967264 }
 0x1e6   :  { %6118 = dma.done.wait [#allocation36], 32  }
 0x1e7   :  { %6119 = vsyncadd [#allocation36], 4294967264 }
 0x1e8   :  { %6120 = dma.done.wait [#allocation39], 32  }
 0x1e9   :  { %6121 = vsyncadd [#allocation39], 4294967264 }
 0x1ea   :  { %6122 = dma.done.wait [#allocation42], 32  }
 0x1eb   :  { %6123 = vsyncadd [#allocation42], 4294967264  ;;  %s7859_s22 = sld [smem:[#allocation65_spill]]  ;;  %vm663_vm0 = vcmask 64512   ;;  %s6221_s1 = smov 96   ;;  %vm749_vm1 = vcmask 261120  }
 0x1ec   :  { %s7860_s26 = sld [smem:[#allocation58_spill]]  ;;  %v5187_v21 = vld [vmem:[#allocation3] ss:$0 sm:$0xff]  ;;  %v6222_v26 = vmov -1e+30   ;;  %vm785_vm3 = vcmask 130048  }
 0x1ed   :  { %s7861_s19 = sld [smem:[#allocation63_spill]]  ;;  %s6223_s2 = smov 64  }
 0x1ee   :  { %s7862_s8 = sld [smem:[#allocation64_spill]]  ;;  %s6224_s10 = smov 32  }
 0x1ef   :  { %s7863_s9 = sld [smem:[#allocation66_spill]]  ;;  %s6226_s14 = smov 112  }
 0x1f0   :  { %s7864_s21 = sld [smem:[#allocation67_spill]]  ;;  %s6227_s15 = smov 80  }
 0x1f1   :  { %v693_v1 = vld [vmem:[%s7859_s22] sm:$0xff]  ;;  %s7865_s28 = sld [smem:[#allocation59_spill]]  ;;  %s6228_s12 = smov 120  }
 0x1f2   :  { %v6674_v2 = vld [vmem:[%s7860_s26] sm:$0xff]  ;;  %713 = vmatpush.msra.mxu1 %v693_v1  ;;  %v6682_v4 = vld [vmem:[%s7860_s26 + $0x8] sm:$0xff]  ;;  %s7866_s3 = sld [smem:[#allocation68_spill]]  ;;  %s6229_s29 = smov 104  }
 0x1f3   :  { %v658_v3 = vld [vmem:[%s7861_s19] sm:$0xff]  ;;  %4803 = vmatmul.msk.f32.vlgmr.msra.gmra.mxu1 %vm663_vm0, %v6674_v2  ;;  %s7867_s25 = sld [smem:[#allocation70_spill]] }
 0x1f4   :  { %685 = vmatpush.msra.mxu0 %v658_v3  ;;  %v5186_v5 = vld [vmem:[%s7862_s8] ss:$0 sm:$0xff]  ;;  %s7868_s7 = sld [smem:[#allocation72_spill]]  ;;  %s6230_s8 = smov 124  }
 0x1f5   :  { %4801 = vmatmul.msk.f32.vlgmr.msra.gmra.mxu0 %vm663_vm0, %v6674_v2  ;;  %v5185_v9 = vld [vmem:[%s7863_s9] ss:$0 sm:$0xff]  ;;  %s7869_s11 = sld [smem:[#allocation73_spill]] }
 0x1f6   :  { %v721_v15 = vld [vmem:[%s7864_s21] sm:$0xff]  ;;  %s7870_s20 = sld [smem:[#allocation101_spill]] }
 0x1f7   :  { %741 = vmatpush.msra.mxu2 %v721_v15  ;;  %v6720_v24 = vld [vmem:[%s7865_s28] sm:$0xff]  ;;  %v6727_v30 = vld [vmem:[%s7865_s28 + $0x8] sm:$0xff]  ;;  %s7871_s30 = sld [smem:[#allocation102_spill]] }
 0x1f8   :  { %4805 = vmatmul.msk.f32.vlgmr.msra.gmra.mxu2 %vm663_vm0, %v6674_v2  ;;  %vm652_vm2 = vcmp.gt.f32.partialorder %v6720_v24, 0.0  ;;  %vm653_vm4 = vcmp.gt.f32.partialorder %v6727_v30, 0.0  ;;  %s7872_s5 = sld [smem:[#allocation75_spill]] }
 0x1f9   :  { %v6723_v27 = vsel %vm652_vm2, 0.0, %v6222_v26  ;;  %v6731_v32 = vsel %vm653_vm4, 0.0, %v6222_v26  ;;  %s7875_s0 = sld [smem:[#allocation77_spill]] }
 0x1fa   :  { %s7876_s27 = sld [smem:[#allocation79_spill]] }
 0x1fb   :  { %4804 = vmatmul.msk.f32.gmra.mxu1 %vm663_vm0, %v6682_v4  ;;  %s7877_s18 = sld [smem:[#allocation80_spill]] }
 0x1fc   :  { %s7878_s24 = sld [smem:[#allocation103_spill]] }
 0x1fd   :  { %4802 = vmatmul.msk.f32.gmra.mxu0 %vm663_vm0, %v6682_v4  ;;  %s7879_s4 = sld [smem:[#allocation104_spill]] }
 0x1fe   :  { %s7880_s16 = sld [smem:[#allocation82_spill]] }
 0x1ff   :  { %s7883_s23 = sld [smem:[#allocation86_spill]] }
 0x200   :  { %4806 = vmatmul.msk.f32.gmra.mxu2 %vm663_vm0, %v6682_v4  ;;  %s7884_s22 = sld [smem:[#allocation84_spill]] }
 0x201   :  { %s7885_s26 = sld [smem:[#allocation87_spill]] }
 0x202   :  { %s7886_s19 = sld [smem:[#allocation105_spill]] }
 0x203   :  { %s7887_s9 = sld [smem:[#allocation89_spill]] }
 0x204   :  { %s7888_s21 = sld [smem:[#allocation93_spill]] }
 0x270   :  { %v715_v6 = vpop.f32.mrf.mxu1 }
 0x271   :  { %v6700_v14 = vadd.f32 %v5185_v9, %v715_v6 }
 0x272   :  { %v687_v7 = vpop.f32.mrf.mxu0 }
 0x273   :  { %v6689_v8 = vadd.f32 %v5186_v5, %v687_v7 }
 0x275   :  { %838 = vrot.lane.b32.xlu1 %v6689_v8, %s6221_s1 }
 0x278   :  { %v718_v10 = vpop.f32.mrf.mxu1 }
 0x279   :  { %v719_v11 = vadd.f32 %v5185_v9, %v718_v10 }
 0x27a   :  { %v690_v12 = vpop.f32.mrf.mxu0 }
 0x27b   :  { %v6694_v13 = vadd.f32 %v5186_v5, %v690_v12  ;;  %844 = vrot.lane.b32.xlu0 %v719_v11, %s6221_s1  ;;  %4807 = vmatpush.xpose.msk.msra.mxu3 %vm749_vm1, %v719_v11  ;;  %v743_v20 = vpop.f32.mrf.mxu2 }
 0x27c   :  { %v744_v25 = vadd.f32 %v5187_v21, %v743_v20 }
 0x27d   :  { %840 = vrot.lane.b32.xlu1 %v6694_v13, %s6221_s1 }
 0x27f   :  { %4808 = vmatpush.xpose.msk.msra.mxu3 %vm749_vm1, %v6700_v14 }
 0x282   :  { %4809 = vmatmul.msk.f32.vlgmr.msra.gmra.mxu3 %vm749_vm1, %v6689_v8 }
 0x283   :  { %842 = vrot.lane.b32.xlu0 %v6700_v14, %s6221_s1  ;;  %v746_v22 = vpop.f32.mrf.mxu2 }
 0x284   :  { %v747_v23 = vadd.f32 %v5187_v21, %v746_v22 }
 0x286   :  { %986 = vmatpush.msrb.mxu2 %v747_v23  ;;  %v6735_v36 = vpack.i.bf16 %v744_v25, %v747_v23 }
 0x288   :  { %987 = vmatpush.msrb.mxu2 %v744_v25 }
 0x28a   :  { %4810 = vmatmul.msk.f32.gmra.mxu3 %vm749_vm1, %v6694_v13 }
 0x2e7   :  { %v839_v17 = vpop.permute.xlu1 %838 }
 0x2ed   :  { %v845_v16 = vpop.permute.xlu0 %844 }
 0x2ee   :  { %4811 = vmatpush.xpose.msk.msrb.mxu0 %vm749_vm1, %v845_v16 }
 0x2ef   :  { %v841_v19 = vpop.permute.xlu1 %840 }
 0x2f5   :  { %v843_v18 = vpop.permute.xlu0 %842 }
 0x2f6   :  { %4812 = vmatpush.xpose.msk.msrb.mxu0 %vm749_vm1, %v843_v18 }
 0x2f9   :  { %4813 = vmatmul.msk.f32.vlgmr.msrb.gmra.mxu0 %vm749_vm1, %v839_v17 }
 0x301   :  { %4814 = vmatmul.msk.f32.gmra.mxu0 %vm749_vm1, %v841_v19 }
 0x305   :  { %v779_v37 = vpop.f32.mrf.mxu3 }
 0x306   :  { %v6748_v38 = vadd.f32 %v779_v37, %v6723_v27 }
 0x308   :  { %v786_v39 = vsel %vm785_vm3, %v6748_v38, -inf }
 0x30d   :  { %v782_v58 = vpop.f32.mrf.mxu3 }
 0x30e   :  { %v783_v59 = vadd.f32 %v782_v58, %v6731_v32 }
 0x310   :  { %v789_v60 = vsel %vm785_vm3, %v783_v59, -inf }
 0x376   :  { %v871_v28 = vpop.f32.mrf.mxu0 }
 0x377   :  { %v872_v29 = vadd.f32 %v871_v28, %v6723_v27 }
 0x379   :  { %v877_v31 = vsel %vm785_vm3, %v872_v29, -inf }
 0x37a   :  { %878 = vmax.xlane.f32.xlu2 %v877_v31 }
 0x37e   :  { %v874_v33 = vpop.f32.mrf.mxu0 }
 0x37f   :  { %v875_v34 = vadd.f32 %v874_v33, %v6731_v32 }
 0x381   :  { %v880_v35 = vsel %vm785_vm3, %v875_v34, -inf }
 0x382   :  { %881 = vmax.xlane.f32.xlu2 %v880_v35 }
 0x39a   :  { %5111 = vrot.lane.b32.xlu2 %v6735_v36, %s6221_s1 }
 0x3a2   :  { %1001 = vrot.lane.b32.xlu2 %v719_v11, %s6223_s2 }
 0x3aa   :  { %1129 = vrot.lane.b32.xlu2 %v719_v11, %s6224_s10 }
 0x3b2   :  { %999 = vrot.lane.b32.xlu2 %v6700_v14, %s6223_s2 }
 0x3ba   :  { %1123 = vrot.lane.b32.xlu2 %v6689_v8, %s6224_s10 }
 0x3c2   :  { %997 = vrot.lane.b32.xlu2 %v6694_v13, %s6223_s2 }
 0x3eb   :  { %787 = vmax.xlane.f32.xlu2 %v786_v39 }
 0x3ed   :  { %v879_v40 = vpop.xlane.xlu2 %878 }
 0x3ee   :  { %v883_v41 = vsub.f32 %v872_v29, %v879_v40 }
 0x3f0   :  { %v885_v42 = vmul.f32 1.442695, %v883_v41 }
 0x3f2   :  { %5226 = vpow2.f32 %v885_v42 }
 0x3f5   :  { %v882_v43 = vpop.xlane.xlu2 %881 }
 0x3f6   :  { %v884_v44 = vsub.f32 %v875_v34, %v882_v43 }
 0x3f8   :  { %v5227_v45 = vpop.eup %5226  ;;  %v887_v46 = vmul.f32 1.442695, %v884_v44 }
 0x3f9   :  { %v889_v47 = vmul.f32 %v5227_v45, %v6720_v24 }
 0x3fa   :  { %5228 = vpow2.f32 %v887_v46 }
 0x3fb   :  { %v891_v48 = vsel %vm785_vm3, %v889_v47, 0.0 }
 0x3fc   :  { %892 = vadd.xlane.f32.xlu0 %v891_v48 }
 0x3fd   :  { %v5112_v49 = vpop.permute.xlu2 %5111 }
 0x3fe   :  { %v5113_v50 = vunpack.i.l.bf16 %v5112_v49  ;;  %v5114_v51 = vunpack.i.h.bf16 %v5112_v49 }
 0x400   :  { %v5229_v52 = vpop.eup %5228  ;;  %957 = vmatpush.msrb.mxu1 %v5113_v50 }
 0x401   :  { %v890_v53 = vmul.f32 %v5229_v52, %v6727_v30 }
 0x402   :  { %958 = vmatpush.msrb.mxu1 %v5114_v51 }
 0x403   :  { %v894_v54 = vsel %vm785_vm3, %v890_v53, 0.0 }
 0x404   :  { %895 = vadd.xlane.f32.xlu1 %v894_v54 }
 0x405   :  { %v1002_v55 = vpop.permute.xlu2 %1001 }
 0x406   :  { %4819 = vmatpush.xpose.msk.msrb.mxu3 %vm749_vm1, %v1002_v55 }
 0x40d   :  { %v1130_v56 = vpop.permute.xlu2 %1129 }
 0x40e   :  { %4825 = vmatpush.xpose.msk.msra.mxu1 %vm749_vm1, %v1130_v56 }
 0x410   :  { %1127 = vrot.lane.b32.xlu0 %v6700_v14, %s6224_s10 }
 0x415   :  { %v1000_v57 = vpop.permute.xlu2 %999 }
 0x416   :  { %4820 = vmatpush.xpose.msk.msrb.mxu3 %vm749_vm1, %v1000_v57 }
 0x418   :  { %1125 = vrot.lane.b32.xlu0 %v6694_v13, %s6224_s10 }
 0x41d   :  { %995 = vrot.lane.b32.xlu1 %v6689_v8, %s6223_s2  ;;  %v1124_v28 = vpop.permute.xlu2 %1123 }
 0x425   :  { %v998_v31 = vpop.permute.xlu2 %997 }
 0x447   :  { %790 = vmax.xlane.f32.xlu1 %v789_v60 }
 0x45e   :  { %v788_v35 = vpop.xlane.xlu2 %787 }
 0x45f   :  { %v792_v37 = vsub.f32 %v6748_v38, %v788_v35 }
 0x461   :  { %v794_v40 = vmul.f32 1.442695, %v792_v37 }
 0x46f   :  { %v893_v61 = vpop.xlane.xlu0 %892 }
 0x470   :  { %v897_v62 = vmax.f32 %v893_v61, 1e-16 }
 0x472   :  { %5230 = vrcp.f32 %v897_v62  ;;  %v910_v6 = vand.u32 2147483648, %v897_v62  ;;  %v908_v9 = vand.u32 2147483647, %v897_v62  ;;  %vm904_vm6 = vweird.f32 %v897_v62 }
 0x474   :  { %v911_v11 = vor.u32 1.1754944e-38, %v910_v6  ;;  %vm909_vm8 = vcmp.eq.f32.partialorder %v908_v9, 8.507059e+37 }
 0x477   :  { %v896_v63 = vpop.xlane.xlu1 %895 }
 0x478   :  { %v5231_v0 = vpop.eup %5230  ;;  %v898_v1 = vmax.f32 %v896_v63, 1e-16 }
 0x479   :  { %v900_v3 = vmul.f32 %v5231_v0, %v897_v62  ;;  %vm905_vm5 = vweird.f32 %v5231_v0 }
 0x47a   :  { %5232 = vrcp.f32 %v898_v1  ;;  %vm906_vm7 = vmor %vm904_vm6, %vm905_vm5  ;;  %v925_v18 = vand.u32 2147483648, %v898_v1  ;;  %v923_v20 = vand.u32 2147483647, %v898_v1  ;;  %vm919_vm10 = vweird.f32 %v898_v1 }
 0x47b   :  { %v901_v5 = vsub.f32 1.0, %v900_v3  ;;  %5234 = vpow2.f32 %v794_v40 }
 0x47c   :  { %v926_v22 = vor.u32 1.1754944e-38, %v925_v18  ;;  %vm924_vm12 = vcmp.eq.f32.partialorder %v923_v20, 8.507059e+37 }
 0x47d   :  { %v902_v7 = vmul.f32 %v5231_v0, %v901_v5 }
 0x47f   :  { %v903_v8 = vadd.f32 %v5231_v0, %v902_v7 }
 0x480   :  { %v5233_v10 = vpop.eup %5232 }
 0x481   :  { %v915_v12 = vmul.f32 %v5233_v10, %v898_v1  ;;  %v907_v13 = vsel %vm906_vm7, %v5231_v0, %v903_v8  ;;  %vm920_vm9 = vweird.f32 %v5233_v10  ;;  %v5235_v50 = vpop.eup %5234 }
 0x482   :  { %v1128_v14 = vpop.permute.xlu0 %1127  ;;  %v912_v15 = vsel %vm909_vm8, %v911_v11, %v907_v13  ;;  %vm921_vm11 = vmor %vm919_vm10, %vm920_vm9  ;;  %v6784_v51 = vmul.f32 %v5235_v50, %v6720_v24 }
 0x483   :  { %v916_v16 = vsub.f32 1.0, %v915_v12  ;;  %4826 = vmatpush.xpose.msk.msra.mxu1 %vm749_vm1, %v1128_v14  ;;  %v913_v17 = vmul.f32 %v912_v15, %v889_v47 }
 0x484   :  { %v800_v58 = vsel %vm785_vm3, %v6784_v51, 0.0 }
 0x485   :  { %4815 = vmatmul.msk.f32.vlgmr.msrb.gmra.mxu1 %vm785_vm3, %v913_v17  ;;  %v917_v19 = vmul.f32 %v5233_v10, %v916_v16 }
 0x487   :  { %v918_v21 = vadd.f32 %v5233_v10, %v917_v19 }
 0x489   :  { %v922_v23 = vsel %vm921_vm11, %v5233_v10, %v918_v21 }
 0x48a   :  { %v927_v25 = vsel %vm924_vm12, %v926_v22, %v922_v23  ;;  %v1126_v33 = vpop.permute.xlu0 %1125 }
 0x48b   :  { %v928_v26 = vmul.f32 %v927_v25, %v890_v53 }
 0x48d   :  { %4816 = vmatmul.msk.f32.gmra.mxu1 %vm785_vm3, %v928_v26 }
 0x48f   :  { %v996_v29 = vpop.permute.xlu1 %995 }
 0x490   :  { %4821 = vmatmul.msk.f32.vlgmr.msrb.gmra.mxu3 %vm749_vm1, %v996_v29 }
 0x495   :  { %4827 = vmatmul.msk.f32.vlgmr.msra.gmra.mxu1 %vm749_vm1, %v1124_v28 }
 0x498   :  { %4822 = vmatmul.msk.f32.gmra.mxu3 %vm749_vm1, %v998_v31 }
 0x49d   :  { %4828 = vmatmul.msk.f32.gmra.mxu1 %vm749_vm1, %v1126_v33 }
 0x4ba   :  { %v791_v41 = vpop.xlane.xlu1 %790 }
 0x4bb   :  { %v793_v42 = vsub.f32 %v783_v59, %v791_v41 }
 0x4bd   :  { %v796_v46 = vmul.f32 1.442695, %v793_v42 }
 0x4bf   :  { %5236 = vpow2.f32 %v796_v46 }
 0x4c5   :  { %v5237_v56 = vpop.eup %5236 }
 0x4c6   :  { %v6793_v59 = vmul.f32 %v5237_v56, %v6727_v30  ;;  %v1253_v56 = vld [vmem:[%s7866_s3] sm:$0xff]  ;;  %s7891_s3 = sld [smem:[#allocation92_spill]] }
 0x4c7   :  { %1273 = vmatpush.msra.mxu3 %v1253_v56 }
 0x4c8   :  { %v803_v60 = vsel %vm785_vm3, %v6793_v59, 0.0  ;;  %4831 = vmatmul.msk.f32.vlgmr.msra.gmra.mxu3 %vm663_vm0, %v6674_v2 }
 0x4d0   :  { %4832 = vmatmul.msk.f32.gmra.mxu3 %vm663_vm0, %v6682_v4 }
 0x502   :  { %v6774_v34 = vpop.f32.mrf.mxu1 }
 0x50a   :  { %v6777_v39 = vpop.f32.mrf.mxu1 }
 0x512   :  { %v1156_v43 = vpop.f32.mrf.mxu1 }
 0x513   :  { %v1157_v44 = vadd.f32 %v1156_v43, %v6723_v27  ;;  %v1028_v45 = vpop.f32.mrf.mxu3 }
 0x514   :  { %v1029_v47 = vadd.f32 %v1028_v45, %v6723_v27 }
 0x515   :  { %v1162_v48 = vsel %vm785_vm3, %v1157_v44, -inf }
 0x516   :  { %1163 = vmax.xlane.f32.xlu0 %v1162_v48  ;;  %v1034_v49 = vsel %vm785_vm3, %v1029_v47, -inf }
 0x517   :  { %1035 = vmax.xlane.f32.xlu2 %v1034_v49 }
 0x51a   :  { %v1159_v38 = vpop.f32.mrf.mxu1 }
 0x51b   :  { %v1160_v52 = vadd.f32 %v1159_v38, %v6731_v32  ;;  %v1031_v53 = vpop.f32.mrf.mxu3 }
 0x51c   :  { %v1032_v54 = vadd.f32 %v1031_v53, %v6731_v32 }
 0x51d   :  { %v1165_v55 = vsel %vm785_vm3, %v1160_v52, -inf }
 0x51e   :  { %1166 = vmax.xlane.f32.xlu1 %v1165_v55  ;;  %v1037_v57 = vsel %vm785_vm3, %v1032_v54, -inf }
 0x51f   :  { %1038 = vmax.xlane.f32.xlu0 %v1037_v57  ;;  %801 = vadd.xlane.f32.xlu2 %v800_v58 }
 0x526   :  { %804 = vadd.xlane.f32.xlu1 %v803_v60 }
 0x589   :  { %v1164_v61 = vpop.xlane.xlu0 %1163 }
 0x58a   :  { %v1168_v62 = vsub.f32 %v1157_v44, %v1164_v61  ;;  %v1036_v63 = vpop.xlane.xlu2 %1035 }
 0x58b   :  { %v1040_v0 = vsub.f32 %v1029_v47, %v1036_v63 }
 0x58c   :  { %v1170_v1 = vmul.f32 1.442695, %v1168_v62 }
 0x58d   :  { %v1042_v3 = vmul.f32 1.442695, %v1040_v0 }
 0x58e   :  { %5238 = vpow2.f32 %v1170_v1 }
 0x58f   :  { %5240 = vpow2.f32 %v1042_v3 }
 0x591   :  { %v1167_v5 = vpop.xlane.xlu1 %1166 }
 0x592   :  { %v1169_v6 = vsub.f32 %v1160_v52, %v1167_v5  ;;  %v1039_v7 = vpop.xlane.xlu0 %1038  ;;  %v802_v9 = vpop.xlane.xlu2 %801 }
 0x593   :  { %v1041_v8 = vsub.f32 %v1032_v54, %v1039_v7  ;;  %v806_v10 = vmax.f32 %v802_v9, 1e-16 }
 0x594   :  { %v5239_v11 = vpop.eup %5238  ;;  %v1172_v12 = vmul.f32 1.442695, %v1169_v6 }
 0x595   :  { %v5241_v13 = vpop.eup %5240  ;;  %v1044_v14 = vmul.f32 1.442695, %v1041_v8  ;;  %5242 = vrcp.f32 %v806_v10  ;;  %v6798_v15 = vmul.f32 %v5239_v11, %v6720_v24  ;;  %v819_v29 = vand.u32 2147483648, %v806_v10 }
 0x596   :  { %5244 = vpow2.f32 %v1172_v12  ;;  %v6801_v16 = vmul.f32 %v5241_v13, %v6720_v24  ;;  %v817_v37 = vand.u32 2147483647, %v806_v10  ;;  %vm813_vm14 = vweird.f32 %v806_v10 }
 0x597   :  { %5246 = vpow2.f32 %v1044_v14  ;;  %v1176_v17 = vsel %vm785_vm3, %v6798_v15, 0.0  ;;  %v820_v43 = vor.u32 1.1754944e-38, %v819_v29 }
 0x598   :  { %v1048_v18 = vsel %vm785_vm3, %v6801_v16, 0.0  ;;  %1177 = vadd.xlane.f32.xlu0 %v1176_v17  ;;  %vm818_vm2 = vcmp.eq.f32.partialorder %v817_v37, 8.507059e+37 }
 0x599   :  { %v805_v19 = vpop.xlane.xlu1 %804  ;;  %1049 = vadd.xlane.f32.xlu2 %v1048_v18 }
 0x59a   :  { %v807_v20 = vmax.f32 %v805_v19, 1e-16 }
 0x59b   :  { %v5243_v21 = vpop.eup %5242 }
 0x59c   :  { %v5245_v22 = vpop.eup %5244  ;;  %v809_v23 = vmul.f32 %v5243_v21, %v806_v10  ;;  %5248 = vrcp.f32 %v807_v20  ;;  %vm814_vm13 = vweird.f32 %v5243_v21  ;;  %v834_v47 = vand.u32 2147483648, %v807_v20 }
 0x59d   :  { %v5247_v25 = vpop.eup %5246  ;;  %v6808_v26 = vmul.f32 %v5245_v22, %v6727_v30  ;;  %vm815_vm15 = vmor %vm813_vm14, %vm814_vm13  ;;  %v832_v49 = vand.u32 2147483647, %v807_v20  ;;  %vm828_vm5 = vweird.f32 %v807_v20 }
 0x59e   :  { %v810_v24 = vsub.f32 1.0, %v809_v23  ;;  %v6811_v28 = vmul.f32 %v5247_v25, %v6727_v30  ;;  %v835_v38 = vor.u32 1.1754944e-38, %v834_v47 }
 0x59f   :  { %v1179_v31 = vsel %vm785_vm3, %v6808_v26, 0.0  ;;  %vm833_vm7 = vcmp.eq.f32.partialorder %v832_v49, 8.507059e+37 }
 0x5a0   :  { %v811_v33 = vmul.f32 %v5243_v21, %v810_v24  ;;  %1180 = vadd.xlane.f32.xlu1 %v1179_v31  ;;  %v1051_v35 = vsel %vm785_vm3, %v6811_v28, 0.0 }
 0x5a1   :  { %1052 = vadd.xlane.f32.xlu0 %v1051_v35 }
 0x5a2   :  { %v5249_v40 = vpop.eup %5248  ;;  %v812_v41 = vadd.f32 %v5243_v21, %v811_v33 }
 0x5a3   :  { %v824_v42 = vmul.f32 %v5249_v40, %v807_v20  ;;  %vm829_vm4 = vweird.f32 %v5249_v40 }
 0x5a4   :  { %v816_v30 = vsel %vm815_vm15, %v5243_v21, %v812_v41  ;;  %vm830_vm6 = vmor %vm828_vm5, %vm829_vm4 }
 0x5a5   :  { %v825_v44 = vsub.f32 1.0, %v824_v42  ;;  %v821_v45 = vsel %vm818_vm2, %v820_v43, %v816_v30 }
 0x5a6   :  { %v822_v46 = vmul.f32 %v821_v45, %v6784_v51 }
 0x5a7   :  { %v826_v48 = vmul.f32 %v5249_v40, %v825_v44 }
 0x5a8   :  { %4817 = vmatmul.msk.f32.vlgmr.msrb.gmra.mxu2 %vm785_vm3, %v822_v46 }
 0x5a9   :  { %v827_v50 = vadd.f32 %v5249_v40, %v826_v48 }
 0x5ab   :  { %v831_v52 = vsel %vm830_vm6, %v5249_v40, %v827_v50 }
 0x5ac   :  { %v836_v53 = vsel %vm833_vm7, %v835_v38, %v831_v52 }
 0x5ad   :  { %v837_v54 = vmul.f32 %v836_v53, %v6793_v59 }
 0x5b0   :  { %4818 = vmatmul.msk.f32.gmra.mxu2 %vm785_vm3, %v837_v54 }
 0x5b1   :  { %5116 = vrot.lane.b32.xlu2 %v6735_v36, %s6224_s10  ;;  %s7890_s10 = sld [smem:[#allocation94_spill]] }
 0x5b9   :  { %5121 = vrot.lane.b32.xlu1 %v6735_v36, %s6223_s2  ;;  %s7889_s2 = sld [smem:[#allocation91_spill]] }
 0x60b   :  { %v1178_v51 = vpop.xlane.xlu0 %1177 }
 0x60c   :  { %v1050_v55 = vpop.xlane.xlu2 %1049  ;;  %v1182_v57 = vmax.f32 %v1178_v51, 1e-16 }
 0x60d   :  { %v6826_v58 = vmax.f32 %v1050_v55, 1e-16 }
 0x60e   :  { %5250 = vrcp.f32 %v1182_v57  ;;  %v1195_v6 = vand.u32 2147483648, %v1182_v57  ;;  %v1193_v8 = vand.u32 2147483647, %v1182_v57  ;;  %vm1189_vm9 = vweird.f32 %v1182_v57 }
 0x60f   :  { %5252 = vrcp.f32 %v6826_v58  ;;  %vm1061_vm4 = vweird.f32 %v6826_v58  ;;  %v1065_v41 = vand.u32 2147483647, %v6826_v58 }
 0x610   :  { %v1196_v12 = vor.u32 1.1754944e-38, %v1195_v6  ;;  %vm1194_vm11 = vcmp.eq.f32.partialorder %v1193_v8, 8.507059e+37 }
 0x611   :  { %vm1066_vm6 = vcmp.eq.f32.partialorder %v1065_v41, 8.507059e+37  ;;  %v1442_v41 = vld [vmem:[%s7868_s7] sm:$0xff] }
 0x613   :  { %v1181_v59 = vpop.xlane.xlu1 %1180 }
 0x614   :  { %v1183_v60 = vmax.f32 %v1181_v59, 1e-16  ;;  %v1053_v61 = vpop.xlane.xlu0 %1052  ;;  %v5117_v62 = vpop.permute.xlu2 %5116 }
 0x615   :  { %v5251_v63 = vpop.eup %5250  ;;  %v6831_v0 = vmax.f32 %v1053_v61, 1e-16  ;;  %v5118_v36 = vunpack.i.l.bf16 %v5117_v62  ;;  %v5119_v5 = vunpack.i.h.bf16 %v5117_v62 }
 0x616   :  { %v5253_v1 = vpop.eup %5252  ;;  %v1185_v3 = vmul.f32 %v5251_v63, %v1182_v57  ;;  %5254 = vrcp.f32 %v1183_v60  ;;  %vm1190_vm8 = vweird.f32 %v5251_v63  ;;  %v1208_v21 = vand.u32 2147483647, %v1183_v60  ;;  %v1275_v57 = vpop.f32.mrf.mxu3 }
 0x617   :  { %1240 = vmatpush.msra.mxu2 %v5118_v36  ;;  %5256 = vrcp.f32 %v6831_v0  ;;  %v1057_v7 = vmul.f32 %v5253_v1, %v6826_v58  ;;  %vm1191_vm10 = vmor %vm1189_vm9, %vm1190_vm8  ;;  %v1210_v22 = vand.u32 2147483648, %v1183_v60  ;;  %vm1204_vm13 = vweird.f32 %v1183_v60  ;;  %v5190_v36 = vld [vmem:[#allocation7] ss:$0 sm:$0xff] }
 0x618   :  { %v1186_v2 = vsub.f32 1.0, %v1185_v3  ;;  %vm1062_vm14 = vweird.f32 %v5253_v1  ;;  %vm1209_vm2 = vcmp.eq.f32.partialorder %v1208_v21, 8.507059e+37  ;;  %v1082_v50 = vand.u32 2147483648, %v6831_v0 }
 0x619   :  { %1241 = vmatpush.msra.mxu2 %v5119_v5  ;;  %v1058_v13 = vsub.f32 1.0, %v1057_v7  ;;  %v1211_v31 = vor.u32 1.1754944e-38, %v1210_v22  ;;  %vm1063_vm5 = vmor %vm1061_vm4, %vm1062_vm14  ;;  %vm1076_vm8 = vweird.f32 %v6831_v0 }
 0x61a   :  { %v1187_v9 = vmul.f32 %v5251_v63, %v1186_v2  ;;  %v1083_v53 = vor.u32 1.1754944e-38, %v1082_v50 }
 0x61b   :  { %v1059_v23 = vmul.f32 %v5253_v1, %v1058_v13 }
 0x61c   :  { %v5255_v10 = vpop.eup %5254  ;;  %v1188_v11 = vadd.f32 %v5251_v63, %v1187_v9 }
 0x61d   :  { %v1200_v14 = vmul.f32 %v5255_v10, %v1183_v60  ;;  %v5257_v4 = vpop.eup %5256  ;;  %vm1205_vm12 = vweird.f32 %v5255_v10  ;;  %v1060_v33 = vadd.f32 %v5253_v1, %v1059_v23  ;;  %v1408_v23 = vld [vmem:[%s7867_s25 + $0x18] sm:$0xff] }
 0x61e   :  { %v1192_v17 = vsel %vm1191_vm10, %v5251_v63, %v1188_v11  ;;  %v1072_v25 = vmul.f32 %v5257_v4, %v6831_v0  ;;  %vm1206_vm15 = vmor %vm1204_vm13, %vm1205_vm12  ;;  %vm1077_vm7 = vweird.f32 %v5257_v4  ;;  %v5189_v63 = vld [vmem:[#allocation8] ss:$0 sm:$0xff]  ;;  %v1278_v3 = vpop.f32.mrf.mxu3 }
 0x61f   :  { %v1201_v18 = vsub.f32 1.0, %v1200_v14  ;;  %v1197_v19 = vsel %vm1194_vm11, %v1196_v12, %v1192_v17  ;;  %v1064_v43 = vsel %vm1063_vm5, %v5253_v1, %v1060_v33  ;;  %vm1078_vm9 = vmor %vm1076_vm8, %vm1077_vm7  ;;  %v1475_v33 = vld [vmem:[%s7869_s11 + $0x10] sm:$0xff] }
 0x620   :  { %v1198_v20 = vmul.f32 %v1197_v19, %v6798_v15  ;;  %v1073_v35 = vsub.f32 1.0, %v1072_v25  ;;  %v1067_v15 = vand.u32 2147483648, %v6826_v58  ;;  %v1445_v25 = vld [vmem:[%s7868_s7 + $0x18] sm:$0xff] }
 0x621   :  { %v1202_v24 = vmul.f32 %v5255_v10, %v1201_v18  ;;  %1462 = vmatpush.msrb.mxu1 %v1445_v25 }
 0x622   :  { %4829 = vmatmul.msk.f32.vlgmr.msra.gmra.mxu2 %vm785_vm3, %v1198_v20  ;;  %v1074_v30 = vmul.f32 %v5257_v4, %v1073_v35  ;;  %v1068_v44 = vor.u32 1.1754944e-38, %v1067_v15  ;;  %v1406_v35 = vld [vmem:[%s7867_s25 + $0x8] sm:$0xff] }
 0x623   :  { %v1203_v29 = vadd.f32 %v5255_v10, %v1202_v24  ;;  %v1476_v24 = vld [vmem:[%s7869_s11 + $0x18] sm:$0xff]  ;;  %v1474_v15 = vld [vmem:[%s7869_s11 + $0x8] sm:$0xff] }
 0x624   :  { %v1069_v47 = vsel %vm1066_vm6, %v1068_v44, %v1064_v43  ;;  %v1075_v48 = vadd.f32 %v5257_v4, %v1074_v30  ;;  %1493 = vmatpush.msrb.mxu2 %v1476_v24 }
 0x625   :  { %v1207_v37 = vsel %vm1206_vm15, %v5255_v10, %v1203_v29  ;;  %v1070_v38 = vmul.f32 %v1069_v47, %v6801_v16  ;;  %v5188_v16 = vld [vmem:[#allocation5] ss:$0 sm:$0xff]  ;;  %v1407_v29 = vld [vmem:[%s7867_s25 + $0x10] sm:$0xff] }
 0x626   :  { %v1212_v40 = vsel %vm1209_vm2, %v1211_v31, %v1207_v37  ;;  %v1079_v52 = vsel %vm1078_vm9, %v5257_v4, %v1075_v48  ;;  %v6853_v62 = vadd.f32 %v5188_v16, %v1275_v57  ;;  %v1444_v31 = vld [vmem:[%s7868_s7 + $0x10] sm:$0xff]  ;;  %v1443_v37 = vld [vmem:[%s7868_s7 + $0x8] sm:$0xff]  ;;  %1494 = vmatpush.msrb.mxu2 %v1475_v33  ;;  %s7894_s7 = sld [smem:[#allocation97_spill]] }
 0x627   :  { %v1213_v42 = vmul.f32 %v1212_v40, %v6808_v26  ;;  %v1080_v26 = vand.u32 2147483647, %v6831_v0  ;;  %1463 = vmatpush.msrb.mxu1 %v1444_v31  ;;  %v1405_v40 = vld [vmem:[%s7867_s25] sm:$0xff]  ;;  %s7893_s25 = sld [smem:[#allocation96_spill]] }
 0x628   :  { %1495 = vmatpush.msrb.mxu2 %v1474_v15 }
 0x629   :  { %vm1081_vm10 = vcmp.eq.f32.partialorder %v1080_v26, 8.507059e+37  ;;  %1464 = vmatpush.msrb.mxu1 %v1443_v37 }
 0x62a   :  { %4830 = vmatmul.msk.f32.gmra.mxu2 %vm785_vm3, %v1213_v42  ;;  %v1084_v54 = vsel %vm1081_vm10, %v1083_v53, %v1079_v52  ;;  %v1473_v42 = vld [vmem:[%s7869_s11] sm:$0xff]  ;;  %s7895_s11 = sld [smem:[#allocation98_spill]] }
 0x62b   :  { %v5122_v45 = vpop.permute.xlu1 %5121  ;;  %v1085_v51 = vmul.f32 %v1084_v54, %v6811_v28  ;;  %v989_v55 = vpop.f32.mrf.mxu2  ;;  %v1291_v28 = vmul.f32 %v5189_v63, %v6853_v62  ;;  %1465 = vmatpush.msrb.mxu1 %v1442_v41  ;;  %1496 = vmatpush.msrb.mxu2 %v1473_v42 }
 0x62c   :  { %v5123_v46 = vunpack.i.l.bf16 %v5122_v45  ;;  %v5124_v49 = vunpack.i.h.bf16 %v5122_v45  ;;  %v990_v58 = vadd.f32 %v989_v55, %v6774_v34  ;;  %v6860_v34 = vadd.f32 %v5188_v16, %v1278_v3 }
 0x62e   :  { %1112 = vmatpush.msra.mxu0 %v5123_v46  ;;  %v1292_v13 = vmul.f32 %v5189_v63, %v6860_v34 }
 0x630   :  { %1113 = vmatpush.msra.mxu0 %v5124_v49 }
 0x631   :  { %4823 = vmatmul.msk.f32.vlgmr.msra.gmra.mxu0 %vm785_vm3, %v1070_v38 }
 0x632   :  { %1431 = vmatpush.msrb.mxu0 %v1408_v23 }
 0x633   :  { %v992_v56 = vpop.f32.mrf.mxu2 }
 0x634   :  { %v993_v5 = vadd.f32 %v992_v56, %v6777_v39  ;;  %1432 = vmatpush.msrb.mxu0 %v1407_v29 }
 0x636   :  { %1433 = vmatpush.msrb.mxu0 %v1406_v35 }
 0x638   :  { %1434 = vmatpush.msrb.mxu0 %v1405_v40 }
 0x639   :  { %4824 = vmatmul.msk.f32.gmra.mxu0 %vm785_vm3, %v1085_v51 }
 0x6a5   :  { %v1243_v59 = vpop.f32.mrf.mxu2 }
 0x6ad   :  { %v1246_v8 = vpop.f32.mrf.mxu2 }
 0x6ae   :  { %v1115_v60 = vpop.f32.mrf.mxu0 }
 0x6af   :  { %v1121_v61 = vadd.f32 %v1115_v60, %v990_v58  ;;  %v6225_v58 = vmov 16.0  }
 0x6b1   :  { %v1249_v0 = vadd.f32 %v1243_v59, %v1121_v61 }
 0x6b3   :  { %v6855_v1 = vmul.f32 0.25, %v1249_v0 }
 0x6b5   :  { %v1285_v2 = vmul.f32 %v5190_v36, %v6855_v1 }
 0x6b6   :  { %v1118_v6 = vpop.f32.mrf.mxu0 }
 0x6b7   :  { %v1122_v7 = vadd.f32 %v1118_v6, %v993_v5  ;;  %v1293_v9 = vadd.f32 %v1291_v28, %v1285_v2 }
 0x6b9   :  { %v1250_v10 = vadd.f32 %v1246_v8, %v1122_v7  ;;  %v1295_v11 = vsel %vm749_vm1, %v1293_v9, 0.0 }
 0x6ba   :  { %1296 = vadd.xlane.f32.xlu0 %v1295_v11 }
 0x6bb   :  { %v6863_v12 = vmul.f32 0.25, %v1250_v10 }
 0x6bd   :  { %v1286_v39 = vmul.f32 %v5190_v36, %v6863_v12 }
 0x6bf   :  { %v1294_v14 = vadd.f32 %v1292_v13, %v1286_v39 }
 0x6c1   :  { %v1298_v4 = vsel %vm749_vm1, %v1294_v14, 0.0 }
 0x6c2   :  { %1299 = vadd.xlane.f32.xlu0 %v1298_v4 }
 0x72d   :  { %v1297_v17 = vpop.xlane.xlu0 %1296 }
 0x72e   :  { %v4833_v18 = vmul.f32 -1.442695, %v1297_v17 }
 0x730   :  { %5258 = vpow2.f32 %v4833_v18 }
 0x735   :  { %v1300_v19 = vpop.xlane.xlu0 %1299 }
 0x736   :  { %v5259_v20 = vpop.eup %5258  ;;  %v4834_v21 = vmul.f32 -1.442695, %v1300_v19 }
 0x737   :  { %v1307_v22 = vadd.f32 1.0, %v5259_v20 }
 0x738   :  { %5260 = vpow2.f32 %v4834_v21 }
 0x739   :  { %5262 = vrcp.f32 %v1307_v22  ;;  %v1320_v47 = vand.u32 2147483648, %v1307_v22  ;;  %v1318_v49 = vand.u32 2147483647, %v1307_v22  ;;  %vm1314_vm12 = vweird.f32 %v1307_v22 }
 0x73b   :  { %v1321_v26 = vor.u32 1.1754944e-38, %v1320_v47  ;;  %vm1319_vm14 = vcmp.eq.f32.partialorder %v1318_v49, 8.507059e+37 }
 0x73e   :  { %v5261_v43 = vpop.eup %5260 }
 0x73f   :  { %v5263_v30 = vpop.eup %5262  ;;  %v1308_v44 = vadd.f32 1.0, %v5261_v43 }
 0x740   :  { %v1310_v45 = vmul.f32 %v5263_v30, %v1307_v22  ;;  %vm1315_vm11 = vweird.f32 %v5263_v30 }
 0x741   :  { %5264 = vrcp.f32 %v1308_v44  ;;  %vm1316_vm13 = vmor %vm1314_vm12, %vm1315_vm11  ;;  %v1335_v56 = vand.u32 2147483648, %v1308_v44  ;;  %v1333_v16 = vand.u32 2147483647, %v1308_v44  ;;  %vm1329_vm2 = vweird.f32 %v1308_v44 }
 0x742   :  { %v1311_v46 = vsub.f32 1.0, %v1310_v45  ;;  %5266 = vrcp.f32 %v6225_v58 }
 0x743   :  { %v1336_v61 = vor.u32 1.1754944e-38, %v1335_v56  ;;  %vm1334_vm5 = vcmp.eq.f32.partialorder %v1333_v16, 8.507059e+37  ;;  %v5194_v16 = vld [vmem:[#allocation11] ss:$0 sm:$0xff] }
 0x744   :  { %v1312_v48 = vmul.f32 %v5263_v30, %v1311_v46 }
 0x746   :  { %v1313_v50 = vadd.f32 %v5263_v30, %v1312_v48 }
 0x747   :  { %v5265_v38 = vpop.eup %5264 }
 0x748   :  { %v1317_v52 = vsel %vm1316_vm13, %v5263_v30, %v1313_v50  ;;  %v1325_v53 = vmul.f32 %v5265_v38, %v1308_v44  ;;  %vm1330_vm15 = vweird.f32 %v5265_v38  ;;  %v5267_v5 = vpop.eup %5266  ;;  %v5191_v50 = vld [vmem:[%s7870_s20] ss:$0 sm:$0xff]  ;;  %s7896_s20 = sld [smem:[#allocation100_spill]] }
 0x749   :  { %v1322_v54 = vsel %vm1319_vm14, %v1321_v26, %v1317_v52  ;;  %vm1331_vm4 = vmor %vm1329_vm2, %vm1330_vm15  ;;  %v1359_v8 = vmul.f32 16.0, %v5267_v5  ;;  %vm1363_vm6 = vweird.f32 %v5267_v5  ;;  %v5192_v52 = vld [vmem:[%s7871_s30] ss:$0 sm:$0xff]  ;;  %s7897_s30 = sld [smem:[#allocation99_spill]] }
 0x74a   :  { %v1341_v51 = vsub.f32 1.0, %v1322_v54  ;;  %v1326_v55 = vsub.f32 1.0, %v1325_v53  ;;  %v1339_v63 = vmul.f32 %v1322_v54, %v6853_v62 }
 0x74b   :  { %v1360_v13 = vsub.f32 1.0, %v1359_v8 }
 0x74c   :  { %v1327_v57 = vmul.f32 %v5265_v38, %v1326_v55  ;;  %v1343_v59 = vmul.f32 %v1341_v51, %v6855_v1 }
 0x74d   :  { %v1361_v14 = vmul.f32 %v5267_v5, %v1360_v13 }
 0x74e   :  { %v1328_v60 = vadd.f32 %v5265_v38, %v1327_v57  ;;  %v1345_v3 = vadd.f32 %v1343_v59, %v1339_v63  ;;  %v5193_v57 = vld [vmem:[#allocation10] ss:$0 sm:$0xff] }
 0x74f   :  { %v1362_v18 = vadd.f32 %v5267_v5, %v1361_v14 }
 0x750   :  { %v1332_v0 = vsel %vm1331_vm4, %v5265_v38, %v1328_v60  ;;  %v1347_v9 = vmax.f32 %v1345_v3, 0.0 }
 0x751   :  { %v1337_v36 = vsel %vm1334_vm5, %v1336_v61, %v1332_v0  ;;  %v6886_v20 = vsel %vm1363_vm6, %v5267_v5, %v1362_v18  ;;  %v5195_v5 = vld [vmem:[#allocation13] ss:$0 sm:$0xff] }
 0x752   :  { %v1342_v28 = vsub.f32 1.0, %v1337_v36  ;;  %v1340_v2 = vmul.f32 %v1337_v36, %v6860_v34  ;;  %v1349_v10 = vsel %vm749_vm1, %v1347_v9, 0.0 }
 0x754   :  { %v1344_v6 = vmul.f32 %v1342_v28, %v6863_v12 }
 0x756   :  { %v1346_v7 = vadd.f32 %v1344_v6, %v1340_v2 }
 0x758   :  { %v1348_v1 = vmax.f32 %v1346_v7, 0.0 }
 0x75a   :  { %v1350_v11 = vsel %vm749_vm1, %v1348_v1, 0.0 }
 0x75b   :  { %v1351_v62 = vadd.f32 %v1350_v11, %v1349_v10 }
 0x75d   :  { %v1352_v39 = vrot.slane %v1351_v62, 4 }
 0x75f   :  { %v1353_v4 = vadd.f32 %v1352_v39, %v1351_v62 }
 0x761   :  { %v1354_v17 = vrot.slane %v1353_v4, 2 }
 0x763   :  { %v1355_v19 = vadd.f32 %v1354_v17, %v1353_v4 }
 0x765   :  { %v1356_v34 = vrot.slane %v1355_v19, 1 }
 0x767   :  { %v1357_v12 = vadd.f32 %v1356_v34, %v1355_v19 }
 0x769   :  { %v1365_v21 = vmul.f32 %v6886_v20, %v1357_v12 }
 0x76b   :  { %v1366_v22 = vsub.f32 %v1347_v9, %v1365_v21  ;;  %v1367_v23 = vsub.f32 %v1348_v1, %v1365_v21 }
 0x76d   :  { %v1368_v25 = vmul.f32 %v1366_v22, %v1366_v22  ;;  %v1369_v24 = vmul.f32 %v1367_v23, %v1367_v23 }
 0x76f   :  { %v1370_v29 = vsel %vm749_vm1, %v1368_v25, 0.0  ;;  %v1371_v31 = vsel %vm749_vm1, %v1369_v24, 0.0 }
 0x770   :  { %v1372_v33 = vadd.f32 %v1371_v31, %v1370_v29 }
 0x772   :  { %v1373_v35 = vrot.slane %v1372_v33, 4 }
 0x774   :  { %v1374_v37 = vadd.f32 %v1373_v35, %v1372_v33  ;;  %v2009_v33 = vld [vmem:[%s7872_s5 + $0x18] sm:$0xff]  ;;  %v2008_v35 = vld [vmem:[%s7872_s5 + $0x10] sm:$0xff] }
 0x776   :  { %v1375_v15 = vrot.slane %v1374_v37, 2 }
 0x778   :  { %v1376_v40 = vadd.f32 %v1375_v15, %v1374_v37 }
 0x77a   :  { %v1377_v41 = vrot.slane %v1376_v40, 1 }
 0x77c   :  { %v1378_v42 = vadd.f32 %v1377_v41, %v1376_v40  ;;  %v2007_v40 = vld [vmem:[%s7872_s5 + $0x8] sm:$0xff]  ;;  %v6957_v41 = vld [vmem:[%s7865_s28] sm:$0xff] }
 0x77e   :  { %v1379_v43 = vmul.f32 %v1378_v42, %v6886_v20 }
 0x780   :  { %v1380_v30 = vadd.f32 1e-05, %v1379_v43 }
 0x782   :  { %5268 = vrsqrt.f32 %v1380_v30  ;;  %vm1387_vm8 = vweird.f32 %v1380_v30 }
 0x788   :  { %v5269_v44 = vpop.eup %5268 }
 0x789   :  { %v1382_v45 = vmul.f32 %v5269_v44, %v1380_v30  ;;  %vm1388_vm7 = vweird.f32 %v5269_v44 }
 0x78a   :  { %vm1389_vm9 = vmor %vm1387_vm8, %vm1388_vm7 }
 0x78b   :  { %v1383_v46 = vmul.f32 %v5269_v44, %v1382_v45 }
 0x78d   :  { %v1384_v47 = vmul.f32 0.5, %v1383_v46 }
 0x78f   :  { %v1385_v48 = vsub.f32 1.5, %v1384_v47 }
 0x791   :  { %v1386_v49 = vmul.f32 %v5269_v44, %v1385_v48  ;;  %v6963_v48 = vld [vmem:[%s7865_s28 + $0x8] sm:$0xff] }
 0x793   :  { %v1390_v38 = vsel %vm1389_vm9, %v5269_v44, %v1386_v49  ;;  %v2006_v44 = vld [vmem:[%s7872_s5] sm:$0xff]  ;;  %s7900_s5 = sld [smem:[#allocation62_spill]] }
 0x794   :  { %v1391_v26 = vmul.f32 %v1390_v38, %v1366_v22  ;;  %v1392_v51 = vmul.f32 %v1390_v38, %v1367_v23 }
 0x796   :  { %v1397_v53 = vmul.f32 %v5191_v50, %v1391_v26  ;;  %v1398_v55 = vmul.f32 %v5191_v50, %v1392_v51 }
 0x798   :  { %v6894_v54 = vadd.f32 %v5192_v52, %v1397_v53  ;;  %v6902_v56 = vadd.f32 %v5192_v52, %v1398_v55 }
 0x79a   :  { %4835 = vmatmul.msk.f32.vlgmr.msrb.gmra.mxu0 %vm749_vm1, %v6894_v54  ;;  %4837 = vmatmul.msk.f32.vlgmr.msrb.gmra.mxu1 %vm749_vm1, %v6894_v54 }
 0x79b   :  { %4839 = vmatmul.msk.f32.vlgmr.msrb.gmra.mxu2 %vm749_vm1, %v6894_v54 }
 0x7a2   :  { %4836 = vmatmul.msk.f32.gmra.mxu0 %vm749_vm1, %v6902_v56  ;;  %4838 = vmatmul.msk.f32.gmra.mxu1 %vm749_vm1, %v6902_v56 }
 0x7a3   :  { %4840 = vmatmul.msk.f32.gmra.mxu2 %vm749_vm1, %v6902_v56 }
 0x817   :  { %v1436_v58 = vpop.f32.mrf.mxu0  ;;  %v1467_v59 = vpop.f32.mrf.mxu1 }
 0x818   :  { %v6910_v60 = vadd.f32 %v5193_v57, %v1436_v58  ;;  %v1468_v61 = vadd.f32 %v5194_v16, %v1467_v59 }
 0x81a   :  { %1595 = vrot.lane.b32.xlu2 %v1468_v61, %s6226_s14  ;;  %1591 = vrot.lane.b32.xlu1 %v6910_v60, %s6226_s14 }
 0x81e   :  { %v1498_v63 = vpop.f32.mrf.mxu2 }
 0x81f   :  { %v1439_v0 = vpop.f32.mrf.mxu0  ;;  %v1470_v36 = vpop.f32.mrf.mxu1  ;;  %v1499_v6 = vadd.f32 %v5195_v5, %v1498_v63 }
 0x820   :  { %v6915_v28 = vadd.f32 %v5193_v57, %v1439_v0  ;;  %v1471_v3 = vadd.f32 %v5194_v16, %v1470_v36 }
 0x822   :  { %1597 = vrot.lane.b32.xlu0 %v1471_v3, %s6226_s14  ;;  %4841 = vmatpush.xpose.msk.msrb.mxu3 %vm785_vm3, %v1471_v3 }
 0x823   :  { %1593 = vrot.lane.b32.xlu2 %v6915_v28, %s6226_s14 }
 0x826   :  { %v1501_v2 = vpop.f32.mrf.mxu2  ;;  %4842 = vmatpush.xpose.msk.msrb.mxu3 %vm785_vm3, %v1468_v61 }
 0x827   :  { %v1502_v7 = vadd.f32 %v5195_v5, %v1501_v2 }
 0x829   :  { %1739 = vmatpush.msra.mxu2 %v1502_v7  ;;  %4843 = vmatmul.msk.f32.vlgmr.msrb.gmra.mxu3 %vm785_vm3, %v6910_v60  ;;  %v6924_v9 = vpack.i.bf16 %v1499_v6, %v1502_v7 }
 0x82a   :  { %1754 = vrot.lane.b32.xlu0 %v1471_v3, %s6221_s1 }
 0x82b   :  { %1740 = vmatpush.msra.mxu2 %v1499_v6 }
 0x831   :  { %4844 = vmatmul.msk.f32.gmra.mxu3 %vm785_vm3, %v6915_v28 }
 0x832   :  { %1752 = vrot.lane.b32.xlu0 %v1468_v61, %s6221_s1 }
 0x874   :  { %v1596_v1 = vpop.permute.xlu2 %1595 }
 0x87d   :  { %v1594_v13 = vpop.permute.xlu2 %1593 }
 0x88c   :  { %v1592_v10 = vpop.permute.xlu1 %1591 }
 0x894   :  { %v1598_v8 = vpop.permute.xlu0 %1597 }
 0x895   :  { %4845 = vmatpush.xpose.msk.msra.mxu0 %vm785_vm3, %v1598_v8 }
 0x899   :  { %4846 = vmatpush.xpose.msk.msra.mxu0 %vm785_vm3, %v1596_v1 }
 0x89c   :  { %v1755_v11 = vpop.permute.xlu0 %1754  ;;  %4847 = vmatmul.msk.f32.vlgmr.msra.gmra.mxu0 %vm785_vm3, %v1592_v10 }
 0x89d   :  { %4853 = vmatpush.xpose.msk.msra.mxu3 %vm785_vm3, %v1755_v11 }
 0x8a4   :  { %v1753_v62 = vpop.permute.xlu0 %1752  ;;  %4848 = vmatmul.msk.f32.gmra.mxu0 %vm785_vm3, %v1594_v13 }
 0x8a5   :  { %4854 = vmatpush.xpose.msk.msra.mxu3 %vm785_vm3, %v1753_v62 }
 0x8a9   :  { %2026 = vmatpush.msrb.mxu3 %v2009_v33 }
 0x8ab   :  { %2027 = vmatpush.msrb.mxu3 %v2008_v35 }
 0x8ac   :  { %v1533_v34 = vpop.f32.mrf.mxu3 }
 0x8ad   :  { %2028 = vmatpush.msrb.mxu3 %v2007_v40  ;;  %v1534_v51 = vadd.f32 %v1533_v34, %v6723_v27 }
 0x8af   :  { %2029 = vmatpush.msrb.mxu3 %v2006_v44  ;;  %v1539_v55 = vsel %vm785_vm3, %v1534_v51, -inf }
 0x8b4   :  { %v1536_v12 = vpop.f32.mrf.mxu3 }
 0x8b5   :  { %v6949_v21 = vadd.f32 %v1536_v12, %v6731_v32 }
 0x8b7   :  { %v1542_v22 = vsel %vm785_vm3, %v6949_v21, -inf }
 0x919   :  { %v1624_v39 = vpop.f32.mrf.mxu0 }
 0x91a   :  { %v1625_v14 = vadd.f32 %v1624_v39, %v6723_v27 }
 0x91c   :  { %v1630_v4 = vsel %vm785_vm3, %v1625_v14, -inf }
 0x91d   :  { %1631 = vmax.xlane.f32.xlu1 %v1630_v4 }
 0x921   :  { %v1627_v17 = vpop.f32.mrf.mxu0 }
 0x922   :  { %v1628_v18 = vadd.f32 %v1627_v17, %v6731_v32 }
 0x924   :  { %v1633_v19 = vsel %vm785_vm3, %v1628_v18, -inf }
 0x925   :  { %1634 = vmax.xlane.f32.xlu2 %v1633_v19 }
 0x936   :  { %1882 = vrot.lane.b32.xlu1 %v1471_v3, %s6227_s15 }
 0x93d   :  { %5126 = vrot.lane.b32.xlu2 %v6924_v9, %s6226_s14 }
 0x93e   :  { %1748 = vrot.lane.b32.xlu1 %v6910_v60, %s6221_s1 }
 0x945   :  { %1880 = vrot.lane.b32.xlu2 %v1468_v61, %s6227_s15 }
 0x94d   :  { %1750 = vrot.lane.b32.xlu2 %v6915_v28, %s6221_s1 }
 0x976   :  { %1543 = vmax.xlane.f32.xlu2 %v1542_v22 }
 0x990   :  { %v1632_v23 = vpop.xlane.xlu1 %1631 }
 0x991   :  { %v1636_v25 = vsub.f32 %v1625_v14, %v1632_v23 }
 0x993   :  { %v1638_v24 = vmul.f32 1.442695, %v1636_v25 }
 0x995   :  { %5270 = vpow2.f32 %v1638_v24 }
 0x998   :  { %v1635_v29 = vpop.xlane.xlu2 %1634 }
 0x999   :  { %v1637_v31 = vsub.f32 %v1628_v18, %v1635_v29 }
 0x99b   :  { %v5271_v37 = vpop.eup %5270  ;;  %v1640_v15 = vmul.f32 1.442695, %v1637_v31 }
 0x99c   :  { %v1642_v42 = vmul.f32 %v6957_v41, %v5271_v37 }
 0x99d   :  { %5272 = vpow2.f32 %v1640_v15 }
 0x99e   :  { %v1644_v43 = vsel %vm785_vm3, %v1642_v42, 0.0 }
 0x99f   :  { %1645 = vadd.xlane.f32.xlu0 %v1644_v43 }
 0x9a0   :  { %v5127_v30 = vpop.permute.xlu2 %5126 }
 0x9a1   :  { %v5128_v45 = vunpack.i.l.bf16 %v5127_v30  ;;  %v5129_v47 = vunpack.i.h.bf16 %v5127_v30 }
 0x9a3   :  { %v5273_v46 = vpop.eup %5272  ;;  %1710 = vmatpush.msra.mxu1 %v5128_v45 }
 0x9a4   :  { %v1643_v49 = vmul.f32 %v6963_v48, %v5273_v46 }
 0x9a5   :  { %1711 = vmatpush.msra.mxu1 %v5129_v47 }
 0x9a6   :  { %v1647_v50 = vsel %vm785_vm3, %v1643_v49, 0.0 }
 0x9a7   :  { %1648 = vadd.xlane.f32.xlu1 %v1647_v50 }
 0x9a8   :  { %v1883_v38 = vpop.permute.xlu1 %1882  ;;  %v1881_v26 = vpop.permute.xlu2 %1880 }
 0x9a9   :  { %4859 = vmatpush.xpose.msk.msrb.mxu1 %vm785_vm3, %v1883_v38 }
 0x9ad   :  { %4860 = vmatpush.xpose.msk.msrb.mxu1 %vm785_vm3, %v1881_v26 }
 0x9b0   :  { %v1749_v52 = vpop.permute.xlu1 %1748  ;;  %v1751_v53 = vpop.permute.xlu2 %1750 }
 0x9b1   :  { %4855 = vmatmul.msk.f32.vlgmr.msra.gmra.mxu3 %vm785_vm3, %v1749_v52 }
 0x9b3   :  { %1876 = vrot.lane.b32.xlu0 %v6910_v60, %s6227_s15 }
 0x9b9   :  { %4856 = vmatmul.msk.f32.gmra.mxu3 %vm785_vm3, %v1751_v53 }
 0x9c0   :  { %1878 = vrot.lane.b32.xlu1 %v6915_v28, %s6227_s15 }
 0x9c1   :  { %4865 = vmatmul.msk.f32.vlgmr.msrb.gmra.mxu3 %vm749_vm1, %v6894_v54 }
 0x9c9   :  { %4866 = vmatmul.msk.f32.gmra.mxu3 %vm749_vm1, %v6902_v56 }
 0x9dd   :  { %1540 = vmax.xlane.f32.xlu0 %v1539_v55 }
 0x9e9   :  { %v1544_v33 = vpop.xlane.xlu2 %1543 }
 0x9ea   :  { %v1546_v43 = vsub.f32 %v6949_v21, %v1544_v33 }
 0x9ec   :  { %v1549_v46 = vmul.f32 1.442695, %v1546_v43 }
 0xa12   :  { %v1646_v57 = vpop.xlane.xlu0 %1645 }
 0xa13   :  { %v1650_v16 = vmax.f32 %v1646_v57, 1e-16 }
 0xa15   :  { %5274 = vrcp.f32 %v1650_v16  ;;  %v1663_v0 = vand.u32 2147483648, %v1650_v16  ;;  %v1661_v54 = vand.u32 2147483647, %v1650_v16  ;;  %vm1657_vm11 = vweird.f32 %v1650_v16 }
 0xa17   :  { %v1664_v3 = vor.u32 1.1754944e-38, %v1663_v0  ;;  %vm1662_vm13 = vcmp.eq.f32.partialorder %v1661_v54, 8.507059e+37 }
 0xa1a   :  { %v1649_v58 = vpop.xlane.xlu1 %1648 }
 0xa1b   :  { %v5275_v59 = vpop.eup %5274  ;;  %v1651_v60 = vmax.f32 %v1649_v58, 1e-16 }
 0xa1c   :  { %v1653_v61 = vmul.f32 %v5275_v59, %v1650_v16  ;;  %vm1658_vm10 = vweird.f32 %v5275_v59 }
 0xa1d   :  { %5276 = vrcp.f32 %v1651_v60  ;;  %vm1659_vm12 = vmor %vm1657_vm11, %vm1658_vm10  ;;  %v1678_v1 = vand.u32 2147483648, %v1651_v60  ;;  %v1676_v11 = vand.u32 2147483647, %v1651_v60  ;;  %vm1672_vm15 = vweird.f32 %v1651_v60 }
 0xa1e   :  { %v1654_v63 = vsub.f32 1.0, %v1653_v61 }
 0xa1f   :  { %v1679_v62 = vor.u32 1.1754944e-38, %v1678_v1  ;;  %vm1677_vm4 = vcmp.eq.f32.partialorder %v1676_v11, 8.507059e+37 }
 0xa20   :  { %v1655_v36 = vmul.f32 %v5275_v59, %v1654_v63 }
 0xa22   :  { %v1656_v28 = vadd.f32 %v5275_v59, %v1655_v36 }
 0xa23   :  { %v5277_v56 = vpop.eup %5276 }
 0xa24   :  { %v1668_v5 = vmul.f32 %v5277_v56, %v1651_v60  ;;  %v1660_v2 = vsel %vm1659_vm12, %v5275_v59, %v1656_v28  ;;  %vm1673_vm14 = vweird.f32 %v5277_v56 }
 0xa25   :  { %v1665_v6 = vsel %vm1662_vm13, %v1664_v3, %v1660_v2  ;;  %vm1674_vm2 = vmor %vm1672_vm15, %vm1673_vm14  ;;  %v1877_v19 = vpop.permute.xlu0 %1876 }
 0xa26   :  { %v1669_v7 = vsub.f32 1.0, %v1668_v5  ;;  %v1666_v8 = vmul.f32 %v1665_v6, %v1642_v42 }
 0xa28   :  { %4849 = vmatmul.msk.f32.vlgmr.msra.gmra.mxu1 %vm785_vm3, %v1666_v8  ;;  %v1670_v10 = vmul.f32 %v5277_v56, %v1669_v7 }
 0xa2a   :  { %v1671_v13 = vadd.f32 %v5277_v56, %v1670_v10 }
 0xa2c   :  { %v1675_v39 = vsel %vm1674_vm2, %v5277_v56, %v1671_v13 }
 0xa2d   :  { %v1680_v14 = vsel %vm1677_vm4, %v1679_v62, %v1675_v39 }
 0xa2e   :  { %v1681_v4 = vmul.f32 %v1680_v14, %v1643_v49 }
 0xa30   :  { %4850 = vmatmul.msk.f32.gmra.mxu1 %vm785_vm3, %v1681_v4 }
 0xa32   :  { %v1879_v12 = vpop.permute.xlu1 %1878 }
 0xa34   :  { %v1781_v17 = vpop.f32.mrf.mxu3 }
 0xa35   :  { %v1782_v18 = vadd.f32 %v1781_v17, %v6723_v27 }
 0xa37   :  { %v1787_v34 = vsel %vm785_vm3, %v1782_v18, -inf }
 0xa38   :  { %4861 = vmatmul.msk.f32.vlgmr.msrb.gmra.mxu1 %vm785_vm3, %v1877_v19  ;;  %1788 = vmax.xlane.f32.xlu2 %v1787_v34 }
 0xa3c   :  { %v1784_v50 = vpop.f32.mrf.mxu3 }
 0xa3d   :  { %v1785_v26 = vadd.f32 %v1784_v50, %v6731_v32 }
 0xa3f   :  { %v1790_v53 = vsel %vm785_vm3, %v1785_v26, -inf }
 0xa40   :  { %4862 = vmatmul.msk.f32.gmra.mxu1 %vm785_vm3, %v1879_v12 }
 0xa50   :  { %v1541_v22 = vpop.xlane.xlu0 %1540 }
 0xa51   :  { %v1545_v23 = vsub.f32 %v1534_v51, %v1541_v22 }
 0xa53   :  { %v1547_v25 = vmul.f32 1.442695, %v1545_v23 }
 0xa55   :  { %5278 = vpow2.f32 %v1547_v25 }
 0xa5b   :  { %v5279_v24 = vpop.eup %5278 }
 0xa5c   :  { %v1551_v29 = vmul.f32 %v6957_v41, %v5279_v24 }
 0xa5e   :  { %v1553_v31 = vsel %vm785_vm3, %v1551_v29, 0.0 }
 0xa5f   :  { %1554 = vadd.xlane.f32.xlu2 %v1553_v31 }
 0xaa5   :  { %v6989_v35 = vpop.f32.mrf.mxu1 }
 0xaab   :  { %v1789_v37 = vpop.xlane.xlu2 %1788 }
 0xaac   :  { %v1793_v15 = vsub.f32 %v1782_v18, %v1789_v37 }
 0xaad   :  { %v6991_v40 = vpop.f32.mrf.mxu1 }
 0xaae   :  { %v1795_v42 = vmul.f32 1.442695, %v1793_v15 }
 0xab0   :  { %5280 = vpow2.f32 %v1795_v42 }
 0xab1   :  { %5282 = vpow2.f32 %v1549_v46 }
 0xab5   :  { %v1909_v30 = vpop.f32.mrf.mxu1 }
 0xab6   :  { %v5281_v44 = vpop.eup %5280  ;;  %v1910_v45 = vadd.f32 %v1909_v30, %v6723_v27 }
 0xab7   :  { %v6996_v47 = vmul.f32 %v6957_v41, %v5281_v44  ;;  %v5283_v55 = vpop.eup %5282 }
 0xab8   :  { %v1915_v49 = vsel %vm785_vm3, %v1910_v45, -inf  ;;  %v7006_v57 = vmul.f32 %v6963_v48, %v5283_v55 }
 0xab9   :  { %1916 = vmax.xlane.f32.xlu1 %v1915_v49  ;;  %v1801_v38 = vsel %vm785_vm3, %v6996_v47, 0.0 }
 0xaba   :  { %1802 = vadd.xlane.f32.xlu2 %v1801_v38  ;;  %v1556_v16 = vsel %vm785_vm3, %v7006_v57, 0.0 }
 0xabd   :  { %v1912_v21 = vpop.f32.mrf.mxu1 }
 0xabe   :  { %v1913_v52 = vadd.f32 %v1912_v21, %v6731_v32 }
 0xac0   :  { %v1918_v51 = vsel %vm785_vm3, %v1913_v52, -inf }
 0xac1   :  { %1791 = vmax.xlane.f32.xlu1 %v1790_v53  ;;  %1919 = vmax.xlane.f32.xlu0 %v1918_v51 }
 0xac9   :  { %1557 = vadd.xlane.f32.xlu0 %v1556_v16 }
 0xad2   :  { %5131 = vrot.lane.b32.xlu2 %v6924_v9, %s6227_s15  ;;  %v1555_v58 = vpop.xlane.xlu2 %1554  ;;  %s7899_s15 = sld [smem:[#allocation61_spill]] }
 0xad3   :  { %v1559_v59 = vmax.f32 %v1555_v58, 1e-16 }
 0xad5   :  { %5284 = vrcp.f32 %v1559_v59  ;;  %v1572_v0 = vand.u32 2147483648, %v1559_v59  ;;  %v1570_v54 = vand.u32 2147483647, %v1559_v59  ;;  %vm1566_vm6 = vweird.f32 %v1559_v59 }
 0xad7   :  { %v1573_v56 = vor.u32 1.1754944e-38, %v1572_v0  ;;  %vm1571_vm8 = vcmp.eq.f32.partialorder %v1570_v54, 8.507059e+37 }
 0xadb   :  { %v5285_v60 = vpop.eup %5284 }
 0xadc   :  { %v1562_v61 = vmul.f32 %v5285_v60, %v1559_v59  ;;  %vm1567_vm5 = vweird.f32 %v5285_v60 }
 0xadd   :  { %vm1568_vm7 = vmor %vm1566_vm6, %vm1567_vm5 }
 0xade   :  { %v1563_v63 = vsub.f32 1.0, %v1562_v61 }
 0xae0   :  { %v1564_v36 = vmul.f32 %v5285_v60, %v1563_v63 }
 0xae2   :  { %v1565_v28 = vadd.f32 %v5285_v60, %v1564_v36 }
 0xae4   :  { %v1569_v3 = vsel %vm1568_vm7, %v5285_v60, %v1565_v28 }
 0xae5   :  { %v1574_v5 = vsel %vm1571_vm8, %v1573_v56, %v1569_v3 }
 0xae6   :  { %v1575_v2 = vmul.f32 %v1574_v5, %v1551_v29 }
 0xae8   :  { %4851 = vmatmul.msk.f32.vlgmr.msra.gmra.mxu2 %vm785_vm3, %v1575_v2 }
 0xb2c   :  { %v1917_v6 = vpop.xlane.xlu1 %1916 }
 0xb2d   :  { %v1921_v7 = vsub.f32 %v1910_v45, %v1917_v6  ;;  %v1803_v8 = vpop.xlane.xlu2 %1802 }
 0xb2e   :  { %v1807_v21 = vmax.f32 %v1803_v8, 1e-16 }
 0xb2f   :  { %v1923_v1 = vmul.f32 1.442695, %v1921_v7 }
 0xb30   :  { %vm1814_vm6 = vweird.f32 %v1807_v21 }
 0xb31   :  { %5286 = vpow2.f32 %v1923_v1 }
 0xb34   :  { %v1792_v10 = vpop.xlane.xlu1 %1791  ;;  %v1920_v11 = vpop.xlane.xlu0 %1919 }
 0xb35   :  { %v1794_v13 = vsub.f32 %v1785_v26, %v1792_v10  ;;  %v1922_v62 = vsub.f32 %v1913_v52, %v1920_v11  ;;  %v5132_v39 = vpop.permute.xlu2 %5131 }
 0xb36   :  { %v5133_v14 = vunpack.i.l.bf16 %v5132_v39  ;;  %v5134_v19 = vunpack.i.h.bf16 %v5132_v39 }
 0xb37   :  { %v5287_v4 = vpop.eup %5286  ;;  %v1797_v17 = vmul.f32 1.442695, %v1794_v13  ;;  %v1925_v18 = vmul.f32 1.442695, %v1922_v62 }
 0xb38   :  { %1993 = vmatpush.msrb.mxu2 %v5133_v14  ;;  %v7014_v34 = vmul.f32 %v6957_v41, %v5287_v4  ;;  %v1820_v14 = vand.u32 2147483648, %v1807_v21 }
 0xb39   :  { %5288 = vpow2.f32 %v1797_v17 }
 0xb3a   :  { %5290 = vpow2.f32 %v1925_v18  ;;  %1994 = vmatpush.msrb.mxu2 %v5134_v19  ;;  %v1929_v12 = vsel %vm785_vm3, %v7014_v34, 0.0  ;;  %v1818_v18 = vand.u32 2147483647, %v1807_v21  ;;  %v2154_v19 = vld [vmem:[%s7875_s0] sm:$0xff] }
 0xb3b   :  { %1930 = vadd.xlane.f32.xlu1 %v1929_v12 }
 0xb3c   :  { %v1558_v22 = vpop.xlane.xlu0 %1557 }
 0xb3d   :  { %v1560_v23 = vmax.f32 %v1558_v22, 1e-16 }
 0xb3f   :  { %v5289_v25 = vpop.eup %5288  ;;  %5292 = vrcp.f32 %v1560_v23  ;;  %v1587_v30 = vand.u32 2147483648, %v1560_v23  ;;  %v1585_v45 = vand.u32 2147483647, %v1560_v23  ;;  %vm1581_vm10 = vweird.f32 %v1560_v23 }
 0xb40   :  { %v5291_v24 = vpop.eup %5290  ;;  %v7019_v29 = vmul.f32 %v6963_v48, %v5289_v25  ;;  %5294 = vrcp.f32 %v1807_v21  ;;  %v1821_v25 = vor.u32 1.1754944e-38, %v1820_v14 }
 0xb41   :  { %v7022_v31 = vmul.f32 %v6963_v48, %v5291_v24  ;;  %v1588_v49 = vor.u32 1.1754944e-38, %v1587_v30  ;;  %vm1586_vm12 = vcmp.eq.f32.partialorder %v1585_v45, 8.507059e+37 }
 0xb42   :  { %v1804_v33 = vsel %vm785_vm3, %v7019_v29, 0.0 }
 0xb43   :  { %1805 = vadd.xlane.f32.xlu1 %v1804_v33  ;;  %v1932_v37 = vsel %vm785_vm3, %v7022_v31, 0.0 }
 0xb44   :  { %1933 = vadd.xlane.f32.xlu0 %v1932_v37 }
 0xb45   :  { %v5293_v15 = vpop.eup %5292 }
 0xb46   :  { %v1577_v42 = vmul.f32 %v5293_v15, %v1560_v23  ;;  %vm1582_vm9 = vweird.f32 %v5293_v15  ;;  %v5295_v51 = vpop.eup %5294 }
 0xb47   :  { %vm1583_vm11 = vmor %vm1581_vm10, %vm1582_vm9  ;;  %v1810_v60 = vmul.f32 %v5295_v51, %v1807_v21  ;;  %vm1815_vm4 = vweird.f32 %v5295_v51 }
 0xb48   :  { %v1578_v43 = vsub.f32 1.0, %v1577_v42  ;;  %vm7038_vm7 = vmor %vm1814_vm6, %vm1815_vm4 }
 0xb4a   :  { %v1579_v44 = vmul.f32 %v5293_v15, %v1578_v43 }
 0xb4c   :  { %v1580_v46 = vadd.f32 %v5293_v15, %v1579_v44 }
 0xb4e   :  { %v1584_v50 = vsel %vm1583_vm11, %v5293_v15, %v1580_v46  ;;  %vm1819_vm11 = vcmp.eq.f32.partialorder %v1818_v18, 8.507059e+37  ;;  %v2219_v18 = vld [vmem:[%s7877_s18 + $0x8] sm:$0xff] }
 0xb4f   :  { %v1589_v38 = vsel %vm1586_vm12, %v1588_v49, %v1584_v50  ;;  %2238 = vmatpush.msra.mxu2 %v2219_v18 }
 0xb50   :  { %v1590_v26 = vmul.f32 %v1589_v38, %v7006_v57 }
 0xb52   :  { %4852 = vmatmul.msk.f32.gmra.mxu2 %vm785_vm3, %v1590_v26 }
 0xb58   :  { %5136 = vrot.lane.b32.xlu0 %v6924_v9, %s6221_s1  ;;  %v1811_v9 = vsub.f32 1.0, %v1810_v60  ;;  %v5197_v60 = vld [vmem:[#allocation17] ss:$0 sm:$0xff]  ;;  %s6231_s1 = smov 116  }
 0xb5a   :  { %v1812_v2 = vmul.f32 %v5295_v51, %v1811_v9 }
 0xb5c   :  { %v1813_v13 = vadd.f32 %v5295_v51, %v1812_v2 }
 0xb5e   :  { %v1817_v22 = vsel %vm7038_vm7, %v5295_v51, %v1813_v13 }
 0xb5f   :  { %v1822_v43 = vsel %vm1819_vm11, %v1821_v25, %v1817_v22 }
 0xb60   :  { %v1823_v46 = vmul.f32 %v1822_v43, %v6996_v47  ;;  %v5196_v47 = vld [vmem:[#allocation14] ss:$0 sm:$0xff] }
 0xb6b   :  { %v1742_v21 = vpop.f32.mrf.mxu2 }
 0xb6c   :  { %v1743_v51 = vadd.f32 %v1742_v21, %v6989_v35 }
 0xbae   :  { %v1931_v52 = vpop.xlane.xlu1 %1930 }
 0xbaf   :  { %v1935_v53 = vmax.f32 %v1931_v52, 1e-16 }
 0xbb1   :  { %5296 = vrcp.f32 %v1935_v53  ;;  %v1948_v0 = vand.u32 2147483648, %v1935_v53  ;;  %v1946_v54 = vand.u32 2147483647, %v1935_v53  ;;  %vm1942_vm14 = vweird.f32 %v1935_v53 }
 0xbb3   :  { %v1949_v3 = vor.u32 1.1754944e-38, %v1948_v0  ;;  %vm1947_vm2 = vcmp.eq.f32.partialorder %v1946_v54, 8.507059e+37 }
 0xbb6   :  { %v1806_v55 = vpop.xlane.xlu1 %1805 }
 0xbb7   :  { %v5297_v16 = vpop.eup %5296  ;;  %v7032_v58 = vmax.f32 %v1806_v55, 1e-16  ;;  %v1934_v59 = vpop.xlane.xlu0 %1933 }
 0xbb8   :  { %v1938_v61 = vmul.f32 %v5297_v16, %v1935_v53  ;;  %v1936_v63 = vmax.f32 %v1934_v59, 1e-16  ;;  %vm1943_vm13 = vweird.f32 %v5297_v16  ;;  %v2031_v53 = vpop.f32.mrf.mxu3 }
 0xbb9   :  { %5298 = vrcp.f32 %v7032_v58  ;;  %vm1944_vm15 = vmor %vm1942_vm14, %vm1943_vm13  ;;  %v1835_v45 = vand.u32 2147483648, %v7032_v58  ;;  %vm1829_vm13 = vweird.f32 %v7032_v58  ;;  %v1833_v49 = vand.u32 2147483647, %v7032_v58 }
 0xbba   :  { %v1939_v57 = vsub.f32 1.0, %v1938_v61  ;;  %5300 = vrcp.f32 %v1936_v63  ;;  %v1963_v39 = vand.u32 2147483648, %v1936_v63  ;;  %v1961_v17 = vand.u32 2147483647, %v1936_v63 }
 0xbbb   :  { %vm1957_vm8 = vweird.f32 %v1936_v63  ;;  %v1836_v50 = vor.u32 1.1754944e-38, %v1835_v45  ;;  %v7054_v59 = vadd.f32 %v5196_v47, %v2031_v53 }
 0xbbc   :  { %v1940_v36 = vmul.f32 %v5297_v16, %v1939_v57  ;;  %vm1962_vm10 = vcmp.eq.f32.partialorder %v1961_v17, 8.507059e+37  ;;  %v2190_v17 = vld [vmem:[%s7876_s27 + $0x8] sm:$0xff] }
 0xbbd   :  { %2209 = vmatpush.msra.mxu1 %v2190_v17 }
 0xbbe   :  { %v1941_v28 = vadd.f32 %v5297_v16, %v1940_v36 }
 0xbbf   :  { %v5299_v56 = vpop.eup %5298 }
 0xbc0   :  { %v5301_v5 = vpop.eup %5300  ;;  %v1825_v6 = vmul.f32 %v5299_v56, %v7032_v58  ;;  %v1945_v7 = vsel %vm1944_vm15, %v5297_v16, %v1941_v28  ;;  %vm1830_vm12 = vweird.f32 %v5299_v56  ;;  %vm1834_vm15 = vcmp.eq.f32.partialorder %v1833_v49, 8.507059e+37  ;;  %v2034_v36 = vpop.f32.mrf.mxu3 }
 0xbc1   :  { %v1953_v8 = vmul.f32 %v5301_v5, %v1936_v63  ;;  %v1950_v1 = vsel %vm1947_vm2, %v1949_v3, %v1945_v7  ;;  %vm1958_vm5 = vweird.f32 %v5301_v5  ;;  %vm1831_vm14 = vmor %vm1829_vm13, %vm1830_vm12  ;;  %v5198_v63 = vld [vmem:[#allocation16] ss:$0 sm:$0xff]  ;;  %v7061_v3 = vadd.f32 %v5196_v47, %v2034_v36 }
 0xbc2   :  { %v1951_v10 = vmul.f32 %v1950_v1, %v7014_v34  ;;  %v1826_v62 = vsub.f32 1.0, %v1825_v6  ;;  %vm1959_vm9 = vmor %vm1957_vm8, %vm1958_vm5  ;;  %v1964_v34 = vor.u32 1.1754944e-38, %v1963_v39 }
 0xbc3   :  { %v1954_v11 = vsub.f32 1.0, %v1953_v8  ;;  %v2048_v7 = vmul.f32 %v5197_v60, %v7061_v3 }
 0xbc4   :  { %4863 = vmatmul.msk.f32.vlgmr.msrb.gmra.mxu2 %vm785_vm3, %v1951_v10  ;;  %v1827_v23 = vmul.f32 %v5299_v56, %v1826_v62 }
 0xbc5   :  { %v1955_v4 = vmul.f32 %v5301_v5, %v1954_v11 }
 0xbc6   :  { %v1828_v30 = vadd.f32 %v5299_v56, %v1827_v23 }
 0xbc7   :  { %v1956_v12 = vadd.f32 %v5301_v5, %v1955_v4  ;;  %v2155_v4 = vld [vmem:[%s7875_s0 + $0x8] sm:$0xff]  ;;  %s7902_s0 = sld [smem:[#allocation107_spill]] }
 0xbc9   :  { %v1960_v24 = vsel %vm1959_vm9, %v5301_v5, %v1956_v12  ;;  %v2189_v12 = vld [vmem:[%s7876_s27] sm:$0xff] }
 0xbca   :  { %v5137_v33 = vpop.permute.xlu0 %5136  ;;  %v1965_v37 = vsel %vm1962_vm10, %v1964_v34, %v1960_v24  ;;  %v2218_v34 = vld [vmem:[%s7877_s18] sm:$0xff]  ;;  %2210 = vmatpush.msra.mxu1 %v2189_v12 }
 0xbcb   :  { %v5138_v15 = vunpack.i.l.bf16 %v5137_v33  ;;  %v1966_v42 = vmul.f32 %v1965_v37, %v7022_v31  ;;  %v5139_v44 = vunpack.i.h.bf16 %v5137_v33  ;;  %v1832_v31 = vsel %vm1831_vm14, %v5299_v56, %v1828_v30  ;;  %2239 = vmatpush.msra.mxu2 %v2218_v34 }
 0xbcc   :  { %v1837_v38 = vsel %vm1834_vm15, %v1836_v50, %v1832_v31 }
 0xbcd   :  { %1865 = vmatpush.msrb.mxu0 %v5138_v15  ;;  %4864 = vmatmul.msk.f32.gmra.mxu2 %vm785_vm3, %v1966_v42  ;;  %v1838_v26 = vmul.f32 %v1837_v38, %v7019_v29  ;;  %v2047_v29 = vmul.f32 %v5197_v60, %v7054_v59 }
 0xbcf   :  { %1866 = vmatpush.msrb.mxu0 %v5139_v44 }
 0xbd0   :  { %4857 = vmatmul.msk.f32.vlgmr.msrb.gmra.mxu0 %vm785_vm3, %v1823_v46 }
 0xbd1   :  { %2180 = vmatpush.msra.mxu0 %v2155_v4 }
 0xbd3   :  { %2181 = vmatpush.msra.mxu0 %v2154_v19 }
 0xbd5   :  { %v1745_v52 = vpop.f32.mrf.mxu2 }
 0xbd6   :  { %v1746_v0 = vadd.f32 %v1745_v52, %v6991_v40 }
 0xbd8   :  { %4858 = vmatmul.msk.f32.gmra.mxu0 %vm785_vm3, %v1838_v26 }
 0xc47   :  { %v1996_v55 = vpop.f32.mrf.mxu2 }
 0xc4d   :  { %v1868_v16 = vpop.f32.mrf.mxu0 }
 0xc4e   :  { %v1874_v58 = vadd.f32 %v1868_v16, %v1743_v51 }
 0xc50   :  { %v2002_v61 = vadd.f32 %v1996_v55, %v1874_v58  ;;  %v1999_v56 = vpop.f32.mrf.mxu2 }
 0xc52   :  { %v7056_v57 = vmul.f32 0.25, %v2002_v61 }
 0xc54   :  { %v2041_v9 = vmul.f32 %v5198_v63, %v7056_v57 }
 0xc55   :  { %v1871_v54 = vpop.f32.mrf.mxu0 }
 0xc56   :  { %v1875_v28 = vadd.f32 %v1871_v54, %v1746_v0  ;;  %v2049_v35 = vadd.f32 %v2047_v29, %v2041_v9 }
 0xc58   :  { %v2003_v5 = vadd.f32 %v1999_v56, %v1875_v28  ;;  %v2051_v2 = vsel %vm785_vm3, %v2049_v35, 0.0 }
 0xc59   :  { %2052 = vadd.xlane.f32.xlu1 %v2051_v2 }
 0xc5a   :  { %v7064_v6 = vmul.f32 0.25, %v2003_v5 }
 0xc5c   :  { %v2042_v40 = vmul.f32 %v5198_v63, %v7064_v6 }
 0xc5e   :  { %v2050_v8 = vadd.f32 %v2048_v7, %v2042_v40 }
 0xc60   :  { %v2054_v1 = vsel %vm785_vm3, %v2050_v8, 0.0 }
 0xc61   :  { %2055 = vadd.xlane.f32.xlu1 %v2054_v1 }
 0xccc   :  { %v2053_v10 = vpop.xlane.xlu1 %2052 }
 0xccd   :  { %v4867_v11 = vmul.f32 -1.442695, %v2053_v10 }
 0xccf   :  { %5302 = vpow2.f32 %v4867_v11 }
 0xcd4   :  { %v2056_v13 = vpop.xlane.xlu1 %2055 }
 0xcd5   :  { %v5303_v62 = vpop.eup %5302  ;;  %v4868_v39 = vmul.f32 -1.442695, %v2056_v13 }
 0xcd6   :  { %v2063_v14 = vadd.f32 1.0, %v5303_v62 }
 0xcd7   :  { %5304 = vpow2.f32 %v4868_v39 }
 0xcd8   :  { %5306 = vrcp.f32 %v2063_v14  ;;  %v2076_v37 = vand.u32 2147483648, %v2063_v14  ;;  %v2074_v42 = vand.u32 2147483647, %v2063_v14  ;;  %vm2070_vm4 = vweird.f32 %v2063_v14 }
 0xcda   :  { %v2077_v44 = vor.u32 1.1754944e-38, %v2076_v37  ;;  %vm2075_vm6 = vcmp.eq.f32.partialorder %v2074_v42, 8.507059e+37  ;;  %v5200_v42 = vld [vmem:[%s7879_s4] ss:$0 sm:$0xff] }
 0xcdd   :  { %v5305_v22 = vpop.eup %5304 }
 0xcde   :  { %v5307_v23 = vpop.eup %5306  ;;  %v2064_v25 = vadd.f32 1.0, %v5305_v22 }
 0xcdf   :  { %v2066_v24 = vmul.f32 %v5307_v23, %v2063_v14  ;;  %vm2071_vm2 = vweird.f32 %v5307_v23 }
 0xce0   :  { %5308 = vrcp.f32 %v2064_v25  ;;  %vm2072_vm5 = vmor %vm2070_vm4, %vm2071_vm2  ;;  %v2091_v38 = vand.u32 2147483648, %v2064_v25  ;;  %v2089_v21 = vand.u32 2147483647, %v2064_v25  ;;  %vm2085_vm8 = vweird.f32 %v2064_v25 }
 0xce1   :  { %v2067_v33 = vsub.f32 1.0, %v2066_v24 }
 0xce2   :  { %v2092_v47 = vor.u32 1.1754944e-38, %v2091_v38  ;;  %vm2090_vm10 = vcmp.eq.f32.partialorder %v2089_v21, 8.507059e+37 }
 0xce3   :  { %v2068_v15 = vmul.f32 %v5307_v23, %v2067_v33  ;;  %v5199_v33 = vld [vmem:[%s7878_s24] ss:$0 sm:$0xff] }
 0xce5   :  { %v2069_v43 = vadd.f32 %v5307_v23, %v2068_v15 }
 0xce6   :  { %v5309_v30 = vpop.eup %5308 }
 0xce7   :  { %v2073_v45 = vsel %vm2072_vm5, %v5307_v23, %v2069_v43  ;;  %v2081_v46 = vmul.f32 %v5309_v30, %v2064_v25  ;;  %vm2086_vm7 = vweird.f32 %v5309_v30 }
 0xce8   :  { %v2078_v49 = vsel %vm2075_vm6, %v2077_v44, %v2073_v45  ;;  %vm2087_vm9 = vmor %vm2085_vm8, %vm2086_vm7 }
 0xce9   :  { %v2097_v31 = vsub.f32 1.0, %v2078_v49  ;;  %v2082_v50 = vsub.f32 1.0, %v2081_v46  ;;  %v2095_v51 = vmul.f32 %v2078_v49, %v7054_v59  ;;  %v5201_v49 = vld [vmem:[#allocation19] ss:$0 sm:$0xff] }
 0xceb   :  { %v2083_v26 = vmul.f32 %v5309_v30, %v2082_v50  ;;  %v2099_v52 = vmul.f32 %v2097_v31, %v7056_v57  ;;  %v5202_v31 = vld [vmem:[#allocation20] ss:$0 sm:$0xff] }
 0xced   :  { %v2084_v53 = vadd.f32 %v5309_v30, %v2083_v26  ;;  %v2101_v60 = vadd.f32 %v2099_v52, %v2095_v51  ;;  %v5203_v51 = vld [vmem:[#allocation22] ss:$0 sm:$0xff] }
 0xcef   :  { %v2088_v55 = vsel %vm2087_vm9, %v5309_v30, %v2084_v53  ;;  %v2103_v0 = vmax.f32 %v2101_v60, 0.0 }
 0xcf0   :  { %v2093_v16 = vsel %vm2090_vm10, %v2092_v47, %v2088_v55 }
 0xcf1   :  { %v2098_v58 = vsub.f32 1.0, %v2093_v16  ;;  %v2096_v61 = vmul.f32 %v2093_v16, %v7061_v3  ;;  %v2105_v36 = vsel %vm785_vm3, %v2103_v0, 0.0 }
 0xcf3   :  { %v2100_v63 = vmul.f32 %v2098_v58, %v7064_v6 }
 0xcf5   :  { %v2102_v29 = vadd.f32 %v2100_v63, %v2096_v61 }
 0xcf7   :  { %v2104_v9 = vmax.f32 %v2102_v29, 0.0 }
 0xcf9   :  { %v2106_v57 = vsel %vm785_vm3, %v2104_v9, 0.0 }
 0xcfa   :  { %v2107_v54 = vadd.f32 %v2106_v57, %v2105_v36 }
 0xcfc   :  { %v2108_v28 = vrot.slane %v2107_v54, 4 }
 0xcfe   :  { %v2109_v35 = vadd.f32 %v2108_v28, %v2107_v54 }
 0xd00   :  { %v2110_v59 = vrot.slane %v2109_v35, 2 }
 0xd02   :  { %v2111_v56 = vadd.f32 %v2110_v59, %v2109_v35 }
 0xd04   :  { %v2112_v5 = vrot.slane %v2111_v56, 1 }
 0xd06   :  { %v2113_v2 = vadd.f32 %v2112_v5, %v2111_v56 }
 0xd08   :  { %v2114_v7 = vmul.f32 %v2113_v2, %v6886_v20 }
 0xd0a   :  { %v2115_v40 = vsub.f32 %v2103_v0, %v2114_v7  ;;  %v2116_v3 = vsub.f32 %v2104_v9, %v2114_v7 }
 0xd0c   :  { %v2117_v8 = vmul.f32 %v2115_v40, %v2115_v40  ;;  %v2118_v6 = vmul.f32 %v2116_v3, %v2116_v3 }
 0xd0e   :  { %v2119_v1 = vsel %vm785_vm3, %v2117_v8, 0.0  ;;  %v2120_v10 = vsel %vm785_vm3, %v2118_v6, 0.0 }
 0xd0f   :  { %v2121_v11 = vadd.f32 %v2120_v10, %v2119_v1 }
 0xd11   :  { %v2122_v13 = vrot.slane %v2121_v11, 4 }
 0xd13   :  { %v2123_v62 = vadd.f32 %v2122_v13, %v2121_v11 }
 0xd15   :  { %v2124_v39 = vrot.slane %v2123_v62, 2 }
 0xd17   :  { %v2125_v14 = vadd.f32 %v2124_v39, %v2123_v62 }
 0xd19   :  { %v2126_v4 = vrot.slane %v2125_v14, 1 }
 0xd1b   :  { %v2127_v17 = vadd.f32 %v2126_v4, %v2125_v14 }
 0xd1d   :  { %v2128_v18 = vmul.f32 %v2127_v17, %v6886_v20 }
 0xd1f   :  { %v2129_v19 = vadd.f32 1e-05, %v2128_v18 }
 0xd21   :  { %5310 = vrsqrt.f32 %v2129_v19  ;;  %vm2136_vm12 = vweird.f32 %v2129_v19 }
 0xd27   :  { %v5311_v12 = vpop.eup %5310 }
 0xd28   :  { %v2131_v34 = vmul.f32 %v5311_v12, %v2129_v19  ;;  %vm2137_vm11 = vweird.f32 %v5311_v12 }
 0xd29   :  { %vm2138_vm13 = vmor %vm2136_vm12, %vm2137_vm11 }
 0xd2a   :  { %v2132_v22 = vmul.f32 %v5311_v12, %v2131_v34 }
 0xd2c   :  { %v2133_v23 = vmul.f32 0.5, %v2132_v22  ;;  %v2750_v22 = vld [vmem:[%s7880_s16 + $0x8] sm:$0xff] }
 0xd2e   :  { %v2134_v25 = vsub.f32 1.5, %v2133_v23  ;;  %v2749_v23 = vld [vmem:[%s7880_s16] sm:$0xff] }
 0xd30   :  { %v2135_v24 = vmul.f32 %v5311_v12, %v2134_v25 }
 0xd32   :  { %v2139_v37 = vsel %vm2138_vm13, %v5311_v12, %v2135_v24 }
 0xd33   :  { %v2140_v15 = vmul.f32 %v2139_v37, %v2115_v40  ;;  %v2141_v44 = vmul.f32 %v2139_v37, %v2116_v3 }
 0xd35   :  { %v2146_v43 = vmul.f32 %v5199_v33, %v2140_v15  ;;  %v2147_v45 = vmul.f32 %v5199_v33, %v2141_v44 }
 0xd37   :  { %v7087_v30 = vadd.f32 %v5200_v42, %v2146_v43  ;;  %v7095_v46 = vadd.f32 %v5200_v42, %v2147_v45 }
 0xd39   :  { %4869 = vmatmul.msk.f32.vlgmr.msra.gmra.mxu0 %vm785_vm3, %v7087_v30  ;;  %4871 = vmatmul.msk.f32.vlgmr.msra.gmra.mxu1 %vm785_vm3, %v7087_v30 }
 0xd3a   :  { %4873 = vmatmul.msk.f32.vlgmr.msra.gmra.mxu2 %vm785_vm3, %v7087_v30 }
 0xd41   :  { %4870 = vmatmul.msk.f32.gmra.mxu0 %vm785_vm3, %v7095_v46  ;;  %4872 = vmatmul.msk.f32.gmra.mxu1 %vm785_vm3, %v7095_v46 }
 0xd42   :  { %4874 = vmatmul.msk.f32.gmra.mxu2 %vm785_vm3, %v7095_v46 }
 0xdb6   :  { %v2183_v50 = vpop.f32.mrf.mxu0  ;;  %v2212_v38 = vpop.f32.mrf.mxu1 }
 0xdb7   :  { %v7103_v26 = vadd.f32 %v5201_v49, %v2183_v50  ;;  %v2213_v21 = vadd.f32 %v5202_v31, %v2212_v38 }
 0xdb9   :  { %2338 = vrot.lane.b32.xlu1 %v2213_v21, %s6228_s12  ;;  %2334 = vrot.lane.b32.xlu2 %v7103_v26, %s6228_s12 }
 0xdbd   :  { %v2241_v52 = vpop.f32.mrf.mxu2 }
 0xdbe   :  { %v2215_v53 = vpop.f32.mrf.mxu1  ;;  %v2186_v55 = vpop.f32.mrf.mxu0  ;;  %v2242_v58 = vadd.f32 %v5203_v51, %v2241_v52 }
 0xdbf   :  { %v7108_v47 = vadd.f32 %v5202_v31, %v2215_v53  ;;  %v7115_v61 = vadd.f32 %v5201_v49, %v2186_v55 }
 0xdc1   :  { %2340 = vrot.lane.b32.xlu0 %v7108_v47, %s6228_s12  ;;  %4875 = vmatpush.xpose.msk.msra.mxu3 %vm663_vm0, %v7108_v47 }
 0xdc5   :  { %v2244_v16 = vpop.f32.mrf.mxu2  ;;  %4876 = vmatpush.xpose.msk.msra.mxu3 %vm663_vm0, %v2213_v21 }
 0xdc6   :  { %v2245_v60 = vadd.f32 %v5203_v51, %v2244_v16 }
 0xdc8   :  { %2482 = vmatpush.msrb.mxu2 %v2245_v60  ;;  %4877 = vmatmul.msk.f32.vlgmr.msra.gmra.mxu3 %vm663_vm0, %v7103_v26  ;;  %v7119_v63 = vpack.i.bf16 %v2242_v58, %v2245_v60 }
 0xdc9   :  { %2336 = vrot.lane.b32.xlu0 %v7115_v61, %s6228_s12 }
 0xdca   :  { %2483 = vmatpush.msrb.mxu2 %v2242_v58 }
 0xdd0   :  { %4878 = vmatmul.msk.f32.gmra.mxu3 %vm663_vm0, %v7115_v61 }
 0xe13   :  { %v2335_v9 = vpop.permute.xlu2 %2334 }
 0xe2b   :  { %v2339_v0 = vpop.permute.xlu1 %2338 }
 0xe33   :  { %v2341_v29 = vpop.permute.xlu0 %2340 }
 0xe34   :  { %4879 = vmatpush.xpose.msk.msrb.mxu0 %vm663_vm0, %v2341_v29 }
 0xe38   :  { %4880 = vmatpush.xpose.msk.msrb.mxu0 %vm663_vm0, %v2339_v0 }
 0xe3b   :  { %4881 = vmatmul.msk.f32.vlgmr.msrb.gmra.mxu0 %vm663_vm0, %v2335_v9  ;;  %v2337_v57 = vpop.permute.xlu0 %2336 }
 0xe43   :  { %4882 = vmatmul.msk.f32.gmra.mxu0 %vm663_vm0, %v2337_v57 }
 0xe4b   :  { %v2276_v5 = vpop.f32.mrf.mxu3 }
 0xe4c   :  { %v2277_v24 = vadd.f32 %v2276_v5, %v6723_v27 }
 0xe4e   :  { %v2282_v33 = vsel %vm785_vm3, %v2277_v24, -inf }
 0xe53   :  { %v2279_v2 = vpop.f32.mrf.mxu3 }
 0xe54   :  { %v7144_v7 = vadd.f32 %v2279_v2, %v6731_v32 }
 0xe56   :  { %v2285_v40 = vsel %vm785_vm3, %v7144_v7, -inf }
 0xeb8   :  { %v2367_v36 = vpop.f32.mrf.mxu0 }
 0xeb9   :  { %v2368_v54 = vadd.f32 %v2367_v36, %v6723_v27 }
 0xebb   :  { %v2373_v28 = vsel %vm785_vm3, %v2368_v54, -inf }
 0xebc   :  { %2374 = vmax.xlane.f32.xlu2 %v2373_v28 }
 0xec0   :  { %v2370_v35 = vpop.f32.mrf.mxu0 }
 0xec1   :  { %v2371_v59 = vadd.f32 %v2370_v35, %v6731_v32 }
 0xec3   :  { %v2376_v56 = vsel %vm785_vm3, %v2371_v59, -inf }
 0xec4   :  { %2377 = vmax.xlane.f32.xlu0 %v2376_v56 }
 0xed4   :  { %2497 = vrot.lane.b32.xlu2 %v7108_v47, %s6226_s14 }
 0xed8   :  { %5141 = vrot.lane.b32.xlu0 %v7119_v63, %s6228_s12 }
 0xedc   :  { %2623 = vrot.lane.b32.xlu2 %v2213_v21, %s6229_s29 }
 0xee0   :  { %2495 = vrot.lane.b32.xlu0 %v2213_v21, %s6226_s14 }
 0xee8   :  { %2491 = vrot.lane.b32.xlu0 %v7103_v26, %s6226_s14 }
 0xef0   :  { %2493 = vrot.lane.b32.xlu0 %v7115_v61, %s6226_s14 }
 0xf1a   :  { %2286 = vmax.xlane.f32.xlu0 %v2285_v40 }
 0xf2f   :  { %v2375_v3 = vpop.xlane.xlu2 %2374 }
 0xf30   :  { %v2379_v8 = vsub.f32 %v2368_v54, %v2375_v3 }
 0xf32   :  { %v2381_v6 = vmul.f32 1.442695, %v2379_v8  ;;  %v7183_v8 = vld [vmem:[%s7865_s28] sm:$0xff] }
 0xf34   :  { %5312 = vpow2.f32 %v2381_v6 }
 0xf37   :  { %v2378_v1 = vpop.xlane.xlu0 %2377  ;;  %v2498_v10 = vpop.permute.xlu2 %2497 }
 0xf38   :  { %v2380_v11 = vsub.f32 %v2371_v59, %v2378_v1  ;;  %4887 = vmatpush.xpose.msk.msrb.mxu3 %vm663_vm0, %v2498_v10 }
 0xf3a   :  { %v5313_v13 = vpop.eup %5312  ;;  %v2383_v62 = vmul.f32 1.442695, %v2380_v11 }
 0xf3b   :  { %v2385_v39 = vmul.f32 %v6957_v41, %v5313_v13 }
 0xf3c   :  { %5314 = vpow2.f32 %v2383_v62 }
 0xf3d   :  { %v2387_v14 = vsel %vm785_vm3, %v2385_v39, 0.0 }
 0xf3e   :  { %2388 = vadd.xlane.f32.xlu1 %v2387_v14 }
 0xf3f   :  { %v2624_v37 = vpop.permute.xlu2 %2623 }
 0xf42   :  { %v5315_v4 = vpop.eup %5314 }
 0xf43   :  { %v7152_v17 = vmul.f32 %v6963_v48, %v5315_v4 }
 0xf45   :  { %v2390_v18 = vsel %vm785_vm3, %v7152_v17, 0.0 }
 0xf46   :  { %2391 = vadd.xlane.f32.xlu2 %v2390_v18 }
 0xf4a   :  { %v5142_v19 = vpop.permute.xlu0 %5141 }
 0xf4b   :  { %v5143_v12 = vunpack.i.l.bf16 %v5142_v19  ;;  %v5144_v34 = vunpack.i.h.bf16 %v5142_v19 }
 0xf4d   :  { %2453 = vmatpush.msrb.mxu1 %v5143_v12 }
 0xf4f   :  { %2454 = vmatpush.msrb.mxu1 %v5144_v34 }
 0xf52   :  { %v2496_v41 = vpop.permute.xlu0 %2495 }
 0xf53   :  { %4888 = vmatpush.xpose.msk.msrb.mxu3 %vm663_vm0, %v2496_v41 }
 0xf57   :  { %2769 = vmatpush.msra.mxu3 %v2750_v22  ;;  %2625 = vrot.lane.b32.xlu1 %v7108_v47, %s6229_s29 }
 0xf59   :  { %2770 = vmatpush.msra.mxu3 %v2749_v23 }
 0xf5a   :  { %v2492_v48 = vpop.permute.xlu0 %2491 }
 0xf5b   :  { %4889 = vmatmul.msk.f32.vlgmr.msrb.gmra.mxu3 %vm663_vm0, %v2492_v48 }
 0xf5e   :  { %2619 = vrot.lane.b32.xlu2 %v7103_v26, %s6229_s29 }
 0xf5f   :  { %2621 = vrot.lane.b32.xlu1 %v7115_v61, %s6229_s29 }
 0xf62   :  { %v2494_v25 = vpop.permute.xlu0 %2493 }
 0xf63   :  { %4890 = vmatmul.msk.f32.gmra.mxu3 %vm663_vm0, %v2494_v25 }
 0xf6b   :  { %4899 = vmatmul.msk.f32.vlgmr.msra.gmra.mxu3 %vm785_vm3, %v7087_v30 }
 0xf73   :  { %4900 = vmatmul.msk.f32.gmra.mxu3 %vm785_vm3, %v7095_v46 }
 0xf87   :  { %2283 = vmax.xlane.f32.xlu2 %v2282_v33 }
 0xf8d   :  { %v2287_v13 = vpop.xlane.xlu0 %2286 }
 0xf8e   :  { %v2289_v62 = vsub.f32 %v7144_v7, %v2287_v13 }
 0xf90   :  { %v2292_v14 = vmul.f32 1.442695, %v2289_v62 }
 0xfb1   :  { %v2389_v15 = vpop.xlane.xlu1 %2388 }
 0xfb2   :  { %v2393_v42 = vmax.f32 %v2389_v15, 1e-16  ;;  %v7204_v15 = vld [vmem:[%s7865_s28 + $0x8] sm:$0xff] }
 0xfb4   :  { %5316 = vrcp.f32 %v2393_v42  ;;  %v2406_v50 = vand.u32 2147483648, %v2393_v42  ;;  %v2404_v38 = vand.u32 2147483647, %v2393_v42  ;;  %vm2400_vm15 = vweird.f32 %v2393_v42 }
 0xfb6   :  { %v2407_v21 = vor.u32 1.1754944e-38, %v2406_v50  ;;  %vm2405_vm4 = vcmp.eq.f32.partialorder %v2404_v38, 8.507059e+37 }
 0xfb9   :  { %v2392_v43 = vpop.xlane.xlu2 %2391 }
 0xfba   :  { %v5317_v44 = vpop.eup %5316  ;;  %v2394_v45 = vmax.f32 %v2392_v43, 1e-16 }
 0xfbb   :  { %v2396_v49 = vmul.f32 %v5317_v44, %v2393_v42  ;;  %vm2401_vm14 = vweird.f32 %v5317_v44 }
 0xfbc   :  { %5318 = vrcp.f32 %v2394_v45  ;;  %vm2402_vm2 = vmor %vm2400_vm15, %vm2401_vm14  ;;  %v2421_v16 = vand.u32 2147483648, %v2394_v45  ;;  %v2419_v60 = vand.u32 2147483647, %v2394_v45  ;;  %vm2415_vm6 = vweird.f32 %v2394_v45 }
 0xfbd   :  { %v2397_v31 = vsub.f32 1.0, %v2396_v49 }
 0xfbe   :  { %v2422_v0 = vor.u32 1.1754944e-38, %v2421_v16  ;;  %vm2420_vm8 = vcmp.eq.f32.partialorder %v2419_v60, 8.507059e+37 }
 0xfbf   :  { %v2398_v30 = vmul.f32 %v5317_v44, %v2397_v31 }
 0xfc1   :  { %v2399_v46 = vadd.f32 %v5317_v44, %v2398_v30  ;;  %v2620_v54 = vpop.permute.xlu2 %2619 }
 0xfc2   :  { %v5319_v26 = vpop.eup %5318 }
 0xfc3   :  { %v2411_v52 = vmul.f32 %v5319_v26, %v2394_v45  ;;  %v2403_v53 = vsel %vm2402_vm2, %v5317_v44, %v2399_v46  ;;  %vm2416_vm5 = vweird.f32 %v5319_v26 }
 0xfc4   :  { %v2408_v47 = vsel %vm2405_vm4, %v2407_v21, %v2403_v53  ;;  %vm2417_vm7 = vmor %vm2415_vm6, %vm2416_vm5 }
 0xfc5   :  { %v2412_v51 = vsub.f32 1.0, %v2411_v52  ;;  %v2409_v55 = vmul.f32 %v2408_v47, %v2385_v39 }
 0xfc7   :  { %4883 = vmatmul.msk.f32.vlgmr.msrb.gmra.mxu1 %vm785_vm3, %v2409_v55  ;;  %v2413_v58 = vmul.f32 %v5319_v26, %v2412_v51 }
 0xfc9   :  { %v2626_v61 = vpop.permute.xlu1 %2625  ;;  %v2414_v29 = vadd.f32 %v5319_v26, %v2413_v58 }
 0xfca   :  { %4893 = vmatpush.xpose.msk.msra.mxu1 %vm663_vm0, %v2626_v61 }
 0xfcb   :  { %v2418_v9 = vsel %vm2417_vm7, %v5319_v26, %v2414_v29 }
 0xfcc   :  { %v2423_v57 = vsel %vm2420_vm8, %v2422_v0, %v2418_v9 }
 0xfcd   :  { %v2424_v36 = vmul.f32 %v2423_v57, %v7152_v17 }
 0xfce   :  { %4894 = vmatpush.xpose.msk.msra.mxu1 %vm663_vm0, %v2624_v37 }
 0xfcf   :  { %4884 = vmatmul.msk.f32.gmra.mxu1 %vm785_vm3, %v2424_v36 }
 0xfd1   :  { %v2622_v28 = vpop.permute.xlu1 %2621 }
 0xfd7   :  { %4895 = vmatmul.msk.f32.vlgmr.msra.gmra.mxu1 %vm663_vm0, %v2620_v54 }
 0xfde   :  { %v2524_v35 = vpop.f32.mrf.mxu3 }
 0xfdf   :  { %v2525_v59 = vadd.f32 %v2524_v35, %v6723_v27  ;;  %4896 = vmatmul.msk.f32.gmra.mxu1 %vm663_vm0, %v2622_v28 }
 0xfe1   :  { %v2530_v56 = vsel %vm785_vm3, %v2525_v59, -inf }
 0xfe2   :  { %2531 = vmax.xlane.f32.xlu2 %v2530_v56 }
 0xfe6   :  { %v2527_v12 = vpop.f32.mrf.mxu3 }
 0xfe7   :  { %v2528_v22 = vadd.f32 %v2527_v12, %v6731_v32 }
 0xfe9   :  { %v2533_v48 = vsel %vm785_vm3, %v2528_v22, -inf }
 0xffa   :  { %v2284_v5 = vpop.xlane.xlu2 %2283 }
 0xffb   :  { %v2288_v2 = vsub.f32 %v2277_v24, %v2284_v5 }
 0xffd   :  { %v2290_v40 = vmul.f32 1.442695, %v2288_v2 }
 0xfff   :  { %5320 = vpow2.f32 %v2290_v40 }
0x1000   :  { %5322 = vpow2.f32 %v2292_v14 }
0x1005   :  { %v5321_v3 = vpop.eup %5320 }
0x1006   :  { %v2294_v6 = vmul.f32 %v7183_v8, %v5321_v3  ;;  %v5323_v7 = vpop.eup %5322 }
0x1007   :  { %v7207_v42 = vmul.f32 %v7204_v15, %v5323_v7 }
0x1008   :  { %v2296_v1 = vsel %vm785_vm3, %v2294_v6, 0.0 }
0x1009   :  { %2297 = vadd.xlane.f32.xlu2 %v2296_v1  ;;  %v2299_v43 = vsel %vm785_vm3, %v7207_v42, 0.0 }
0x1044   :  { %v7187_v10 = vpop.f32.mrf.mxu1 }
0x104c   :  { %v7189_v11 = vpop.f32.mrf.mxu1 }
0x1054   :  { %v2652_v39 = vpop.f32.mrf.mxu1 }
0x1055   :  { %v2653_v4 = vadd.f32 %v2652_v39, %v6723_v27  ;;  %v2532_v17 = vpop.xlane.xlu2 %2531 }
0x1056   :  { %v2536_v18 = vsub.f32 %v2525_v59, %v2532_v17 }
0x1057   :  { %v2658_v19 = vsel %vm785_vm3, %v2653_v4, -inf }
0x1058   :  { %v2538_v34 = vmul.f32 1.442695, %v2536_v18  ;;  %2659 = vmax.xlane.f32.xlu1 %v2658_v19 }
0x105a   :  { %5324 = vpow2.f32 %v2538_v34 }
0x105c   :  { %v2655_v41 = vpop.f32.mrf.mxu1 }
0x105d   :  { %v2656_v23 = vadd.f32 %v2655_v41, %v6731_v32 }
0x105f   :  { %v2661_v25 = vsel %vm785_vm3, %v2656_v23, -inf }
0x1060   :  { %v5325_v24 = vpop.eup %5324  ;;  %2534 = vmax.xlane.f32.xlu1 %v2533_v48  ;;  %2662 = vmax.xlane.f32.xlu0 %v2661_v25 }
0x1061   :  { %v7199_v33 = vmul.f32 %v7183_v8, %v5325_v24 }
0x1063   :  { %v2544_v37 = vsel %vm785_vm3, %v7199_v33, 0.0 }
0x1064   :  { %2545 = vadd.xlane.f32.xlu2 %v2544_v37 }
0x1068   :  { %2300 = vadd.xlane.f32.xlu0 %v2299_v43 }
0x107c   :  { %5146 = vrot.lane.b32.xlu2 %v7119_v63, %s6229_s29  ;;  %v2298_v44 = vpop.xlane.xlu2 %2297 }
0x107d   :  { %v2302_v45 = vmax.f32 %v2298_v44, 1e-16 }
0x107f   :  { %5326 = vrcp.f32 %v2302_v45  ;;  %v2315_v30 = vand.u32 2147483648, %v2302_v45  ;;  %v2313_v46 = vand.u32 2147483647, %v2302_v45  ;;  %vm2309_vm10 = vweird.f32 %v2302_v45 }
0x1081   :  { %v2316_v21 = vor.u32 1.1754944e-38, %v2315_v30  ;;  %vm2314_vm12 = vcmp.eq.f32.partialorder %v2313_v46, 8.507059e+37 }
0x1085   :  { %v5327_v49 = vpop.eup %5326 }
0x1086   :  { %v2305_v31 = vmul.f32 %v5327_v49, %v2302_v45  ;;  %vm2310_vm9 = vweird.f32 %v5327_v49 }
0x1087   :  { %vm2311_vm11 = vmor %vm2309_vm10, %vm2310_vm9 }
0x1088   :  { %v2306_v50 = vsub.f32 1.0, %v2305_v31 }
0x108a   :  { %v2307_v38 = vmul.f32 %v5327_v49, %v2306_v50 }
0x108c   :  { %v2308_v26 = vadd.f32 %v5327_v49, %v2307_v38 }
0x108e   :  { %v2312_v52 = vsel %vm2311_vm11, %v5327_v49, %v2308_v26 }
0x108f   :  { %v2317_v53 = vsel %vm2314_vm12, %v2316_v21, %v2312_v52 }
0x1090   :  { %v2318_v47 = vmul.f32 %v2317_v53, %v2294_v6 }
0x1092   :  { %4885 = vmatmul.msk.f32.vlgmr.msrb.gmra.mxu2 %vm785_vm3, %v2318_v47 }
0x10cb   :  { %v2660_v51 = vpop.xlane.xlu1 %2659 }
0x10cc   :  { %v2664_v55 = vsub.f32 %v2653_v4, %v2660_v51 }
0x10ce   :  { %v2666_v16 = vmul.f32 1.442695, %v2664_v55 }
0x10d0   :  { %5328 = vpow2.f32 %v2666_v16 }
0x10d3   :  { %v2535_v58 = vpop.xlane.xlu1 %2534  ;;  %v2663_v60 = vpop.xlane.xlu0 %2662 }
0x10d4   :  { %v2537_v61 = vsub.f32 %v2528_v22, %v2535_v58  ;;  %v2665_v29 = vsub.f32 %v2656_v23, %v2663_v60 }
0x10d6   :  { %v5329_v0 = vpop.eup %5328  ;;  %v2540_v9 = vmul.f32 1.442695, %v2537_v61  ;;  %v2668_v57 = vmul.f32 1.442695, %v2665_v29 }
0x10d7   :  { %v2546_v36 = vpop.xlane.xlu2 %2545  ;;  %v7215_v54 = vmul.f32 %v7183_v8, %v5329_v0 }
0x10d8   :  { %5330 = vpow2.f32 %v2540_v9  ;;  %v2550_v7 = vmax.f32 %v2546_v36, 1e-16 }
0x10d9   :  { %5332 = vpow2.f32 %v2668_v57  ;;  %v2672_v28 = vsel %vm785_vm3, %v7215_v54, 0.0 }
0x10da   :  { %2673 = vadd.xlane.f32.xlu1 %v2672_v28  ;;  %v2563_v57 = vand.u32 2147483648, %v2550_v7  ;;  %vm2557_vm10 = vweird.f32 %v2550_v7 }
0x10db   :  { %v2301_v35 = vpop.xlane.xlu0 %2300 }
0x10dc   :  { %v2303_v59 = vmax.f32 %v2301_v35, 1e-16  ;;  %v2561_v35 = vand.u32 2147483647, %v2550_v7 }
0x10de   :  { %v5331_v56 = vpop.eup %5330  ;;  %5334 = vrcp.f32 %v2303_v59  ;;  %v2330_v17 = vand.u32 2147483648, %v2303_v59  ;;  %v2328_v19 = vand.u32 2147483647, %v2303_v59  ;;  %vm2324_vm14 = vweird.f32 %v2303_v59 }
0x10df   :  { %v5333_v5 = vpop.eup %5332  ;;  %v5147_v2 = vpop.permute.xlu2 %5146  ;;  %v7220_v40 = vmul.f32 %v7204_v15, %v5331_v56  ;;  %5336 = vrcp.f32 %v2550_v7 }
0x10e0   :  { %v5148_v3 = vunpack.i.l.bf16 %v5147_v2  ;;  %v7223_v6 = vmul.f32 %v7204_v15, %v5333_v5  ;;  %v5149_v13 = vunpack.i.h.bf16 %v5147_v2  ;;  %v2331_v34 = vor.u32 1.1754944e-38, %v2330_v17 }
0x10e1   :  { %v2547_v1 = vsel %vm785_vm3, %v7220_v40, 0.0  ;;  %vm2329_vm2 = vcmp.eq.f32.partialorder %v2328_v19, 8.507059e+37 }
0x10e2   :  { %2548 = vadd.xlane.f32.xlu1 %v2547_v1  ;;  %v2675_v62 = vsel %vm785_vm3, %v7223_v6, 0.0  ;;  %2736 = vmatpush.msra.mxu2 %v5148_v3  ;;  %v2564_v3 = vor.u32 1.1754944e-38, %v2563_v57 }
0x10e3   :  { %2676 = vadd.xlane.f32.xlu0 %v2675_v62 }
0x10e4   :  { %v5335_v39 = vpop.eup %5334  ;;  %2737 = vmatpush.msra.mxu2 %v5149_v13 }
0x10e5   :  { %v2320_v14 = vmul.f32 %v5335_v39, %v2303_v59  ;;  %vm2325_vm13 = vweird.f32 %v5335_v39  ;;  %v5337_v24 = vpop.eup %5336 }
0x10e6   :  { %vm2326_vm15 = vmor %vm2324_vm14, %vm2325_vm13  ;;  %v2553_v49 = vmul.f32 %v5337_v24, %v2550_v7  ;;  %vm2558_vm8 = vweird.f32 %v5337_v24 }
0x10e7   :  { %v2321_v4 = vsub.f32 1.0, %v2320_v14  ;;  %vm7239_vm11 = vmor %vm2557_vm10, %vm2558_vm8 }
0x10e9   :  { %v2322_v18 = vmul.f32 %v5335_v39, %v2321_v4 }
0x10eb   :  { %v2323_v12 = vadd.f32 %v5335_v39, %v2322_v18 }
0x10ed   :  { %v2327_v22 = vsel %vm2326_vm15, %v5335_v39, %v2323_v12  ;;  %vm2562_vm15 = vcmp.eq.f32.partialorder %v2561_v35, 8.507059e+37 }
0x10ee   :  { %v2332_v41 = vsel %vm2329_vm2, %v2331_v34, %v2327_v22 }
0x10ef   :  { %v2333_v23 = vmul.f32 %v2332_v41, %v7207_v42 }
0x10f1   :  { %4886 = vmatmul.msk.f32.gmra.mxu2 %vm785_vm3, %v2333_v23 }
0x10f7   :  { %5151 = vrot.lane.b32.xlu0 %v7119_v63, %s6226_s14  ;;  %v2554_v63 = vsub.f32 1.0, %v2553_v49  ;;  %v5205_v49 = vld [vmem:[#allocation26] ss:$0 sm:$0xff]  ;;  %s7898_s14 = sld [smem:[#allocation60_spill]] }
0x10f9   :  { %v2555_v47 = vmul.f32 %v5337_v24, %v2554_v63 }
0x10fb   :  { %v2556_v29 = vadd.f32 %v5337_v24, %v2555_v47 }
0x10fd   :  { %v2560_v5 = vsel %vm7239_vm11, %v5337_v24, %v2556_v29 }
0x10fe   :  { %v2565_v4 = vsel %vm2562_vm15, %v2564_v3, %v2560_v5 }
0x10ff   :  { %v2566_v12 = vmul.f32 %v2565_v4, %v7199_v33  ;;  %v5204_v33 = vld [vmem:[#allocation23] ss:$0 sm:$0xff] }
0x1115   :  { %v2485_v7 = vpop.f32.mrf.mxu2 }
0x1116   :  { %v2486_v24 = vadd.f32 %v2485_v7, %v7187_v10 }
0x114d   :  { %v2674_v48 = vpop.xlane.xlu1 %2673 }
0x114e   :  { %v2678_v25 = vmax.f32 %v2674_v48, 1e-16 }
0x1150   :  { %5338 = vrcp.f32 %v2678_v25  ;;  %v2691_v30 = vand.u32 2147483648, %v2678_v25  ;;  %v2689_v46 = vand.u32 2147483647, %v2678_v25  ;;  %vm2685_vm5 = vweird.f32 %v2678_v25 }
0x1152   :  { %v2692_v52 = vor.u32 1.1754944e-38, %v2691_v30  ;;  %vm2690_vm7 = vcmp.eq.f32.partialorder %v2689_v46, 8.507059e+37 }
0x1155   :  { %v2549_v37 = vpop.xlane.xlu1 %2548 }
0x1156   :  { %v5339_v43 = vpop.eup %5338  ;;  %v7233_v44 = vmax.f32 %v2549_v37, 1e-16  ;;  %v2677_v45 = vpop.xlane.xlu0 %2676 }
0x1157   :  { %v2681_v31 = vmul.f32 %v5339_v43, %v2678_v25  ;;  %v2679_v50 = vmax.f32 %v2677_v45, 1e-16  ;;  %vm2686_vm4 = vweird.f32 %v5339_v43  ;;  %v2772_v25 = vpop.f32.mrf.mxu3 }
0x1158   :  { %5340 = vrcp.f32 %v7233_v44  ;;  %vm2687_vm6 = vmor %vm2685_vm5, %vm2686_vm4  ;;  %v2578_v19 = vand.u32 2147483648, %v7233_v44  ;;  %vm2572_vm4 = vweird.f32 %v7233_v44  ;;  %v2576_v34 = vand.u32 2147483647, %v7233_v44 }
0x1159   :  { %v2682_v42 = vsub.f32 1.0, %v2681_v31  ;;  %5342 = vrcp.f32 %v2679_v50  ;;  %v2706_v9 = vand.u32 2147483648, %v2679_v50  ;;  %v2704_v28 = vand.u32 2147483647, %v2679_v50 }
0x115a   :  { %vm2700_vm12 = vweird.f32 %v2679_v50  ;;  %v2579_v22 = vor.u32 1.1754944e-38, %v2578_v19  ;;  %v2773_v45 = vadd.f32 %v5204_v33, %v2772_v25 }
0x115b   :  { %v2683_v38 = vmul.f32 %v5339_v43, %v2682_v42  ;;  %vm2705_vm14 = vcmp.eq.f32.partialorder %v2704_v28, 8.507059e+37 }
0x115c   :  { %v2788_v30 = vmul.f32 %v5205_v49, %v2773_v45 }
0x115d   :  { %v2684_v26 = vadd.f32 %v5339_v43, %v2683_v38 }
0x115e   :  { %v5341_v21 = vpop.eup %5340 }
0x115f   :  { %v5343_v53 = vpop.eup %5342  ;;  %v2568_v51 = vmul.f32 %v5341_v21, %v7233_v44  ;;  %v2688_v55 = vsel %vm2687_vm6, %v5339_v43, %v2684_v26  ;;  %vm2573_vm2 = vweird.f32 %v5341_v21  ;;  %vm2577_vm6 = vcmp.eq.f32.partialorder %v2576_v34, 8.507059e+37  ;;  %v2775_v38 = vpop.f32.mrf.mxu3 }
0x1160   :  { %v2696_v16 = vmul.f32 %v5343_v53, %v2679_v50  ;;  %v2693_v58 = vsel %vm2690_vm7, %v2692_v52, %v2688_v55  ;;  %vm2701_vm9 = vweird.f32 %v5343_v53  ;;  %vm2574_vm5 = vmor %vm2572_vm4, %vm2573_vm2  ;;  %v5206_v50 = vld [vmem:[#allocation25] ss:$0 sm:$0xff] }
0x1161   :  { %v2694_v60 = vmul.f32 %v2693_v58, %v7215_v54  ;;  %v2569_v0 = vsub.f32 1.0, %v2568_v51  ;;  %vm2702_vm13 = vmor %vm2700_vm12, %vm2701_vm9  ;;  %v2707_v54 = vor.u32 1.1754944e-38, %v2706_v9 }
0x1162   :  { %v2697_v61 = vsub.f32 1.0, %v2696_v16 }
0x1163   :  { %4897 = vmatmul.msk.f32.vlgmr.msra.gmra.mxu2 %vm785_vm3, %v2694_v60  ;;  %v2570_v2 = vmul.f32 %v5341_v21, %v2569_v0 }
0x1164   :  { %v2698_v36 = vmul.f32 %v5343_v53, %v2697_v61 }
0x1165   :  { %v2571_v17 = vadd.f32 %v5341_v21, %v2570_v2 }
0x1166   :  { %v2699_v56 = vadd.f32 %v5343_v53, %v2698_v36 }
0x1168   :  { %v2703_v1 = vsel %vm2702_vm13, %v5343_v53, %v2699_v56  ;;  %v2776_v53 = vadd.f32 %v5204_v33, %v2775_v38 }
0x1169   :  { %v5152_v13 = vpop.permute.xlu0 %5151  ;;  %v2708_v62 = vsel %vm2705_vm14, %v2707_v54, %v2703_v1 }
0x116a   :  { %v5153_v39 = vunpack.i.l.bf16 %v5152_v13  ;;  %v2709_v14 = vmul.f32 %v2708_v62, %v7223_v6  ;;  %v5154_v18 = vunpack.i.h.bf16 %v5152_v13  ;;  %v2575_v6 = vsel %vm2574_vm5, %v5341_v21, %v2571_v17 }
0x116b   :  { %v2580_v41 = vsel %vm2577_vm6, %v2579_v22, %v2575_v6  ;;  %v2789_v55 = vmul.f32 %v5205_v49, %v2776_v53  ;;  %vm2985_vm5 = vcmask 31744  }
0x116c   :  { %2608 = vmatpush.msra.mxu0 %v5153_v39  ;;  %4898 = vmatmul.msk.f32.gmra.mxu2 %vm785_vm3, %v2709_v14  ;;  %v2581_v23 = vmul.f32 %v2580_v41, %v7220_v40 }
0x116e   :  { %2609 = vmatpush.msra.mxu0 %v5154_v18 }
0x116f   :  { %4891 = vmatmul.msk.f32.vlgmr.msra.gmra.mxu0 %vm785_vm3, %v2566_v12 }
0x1174   :  { %v2488_v48 = vpop.f32.mrf.mxu2 }
0x1175   :  { %v2489_v63 = vadd.f32 %v2488_v48, %v7189_v11 }
0x1177   :  { %4892 = vmatmul.msk.f32.gmra.mxu0 %vm785_vm3, %v2581_v23 }
0x11e6   :  { %v2739_v37 = vpop.f32.mrf.mxu2 }
0x11ec   :  { %v2611_v43 = vpop.f32.mrf.mxu0 }
0x11ed   :  { %v2617_v44 = vadd.f32 %v2611_v43, %v2486_v24 }
0x11ef   :  { %v2745_v31 = vadd.f32 %v2739_v37, %v2617_v44  ;;  %v2742_v52 = vpop.f32.mrf.mxu2 }
0x11f1   :  { %v2747_v42 = vmul.f32 0.25, %v2745_v31 }
0x11f3   :  { %v2782_v40 = vmul.f32 %v5206_v50, %v2747_v42 }
0x11f4   :  { %v2614_v46 = vpop.f32.mrf.mxu0 }
0x11f5   :  { %v2618_v26 = vadd.f32 %v2614_v46, %v2489_v63  ;;  %v2790_v21 = vadd.f32 %v2788_v30, %v2782_v40 }
0x11f7   :  { %v2746_v47 = vadd.f32 %v2742_v52, %v2618_v26  ;;  %v2792_v10 = vsel %vm663_vm0, %v2790_v21, 0.0 }
0x11f8   :  { %2793 = vadd.xlane.f32.xlu1 %v2792_v10 }
0x11f9   :  { %v2748_v51 = vmul.f32 0.25, %v2746_v47 }
0x11fb   :  { %v2783_v16 = vmul.f32 %v5206_v50, %v2748_v51 }
0x11fd   :  { %v2791_v58 = vadd.f32 %v2789_v55, %v2783_v16 }
0x11ff   :  { %v2795_v60 = vsel %vm663_vm0, %v2791_v58, 0.0 }
0x1200   :  { %2796 = vadd.xlane.f32.xlu1 %v2795_v60 }
0x126b   :  { %v2794_v61 = vpop.xlane.xlu1 %2793 }
0x126c   :  { %v4901_v11 = vmul.f32 -1.442695, %v2794_v61  ;;  %v2929_v61 = vld [vmem:[%s7883_s23] sm:$0xff] }
0x126d   :  { %2949 = vmatpush.msrb.mxu1 %v2929_v61 }
0x126e   :  { %5344 = vpow2.f32 %v4901_v11  ;;  %v2895_v11 = vld [vmem:[%s7884_s22] sm:$0xff] }
0x126f   :  { %2921 = vmatpush.msrb.mxu0 %v2895_v11 }
0x1273   :  { %v2797_v29 = vpop.xlane.xlu1 %2796 }
0x1274   :  { %v5345_v0 = vpop.eup %5344  ;;  %v4902_v9 = vmul.f32 -1.442695, %v2797_v29  ;;  %v2957_v29 = vld [vmem:[%s7885_s26] sm:$0xff] }
0x1275   :  { %v2804_v57 = vadd.f32 1.0, %v5345_v0  ;;  %2977 = vmatpush.msrb.mxu2 %v2957_v29 }
0x1276   :  { %5346 = vpow2.f32 %v4902_v9 }
0x1277   :  { %5348 = vrcp.f32 %v2804_v57  ;;  %v2817_v54 = vand.u32 2147483648, %v2804_v57  ;;  %v2815_v2 = vand.u32 2147483647, %v2804_v57  ;;  %vm2811_vm8 = vweird.f32 %v2804_v57 }
0x1279   :  { %v2818_v13 = vor.u32 1.1754944e-38, %v2817_v54  ;;  %vm2816_vm10 = vcmp.eq.f32.partialorder %v2815_v2, 8.507059e+37  ;;  %v5207_v2 = vld [vmem:[%s7886_s19] ss:$0 sm:$0xff] }
0x127c   :  { %v5347_v36 = vpop.eup %5346 }
0x127d   :  { %v5349_v28 = vpop.eup %5348  ;;  %v2805_v35 = vadd.f32 1.0, %v5347_v36 }
0x127e   :  { %v2807_v59 = vmul.f32 %v5349_v28, %v2804_v57  ;;  %vm2812_vm7 = vweird.f32 %v5349_v28 }
0x127f   :  { %5350 = vrcp.f32 %v2805_v35  ;;  %vm2813_vm9 = vmor %vm2811_vm8, %vm2812_vm7  ;;  %v2832_v18 = vand.u32 2147483648, %v2805_v35  ;;  %v2830_v12 = vand.u32 2147483647, %v2805_v35  ;;  %vm2826_vm12 = vweird.f32 %v2805_v35 }
0x1280   :  { %v2808_v56 = vsub.f32 1.0, %v2807_v59 }
0x1281   :  { %v2833_v22 = vor.u32 1.1754944e-38, %v2832_v18  ;;  %vm2831_vm14 = vcmp.eq.f32.partialorder %v2830_v12, 8.507059e+37  ;;  %v5210_v18 = vld [vmem:[#allocation29] ss:$0 sm:$0xff] }
0x1282   :  { %v2809_v5 = vmul.f32 %v5349_v28, %v2808_v56 }
0x1284   :  { %v2810_v3 = vadd.f32 %v5349_v28, %v2809_v5 }
0x1285   :  { %v5351_v1 = vpop.eup %5350 }
0x1286   :  { %v2814_v62 = vsel %vm2813_vm9, %v5349_v28, %v2810_v3  ;;  %v2822_v39 = vmul.f32 %v5351_v1, %v2805_v35  ;;  %vm2827_vm11 = vweird.f32 %v5351_v1 }
0x1287   :  { %v2819_v14 = vsel %vm2816_vm10, %v2818_v13, %v2814_v62  ;;  %vm2828_vm13 = vmor %vm2826_vm12, %vm2827_vm11 }
0x1288   :  { %v2838_v4 = vsub.f32 1.0, %v2819_v14  ;;  %v2823_v17 = vsub.f32 1.0, %v2822_v39  ;;  %v2836_v41 = vmul.f32 %v2819_v14, %v2773_v45 }
0x128a   :  { %v2824_v19 = vmul.f32 %v5351_v1, %v2823_v17  ;;  %v2840_v34 = vmul.f32 %v2838_v4, %v2747_v42  ;;  %v5209_v17 = vld [vmem:[#allocation28] ss:$0 sm:$0xff] }
0x128c   :  { %v2825_v6 = vadd.f32 %v5351_v1, %v2824_v19  ;;  %v2842_v48 = vadd.f32 %v2840_v34, %v2836_v41 }
0x128e   :  { %v2829_v23 = vsel %vm2828_vm13, %v5351_v1, %v2825_v6  ;;  %v2844_v37 = vmax.f32 %v2842_v48, 0.0  ;;  %v5208_v1 = vld [vmem:[#allocation37] ss:$0 sm:$0xff] }
0x128f   :  { %v2834_v7 = vsel %vm2831_vm14, %v2833_v22, %v2829_v23 }
0x1290   :  { %v2839_v25 = vsub.f32 1.0, %v2834_v7  ;;  %v2837_v33 = vmul.f32 %v2834_v7, %v2776_v53  ;;  %v2846_v49 = vsel %vm663_vm0, %v2844_v37, 0.0 }
0x1292   :  { %v2841_v24 = vmul.f32 %v2839_v25, %v2748_v51  ;;  %v5211_v25 = vld [vmem:[#allocation31] ss:$0 sm:$0xff] }
0x1294   :  { %v2843_v43 = vadd.f32 %v2841_v24, %v2837_v33 }
0x1296   :  { %v2845_v44 = vmax.f32 %v2843_v43, 0.0 }
0x1298   :  { %v2847_v31 = vsel %vm663_vm0, %v2845_v44, 0.0 }
0x1299   :  { %v2848_v50 = vadd.f32 %v2847_v31, %v2846_v49 }
0x129b   :  { %v2849_v42 = vrot.slane %v2848_v50, 4 }
0x129d   :  { %v2850_v30 = vadd.f32 %v2849_v42, %v2848_v50 }
0x129f   :  { %v2851_v63 = vrot.slane %v2850_v30, 2 }
0x12a1   :  { %v2852_v45 = vadd.f32 %v2851_v63, %v2850_v30  ;;  %v3488_v30 = vld [vmem:[%s7887_s9] sm:$0xff] }
0x12a3   :  { %v2853_v40 = vrot.slane %v2852_v45, 1 }
0x12a5   :  { %v2854_v38 = vadd.f32 %v2853_v40, %v2852_v45 }
0x12a7   :  { %v2855_v46 = vmul.f32 %v2854_v38, %v6886_v20 }
0x12a9   :  { %v2856_v26 = vsub.f32 %v2844_v37, %v2855_v46  ;;  %v2857_v21 = vsub.f32 %v2845_v44, %v2855_v46 }
0x12ab   :  { %v2858_v52 = vmul.f32 %v2856_v26, %v2856_v26  ;;  %v2859_v53 = vmul.f32 %v2857_v21, %v2857_v21 }
0x12ad   :  { %v2860_v47 = vsel %vm663_vm0, %v2858_v52, 0.0  ;;  %v2861_v10 = vsel %vm663_vm0, %v2859_v53, 0.0 }
0x12ae   :  { %v2862_v51 = vadd.f32 %v2861_v10, %v2860_v47 }
0x12b0   :  { %v2863_v55 = vrot.slane %v2862_v51, 4 }
0x12b2   :  { %v2864_v16 = vadd.f32 %v2863_v55, %v2862_v51 }
0x12b4   :  { %v2865_v58 = vrot.slane %v2864_v16, 2 }
0x12b6   :  { %v2866_v60 = vadd.f32 %v2865_v58, %v2864_v16 }
0x12b8   :  { %v2867_v0 = vrot.slane %v2866_v60, 1 }
0x12ba   :  { %v2868_v9 = vadd.f32 %v2867_v0, %v2866_v60 }
0x12bc   :  { %v2869_v57 = vmul.f32 %v2868_v9, %v6886_v20 }
0x12be   :  { %v2870_v36 = vadd.f32 1e-05, %v2869_v57 }
0x12c0   :  { %5352 = vrsqrt.f32 %v2870_v36  ;;  %vm2877_vm2 = vweird.f32 %v2870_v36 }
0x12c6   :  { %v5353_v28 = vpop.eup %5352 }
0x12c7   :  { %v2872_v35 = vmul.f32 %v5353_v28, %v2870_v36  ;;  %vm2878_vm15 = vweird.f32 %v5353_v28 }
0x12c8   :  { %vm2879_vm4 = vmor %vm2877_vm2, %vm2878_vm15 }
0x12c9   :  { %v2873_v59 = vmul.f32 %v5353_v28, %v2872_v35 }
0x12cb   :  { %v2874_v56 = vmul.f32 0.5, %v2873_v59 }
0x12cd   :  { %v2875_v54 = vsub.f32 1.5, %v2874_v56 }
0x12cf   :  { %v2876_v5 = vmul.f32 %v5353_v28, %v2875_v54 }
0x12d1   :  { %v2880_v3 = vsel %vm2879_vm4, %v5353_v28, %v2876_v5 }
0x12d2   :  { %v2881_v13 = vmul.f32 %v2880_v3, %v2856_v26  ;;  %v2882_v39 = vmul.f32 %v2880_v3, %v2857_v21 }
0x12d4   :  { %v2887_v62 = vmul.f32 %v5207_v2, %v2881_v13  ;;  %v2888_v20 = vmul.f32 %v5207_v2, %v2882_v39 }
0x12d6   :  { %v7268_v14 = vadd.f32 %v5208_v1, %v2887_v62  ;;  %v7276_v4 = vadd.f32 %v5208_v1, %v2888_v20 }
0x12d8   :  { %4903 = vmatmul.msk.f32.vlgmr.msrb.gmra.mxu0 %vm663_vm0, %v7268_v14  ;;  %4905 = vmatmul.msk.f32.vlgmr.msrb.gmra.mxu1 %vm663_vm0, %v7268_v14 }
0x12d9   :  { %4907 = vmatmul.msk.f32.vlgmr.msrb.gmra.mxu2 %vm663_vm0, %v7268_v14 }
0x12e0   :  { %4904 = vmatmul.msk.f32.gmra.mxu0 %vm663_vm0, %v7276_v4  ;;  %4906 = vmatmul.msk.f32.gmra.mxu1 %vm663_vm0, %v7276_v4 }
0x12e1   :  { %4908 = vmatmul.msk.f32.gmra.mxu2 %vm663_vm0, %v7276_v4 }
0x1355   :  { %v2923_v19 = vpop.f32.mrf.mxu0  ;;  %v2951_v12 = vpop.f32.mrf.mxu1 }
0x1356   :  { %v7284_v34 = vadd.f32 %v5209_v17, %v2923_v19  ;;  %v7286_v6 = vadd.f32 %v5210_v18, %v2951_v12 }
0x1358   :  { %3077 = vrot.lane.b32.xlu0 %v7286_v6, %s6230_s8  ;;  %3073 = vrot.lane.b32.xlu2 %v7284_v34, %s6230_s8 }
0x135c   :  { %v2979_v22 = vpop.f32.mrf.mxu2 }
0x135d   :  { %v2926_v41 = vpop.f32.mrf.mxu0  ;;  %v2954_v23 = vpop.f32.mrf.mxu1  ;;  %v2980_v24 = vadd.f32 %v5211_v25, %v2979_v22 }
0x135e   :  { %v2927_v7 = vadd.f32 %v5209_v17, %v2926_v41  ;;  %v7292_v48 = vadd.f32 %v5210_v18, %v2954_v23 }
0x1360   :  { %3079 = vrot.lane.b32.xlu1 %v7292_v48, %s6230_s8  ;;  %4909 = vmatpush.xpose.msk.msrb.mxu3 %vm2985_vm5, %v7292_v48 }
0x1361   :  { %3075 = vrot.lane.b32.xlu0 %v2927_v7, %s6230_s8  ;;  %3236 = vrot.lane.b32.xlu2 %v7292_v48, %s6228_s12 }
0x1364   :  { %v2982_v33 = vpop.f32.mrf.mxu2  ;;  %4910 = vmatpush.xpose.msk.msrb.mxu3 %vm2985_vm5, %v7286_v6 }
0x1365   :  { %v2983_v37 = vadd.f32 %v5211_v25, %v2982_v33 }
0x1367   :  { %3221 = vmatpush.msra.mxu2 %v2983_v37  ;;  %4911 = vmatmul.msk.f32.vlgmr.msrb.gmra.mxu3 %vm2985_vm5, %v7284_v34  ;;  %v7305_v43 = vpack.i.bf16 %v2980_v24, %v2983_v37 }
0x1368   :  { %3232 = vrot.lane.b32.xlu1 %v2927_v7, %s6228_s12 }
0x1369   :  { %3222 = vmatpush.msra.mxu2 %v2980_v24  ;;  %3234 = vrot.lane.b32.xlu0 %v7286_v6, %s6228_s12 }
0x136a   :  { %3230 = vrot.lane.b32.xlu2 %v7284_v34, %s6228_s12 }
0x136f   :  { %4912 = vmatmul.msk.f32.gmra.mxu3 %vm2985_vm5, %v2927_v7 }
0x13b2   :  { %v3074_v44 = vpop.permute.xlu2 %3073 }
0x13bb   :  { %v3237_v49 = vpop.permute.xlu2 %3236 }
0x13bc   :  { %4921 = vmatpush.xpose.msk.msra.mxu3 %vm2985_vm5, %v3237_v49 }
0x13c4   :  { %v3231_v45 = vpop.permute.xlu2 %3230 }
0x13ca   :  { %v3078_v31 = vpop.permute.xlu0 %3077 }
0x13d2   :  { %v3080_v50 = vpop.permute.xlu1 %3079 }
0x13d3   :  { %v3076_v42 = vpop.permute.xlu0 %3075  ;;  %4913 = vmatpush.xpose.msk.msra.mxu0 %vm2985_vm5, %v3080_v50 }
0x13d7   :  { %4914 = vmatpush.xpose.msk.msra.mxu0 %vm2985_vm5, %v3078_v31 }
0x13da   :  { %4915 = vmatmul.msk.f32.vlgmr.msra.gmra.mxu0 %vm2985_vm5, %v3074_v44  ;;  %v3233_v40 = vpop.permute.xlu1 %3232 }
0x13db   :  { %v3235_v63 = vpop.permute.xlu0 %3234 }
0x13dc   :  { %4922 = vmatpush.xpose.msk.msra.mxu3 %vm2985_vm5, %v3235_v63 }
0x13df   :  { %4923 = vmatmul.msk.f32.vlgmr.msra.gmra.mxu3 %vm2985_vm5, %v3231_v45 }
0x13e0   :  { %3508 = vmatpush.msrb.mxu3 %v3488_v30 }
0x13e2   :  { %4916 = vmatmul.msk.f32.gmra.mxu0 %vm2985_vm5, %v3076_v42 }
0x13e7   :  { %4924 = vmatmul.msk.f32.gmra.mxu3 %vm2985_vm5, %v3233_v40 }
0x13ea   :  { %v7326_v38 = vpop.f32.mrf.mxu3 }
0x13eb   :  { %v7378_v44 = vadd.f32 %v7326_v38, %v6723_v27 }
0x13ef   :  { %4933 = vmatmul.msk.f32.vlgmr.msrb.gmra.mxu3 %vm663_vm0, %v7268_v14 }
0x13f2   :  { %v3018_v21 = vpop.f32.mrf.mxu3 }
0x13f3   :  { %v7344_v11 = vadd.f32 %v3018_v21, %v6731_v32 }
0x13f5   :  { %v3024_v29 = vsel %vm785_vm3, %v7344_v11, -inf }
0x13f7   :  { %4934 = vmatmul.msk.f32.gmra.mxu3 %vm663_vm0, %v7276_v4 }
0x1457   :  { %v3106_v46 = vpop.f32.mrf.mxu0 }
0x1458   :  { %v3107_v26 = vadd.f32 %v3106_v46, %v6723_v27 }
0x145a   :  { %v3112_v52 = vsel %vm785_vm3, %v3107_v26, -inf }
0x145b   :  { %3113 = vmax.xlane.f32.xlu0 %v3112_v52 }
0x145f   :  { %v3109_v53 = vpop.f32.mrf.mxu0 }
0x1460   :  { %v3110_v47 = vadd.f32 %v3109_v53, %v6731_v32 }
0x1462   :  { %v3263_v10 = vpop.f32.mrf.mxu3  ;;  %v3115_v51 = vsel %vm785_vm3, %v3110_v47, -inf }
0x1463   :  { %v3264_v55 = vadd.f32 %v3263_v10, %v6723_v27  ;;  %3116 = vmax.xlane.f32.xlu2 %v3115_v51 }
0x1465   :  { %v3269_v16 = vsel %vm785_vm3, %v3264_v55, -inf }
0x1466   :  { %3270 = vmax.xlane.f32.xlu1 %v3269_v16 }
0x146a   :  { %v3266_v58 = vpop.f32.mrf.mxu3 }
0x146b   :  { %v3267_v60 = vadd.f32 %v3266_v58, %v6731_v32 }
0x146d   :  { %v3272_v61 = vsel %vm785_vm3, %v3267_v60, -inf }
0x146e   :  { %3273 = vmax.xlane.f32.xlu0 %v3272_v61 }
0x1482   :  { %5156 = vrot.lane.b32.xlu0 %v7305_v43, %s6230_s8 }
0x148a   :  { %3358 = vrot.lane.b32.xlu0 %v7284_v34, %s6231_s1 }
0x1492   :  { %3360 = vrot.lane.b32.xlu0 %v2927_v7, %s6231_s1 }
0x149a   :  { %5161 = vrot.lane.b32.xlu0 %v7305_v43, %s6228_s12 }
0x14c4   :  { %3025 = vmax.xlane.f32.xlu0 %v3024_v29 }
0x14ce   :  { %v3114_v0 = vpop.xlane.xlu0 %3113 }
0x14cf   :  { %v3118_v9 = vsub.f32 %v3107_v26, %v3114_v0 }
0x14d1   :  { %v3120_v57 = vmul.f32 1.442695, %v3118_v9 }
0x14d3   :  { %5354 = vpow2.f32 %v3120_v57 }
0x14d6   :  { %v3117_v36 = vpop.xlane.xlu2 %3116 }
0x14d7   :  { %v3119_v59 = vsub.f32 %v3110_v47, %v3117_v36 }
0x14d9   :  { %v5355_v28 = vpop.eup %5354  ;;  %v3271_v35 = vpop.xlane.xlu1 %3270  ;;  %v3122_v3 = vmul.f32 1.442695, %v3119_v59 }
0x14da   :  { %v3275_v56 = vsub.f32 %v3264_v55, %v3271_v35  ;;  %v7349_v54 = vmul.f32 %v7183_v8, %v5355_v28 }
0x14dc   :  { %v3277_v5 = vmul.f32 1.442695, %v3275_v56  ;;  %v3126_v2 = vsel %vm785_vm3, %v7349_v54, 0.0 }
0x14dd   :  { %3127 = vadd.xlane.f32.xlu2 %v3126_v2 }
0x14de   :  { %5356 = vpow2.f32 %v3277_v5 }
0x14df   :  { %5358 = vpow2.f32 %v3122_v3 }
0x14e1   :  { %v3274_v17 = vpop.xlane.xlu0 %3273 }
0x14e2   :  { %v3276_v41 = vsub.f32 %v3267_v60, %v3274_v17 }
0x14e4   :  { %v5357_v1 = vpop.eup %5356  ;;  %v3279_v23 = vmul.f32 1.442695, %v3276_v41 }
0x14e5   :  { %v7354_v13 = vmul.f32 %v7183_v8, %v5357_v1  ;;  %v5359_v39 = vpop.eup %5358 }
0x14e6   :  { %v7359_v20 = vmul.f32 %v7204_v15, %v5359_v39  ;;  %5360 = vpow2.f32 %v3279_v23 }
0x14e7   :  { %v3283_v62 = vsel %vm785_vm3, %v7354_v13, 0.0 }
0x14e8   :  { %3284 = vadd.xlane.f32.xlu1 %v3283_v62  ;;  %v3129_v18 = vsel %vm785_vm3, %v7359_v20, 0.0 }
0x14ec   :  { %v5361_v24 = vpop.eup %5360 }
0x14f0   :  { %3130 = vadd.xlane.f32.xlu1 %v3129_v18  ;;  %v3610_v18 = vld [vmem:[%s7888_s21] sm:$0xff] }
0x14f4   :  { %v5157_v19 = vpop.permute.xlu0 %5156 }
0x14f5   :  { %v5158_v12 = vunpack.i.l.bf16 %v5157_v19  ;;  %3364 = vrot.lane.b32.xlu2 %v7292_v48, %s6231_s1  ;;  %v5159_v8 = vunpack.i.h.bf16 %v5157_v19  ;;  %v7372_v48 = vmul.f32 %v7204_v15, %v5361_v24  ;;  %v3582_v19 = vld [vmem:[%s7889_s2] sm:$0xff] }
0x14f7   :  { %3192 = vmatpush.msra.mxu1 %v5158_v12  ;;  %v3286_v37 = vsel %vm785_vm3, %v7372_v48, 0.0 }
0x14f9   :  { %3193 = vmatpush.msra.mxu1 %v5159_v8 }
0x14fc   :  { %v7365_v34 = vpop.permute.xlu0 %3358 }
0x1504   :  { %v7367_v22 = vpop.permute.xlu0 %3360 }
0x1509   :  { %3362 = vrot.lane.b32.xlu1 %v7286_v6, %s6231_s1  ;;  %v3021_v6 = vsel %vm785_vm3, %v7378_v44, -inf }
0x150c   :  { %v5162_v7 = vpop.permute.xlu0 %5161 }
0x150d   :  { %v5163_v25 = vunpack.i.l.bf16 %v5162_v7  ;;  %v5164_v33 = vunpack.i.h.bf16 %v5162_v7 }
0x150f   :  { %3347 = vmatpush.msrb.mxu0 %v5163_v25 }
0x1511   :  { %3348 = vmatpush.msrb.mxu0 %v5164_v33 }
0x1513   :  { %3602 = vmatpush.msra.mxu0 %v3582_v19 }
0x151e   :  { %3287 = vadd.xlane.f32.xlu2 %v3286_v37 }
0x1533   :  { %3022 = vmax.xlane.f32.xlu1 %v3021_v6 }
0x1550   :  { %v3128_v49 = vpop.xlane.xlu2 %3127 }
0x1551   :  { %v3132_v31 = vmax.f32 %v3128_v49, 1e-16 }
0x1553   :  { %5362 = vrcp.f32 %v3132_v31  ;;  %v3145_v40 = vand.u32 2147483648, %v3132_v31  ;;  %v3143_v38 = vand.u32 2147483647, %v3132_v31  ;;  %vm3139_vm7 = vweird.f32 %v3132_v31 }
0x1555   :  { %v3146_v21 = vor.u32 1.1754944e-38, %v3145_v40  ;;  %vm3144_vm9 = vcmp.eq.f32.partialorder %v3143_v38, 8.507059e+37  ;;  %v5214_v40 = vld [vmem:[%s7890_s10] ss:$0 sm:$0xff] }
0x1558   :  { %v3365_v50 = vpop.permute.xlu2 %3364 }
0x1559   :  { %v5363_v42 = vpop.eup %5362  ;;  %4927 = vmatpush.xpose.msk.msrb.mxu1 %vm2985_vm5, %v3365_v50 }
0x155a   :  { %v3135_v15 = vmul.f32 %v5363_v42, %v3132_v31  ;;  %vm3140_vm6 = vweird.f32 %v5363_v42 }
0x155b   :  { %v3285_v30 = vpop.xlane.xlu1 %3284  ;;  %vm3141_vm8 = vmor %vm3139_vm7, %vm3140_vm6 }
0x155c   :  { %v3136_v63 = vsub.f32 1.0, %v3135_v15  ;;  %v3289_v45 = vmax.f32 %v3285_v30, 1e-16 }
0x155e   :  { %v3137_v46 = vmul.f32 %v5363_v42, %v3136_v63  ;;  %5364 = vrcp.f32 %v3289_v45  ;;  %v3302_v60 = vand.u32 2147483648, %v3289_v45  ;;  %v3300_v29 = vand.u32 2147483647, %v3289_v45 }
0x155f   :  { %vm3296_vm11 = vweird.f32 %v3289_v45 }
0x1560   :  { %v3138_v26 = vadd.f32 %v5363_v42, %v3137_v46  ;;  %v3303_v57 = vor.u32 1.1754944e-38, %v3302_v60  ;;  %vm3301_vm13 = vcmp.eq.f32.partialorder %v3300_v29, 8.507059e+37 }
0x1562   :  { %v3142_v52 = vsel %vm3141_vm8, %v5363_v42, %v3138_v26 }
0x1563   :  { %v3131_v53 = vpop.xlane.xlu1 %3130  ;;  %v3147_v47 = vsel %vm3144_vm9, %v3146_v21, %v3142_v52 }
0x1564   :  { %v5365_v10 = vpop.eup %5364  ;;  %v3133_v51 = vmax.f32 %v3131_v53, 1e-16  ;;  %v3148_v55 = vmul.f32 %v3147_v47, %v7349_v54  ;;  %v5215_v53 = vld [vmem:[%s7891_s3] ss:$0 sm:$0xff]  ;;  %v3026_v47 = vpop.xlane.xlu0 %3025 }
0x1565   :  { %v3292_v16 = vmul.f32 %v5365_v10, %v3289_v45  ;;  %vm3297_vm10 = vweird.f32 %v5365_v10 }
0x1566   :  { %5366 = vrcp.f32 %v3133_v51  ;;  %4917 = vmatmul.msk.f32.vlgmr.msra.gmra.mxu1 %vm785_vm3, %v3148_v55  ;;  %vm3298_vm12 = vmor %vm3296_vm11, %vm3297_vm10  ;;  %v3160_v54 = vand.u32 2147483648, %v3133_v51  ;;  %v3158_v2 = vand.u32 2147483647, %v3133_v51  ;;  %vm3154_vm15 = vweird.f32 %v3133_v51 }
0x1567   :  { %v3293_v58 = vsub.f32 1.0, %v3292_v16 }
0x1568   :  { %v3161_v1 = vor.u32 1.1754944e-38, %v3160_v54  ;;  %vm3159_vm4 = vcmp.eq.f32.partialorder %v3158_v2, 8.507059e+37 }
0x1569   :  { %v3294_v61 = vmul.f32 %v5365_v10, %v3293_v58 }
0x156b   :  { %v3295_v0 = vadd.f32 %v5365_v10, %v3294_v61 }
0x156c   :  { %v5367_v9 = vpop.eup %5366 }
0x156d   :  { %v3150_v36 = vmul.f32 %v5367_v9, %v3133_v51  ;;  %v3299_v28 = vsel %vm3298_vm12, %v5365_v10, %v3295_v0  ;;  %vm3155_vm14 = vweird.f32 %v5367_v9  ;;  %v3028_v51 = vsub.f32 %v7344_v11, %v3026_v47 }
0x156e   :  { %v3304_v35 = vsel %vm3301_vm13, %v3303_v57, %v3299_v28  ;;  %vm3156_vm2 = vmor %vm3154_vm15, %vm3155_vm14  ;;  %v7451_v28 = vld [vmem:[%s7865_s28] sm:$0xff] }
0x156f   :  { %v3151_v59 = vsub.f32 1.0, %v3150_v36  ;;  %v3305_v56 = vmul.f32 %v3304_v35, %v7354_v13  ;;  %v3031_v16 = vmul.f32 1.442695, %v3028_v51 }
0x1571   :  { %4925 = vmatmul.msk.f32.vlgmr.msrb.gmra.mxu0 %vm785_vm3, %v3305_v56  ;;  %v3152_v5 = vmul.f32 %v5367_v9, %v3151_v59 }
0x1573   :  { %v3153_v3 = vadd.f32 %v5367_v9, %v3152_v5 }
0x1575   :  { %v3157_v62 = vsel %vm3156_vm2, %v5367_v9, %v3153_v3  ;;  %v7443_v9 = vld [vmem:[%s7865_s28 + $0x8] sm:$0xff]  ;;  %s7892_s28 = sld [smem:[#allocation95_spill]] }
0x1576   :  { %v3162_v39 = vsel %vm3159_vm4, %v3161_v1, %v3157_v62 }
0x1577   :  { %v3163_v17 = vmul.f32 %v3162_v39, %v7359_v20 }
0x1579   :  { %4918 = vmatmul.msk.f32.gmra.mxu1 %vm785_vm3, %v3163_v17 }
0x157b   :  { %v3363_v13 = vpop.permute.xlu1 %3362 }
0x157c   :  { %4928 = vmatpush.xpose.msk.msrb.mxu1 %vm2985_vm5, %v3363_v13 }
0x1580   :  { %3630 = vmatpush.msra.mxu1 %v3610_v18 }
0x1581   :  { %4929 = vmatmul.msk.f32.vlgmr.msrb.gmra.mxu1 %vm2985_vm5, %v7365_v34 }
0x1589   :  { %4930 = vmatmul.msk.f32.gmra.mxu1 %vm2985_vm5, %v7367_v22 }
0x1591   :  { %4939 = vmatmul.msk.f32.vlgmr.msra.gmra.mxu1 %vm663_vm0, %v7268_v14  ;;  %v3288_v12 = vpop.xlane.xlu2 %3287 }
0x1592   :  { %v3290_v20 = vmax.f32 %v3288_v12, 1e-16 }
0x1594   :  { %5368 = vrcp.f32 %v3290_v20  ;;  %v3317_v7 = vand.u32 2147483648, %v3290_v20  ;;  %v3315_v34 = vand.u32 2147483647, %v3290_v20  ;;  %vm3311_vm7 = vweird.f32 %v3290_v20 }
0x1595   :  { %5370 = vpow2.f32 %v3031_v16 }
0x1596   :  { %v3318_v22 = vor.u32 1.1754944e-38, %v3317_v7  ;;  %vm3316_vm9 = vcmp.eq.f32.partialorder %v3315_v34, 8.507059e+37 }
0x1599   :  { %4940 = vmatmul.msk.f32.gmra.mxu1 %vm663_vm0, %v7276_v4 }
0x159a   :  { %v5369_v8 = vpop.eup %5368 }
0x159b   :  { %v3307_v41 = vmul.f32 %v5369_v8, %v3290_v20  ;;  %vm3312_vm6 = vweird.f32 %v5369_v8  ;;  %v5371_v0 = vpop.eup %5370  ;;  %v7478_v20 = vpop.f32.mrf.mxu3 }
0x159c   :  { %vm3313_vm8 = vmor %vm3311_vm7, %vm3312_vm6  ;;  %v7446_v57 = vmul.f32 %v7443_v9, %v5371_v0 }
0x159d   :  { %v3308_v23 = vsub.f32 1.0, %v3307_v41 }
0x159e   :  { %v3038_v36 = vsel %vm785_vm3, %v7446_v57, 0.0 }
0x159f   :  { %v3309_v25 = vmul.f32 %v5369_v8, %v3308_v23 }
0x15a1   :  { %v3310_v33 = vadd.f32 %v5369_v8, %v3309_v25 }
0x15a3   :  { %v3314_v24 = vsel %vm3313_vm8, %v5369_v8, %v3310_v33  ;;  %v7481_v23 = vpop.f32.mrf.mxu3 }
0x15a4   :  { %v3319_v37 = vsel %vm3316_vm9, %v3318_v22, %v3314_v24 }
0x15a5   :  { %v3320_v6 = vmul.f32 %v3319_v37, %v7372_v48 }
0x15a6   :  { %v3023_v58 = vpop.xlane.xlu1 %3022 }
0x15a7   :  { %4926 = vmatmul.msk.f32.gmra.mxu0 %vm785_vm3, %v3320_v6  ;;  %v3027_v61 = vsub.f32 %v7378_v44, %v3023_v58 }
0x15a9   :  { %v3029_v11 = vmul.f32 1.442695, %v3027_v61 }
0x15ab   :  { %5372 = vpow2.f32 %v3029_v11 }
0x15af   :  { %4937 = vmatmul.msk.f32.vlgmr.msra.gmra.mxu0 %vm663_vm0, %v7268_v14 }
0x15b1   :  { %v5373_v44 = vpop.eup %5372 }
0x15b2   :  { %v7454_v35 = vmul.f32 %v7451_v28, %v5373_v44 }
0x15b4   :  { %v3035_v59 = vsel %vm785_vm3, %v7454_v35, 0.0 }
0x15b7   :  { %4938 = vmatmul.msk.f32.gmra.mxu0 %vm663_vm0, %v7276_v4 }
0x15e3   :  { %v7406_v49 = vpop.f32.mrf.mxu1 }
0x15ee   :  { %v7421_v21 = vpop.f32.mrf.mxu0 }
0x15f6   :  { %v7408_v31 = vpop.f32.mrf.mxu1 }
0x15fe   :  { %v3391_v50 = vpop.f32.mrf.mxu1 }
0x15ff   :  { %v3392_v42 = vadd.f32 %v3391_v50, %v6723_v27 }
0x1601   :  { %v3397_v15 = vsel %vm785_vm3, %v3392_v42, -inf }
0x1602   :  { %3398 = vmax.xlane.f32.xlu2 %v3397_v15 }
0x1606   :  { %v3394_v48 = vpop.f32.mrf.mxu1 }
0x1607   :  { %v3395_v30 = vadd.f32 %v3394_v48, %v6731_v32 }
0x1609   :  { %v3400_v63 = vsel %vm785_vm3, %v3395_v30, -inf }
0x160a   :  { %3401 = vmax.xlane.f32.xlu2 %v3400_v63 }
0x160e   :  { %v3632_v45 = vpop.f32.mrf.mxu1 }
0x160f   :  { %v3633_v26 = vadd.f32 %v5214_v40, %v3632_v45 }
0x1616   :  { %v3635_v46 = vpop.f32.mrf.mxu1 }
0x1617   :  { %v7415_v38 = vadd.f32 %v5214_v40, %v3635_v46 }
0x1619   :  { %4943 = vmatpush.xpose.msk.msra.mxu3 %vm2985_vm5, %v7415_v38  ;;  %3759 = vrot.lane.b32.xlu1 %v7415_v38, %s6230_s8 }
0x161d   :  { %4944 = vmatpush.xpose.msk.msra.mxu3 %vm2985_vm5, %v3633_v26 }
0x1622   :  { %3757 = vrot.lane.b32.xlu2 %v3633_v26, %s6230_s8 }
0x1624   :  { %v7425_v52 = vpop.f32.mrf.mxu0 }
0x162c   :  { %v3604_v10 = vpop.f32.mrf.mxu0 }
0x162d   :  { %v7429_v55 = vadd.f32 %v5215_v53, %v3604_v10 }
0x162f   :  { %4945 = vmatmul.msk.f32.vlgmr.msra.gmra.mxu3 %vm2985_vm5, %v7429_v55  ;;  %3753 = vrot.lane.b32.xlu0 %v7429_v55, %s6230_s8 }
0x1634   :  { %v3607_v60 = vpop.f32.mrf.mxu0 }
0x1635   :  { %v7436_v29 = vadd.f32 %v5215_v53, %v3607_v60 }
0x1637   :  { %4946 = vmatmul.msk.f32.gmra.mxu3 %vm2985_vm5, %v7436_v29  ;;  %3755 = vrot.lane.b32.xlu0 %v7436_v29, %s6230_s8 }
0x1643   :  { %3039 = vadd.xlane.f32.xlu1 %v3038_v36 }
0x164b   :  { %3036 = vadd.xlane.f32.xlu2 %v3035_v59 }
0x165c   :  { %5166 = vrot.lane.b32.xlu1 %v7305_v43, %s6231_s1 }
0x1664   :  { %4044 = vrot.lane.b32.xlu1 %v7415_v38, %s6231_s1 }
0x166c   :  { %3914 = vrot.lane.b32.xlu1 %v3633_v26, %s6228_s12 }
0x1674   :  { %4042 = vrot.lane.b32.xlu1 %v3633_v26, %s6231_s1 }
0x1675   :  { %v3399_v56 = vpop.xlane.xlu2 %3398 }
0x1676   :  { %v3403_v54 = vsub.f32 %v3392_v42, %v3399_v56 }
0x1678   :  { %v3405_v5 = vmul.f32 1.442695, %v3403_v54 }
0x167a   :  { %5374 = vpow2.f32 %v3405_v5  ;;  %v3638_v5 = vld [vmem:[%s7892_s28] sm:$0xff] }
0x167c   :  { %3912 = vrot.lane.b32.xlu1 %v7436_v29, %s6228_s12 }
0x167d   :  { %v3402_v2 = vpop.xlane.xlu2 %3401 }
0x167e   :  { %v3404_v3 = vsub.f32 %v3395_v30, %v3402_v2 }
0x1680   :  { %v5375_v1 = vpop.eup %5374  ;;  %v3407_v62 = vmul.f32 1.442695, %v3404_v3 }
0x1681   :  { %v7467_v43 = vmul.f32 %v7451_v28, %v5375_v1 }
0x1682   :  { %5376 = vpow2.f32 %v3407_v62 }
0x1683   :  { %v3411_v39 = vsel %vm785_vm3, %v7467_v43, 0.0 }
0x1684   :  { %3412 = vadd.xlane.f32.xlu0 %v3411_v39 }
0x1685   :  { %v3758_v12 = vpop.permute.xlu2 %3757 }
0x1688   :  { %v5377_v17 = vpop.eup %5376 }
0x1689   :  { %v7472_v18 = vmul.f32 %v7443_v9, %v5377_v17 }
0x168b   :  { %v3760_v13 = vpop.permute.xlu1 %3759  ;;  %v3414_v19 = vsel %vm785_vm3, %v7472_v18, 0.0 }
0x168c   :  { %3415 = vadd.xlane.f32.xlu2 %v3414_v19  ;;  %4947 = vmatpush.xpose.msk.msrb.mxu0 %vm2985_vm5, %v3760_v13 }
0x1690   :  { %4948 = vmatpush.xpose.msk.msrb.mxu0 %vm2985_vm5, %v3758_v12 }
0x16a1   :  { %v3754_v8 = vpop.permute.xlu0 %3753 }
0x16a2   :  { %4949 = vmatmul.msk.f32.vlgmr.msrb.gmra.mxu0 %vm2985_vm5, %v3754_v8 }
0x16a9   :  { %v3756_v41 = vpop.permute.xlu0 %3755 }
0x16aa   :  { %4950 = vmatmul.msk.f32.gmra.mxu0 %vm2985_vm5, %v3756_v41 }
0x16b2   :  { %v7484_v7 = vpop.f32.mrf.mxu3 }
0x16b6   :  { %v3040_v25 = vpop.xlane.xlu1 %3039 }
0x16b7   :  { %v3042_v34 = vmax.f32 %v3040_v25, 1e-16 }
0x16b9   :  { %5378 = vrcp.f32 %v3042_v34  ;;  %v3069_v11 = vand.u32 2147483648, %v3042_v34  ;;  %vm3063_vm15 = vweird.f32 %v3042_v34  ;;  %v3067_v36 = vand.u32 2147483647, %v3042_v34 }
0x16ba   :  { %v3698_v33 = vpop.f32.mrf.mxu3 }
0x16bb   :  { %v7487_v22 = vadd.f32 %v3698_v33, %v6731_v32  ;;  %v3070_v59 = vor.u32 1.1754944e-38, %v3069_v11  ;;  %vm3068_vm4 = vcmp.eq.f32.partialorder %v3067_v36, 8.507059e+37 }
0x16bd   :  { %v3704_v24 = vsel %vm785_vm3, %v7487_v22, -inf }
0x16be   :  { %v3037_v37 = vpop.xlane.xlu2 %3036  ;;  %3705 = vmax.xlane.f32.xlu1 %v3704_v24 }
0x16bf   :  { %v3041_v6 = vmax.f32 %v3037_v37, 1e-16  ;;  %v5379_v50 = vpop.eup %5378 }
0x16c0   :  { %v3059_v42 = vmul.f32 %v5379_v50, %v3042_v34  ;;  %vm3064_vm14 = vweird.f32 %v5379_v50 }
0x16c1   :  { %5380 = vrcp.f32 %v3041_v6  ;;  %v3054_v45 = vand.u32 2147483648, %v3041_v6  ;;  %v3052_v46 = vand.u32 2147483647, %v3041_v6  ;;  %vm3048_vm11 = vweird.f32 %v3041_v6  ;;  %vm3065_vm2 = vmor %vm3063_vm15, %vm3064_vm14 }
0x16c2   :  { %v3060_v48 = vsub.f32 1.0, %v3059_v42 }
0x16c3   :  { %v3055_v10 = vor.u32 1.1754944e-38, %v3054_v45  ;;  %vm3053_vm13 = vcmp.eq.f32.partialorder %v3052_v46, 8.507059e+37 }
0x16c4   :  { %v3061_v26 = vmul.f32 %v5379_v50, %v3060_v48 }
0x16c6   :  { %v3062_v58 = vadd.f32 %v5379_v50, %v3061_v26 }
0x16c7   :  { %v5381_v15 = vpop.eup %5380 }
0x16c8   :  { %v3044_v30 = vmul.f32 %v5381_v15, %v3041_v6  ;;  %vm3049_vm10 = vweird.f32 %v5381_v15  ;;  %v3066_v44 = vsel %vm3065_vm2, %v5379_v50, %v3062_v58 }
0x16c9   :  { %vm3050_vm12 = vmor %vm3048_vm11, %vm3049_vm10  ;;  %v3071_v56 = vsel %vm3068_vm4, %v3070_v59, %v3066_v44 }
0x16ca   :  { %v3045_v63 = vsub.f32 1.0, %v3044_v30  ;;  %v3072_v54 = vmul.f32 %v3071_v56, %v7446_v57 }
0x16cc   :  { %v3046_v40 = vmul.f32 %v5381_v15, %v3045_v63 }
0x16ce   :  { %v3047_v53 = vadd.f32 %v5381_v15, %v3046_v40  ;;  %v5167_v47 = vpop.permute.xlu1 %5166 }
0x16cf   :  { %v5168_v51 = vunpack.i.l.bf16 %v5167_v47  ;;  %v5169_v60 = vunpack.i.h.bf16 %v5167_v47 }
0x16d0   :  { %v3051_v16 = vsel %vm3050_vm12, %v5381_v15, %v3047_v53 }
0x16d1   :  { %3475 = vmatpush.msrb.mxu2 %v5168_v51  ;;  %v3056_v61 = vsel %vm3053_vm13, %v3055_v10, %v3051_v16 }
0x16d2   :  { %v3057_v0 = vmul.f32 %v3056_v61, %v7454_v35 }
0x16d3   :  { %3476 = vmatpush.msrb.mxu2 %v5169_v60 }
0x16d4   :  { %4919 = vmatmul.msk.f32.vlgmr.msra.gmra.mxu2 %vm785_vm3, %v3057_v0  ;;  %v7513_v0 = vld [vmem:[#allocation32] ss:$0 sm:$0xff] }
0x16d5   :  { %3658 = vmatpush.msra.mxu2 %v3638_v5  ;;  %v7518_v56 = vadd.f32 %v7513_v0, %v7481_v23  ;;  %v7522_v5 = vld [vmem:[#allocation34] ss:$0 sm:$0xff] }
0x16dc   :  { %4920 = vmatmul.msk.f32.gmra.mxu2 %vm785_vm3, %v3072_v54 }
0x16f7   :  { %v3413_v2 = vpop.xlane.xlu0 %3412 }
0x16f8   :  { %v3417_v3 = vmax.f32 %v3413_v2, 1e-16 }
0x16fa   :  { %5382 = vrcp.f32 %v3417_v3  ;;  %v3430_v13 = vand.u32 2147483648, %v3417_v3  ;;  %v3428_v12 = vand.u32 2147483647, %v3417_v3  ;;  %vm3424_vm7 = vweird.f32 %v3417_v3 }
0x16fc   :  { %v3431_v41 = vor.u32 1.1754944e-38, %v3430_v13  ;;  %vm3429_vm9 = vcmp.eq.f32.partialorder %v3428_v12, 8.507059e+37 }
0x16ff   :  { %v3416_v35 = vpop.xlane.xlu2 %3415 }
0x1700   :  { %v5383_v1 = vpop.eup %5382  ;;  %v3418_v62 = vmax.f32 %v3416_v35, 1e-16 }
0x1701   :  { %v3420_v39 = vmul.f32 %v5383_v1, %v3417_v3  ;;  %vm3425_vm6 = vweird.f32 %v5383_v1 }
0x1702   :  { %5384 = vrcp.f32 %v3418_v62  ;;  %vm3426_vm8 = vmor %vm3424_vm7, %vm3425_vm6  ;;  %v3445_v6 = vand.u32 2147483648, %v3418_v62  ;;  %v3443_v42 = vand.u32 2147483647, %v3418_v62  ;;  %vm3439_vm11 = vweird.f32 %v3418_v62 }
0x1703   :  { %v3421_v17 = vsub.f32 1.0, %v3420_v39 }
0x1704   :  { %v3446_v48 = vor.u32 1.1754944e-38, %v3445_v6  ;;  %vm3444_vm13 = vcmp.eq.f32.partialorder %v3443_v42, 8.507059e+37  ;;  %v4045_v6 = vpop.permute.xlu1 %4044 }
0x1705   :  { %v3422_v19 = vmul.f32 %v5383_v1, %v3421_v17 }
0x1707   :  { %v3423_v8 = vadd.f32 %v5383_v1, %v3422_v19  ;;  %v5217_v19 = vld [vmem:[%s7893_s25] ss:$0 sm:$0xff] }
0x1708   :  { %v5385_v57 = vpop.eup %5384 }
0x1709   :  { %v3435_v25 = vmul.f32 %v5385_v57, %v3418_v62  ;;  %v3427_v34 = vsel %vm3426_vm8, %v5383_v1, %v3423_v8  ;;  %vm3440_vm10 = vweird.f32 %v5385_v57 }
0x170a   :  { %v3432_v33 = vsel %vm3429_vm9, %v3431_v41, %v3427_v34  ;;  %vm3441_vm12 = vmor %vm3439_vm11, %vm3440_vm10 }
0x170b   :  { %v3436_v24 = vsub.f32 1.0, %v3435_v25  ;;  %v3433_v37 = vmul.f32 %v3432_v33, %v7467_v43 }
0x170c   :  { %v3915_v42 = vpop.permute.xlu1 %3914 }
0x170d   :  { %4931 = vmatmul.msk.f32.vlgmr.msrb.gmra.mxu2 %vm785_vm3, %v3433_v37  ;;  %v3437_v50 = vmul.f32 %v5385_v57, %v3436_v24  ;;  %v7551_v24 = vadd.f32 %v7484_v7, %v6723_v27 }
0x170f   :  { %v3438_v15 = vadd.f32 %v5385_v57, %v3437_v50  ;;  %v3701_v37 = vsel %vm785_vm3, %v7551_v24, -inf }
0x1711   :  { %v3442_v30 = vsel %vm3441_vm12, %v5385_v57, %v3438_v15 }
0x1712   :  { %v3447_v63 = vsel %vm3444_vm13, %v3446_v48, %v3442_v30 }
0x1713   :  { %v3448_v45 = vmul.f32 %v3447_v63, %v7472_v18 }
0x1715   :  { %4932 = vmatmul.msk.f32.gmra.mxu2 %vm785_vm3, %v3448_v45 }
0x171d   :  { %4941 = vmatmul.msk.f32.vlgmr.msra.gmra.mxu2 %vm663_vm0, %v7268_v14 }
0x171f   :  { %v3786_v43 = vpop.f32.mrf.mxu0 }
0x1720   :  { %v3787_v40 = vadd.f32 %v3786_v43, %v6723_v27 }
0x1722   :  { %v3792_v46 = vsel %vm785_vm3, %v3787_v40, -inf }
0x1723   :  { %3793 = vmax.xlane.f32.xlu2 %v3792_v46 }
0x1725   :  { %4942 = vmatmul.msk.f32.gmra.mxu2 %vm663_vm0, %v7276_v4 }
0x1727   :  { %v3789_v26 = vpop.f32.mrf.mxu0 }
0x1728   :  { %v3790_v53 = vadd.f32 %v3789_v26, %v6731_v32 }
0x172a   :  { %v3795_v47 = vsel %vm785_vm3, %v3790_v53, -inf }
0x172b   :  { %3796 = vmax.xlane.f32.xlu0 %v3795_v47  ;;  %v4043_v47 = vpop.permute.xlu1 %4042 }
0x1757   :  { %v3224_v18 = vpop.f32.mrf.mxu2 }
0x1758   :  { %v3225_v51 = vadd.f32 %v3224_v18, %v7406_v49 }
0x175a   :  { %v3356_v16 = vadd.f32 %v7421_v21, %v3225_v51  ;;  %v7520_v21 = vld [vmem:[#allocation35] ss:$0 sm:$0xff] }
0x175b   :  { %v3527_v2 = vmul.f32 %v7520_v21, %v7518_v56 }
0x175f   :  { %v3227_v10 = vpop.f32.mrf.mxu2 }
0x1760   :  { %v3228_v61 = vadd.f32 %v3227_v10, %v7408_v31 }
0x1762   :  { %v3357_v44 = vadd.f32 %v7425_v52, %v3228_v61 }
0x1790   :  { %v3478_v58 = vpop.f32.mrf.mxu2 }
0x1791   :  { %v7510_v60 = vadd.f32 %v3478_v58, %v3356_v16 }
0x1796   :  { %v3794_v11 = vpop.xlane.xlu2 %3793 }
0x1797   :  { %v3798_v36 = vsub.f32 %v3787_v40, %v3794_v11 }
0x1798   :  { %v3481_v59 = vpop.f32.mrf.mxu2 }
0x1799   :  { %v3800_v54 = vmul.f32 1.442695, %v3798_v36  ;;  %v3485_v49 = vadd.f32 %v3481_v59, %v3357_v44 }
0x179b   :  { %5386 = vpow2.f32 %v3800_v54  ;;  %v7524_v31 = vmul.f32 0.25, %v3485_v49 }
0x179d   :  { %v3521_v52 = vmul.f32 %v7522_v5, %v7524_v31 }
0x179e   :  { %v3797_v3 = vpop.xlane.xlu0 %3796 }
0x179f   :  { %v3799_v35 = vsub.f32 %v3790_v53, %v3797_v3  ;;  %v7530_v23 = vadd.f32 %v3527_v2, %v3521_v52 }
0x17a0   :  { %v3660_v1 = vpop.f32.mrf.mxu2 }
0x17a1   :  { %v5387_v62 = vpop.eup %5386  ;;  %v3802_v39 = vmul.f32 1.442695, %v3799_v35  ;;  %v3661_v57 = vadd.f32 %v5217_v19, %v3660_v1  ;;  %v4168_v35 = vld [vmem:[%s7894_s7] sm:$0xff] }
0x17a2   :  { %v3804_v17 = vmul.f32 %v7451_v28, %v5387_v62 }
0x17a3   :  { %5388 = vpow2.f32 %v3802_v39  ;;  %v3913_v39 = vpop.permute.xlu1 %3912 }
0x17a4   :  { %v3806_v13 = vsel %vm785_vm3, %v3804_v17, 0.0 }
0x17a5   :  { %3807 = vadd.xlane.f32.xlu2 %v3806_v13 }
0x17a8   :  { %v3663_v12 = vpop.f32.mrf.mxu2 }
0x17a9   :  { %v5389_v8 = vpop.eup %5388  ;;  %v3664_v41 = vadd.f32 %v5217_v19, %v3663_v12 }
0x17aa   :  { %v3805_v25 = vmul.f32 %v7443_v9, %v5389_v8 }
0x17ab   :  { %3901 = vmatpush.msrb.mxu2 %v3664_v41  ;;  %v7536_v34 = vpack.i.bf16 %v3661_v57, %v3664_v41 }
0x17ac   :  { %v3809_v33 = vsel %vm785_vm3, %v3805_v25, 0.0 }
0x17ad   :  { %3902 = vmatpush.msrb.mxu2 %v3661_v57  ;;  %3810 = vadd.xlane.f32.xlu0 %v3809_v33  ;;  %v3706_v57 = vpop.xlane.xlu1 %3705 }
0x17ae   :  { %v3708_v41 = vsub.f32 %v7487_v22, %v3706_v57 }
0x17bd   :  { %5171 = vrot.lane.b32.xlu2 %v7536_v34, %s6230_s8 }
0x17c1   :  { %3916 = vrot.lane.b32.xlu0 %v7415_v38, %s6228_s12 }
0x17c5   :  { %4038 = vrot.lane.b32.xlu2 %v7429_v55, %s6231_s1 }
0x17c9   :  { %3910 = vrot.lane.b32.xlu0 %v7429_v55, %s6228_s12 }
0x17d1   :  { %4040 = vrot.lane.b32.xlu0 %v7436_v29, %s6231_s1 }
0x17ee   :  { %3702 = vmax.xlane.f32.xlu2 %v3701_v37 }
0x1818   :  { %v3808_v50 = vpop.xlane.xlu2 %3807 }
0x1819   :  { %v3812_v38 = vmax.f32 %v3808_v50, 1e-16 }
0x181b   :  { %5390 = vrcp.f32 %v3812_v38  ;;  %v3825_v43 = vand.u32 2147483648, %v3812_v38  ;;  %v3823_v46 = vand.u32 2147483647, %v3812_v38  ;;  %vm3819_vm15 = vweird.f32 %v3812_v38 }
0x181d   :  { %v3826_v18 = vor.u32 1.1754944e-38, %v3825_v43  ;;  %vm3824_vm4 = vcmp.eq.f32.partialorder %v3823_v46, 8.507059e+37 }
0x1820   :  { %v3811_v15 = vpop.xlane.xlu0 %3810  ;;  %v5172_v48 = vpop.permute.xlu2 %5171 }
0x1821   :  { %v5391_v30 = vpop.eup %5390  ;;  %v3813_v55 = vmax.f32 %v3811_v15, 1e-16  ;;  %v5173_v63 = vunpack.i.l.bf16 %v5172_v48  ;;  %v5174_v29 = vunpack.i.h.bf16 %v5172_v48 }
0x1822   :  { %v3815_v45 = vmul.f32 %v5391_v30, %v3812_v38  ;;  %vm3820_vm14 = vweird.f32 %v5391_v30 }
0x1823   :  { %5392 = vrcp.f32 %v3813_v55  ;;  %3872 = vmatpush.msrb.mxu1 %v5173_v63  ;;  %vm3821_vm2 = vmor %vm3819_vm15, %vm3820_vm14  ;;  %v3840_v11 = vand.u32 2147483648, %v3813_v55  ;;  %v3838_v44 = vand.u32 2147483647, %v3813_v55  ;;  %vm3834_vm7 = vweird.f32 %v3813_v55 }
0x1824   :  { %v3816_v7 = vsub.f32 1.0, %v3815_v45 }
0x1825   :  { %3873 = vmatpush.msrb.mxu1 %v5174_v29  ;;  %v3841_v54 = vor.u32 1.1754944e-38, %v3840_v11  ;;  %vm3839_vm9 = vcmp.eq.f32.partialorder %v3838_v44, 8.507059e+37 }
0x1826   :  { %v3817_v40 = vmul.f32 %v5391_v30, %v3816_v7 }
0x1827   :  { %4961 = vmatpush.xpose.msk.msra.mxu1 %vm2985_vm5, %v4045_v6  ;;  %v3711_v6 = vmul.f32 1.442695, %v3708_v41 }
0x1828   :  { %v3818_v26 = vadd.f32 %v5391_v30, %v3817_v40  ;;  %v4039_v62 = vpop.permute.xlu2 %4038 }
0x1829   :  { %v5393_v53 = vpop.eup %5392 }
0x182a   :  { %v3822_v10 = vsel %vm3821_vm2, %v5391_v30, %v3818_v26  ;;  %v3830_v51 = vmul.f32 %v5393_v53, %v3813_v55  ;;  %vm3835_vm6 = vweird.f32 %v5393_v53 }
0x182b   :  { %4962 = vmatpush.xpose.msk.msra.mxu1 %vm2985_vm5, %v4043_v47  ;;  %v3827_v16 = vsel %vm3824_vm4, %v3826_v18, %v3822_v10  ;;  %vm3836_vm8 = vmor %vm3834_vm7, %vm3835_vm6 }
0x182c   :  { %v3828_v58 = vmul.f32 %v3827_v16, %v3804_v17  ;;  %v3831_v61 = vsub.f32 1.0, %v3830_v51 }
0x182e   :  { %v3832_v36 = vmul.f32 %v5393_v53, %v3831_v61  ;;  %4951 = vmatmul.msk.f32.vlgmr.msrb.gmra.mxu1 %vm785_vm3, %v3828_v58 }
0x1830   :  { %v3833_v59 = vadd.f32 %v5393_v53, %v3832_v36 }
0x1832   :  { %v3837_v49 = vsel %vm3836_vm8, %v5393_v53, %v3833_v59 }
0x1833   :  { %v3917_v2 = vpop.permute.xlu0 %3916  ;;  %v3842_v52 = vsel %vm3839_vm9, %v3841_v54, %v3837_v49 }
0x1834   :  { %4955 = vmatpush.xpose.msk.msrb.mxu3 %vm2985_vm5, %v3917_v2  ;;  %v3843_v3 = vmul.f32 %v3842_v52, %v3805_v25 }
0x1836   :  { %4952 = vmatmul.msk.f32.gmra.mxu1 %vm785_vm3, %v3843_v3 }
0x1838   :  { %4956 = vmatpush.xpose.msk.msrb.mxu3 %vm2985_vm5, %v3915_v42 }
0x183b   :  { %v3911_v1 = vpop.permute.xlu0 %3910 }
0x183c   :  { %4188 = vmatpush.msra.mxu3 %v4168_v35 }
0x183d   :  { %4957 = vmatmul.msk.f32.vlgmr.msrb.gmra.mxu3 %vm2985_vm5, %v3911_v1 }
0x183e   :  { %4963 = vmatmul.msk.f32.vlgmr.msra.gmra.mxu1 %vm2985_vm5, %v4039_v62 }
0x1843   :  { %v4041_v17 = vpop.permute.xlu0 %4040 }
0x1845   :  { %4958 = vmatmul.msk.f32.gmra.mxu3 %vm2985_vm5, %v3913_v39 }
0x1846   :  { %4964 = vmatmul.msk.f32.gmra.mxu1 %vm2985_vm5, %v4041_v17 }
0x184d   :  { %4967 = vmatmul.msk.f32.vlgmr.msra.gmra.mxu3 %vm663_vm0, %v7268_v14 }
0x1855   :  { %4968 = vmatmul.msk.f32.gmra.mxu3 %vm663_vm0, %v7276_v4 }
0x1861   :  { %v3703_v19 = vpop.xlane.xlu2 %3702 }
0x1862   :  { %v3707_v8 = vsub.f32 %v7551_v24, %v3703_v19 }
0x1864   :  { %v3709_v25 = vmul.f32 1.442695, %v3707_v8 }
0x1866   :  { %5394 = vpow2.f32 %v3709_v25 }
0x1867   :  { %5396 = vpow2.f32 %v3711_v6 }
0x186c   :  { %v5395_v42 = vpop.eup %5394 }
0x186d   :  { %v7583_v48 = vmul.f32 %v7451_v28, %v5395_v42  ;;  %v5397_v30 = vpop.eup %5396 }
0x186e   :  { %v7590_v29 = vmul.f32 %v7443_v9, %v5397_v30 }
0x1870   :  { %v3718_v7 = vsel %vm785_vm3, %v7590_v29, 0.0 }
0x18ab   :  { %v7570_v13 = vpop.f32.mrf.mxu1 }
0x18b3   :  { %v7572_v12 = vpop.f32.mrf.mxu1 }
0x18bb   :  { %v4071_v33 = vpop.f32.mrf.mxu1 }
0x18bc   :  { %v4072_v37 = vadd.f32 %v4071_v33, %v6723_v27 }
0x18be   :  { %v4077_v14 = vsel %vm785_vm3, %v4072_v37, -inf }
0x18bf   :  { %4078 = vmax.xlane.f32.xlu0 %v4077_v14 }
0x18c0   :  { %v3943_v50 = vpop.f32.mrf.mxu3 }
0x18c1   :  { %v3944_v4 = vadd.f32 %v3943_v50, %v6723_v27  ;;  %v3715_v27 = vsel %vm785_vm3, %v7583_v48, 0.0 }
0x18c3   :  { %v3949_v38 = vsel %vm785_vm3, %v3944_v4, -inf  ;;  %v4074_v24 = vpop.f32.mrf.mxu1 }
0x18c4   :  { %3950 = vmax.xlane.f32.xlu2 %v3949_v38  ;;  %v4075_v22 = vadd.f32 %v4074_v24, %v6731_v32 }
0x18c6   :  { %v4080_v15 = vsel %vm785_vm3, %v4075_v22, -inf }
0x18c7   :  { %4081 = vmax.xlane.f32.xlu1 %v4080_v15 }
0x18c8   :  { %v3946_v55 = vpop.f32.mrf.mxu3 }
0x18c9   :  { %v3947_v63 = vadd.f32 %v3946_v55, %v6731_v32 }
0x18cb   :  { %v3952_v45 = vsel %vm785_vm3, %v3947_v63, -inf }
0x18cc   :  { %3716 = vadd.xlane.f32.xlu2 %v3715_v27  ;;  %3953 = vmax.xlane.f32.xlu0 %v3952_v45 }
0x18cf   :  { %3719 = vadd.xlane.f32.xlu1 %v3718_v7  ;;  %v7627_v7 = vadd.f32 %v7513_v0, %v7478_v20 }
0x1932   :  { %v4079_v43 = vpop.xlane.xlu0 %4078 }
0x1933   :  { %v4083_v40 = vsub.f32 %v4072_v37, %v4079_v43 }
0x1935   :  { %v4085_v46 = vmul.f32 1.442695, %v4083_v40 }
0x1937   :  { %v3951_v26 = vpop.xlane.xlu2 %3950  ;;  %5398 = vpow2.f32 %v4085_v46 }
0x1938   :  { %v3955_v32 = vsub.f32 %v3944_v4, %v3951_v26 }
0x193a   :  { %v3957_v53 = vmul.f32 1.442695, %v3955_v32  ;;  %v4082_v47 = vpop.xlane.xlu1 %4081 }
0x193b   :  { %v4084_v18 = vsub.f32 %v4075_v22, %v4082_v47 }
0x193c   :  { %5400 = vpow2.f32 %v3957_v53 }
0x193d   :  { %v5399_v10 = vpop.eup %5398  ;;  %v4087_v51 = vmul.f32 1.442695, %v4084_v18 }
0x193e   :  { %v7595_v61 = vmul.f32 %v7451_v28, %v5399_v10 }
0x193f   :  { %v3717_v16 = vpop.xlane.xlu2 %3716  ;;  %v3954_v58 = vpop.xlane.xlu0 %3953  ;;  %5402 = vpow2.f32 %v4087_v51 }
0x1940   :  { %v3721_v11 = vmax.f32 %v3717_v16, 1e-16  ;;  %v3956_v36 = vsub.f32 %v3947_v63, %v3954_v58  ;;  %v4091_v44 = vsel %vm785_vm3, %v7595_v61, 0.0 }
0x1941   :  { %4092 = vadd.xlane.f32.xlu0 %v4091_v44 }
0x1942   :  { %v5401_v59 = vpop.eup %5400  ;;  %5404 = vrcp.f32 %v3721_v11  ;;  %v3959_v54 = vmul.f32 1.442695, %v3956_v36  ;;  %v3720_v49 = vpop.xlane.xlu1 %3719  ;;  %v3734_v57 = vand.u32 2147483648, %v3721_v11  ;;  %v3732_v33 = vand.u32 2147483647, %v3721_v11 }
0x1943   :  { %v7600_v2 = vmul.f32 %v7451_v28, %v5401_v59  ;;  %v3722_v52 = vmax.f32 %v3720_v49, 1e-16  ;;  %vm3728_vm10 = vweird.f32 %v3721_v11 }
0x1944   :  { %5406 = vpow2.f32 %v3959_v54  ;;  %v3735_v4 = vor.u32 1.1754944e-38, %v3734_v57  ;;  %vm3733_vm12 = vcmp.eq.f32.partialorder %v3732_v33, 8.507059e+37 }
0x1945   :  { %v3963_v3 = vsel %vm785_vm3, %v7600_v2, 0.0  ;;  %v5403_v35 = vpop.eup %5402  ;;  %5408 = vrcp.f32 %v3722_v52  ;;  %vm3743_vm14 = vweird.f32 %v3722_v52  ;;  %v3747_v30 = vand.u32 2147483647, %v3722_v52 }
0x1946   :  { %3964 = vadd.xlane.f32.xlu2 %v3963_v3  ;;  %v7605_v1 = vmul.f32 %v7443_v9, %v5403_v35 }
0x1947   :  { %vm3748_vm2 = vcmp.eq.f32.partialorder %v3747_v30, 8.507059e+37 }
0x1948   :  { %v5405_v62 = vpop.eup %5404  ;;  %v4094_v17 = vsel %vm785_vm3, %v7605_v1, 0.0 }
0x1949   :  { %v3724_v39 = vmul.f32 %v5405_v62, %v3721_v11  ;;  %4095 = vadd.xlane.f32.xlu1 %v4094_v17  ;;  %vm3729_vm0 = vweird.f32 %v5405_v62 }
0x194a   :  { %v5407_v19 = vpop.eup %5406  ;;  %vm3730_vm11 = vmor %vm3728_vm10, %vm3729_vm0 }
0x194b   :  { %v3725_v28 = vsub.f32 1.0, %v3724_v39  ;;  %v5409_v8 = vpop.eup %5408  ;;  %v7610_v41 = vmul.f32 %v7443_v9, %v5407_v19  ;;  %v3749_v9 = vand.u32 2147483648, %v3722_v52 }
0x194c   :  { %v3739_v37 = vmul.f32 %v5409_v8, %v3722_v52  ;;  %vm3744_vm13 = vweird.f32 %v5409_v8 }
0x194d   :  { %v3726_v25 = vmul.f32 %v5405_v62, %v3725_v28  ;;  %v3966_v6 = vsel %vm785_vm3, %v7610_v41, 0.0  ;;  %vm3745_vm15 = vmor %vm3743_vm14, %vm3744_vm13  ;;  %v3750_v63 = vor.u32 1.1754944e-38, %v3749_v9 }
0x194e   :  { %v3740_v50 = vsub.f32 1.0, %v3739_v37  ;;  %3967 = vadd.xlane.f32.xlu0 %v3966_v6 }
0x194f   :  { %v3727_v14 = vadd.f32 %v5405_v62, %v3726_v25 }
0x1950   :  { %v3741_v42 = vmul.f32 %v5409_v8, %v3740_v50 }
0x1951   :  { %v3731_v38 = vsel %vm3730_vm11, %v5405_v62, %v3727_v14 }
0x1952   :  { %v3736_v24 = vsel %vm3733_vm12, %v3735_v4, %v3731_v38  ;;  %v3742_v15 = vadd.f32 %v5409_v8, %v3741_v42 }
0x1953   :  { %v3737_v22 = vmul.f32 %v3736_v24, %v7583_v48  ;;  %v7623_v48 = vmul.f32 0.25, %v7510_v60 }
0x1954   :  { %v3746_v55 = vsel %vm3745_vm15, %v5409_v8, %v3742_v15 }
0x1955   :  { %4953 = vmatmul.msk.f32.vlgmr.msrb.gmra.mxu2 %vm785_vm3, %v3737_v22  ;;  %v3751_v27 = vsel %vm3748_vm2, %v3750_v63, %v3746_v55  ;;  %v3520_v43 = vmul.f32 %v7522_v5, %v7623_v48 }
0x1956   :  { %v3752_v45 = vmul.f32 %v3751_v27, %v7590_v29  ;;  %v3526_v29 = vmul.f32 %v7520_v21, %v7627_v7 }
0x1958   :  { %v3528_v40 = vadd.f32 %v3526_v29, %v3520_v43 }
0x195a   :  { %v3530_v46 = vsel %vm2985_vm5, %v3528_v40, 0.0 }
0x195d   :  { %4954 = vmatmul.msk.f32.gmra.mxu2 %vm785_vm3, %v3752_v45 }
0x195e   :  { %5176 = vrot.lane.b32.xlu2 %v7536_v34, %s6231_s1 }
0x1962   :  { %5181 = vrot.lane.b32.xlu1 %v7536_v34, %s6228_s12 }
0x1987   :  { %3531 = vadd.xlane.f32.xlu2 %v3530_v46 }
0x19b4   :  { %v4093_v26 = vpop.xlane.xlu0 %4092 }
0x19b5   :  { %v4097_v32 = vmax.f32 %v4093_v26, 1e-16 }
0x19b7   :  { %5410 = vrcp.f32 %v4097_v32  ;;  %v4108_v51 = vand.u32 2147483647, %v4097_v32  ;;  %v4110_v21 = vand.u32 2147483648, %v4097_v32  ;;  %vm4104_vm6 = vweird.f32 %v4097_v32 }
0x19b9   :  { %v3965_v34 = vpop.xlane.xlu2 %3964  ;;  %v4111_v52 = vor.u32 1.1754944e-38, %v4110_v21  ;;  %vm4109_vm8 = vcmp.eq.f32.partialorder %v4108_v51, 8.507059e+37 }
0x19ba   :  { %v3969_v60 = vmax.f32 %v3965_v34, 1e-16 }
0x19bc   :  { %5412 = vrcp.f32 %v3969_v60  ;;  %v4096_v53 = vpop.xlane.xlu1 %4095  ;;  %vm3976_vm13 = vweird.f32 %v3969_v60  ;;  %v3980_v24 = vand.u32 2147483647, %v3969_v60 }
0x19bd   :  { %v5411_v47 = vpop.eup %5410  ;;  %v4098_v20 = vmax.f32 %v4096_v53, 1e-16 }
0x19be   :  { %v4100_v0 = vmul.f32 %v5411_v47, %v4097_v32  ;;  %vm4105_vm4 = vweird.f32 %v5411_v47  ;;  %vm3981_vm15 = vcmp.eq.f32.partialorder %v3980_v24, 8.507059e+37 }
0x19bf   :  { %5414 = vrcp.f32 %v4098_v20  ;;  %vm4106_vm7 = vmor %vm4104_vm6, %vm4105_vm4  ;;  %v4125_v28 = vand.u32 2147483648, %v4098_v20  ;;  %v4123_v8 = vand.u32 2147483647, %v4098_v20  ;;  %vm4119_vm0 = vweird.f32 %v4098_v20 }
0x19c0   :  { %v4101_v18 = vsub.f32 1.0, %v4100_v0 }
0x19c1   :  { %v5177_v5 = vpop.permute.xlu2 %5176  ;;  %v3968_v58 = vpop.xlane.xlu0 %3967  ;;  %vm4124_vm11 = vcmp.eq.f32.partialorder %v4123_v8, 8.507059e+37  ;;  %v4126_v14 = vor.u32 1.1754944e-38, %v4125_v28 }
0x19c2   :  { %v5413_v10 = vpop.eup %5412  ;;  %v5178_v16 = vunpack.i.l.bf16 %v5177_v5  ;;  %v4102_v11 = vmul.f32 %v5411_v47, %v4101_v18  ;;  %v3970_v44 = vmax.f32 %v3968_v58, 1e-16  ;;  %v5179_v59 = vunpack.i.h.bf16 %v5177_v5 }
0x19c3   :  { %v3972_v36 = vmul.f32 %v5413_v10, %v3969_v60  ;;  %vm3977_vm12 = vweird.f32 %v5413_v10 }
0x19c4   :  { %4155 = vmatpush.msra.mxu2 %v5178_v16  ;;  %v4103_v54 = vadd.f32 %v5411_v47, %v4102_v11  ;;  %5416 = vrcp.f32 %v3970_v44  ;;  %vm3978_vm14 = vmor %vm3976_vm13, %vm3977_vm12  ;;  %v3997_v43 = vand.u32 2147483648, %v3970_v44  ;;  %vm3991_vm4 = vweird.f32 %v3970_v44 }
0x19c5   :  { %v5415_v49 = vpop.eup %5414  ;;  %v3973_v35 = vsub.f32 1.0, %v3972_v36  ;;  %v3995_v46 = vand.u32 2147483647, %v3970_v44 }
0x19c6   :  { %4156 = vmatpush.msra.mxu2 %v5179_v59  ;;  %v4107_v3 = vsel %vm4106_vm7, %v5411_v47, %v4103_v54  ;;  %v4115_v62 = vmul.f32 %v5415_v49, %v4098_v20  ;;  %vm4120_vm9 = vweird.f32 %v5415_v49  ;;  %v3998_v26 = vor.u32 1.1754944e-38, %v3997_v43 }
0x19c7   :  { %v4112_v39 = vsel %vm4109_vm8, %v4111_v52, %v4107_v3  ;;  %v3974_v25 = vmul.f32 %v5413_v10, %v3973_v35  ;;  %vm4121_vm10 = vmor %vm4119_vm0, %vm4120_vm9  ;;  %vm3996_vm7 = vcmp.eq.f32.partialorder %v3995_v46, 8.507059e+37  ;;  %v4190_v52 = vpop.f32.mrf.mxu3 }
0x19c8   :  { %v4113_v17 = vmul.f32 %v4112_v39, %v7595_v61  ;;  %v4116_v19 = vsub.f32 1.0, %v4115_v62  ;;  %v3982_v61 = vand.u32 2147483648, %v3969_v60 }
0x19c9   :  { %v3975_v50 = vadd.f32 %v5413_v10, %v3974_v25 }
0x19ca   :  { %v5417_v57 = vpop.eup %5416  ;;  %v4117_v33 = vmul.f32 %v5415_v49, %v4116_v19  ;;  %4965 = vmatmul.msk.f32.vlgmr.msra.gmra.mxu2 %vm785_vm3, %v4113_v17  ;;  %v3983_v30 = vor.u32 1.1754944e-38, %v3982_v61 }
0x19cb   :  { %v3987_v37 = vmul.f32 %v5417_v57, %v3970_v44  ;;  %v3979_v22 = vsel %vm3978_vm14, %v5413_v10, %v3975_v50  ;;  %vm3992_vm2 = vweird.f32 %v5417_v57 }
0x19cc   :  { %v4118_v6 = vadd.f32 %v5415_v49, %v4117_v33  ;;  %v3984_v63 = vsel %vm3981_vm15, %v3983_v30, %v3979_v22  ;;  %vm3993_vm6 = vmor %vm3991_vm4, %vm3992_vm2 }
0x19cd   :  { %v3988_v4 = vsub.f32 1.0, %v3987_v37  ;;  %v3985_v40 = vmul.f32 %v3984_v63, %v7600_v2  ;;  %v5219_v37 = vld [vmem:[%s7896_s20] ss:$0 sm:$0xff] }
0x19ce   :  { %v4122_v38 = vsel %vm4121_vm10, %v5415_v49, %v4118_v6  ;;  %v5220_v6 = vld [vmem:[%s7897_s30] ss:$0 sm:$0xff] }
0x19cf   :  { %v4127_v42 = vsel %vm4124_vm11, %v4126_v14, %v4122_v38  ;;  %v3989_v15 = vmul.f32 %v5417_v57, %v3988_v4 }
0x19d0   :  { %v4128_v9 = vmul.f32 %v4127_v42, %v7605_v1 }
0x19d1   :  { %v3990_v45 = vadd.f32 %v5417_v57, %v3989_v15  ;;  %v3533_v15 = vsel %vm2985_vm5, %v7530_v23, 0.0 }
0x19d2   :  { %4966 = vmatmul.msk.f32.gmra.mxu2 %vm785_vm3, %v4128_v9 }
0x19d3   :  { %v3994_v1 = vsel %vm3993_vm6, %v5417_v57, %v3990_v45 }
0x19d4   :  { %v5182_v55 = vpop.permute.xlu1 %5181  ;;  %v3999_v32 = vsel %vm3996_vm7, %v3998_v26, %v3994_v1 }
0x19d5   :  { %v5183_v27 = vunpack.i.l.bf16 %v5182_v55  ;;  %v5184_v29 = vunpack.i.h.bf16 %v5182_v55  ;;  %v4000_v34 = vmul.f32 %v3999_v32, %v7610_v41 }
0x19d7   :  { %4027 = vmatpush.msra.mxu0 %v5183_v27 }
0x19d8   :  { %v3904_v54 = vpop.f32.mrf.mxu2 }
0x19d9   :  { %4028 = vmatpush.msra.mxu0 %v5184_v29  ;;  %v3905_v62 = vadd.f32 %v3904_v54, %v7570_v13 }
0x19da   :  { %4959 = vmatmul.msk.f32.vlgmr.msra.gmra.mxu0 %vm785_vm3, %v3985_v40 }
0x19e0   :  { %v3907_v49 = vpop.f32.mrf.mxu2 }
0x19e1   :  { %v3908_v39 = vadd.f32 %v3907_v49, %v7572_v12 }
0x19e2   :  { %4960 = vmatmul.msk.f32.gmra.mxu0 %vm785_vm3, %v4000_v34 }
0x19fa   :  { %v3532_v60 = vpop.xlane.xlu2 %3531 }
0x19fb   :  { %v4935_v53 = vmul.f32 -1.442695, %v3532_v60 }
0x19fd   :  { %5418 = vpow2.f32 %v4935_v53 }
0x1a03   :  { %v5419_v47 = vpop.eup %5418 }
0x1a04   :  { %v3542_v20 = vadd.f32 1.0, %v5419_v47 }
0x1a06   :  { %5420 = vrcp.f32 %v3542_v20  ;;  %v3555_v5 = vand.u32 2147483648, %v3542_v20  ;;  %v3553_v51 = vand.u32 2147483647, %v3542_v20  ;;  %vm3549_vm9 = vweird.f32 %v3542_v20 }
0x1a08   :  { %v3556_v41 = vor.u32 1.1754944e-38, %v3555_v5  ;;  %vm3554_vm10 = vcmp.eq.f32.partialorder %v3553_v51, 8.507059e+37 }
0x1a0c   :  { %v5421_v2 = vpop.eup %5420 }
0x1a0d   :  { %v3545_v0 = vmul.f32 %v5421_v2, %v3542_v20  ;;  %vm3550_vm8 = vweird.f32 %v5421_v2 }
0x1a0e   :  { %vm3551_vm0 = vmor %vm3549_vm9, %vm3550_vm8 }
0x1a0f   :  { %v3546_v18 = vsub.f32 1.0, %v3545_v0 }
0x1a11   :  { %v3547_v10 = vmul.f32 %v5421_v2, %v3546_v18 }
0x1a13   :  { %v3548_v21 = vadd.f32 %v5421_v2, %v3547_v10 }
0x1a15   :  { %v3552_v16 = vsel %vm3551_vm0, %v5421_v2, %v3548_v21 }
0x1a16   :  { %v3557_v58 = vsel %vm3554_vm10, %v3556_v41, %v3552_v16  ;;  %vm4431_vm10 = vcmask 1043456  }
0x1a17   :  { %v3576_v11 = vsub.f32 1.0, %v3557_v58  ;;  %v3574_v36 = vmul.f32 %v3557_v58, %v7627_v7  ;;  %v4193_v7 = vpop.f32.mrf.mxu3 }
0x1a19   :  { %v3578_v44 = vmul.f32 %v3576_v11, %v7623_v48  ;;  %v5218_v48 = vld [vmem:[%s7895_s11] ss:$0 sm:$0xff] }
0x1a1a   :  { %v4194_v57 = vadd.f32 %v5218_v48, %v4193_v7  ;;  %v7656_v61 = vadd.f32 %v5218_v48, %v4190_v52 }
0x1a1b   :  { %v7644_v59 = vadd.f32 %v3578_v44, %v3574_v36 }
0x1a1c   :  { %v4207_v50 = vmul.f32 %v5219_v37, %v4194_v57  ;;  %v4206_v24 = vmul.f32 %v5219_v37, %v7656_v61 }
0x1a1d   :  { %4262 = vst.msk [vmem:[%s6579_s13] sm:$0xff] %vm2985_vm5, %v7644_v59 }
0x1a4d   :  { %v4158_v3 = vpop.f32.mrf.mxu2 }
0x1a55   :  { %v4161_v8 = vpop.f32.mrf.mxu2 }
0x1a57   :  { %v4030_v35 = vpop.f32.mrf.mxu0 }
0x1a58   :  { %v4036_v17 = vadd.f32 %v4030_v35, %v3905_v62 }
0x1a5a   :  { %v4164_v25 = vadd.f32 %v4158_v3, %v4036_v17 }
0x1a5c   :  { %v7654_v4 = vmul.f32 0.25, %v4164_v25 }
0x1a5e   :  { %v4200_v12 = vmul.f32 %v5220_v6, %v7654_v4 }
0x1a5f   :  { %v4033_v19 = vpop.f32.mrf.mxu0 }
0x1a60   :  { %v4037_v28 = vadd.f32 %v4033_v19, %v3908_v39  ;;  %v4208_v9 = vadd.f32 %v4206_v24, %v4200_v12 }
0x1a62   :  { %v4165_v33 = vadd.f32 %v4161_v8, %v4037_v28  ;;  %v4210_v22 = vsel %vm2985_vm5, %v4208_v9, 0.0 }
0x1a64   :  { %v4167_v14 = vmul.f32 0.25, %v4165_v33 }
0x1a66   :  { %v4201_v38 = vmul.f32 %v5220_v6, %v4167_v14 }
0x1a68   :  { %v4209_v13 = vadd.f32 %v4207_v50, %v4201_v38 }
0x1a6a   :  { %v4213_v42 = vsel %vm2985_vm5, %v4209_v13, 0.0 }
0x1a6b   :  { %4214 = vadd.xlane.f32.xlu0 %v4213_v42 }
0x1a73   :  { %4211 = vadd.xlane.f32.xlu0 %v4210_v22  ;;  %v4266_v22 = vld [vmem:[%s7898_s14] sm:$0xff] }
0x1a7b   :  { %3534 = vadd.xlane.f32.xlu0 %v3533_v15 }
0x1ade   :  { %v4215_v30 = vpop.xlane.xlu0 %4214 }
0x1adf   :  { %v4970_v55 = vmul.f32 -1.442695, %v4215_v30 }
0x1ae1   :  { %5422 = vpow2.f32 %v4970_v55 }
0x1ae6   :  { %v4212_v63 = vpop.xlane.xlu0 %4211 }
0x1ae7   :  { %v5423_v27 = vpop.eup %5422  ;;  %v4969_v45 = vmul.f32 -1.442695, %v4212_v63 }
0x1ae8   :  { %v4223_v43 = vadd.f32 1.0, %v5423_v27  ;;  %v4277_v27 = vld [vmem:[%s7899_s15 + $0x8] sm:$0xff] }
0x1ae9   :  { %5424 = vpow2.f32 %v4969_v45  ;;  %v4343_v45 = vld [vmem:[%s7900_s5 + $0x8] sm:$0xff] }
0x1aea   :  { %5426 = vrcp.f32 %v4223_v43  ;;  %v4250_v23 = vand.u32 2147483648, %v4223_v43  ;;  %v4248_v53 = vand.u32 2147483647, %v4223_v43  ;;  %vm4244_vm12 = vweird.f32 %v4223_v43 }
0x1aec   :  { %v4251_v0 = vor.u32 1.1754944e-38, %v4250_v23  ;;  %vm4249_vm14 = vcmp.eq.f32.partialorder %v4248_v53, 8.507059e+37  ;;  %v4347_v23 = vld [vmem:[%s7900_s5 + $0x28] sm:$0xff]  ;;  %v4348_v53 = vld [vmem:[%s7900_s5 + $0x30] sm:$0xff] }
0x1aee   :  { %v3535_v29 = vpop.xlane.xlu0 %3534 }
0x1aef   :  { %v5425_v40 = vpop.eup %5424  ;;  %v4936_v46 = vmul.f32 -1.442695, %v3535_v29 }
0x1af0   :  { %v5427_v1 = vpop.eup %5426  ;;  %v4222_v26 = vadd.f32 1.0, %v5425_v40  ;;  %v4408_v40 = vld [vmem:[%s7902_s0] sm:$0xf] }
0x1af1   :  { %v4240_v32 = vmul.f32 %v5427_v1, %v4223_v43  ;;  %5428 = vpow2.f32 %v4936_v46  ;;  %vm4245_vm11 = vweird.f32 %v5427_v1  ;;  %v4344_v43 = vld [vmem:[%s7900_s5 + $0x10] sm:$0xff]  ;;  %4993 = vmatpush.msk.msrb.mxu3 %vm4431_vm10, %v4408_v40  ;;  %v4279_v46 = vld [vmem:[%s7899_s15 + $0x18] sm:$0xff] }
0x1af2   :  { %5430 = vrcp.f32 %v4222_v26  ;;  %vm4246_vm13 = vmor %vm4244_vm12, %vm4245_vm11  ;;  %v4233_v16 = vand.u32 2147483647, %v4222_v26  ;;  %v4235_v58 = vand.u32 2147483648, %v4222_v26  ;;  %vm4229_vm2 = vweird.f32 %v4222_v26 }
0x1af3   :  { %v4241_v34 = vsub.f32 1.0, %v4240_v32  ;;  %v4346_v32 = vld [vmem:[%s7900_s5 + $0x20] sm:$0xff] }
0x1af4   :  { %v4236_v3 = vor.u32 1.1754944e-38, %v4235_v58  ;;  %vm4234_vm6 = vcmp.eq.f32.partialorder %v4233_v16, 8.507059e+37 }
0x1af5   :  { %v4242_v60 = vmul.f32 %v5427_v1, %v4241_v34  ;;  %v4281_v34 = vld [vmem:[%s7899_s15 + $0x28] sm:$0xff] }
0x1af7   :  { %v5429_v47 = vpop.eup %5428  ;;  %v4243_v20 = vadd.f32 %v5427_v1, %v4242_v60  ;;  %v4282_v60 = vld [vmem:[%s7899_s15 + $0x30] sm:$0xff] }
0x1af8   :  { %v5431_v2 = vpop.eup %5430  ;;  %v3543_v18 = vadd.f32 1.0, %v5429_v47 }
0x1af9   :  { %v4247_v5 = vsel %vm4246_vm13, %v5427_v1, %v4243_v20  ;;  %v4225_v10 = vmul.f32 %v5431_v2, %v4222_v26  ;;  %vm4230_vm15 = vweird.f32 %v5431_v2  ;;  %v4345_v1 = vld [vmem:[%s7900_s5 + $0x18] sm:$0xff]  ;;  %v4280_v26 = vld [vmem:[%s7899_s15 + $0x20] sm:$0xff]  ;;  %vm4697_vm13 = vcmask 7168  }
0x1afa   :  { %v4252_v51 = vsel %vm4249_vm14, %v4251_v0, %v4247_v5  ;;  %5432 = vrcp.f32 %v3543_v18  ;;  %vm4231_vm4 = vmor %vm4229_vm2, %vm4230_vm15  ;;  %v3570_v48 = vand.u32 2147483648, %v3543_v18  ;;  %v3568_v28 = vand.u32 2147483647, %v3543_v18 }
0x1afb   :  { %v4257_v21 = vsub.f32 1.0, %v4252_v51  ;;  %v4226_v41 = vsub.f32 1.0, %v4225_v10  ;;  %v4255_v11 = vmul.f32 %v4252_v51, %v4194_v57  ;;  %vm3564_vm8 = vweird.f32 %v3543_v18 }
0x1afc   :  { %v3571_v6 = vor.u32 1.1754944e-38, %v3570_v48  ;;  %vm3569_vm0 = vcmp.eq.f32.partialorder %v3568_v28, 8.507059e+37  ;;  %v5221_v28 = vld [vmem:[#allocation38] ss:$0 sm:$0xff] }
0x1afd   :  { %v4227_v36 = vmul.f32 %v5431_v2, %v4226_v41  ;;  %v4259_v44 = vmul.f32 %v4257_v21, %v4167_v14 }
0x1aff   :  { %v4228_v54 = vadd.f32 %v5431_v2, %v4227_v36  ;;  %v4261_v49 = vadd.f32 %v4259_v44, %v4255_v11 }
0x1b00   :  { %v5433_v52 = vpop.eup %5432 }
0x1b01   :  { %v4232_v35 = vsel %vm4231_vm4, %v5431_v2, %v4228_v54  ;;  %v3560_v62 = vmul.f32 %v5433_v52, %v3543_v18  ;;  %4265 = vst.msk [vmem:[%s6584_s6 + $0x8] sm:$0xff] %vm2985_vm5, %v4261_v49  ;;  %v4270_v17 = vmul.f32 1.442695, %v4261_v49  ;;  %vm3565_vm7 = vweird.f32 %v5433_v52 }
0x1b02   :  { %v4237_v39 = vsel %vm4234_vm6, %v4236_v3, %v4232_v35  ;;  %vm3566_vm9 = vmor %vm3564_vm8, %vm3565_vm7 }
0x1b03   :  { %v4256_v7 = vsub.f32 1.0, %v4237_v39  ;;  %v3561_v19 = vsub.f32 1.0, %v3560_v62  ;;  %v4254_v57 = vmul.f32 %v4237_v39, %v7656_v61  ;;  %5434 = vpow2.f32 %v4270_v17 }
0x1b05   :  { %v3562_v8 = vmul.f32 %v5433_v52, %v3561_v19  ;;  %v4258_v25 = vmul.f32 %v4256_v7, %v7654_v4  ;;  %v4267_v4 = vld [vmem:[%s7898_s14 + $0x8] sm:$0xff] }
0x1b07   :  { %v3563_v33 = vadd.f32 %v5433_v52, %v3562_v8  ;;  %v4260_v37 = vadd.f32 %v4258_v25, %v4254_v57 }
0x1b09   :  { %v3567_v14 = vsel %vm3566_vm9, %v5433_v52, %v3563_v33  ;;  %4264 = vst.msk [vmem:[%s6584_s6] sm:$0xff] %vm2985_vm5, %v4260_v37  ;;  %v4268_v50 = vmul.f32 1.442695, %v4260_v37  ;;  %v5435_v61 = vpop.eup %5434  ;;  %s7901_s6 = sld [smem:[#allocation108_spill]] }
0x1b0a   :  { %v3572_v38 = vsel %vm3569_vm0, %v3571_v6, %v3567_v14  ;;  %v4273_v9 = vmul.f32 %v5435_v61, %v4267_v4 }
0x1b0b   :  { %v3577_v13 = vsub.f32 1.0, %v3572_v38  ;;  %5436 = vpow2.f32 %v4268_v50  ;;  %v3575_v12 = vmul.f32 %v3572_v38, %v7518_v56  ;;  %v4276_v56 = vld [vmem:[%s7899_s15] sm:$0xff] }
0x1b0d   :  { %v3579_v42 = vmul.f32 %v3577_v13, %v7524_v31  ;;  %v4342_v31 = vld [vmem:[%s7900_s5] sm:$0xff] }
0x1b0f   :  { %v3581_v24 = vadd.f32 %v3579_v42, %v3575_v12  ;;  %v4409_v29 = vld [vmem:[%s7901_s6] sm:$0xf] }
0x1b10   :  { %4985 = vmatpush.msk.msrb.mxu2 %vm4431_vm10, %v4409_v29 }
0x1b11   :  { %v5437_v15 = vpop.eup %5436  ;;  %4263 = vst.msk [vmem:[%s6579_s13 + $0x8] sm:$0xff] %vm2985_vm5, %v3581_v24  ;;  %v4275_v30 = vadd.f32 %v4273_v9, %v3581_v24  ;;  %v6232_v24 = vmov 56.0  }
0x1b12   :  { %v4272_v55 = vmul.f32 %v5437_v15, %v4266_v22  ;;  %5438 = vrcp.f32 %v6232_v24 }
0x1b13   :  { %4318 = vmatpush.msrb.mxu0 %v4275_v30  ;;  %4384 = vmatpush.msrb.mxu1 %v4275_v30 }
0x1b14   :  { %v4274_v63 = vadd.f32 %v4272_v55, %v7644_v59  ;;  %v4278_v59 = vld [vmem:[%s7899_s15 + $0x10] sm:$0xff] }
0x1b16   :  { %4319 = vmatpush.msrb.mxu0 %v4274_v63  ;;  %4385 = vmatpush.msrb.mxu1 %v4274_v63 }
0x1b17   :  { %4971 = vmatmul.msk.f32.vlgmr.msrb.gmra.mxu0 %vm785_vm3, %v4276_v56  ;;  %4978 = vmatmul.msk.f32.vlgmr.msrb.gmra.mxu1 %vm785_vm3, %v4342_v31 }
0x1b1f   :  { %4972 = vmatmul.msk.f32.gmra.mxu0 %vm785_vm3, %v4277_v27  ;;  %4979 = vmatmul.msk.f32.gmra.mxu1 %vm785_vm3, %v4343_v45  ;;  %v5439_v45 = vpop.eup %5438 }
0x1b27   :  { %4973 = vmatmul.msk.f32.gmra.mxu0 %vm785_vm3, %v4278_v59  ;;  %4980 = vmatmul.msk.f32.gmra.mxu1 %vm785_vm3, %v4344_v43 }
0x1b2f   :  { %4974 = vmatmul.msk.f32.gmra.mxu0 %vm785_vm3, %v4279_v46  ;;  %4981 = vmatmul.msk.f32.gmra.mxu1 %vm785_vm3, %v4345_v1 }
0x1b37   :  { %4975 = vmatmul.msk.f32.gmra.mxu0 %vm785_vm3, %v4280_v26  ;;  %4982 = vmatmul.msk.f32.gmra.mxu1 %vm785_vm3, %v4346_v32 }
0x1b3f   :  { %4976 = vmatmul.msk.f32.gmra.mxu0 %vm785_vm3, %v4281_v34  ;;  %4983 = vmatmul.msk.f32.gmra.mxu1 %vm785_vm3, %v4347_v23  ;;  %v4573_v34 = vmul.f32 56.0, %v5439_v45 }
0x1b47   :  { %4977 = vmatmul.msk.f32.gmra.mxu0 %vm785_vm3, %v4282_v60  ;;  %4984 = vmatmul.msk.f32.gmra.mxu1 %vm785_vm3, %v4348_v53  ;;  %vm4577_vm3 = vweird.f32 %v5439_v45 }
0x1b94   :  { %v4321_v47 = vpop.f32.mrf.mxu0  ;;  %v4387_v20 = vpop.f32.mrf.mxu1 }
0x1b95   :  { %4986 = vmatmul.msk.f32.vlgmr.msrb.gmra.mxu2 %vm2985_vm5, %v4387_v20  ;;  %4994 = vmatmul.msk.f32.vlgmr.msrb.gmra.mxu3 %vm2985_vm5, %v4321_v47  ;;  %v4574_v20 = vsub.f32 1.0, %v4573_v34 }
0x1b9c   :  { %v4324_v2 = vpop.f32.mrf.mxu0  ;;  %v4390_v0 = vpop.f32.mrf.mxu1 }
0x1b9d   :  { %4987 = vmatmul.msk.f32.gmra.mxu2 %vm2985_vm5, %v4390_v0  ;;  %4995 = vmatmul.msk.f32.gmra.mxu3 %vm2985_vm5, %v4324_v2 }
0x1ba4   :  { %v4327_v18 = vpop.f32.mrf.mxu0  ;;  %v4393_v5 = vpop.f32.mrf.mxu1 }
0x1ba5   :  { %4988 = vmatmul.msk.f32.gmra.mxu2 %vm2985_vm5, %v4393_v5  ;;  %4996 = vmatmul.msk.f32.gmra.mxu3 %vm2985_vm5, %v4327_v18  ;;  %v4575_v18 = vmul.f32 %v5439_v45, %v4574_v20 }
0x1bac   :  { %v4330_v10 = vpop.f32.mrf.mxu0  ;;  %v4396_v51 = vpop.f32.mrf.mxu1 }
0x1bad   :  { %4989 = vmatmul.msk.f32.gmra.mxu2 %vm2985_vm5, %v4396_v51  ;;  %4997 = vmatmul.msk.f32.gmra.mxu3 %vm2985_vm5, %v4330_v10  ;;  %v4576_v51 = vadd.f32 %v5439_v45, %v4575_v18 }
0x1bb4   :  { %v4333_v21 = vpop.f32.mrf.mxu0  ;;  %v4399_v41 = vpop.f32.mrf.mxu1 }
0x1bb5   :  { %4990 = vmatmul.msk.f32.gmra.mxu2 %vm2985_vm5, %v4399_v41  ;;  %4998 = vmatmul.msk.f32.gmra.mxu3 %vm2985_vm5, %v4333_v21 }
0x1bbc   :  { %v4336_v16 = vpop.f32.mrf.mxu0  ;;  %v4402_v58 = vpop.f32.mrf.mxu1 }
0x1bbd   :  { %4991 = vmatmul.msk.f32.gmra.mxu2 %vm2985_vm5, %v4402_v58  ;;  %4999 = vmatmul.msk.f32.gmra.mxu3 %vm2985_vm5, %v4336_v16  ;;  %v4578_v16 = vsel %vm4577_vm3, %v5439_v45, %v4576_v51 }
0x1bc4   :  { %v4339_v11 = vpop.f32.mrf.mxu0  ;;  %v4405_v36 = vpop.f32.mrf.mxu1 }
0x1bc5   :  { %4992 = vmatmul.msk.f32.gmra.mxu2 %vm2985_vm5, %v4405_v36  ;;  %5000 = vmatmul.msk.f32.gmra.mxu3 %vm2985_vm5, %v4339_v11 }
0x1c18   :  { %v4452_v44 = vpop.f32.mrf.mxu2  ;;  %v4514_v54 = vpop.f32.mrf.mxu3 }
0x1c19   :  { %v4515_v48 = vadd.f32 %v4514_v54, %v4452_v44 }
0x1c1b   :  { %v4539_v33 = vadd.f32 %v5221_v28, %v4515_v48 }
0x1c1d   :  { %v4546_v61 = vmax.f32 %v4539_v33, 0.0 }
0x1c1f   :  { %v4553_v30 = vsel %vm749_vm1, %v4546_v61, 0.0 }
0x1c20   :  { %v4455_v49 = vpop.f32.mrf.mxu2  ;;  %v4517_v52 = vpop.f32.mrf.mxu3 }
0x1c21   :  { %v4518_v17 = vadd.f32 %v4517_v52, %v4455_v49 }
0x1c23   :  { %v4540_v57 = vadd.f32 %v5221_v28, %v4518_v17 }
0x1c25   :  { %v4547_v14 = vmax.f32 %v4540_v57, 0.0 }
0x1c27   :  { %v4554_v9 = vsel %vm749_vm1, %v4547_v14, 0.0 }
0x1c28   :  { %v4458_v3 = vpop.f32.mrf.mxu2  ;;  %v4520_v35 = vpop.f32.mrf.mxu3  ;;  %v4555_v56 = vadd.f32 %v4554_v9, %v4553_v30 }
0x1c29   :  { %v4521_v8 = vadd.f32 %v4520_v35, %v4458_v3 }
0x1c2b   :  { %v4541_v37 = vadd.f32 %v5221_v28, %v4521_v8 }
0x1c2d   :  { %v4548_v4 = vmax.f32 %v4541_v37, 0.0 }
0x1c2f   :  { %v4556_v55 = vsel %vm749_vm1, %v4548_v4, 0.0 }
0x1c30   :  { %v4461_v62 = vpop.f32.mrf.mxu2  ;;  %v4523_v39 = vpop.f32.mrf.mxu3  ;;  %v4557_v59 = vadd.f32 %v4556_v55, %v4555_v56 }
0x1c31   :  { %v4524_v25 = vadd.f32 %v4523_v39, %v4461_v62 }
0x1c33   :  { %v4542_v50 = vadd.f32 %v5221_v28, %v4524_v25 }
0x1c35   :  { %v4549_v22 = vmax.f32 %v4542_v50, 0.0 }
0x1c37   :  { %v4558_v31 = vsel %vm749_vm1, %v4549_v22, 0.0 }
0x1c38   :  { %v4464_v7 = vpop.f32.mrf.mxu2  ;;  %v4526_v19 = vpop.f32.mrf.mxu3  ;;  %v4559_v1 = vadd.f32 %v4558_v31, %v4557_v59 }
0x1c39   :  { %v4527_v6 = vadd.f32 %v4526_v19, %v4464_v7 }
0x1c3b   :  { %v4543_v12 = vadd.f32 %v5221_v28, %v4527_v6 }
0x1c3d   :  { %v4550_v63 = vmax.f32 %v4543_v12, 0.0 }
0x1c3f   :  { %v4560_v40 = vsel %vm749_vm1, %v4550_v63, 0.0 }
0x1c40   :  { %v4467_v38 = vpop.f32.mrf.mxu2  ;;  %v4529_v13 = vpop.f32.mrf.mxu3  ;;  %v4561_v23 = vadd.f32 %v4560_v40, %v4559_v1  ;;  %v5223_v1 = vld [vmem:[#allocation41] ss:$0 sm:$0xff] }
0x1c41   :  { %v4530_v42 = vadd.f32 %v4529_v13, %v4467_v38 }
0x1c43   :  { %v4544_v15 = vadd.f32 %v5221_v28, %v4530_v42 }
0x1c45   :  { %v4551_v27 = vmax.f32 %v4544_v15, 0.0 }
0x1c47   :  { %v4562_v26 = vsel %vm749_vm1, %v4551_v27, 0.0 }
0x1c48   :  { %v4470_v43 = vpop.f32.mrf.mxu2  ;;  %v4532_v29 = vpop.f32.mrf.mxu3  ;;  %v4563_v53 = vadd.f32 %v4562_v26, %v4561_v23 }
0x1c49   :  { %v4533_v46 = vadd.f32 %v4532_v29, %v4470_v43  ;;  %v5222_v29 = vld [vmem:[#allocation40] ss:$0 sm:$0xff] }
0x1c4b   :  { %v4545_v32 = vadd.f32 %v5221_v28, %v4533_v46 }
0x1c4d   :  { %v4552_v60 = vmax.f32 %v4545_v32, 0.0 }
0x1c4f   :  { %v4564_v47 = vsel %vm749_vm1, %v4552_v60, 0.0 }
0x1c50   :  { %v4565_v2 = vadd.f32 %v4564_v47, %v4563_v53 }
0x1c52   :  { %v4566_v0 = vrot.slane %v4565_v2, 4 }
0x1c54   :  { %v4567_v5 = vadd.f32 %v4566_v0, %v4565_v2 }
0x1c56   :  { %v4568_v10 = vrot.slane %v4567_v5, 2 }
0x1c58   :  { %v4569_v21 = vadd.f32 %v4568_v10, %v4567_v5 }
0x1c5a   :  { %v4570_v41 = vrot.slane %v4569_v21, 1 }
0x1c5c   :  { %v4571_v58 = vadd.f32 %v4570_v41, %v4569_v21 }
0x1c5e   :  { %v4579_v11 = vmul.f32 %v4578_v16, %v4571_v58 }
0x1c60   :  { %v4580_v36 = vsub.f32 %v4546_v61, %v4579_v11  ;;  %v4581_v44 = vsub.f32 %v4547_v14, %v4579_v11  ;;  %v4582_v54 = vsub.f32 %v4548_v4, %v4579_v11  ;;  %v4583_v49 = vsub.f32 %v4549_v22, %v4579_v11 }
0x1c61   :  { %v7728_v52 = vsub.f32 %v4550_v63, %v4579_v11  ;;  %v7730_v39 = vsub.f32 %v4551_v27, %v4579_v11  ;;  %v4586_v28 = vsub.f32 %v4552_v60, %v4579_v11  ;;  %v5224_v60 = vld [vmem:[#allocation43] ss:$0 sm:$0xff] }
0x1c62   :  { %v4587_v3 = vmul.f32 %v4580_v36, %v4580_v36  ;;  %v4588_v35 = vmul.f32 %v4581_v44, %v4581_v44  ;;  %v4589_v62 = vmul.f32 %v4582_v54, %v4582_v54  ;;  %v4590_v17 = vmul.f32 %v4583_v49, %v4583_v49 }
0x1c63   :  { %v4591_v8 = vmul.f32 %v7728_v52, %v7728_v52  ;;  %v4592_v33 = vmul.f32 %v7730_v39, %v7730_v39  ;;  %v4593_v14 = vmul.f32 %v4586_v28, %v4586_v28 }
0x1c64   :  { %v4594_v7 = vsel %vm749_vm1, %v4587_v3, 0.0  ;;  %v4595_v19 = vsel %vm749_vm1, %v4588_v35, 0.0  ;;  %v4597_v57 = vsel %vm749_vm1, %v4589_v62, 0.0  ;;  %v4599_v37 = vsel %vm749_vm1, %v4590_v17, 0.0 }
0x1c65   :  { %v4596_v48 = vadd.f32 %v4595_v19, %v4594_v7  ;;  %v4601_v50 = vsel %vm749_vm1, %v4591_v8, 0.0  ;;  %v4603_v13 = vsel %vm749_vm1, %v4592_v33, 0.0  ;;  %v4605_v4 = vsel %vm749_vm1, %v4593_v14, 0.0  ;;  %v5225_v33 = vld [vmem:[#allocation2] ss:$0 sm:$0xff] }
0x1c67   :  { %v4598_v25 = vadd.f32 %v4597_v57, %v4596_v48 }
0x1c69   :  { %v4600_v6 = vadd.f32 %v4599_v37, %v4598_v25 }
0x1c6b   :  { %v4602_v38 = vadd.f32 %v4601_v50, %v4600_v6 }
0x1c6d   :  { %v4604_v61 = vadd.f32 %v4603_v13, %v4602_v38 }
0x1c6f   :  { %v4606_v12 = vadd.f32 %v4605_v4, %v4604_v61 }
0x1c71   :  { %v4607_v42 = vrot.slane %v4606_v12, 4 }
0x1c73   :  { %v4608_v24 = vadd.f32 %v4607_v42, %v4606_v12 }
0x1c75   :  { %v4609_v9 = vrot.slane %v4608_v24, 2 }
0x1c77   :  { %v4610_v22 = vadd.f32 %v4609_v9, %v4608_v24 }
0x1c79   :  { %v4611_v15 = vrot.slane %v4610_v22, 1 }
0x1c7b   :  { %v4612_v30 = vadd.f32 %v4611_v15, %v4610_v22 }
0x1c7d   :  { %v4613_v55 = vmul.f32 %v4612_v30, %v4578_v16 }
0x1c7f   :  { %v4614_v63 = vadd.f32 1e-05, %v4613_v55 }
0x1c81   :  { %5440 = vrsqrt.f32 %v4614_v63  ;;  %vm4621_vm11 = vweird.f32 %v4614_v63 }
0x1c87   :  { %v5441_v56 = vpop.eup %5440 }
0x1c88   :  { %v4616_v31 = vmul.f32 %v5441_v56, %v4614_v63  ;;  %vm4622_vm5 = vweird.f32 %v5441_v56 }
0x1c89   :  { %vm4623_vm12 = vmor %vm4621_vm11, %vm4622_vm5 }
0x1c8a   :  { %v4617_v27 = vmul.f32 %v5441_v56, %v4616_v31 }
0x1c8c   :  { %v4618_v45 = vmul.f32 0.5, %v4617_v27 }
0x1c8e   :  { %v4619_v59 = vsub.f32 1.5, %v4618_v45 }
0x1c90   :  { %v4620_v43 = vmul.f32 %v5441_v56, %v4619_v59 }
0x1c92   :  { %v4624_v40 = vsel %vm4623_vm12, %v5441_v56, %v4620_v43 }
0x1c93   :  { %v4631_v46 = vmul.f32 %v4624_v40, %v4586_v28  ;;  %v4626_v26 = vmul.f32 %v4624_v40, %v4581_v44  ;;  %v4625_v32 = vmul.f32 %v4624_v40, %v4580_v36  ;;  %v4627_v34 = vmul.f32 %v4624_v40, %v4582_v54 }
0x1c94   :  { %v4628_v21 = vmul.f32 %v4624_v40, %v4583_v49  ;;  %v4629_v35 = vmul.f32 %v4624_v40, %v7728_v52  ;;  %v4630_v19 = vmul.f32 %v4624_v40, %v7730_v39 }
0x1c95   :  { %v4642_v23 = vmul.f32 %v5222_v29, %v4631_v46  ;;  %v4637_v53 = vmul.f32 %v5222_v29, %v4626_v26  ;;  %v4636_v47 = vmul.f32 %v5222_v29, %v4625_v32  ;;  %v4638_v18 = vmul.f32 %v5222_v29, %v4627_v34 }
0x1c96   :  { %v4639_v44 = vmul.f32 %v5222_v29, %v4628_v21  ;;  %v4640_v49 = vmul.f32 %v5222_v29, %v4629_v35  ;;  %v4641_v28 = vmul.f32 %v5222_v29, %v4630_v19 }
0x1c97   :  { %v4653_v20 = vadd.f32 %v5223_v1, %v4642_v23  ;;  %v4648_v2 = vadd.f32 %v5223_v1, %v4637_v53  ;;  %v4647_v0 = vadd.f32 %v5223_v1, %v4636_v47  ;;  %v4649_v11 = vadd.f32 %v5223_v1, %v4638_v18 }
0x1c98   :  { %v4650_v3 = vadd.f32 %v5223_v1, %v4639_v44  ;;  %v4651_v7 = vadd.f32 %v5223_v1, %v4640_v49  ;;  %v4652_v57 = vadd.f32 %v5223_v1, %v4641_v28 }
0x1c99   :  { %v4664_v5 = vmul.f32 %v5224_v60, %v4653_v20  ;;  %v4659_v10 = vmul.f32 %v5224_v60, %v4648_v2  ;;  %v4658_v51 = vmul.f32 %v5224_v60, %v4647_v0  ;;  %v4660_v36 = vmul.f32 %v5224_v60, %v4649_v11 }
0x1c9a   :  { %v4661_v62 = vmul.f32 %v5224_v60, %v4650_v3  ;;  %v4662_v48 = vmul.f32 %v5224_v60, %v4651_v7  ;;  %v4663_v25 = vmul.f32 %v5224_v60, %v4652_v57 }
0x1c9b   :  { %v4683_v41 = vsel %vm749_vm1, %v4664_v5, 0.0  ;;  %v4668_v16 = vsel %vm749_vm1, %v4659_v10, 0.0  ;;  %v4665_v58 = vsel %vm749_vm1, %v4658_v51, 0.0  ;;  %v4671_v54 = vsel %vm749_vm1, %v4660_v36, 0.0 }
0x1c9c   :  { %4684 = vadd.xlane.f32.xlu2 %v4683_v41  ;;  %4669 = vadd.xlane.f32.xlu0 %v4668_v16  ;;  %v4674_v17 = vsel %vm749_vm1, %v4661_v62, 0.0  ;;  %v4677_v8 = vsel %vm749_vm1, %v4662_v48, 0.0  ;;  %v4680_v52 = vsel %vm749_vm1, %v4663_v25, 0.0 }
0x1c9d   :  { %4666 = vadd.xlane.f32.xlu1 %v4665_v58 }
0x1ca4   :  { %4672 = vadd.xlane.f32.xlu0 %v4671_v54 }
0x1cac   :  { %4675 = vadd.xlane.f32.xlu0 %v4674_v17 }
0x1cb4   :  { %4678 = vadd.xlane.f32.xlu0 %v4677_v8 }
0x1cbc   :  { %4681 = vadd.xlane.f32.xlu0 %v4680_v52 }
0x1d0f   :  { %v4685_v37 = vpop.xlane.xlu2 %4684  ;;  %v4670_v39 = vpop.xlane.xlu0 %4669 }
0x1d10   :  { %v4696_v6 = vadd.f32 %v5225_v33, %v4685_v37  ;;  %v4691_v14 = vadd.f32 %v5225_v33, %v4670_v39  ;;  %v4667_v50 = vpop.xlane.xlu1 %4666 }
0x1d11   :  { %v4690_v38 = vadd.f32 %v5225_v33, %v4667_v50 }
0x1d12   :  { %4704 = vst.msk [vmem:[%s6589_s17 + $0x30] sm:$0xff] %vm4697_vm13, %v4696_v6 }
0x1d13   :  { %4699 = vst.msk [vmem:[%s6589_s17 + $0x8] sm:$0xff] %vm4697_vm13, %v4691_v14 }
0x1d14   :  { %4698 = vst.msk [vmem:[%s6589_s17] sm:$0xff] %vm4697_vm13, %v4690_v38 }
0x1d17   :  { %v4673_v13 = vpop.xlane.xlu0 %4672 }
0x1d18   :  { %v4692_v61 = vadd.f32 %v5225_v33, %v4673_v13 }
0x1d1a   :  { %4700 = vst.msk [vmem:[%s6589_s17 + $0x10] sm:$0xff] %vm4697_vm13, %v4692_v61 }
0x1d1f   :  { %v4676_v4 = vpop.xlane.xlu0 %4675 }
0x1d20   :  { %v4693_v12 = vadd.f32 %v5225_v33, %v4676_v4 }
0x1d22   :  { %4701 = vst.msk [vmem:[%s6589_s17 + $0x18] sm:$0xff] %vm4697_vm13, %v4693_v12 }
0x1d27   :  { %v4679_v42 = vpop.xlane.xlu0 %4678 }
0x1d28   :  { %v4694_v24 = vadd.f32 %v5225_v33, %v4679_v42 }
0x1d2a   :  { %4702 = vst.msk [vmem:[%s6589_s17 + $0x20] sm:$0xff] %vm4697_vm13, %v4694_v24 }
0x1d2f   :  { %v4682_v9 = vpop.xlane.xlu0 %4681 }
0x1d30   :  { %v4695_v22 = vadd.f32 %v5225_v33, %v4682_v9 }
0x1d32   :  { %4703 = vst.msk [vmem:[%s6589_s17 + $0x28] sm:$0xff] %vm4697_vm13, %v4695_v22 }
0x1d33   :  { %4717 = vsyncpa [#allocation4], 1 }
0x1d34   :  { %4718 = vsyncpa [#allocation6], 1 }
0x1d35   :  { %4719 = vsyncpa [#allocation9], 1 }
0x1d36   :  { %4720 = vsyncpa [#allocation12], 1 }
0x1d37   :  { %4721 = vsyncpa [#allocation15], 1 }
0x1d38   :  { %4722 = vsyncpa [#allocation18], 1 }
0x1d39   :  { %4723 = vsyncpa [#allocation21], 1 }
0x1d3a   :  { %4724 = vsyncpa [#allocation24], 1 }
0x1d3b   :  { %4725 = vsyncpa [#allocation27], 1 }
0x1d3c   :  { %4726 = vsyncpa [#allocation30], 1 }
0x1d3d   :  { %4727 = vsyncpa [#allocation33], 1 }
0x1d3e   :  { %4728 = vsyncpa [#allocation36], 1 }
0x1d3f   :  { %4729 = vsyncpa [#allocation39], 1 }
0x1d40   :  { %4730 = vsyncpa [#allocation42], 1 }

</bundles_post_ra>
